<compile_context>
chip_gen: v5e
topology: v5e:2x2
jax: 0.10.0
libtpu: 0.0.40
codegen_flags: <defaults>
</compile_context>

<pallas_src>
import jax
import jax.numpy as jnp
from jax import lax
from jax.experimental import pallas as pl
from jax.experimental.pallas import tpu as pltpu

KH = KW = 3          # kernel_size=3
POOL = 2             # pool_size=2
BN_EPS = 1e-5        # nn.BatchNorm2d default
LANE = 128           # TPU lane width


def _round_up(x, m):
    return (x + m - 1) // m * m


def _vmem_limit_bytes():
    """Generation-aware VMEM budget (v7x: 64 MiB physical vs 128 MiB on v5e/v6e)."""
    cap = 64 * 1024 * 1024
    try:
        cap = int(getattr(pltpu.get_tpu_info(), "vmem_capacity_bytes", cap))
    except Exception:
        pass
    return int(min(3 * cap // 4, 100 * 1024 * 1024))


def _pick_batch_tile(N, H, W, Cin, Cp, vmem_limit):
    """Images per grid step: large enough to fill the MXU and amortize the ~0.35us
    per-step overhead (up to 8), small enough for VMEM, and leaving >=2 grid steps
    when possible so both v7x TensorCores get work."""
    per_img = (
        (H + 2) * (W + 2) * Cin * 4              # zero-halo scratch (f32)
        + H * W * KH * KW * Cin * 2              # im2col scratch (bf16)
        + H * W * Cp * 4                         # conv tile (f32)
        + (H // POOL) * (W // POOL) * Cp * 4     # pooled output tile (f32)
        + 2 * H * W * Cin * 4                    # double-buffered input tile
    )
    vmem_cap = max(1, (vmem_limit // 2) // per_img)
    target = int(min(8, vmem_cap, max(1, N // 2)))
    for nb in range(target, 0, -1):
        if N % nb == 0:
            return nb
    return 1


# ---------------------------------------------------------------------------
# Shared: zero-halo + im2col + one MXU matmul
# ---------------------------------------------------------------------------
def _conv_tile(x_ref, w_ref, xpad_ref, col_ref):
    """Returns the (Nb*H*W, Cp) f32 conv output for this batch tile."""
    Nb, H, W, Cin = x_ref.shape

    # 1-pixel zero halo lives only in VMEM; no padded copy of x ever hits HBM.
    # (Zeroed every step: with "parallel" megacore sharding a core may never run step 0.)
    xpad_ref[...] = jnp.zeros_like(xpad_ref)
    xpad_ref[:, 1:H + 1, 1:W + 1, :] = x_ref[...]

    # im2col: the 9 shifted windows side by side on the lane axis, cast to bf16
    # (MXU-native on v5e/v6e/v7x, halves the scratch vst/vld traffic). The whole
    # 3x3 conv is then ONE (Nb*H*W, 9*Cin) @ (9*Cin, Cp) MXU matmul, f32 accumulate.
    k = 0
    for kh in range(KH):
        for kw in range(KW):
            window = xpad_ref[:, kh:kh + H, kw:kw + W, :]        # (Nb, H, W, Cin)
            col_ref[:, k * Cin:(k + 1) * Cin] = (
                window.reshape(Nb * H * W, Cin).astype(col_ref.dtype))
            k += 1
    # TODO(synk): on v5e (single vector-store slot) the 9 masked sub-lane stores above
    # may bind before the MXU; for tiny Cin an accumulating-matmul variant is the
    # alternative worth benchmarking (cheap on v7x thanks to the MRB).

    return jnp.dot(col_ref[...], w_ref[...], preferred_element_type=jnp.float32)


# ---------------------------------------------------------------------------
# Pass 1: conv (never stored) + per-tile partial BN statistics
# ---------------------------------------------------------------------------
def conv_stats_kernel(x_ref, w_ref, stats_ref, xpad_ref, col_ref):
    # stats_ref: (1, 2, Cp) = per-tile [sum, sum_of_squares]
    conv = _conv_tile(x_ref, w_ref, xpad_ref, col_ref)          # (Nb*H*W, Cp) f32
    stats_ref[0, 0:1, :] = jnp.sum(conv, axis=0, keepdims=True)
    stats_ref[0, 1:2, :] = jnp.sum(conv * conv, axis=0, keepdims=True)


# ---------------------------------------------------------------------------
# Pass 2: recompute conv -> BN (folded scale/shift) -> ReLU -> MaxPool2d(2)
# ---------------------------------------------------------------------------
def bn_relu_pool_kernel(x_ref, w_ref, scale_ref, shift_ref, o_ref, xpad_ref, col_ref):
    Nb, Ho, Wo, Cp = o_ref.shape
    H, W = Ho * POOL, Wo * POOL

    conv = _conv_tile(x_ref, w_ref, xpad_ref, col_ref)          # (Nb*H*W, Cp) f32
    y = jnp.maximum(conv * scale_ref[...] + shift_ref[...], 0.0)   # BN + ReLU (f32 VPU)

    # MaxPool2d(2): reduce over W-pairs then H-pairs; the channel lane axis is untouched.
    y = jnp.max(y.reshape(Nb * H * Wo, POOL, Cp), axis=1)       # pool along W
    y = jnp.max(y.reshape(Nb * Ho, POOL, Wo, Cp), axis=1)       # pool along H
    o_ref[...] = y.reshape(Nb, Ho, Wo, Cp)


# ---------------------------------------------------------------------------
# Wrapper
# ---------------------------------------------------------------------------
@jax.jit
def conv_block_forward(x_nchw, w_oihw, b, gamma, beta):
    del b  # conv bias is exactly cancelled by training-mode BatchNorm's batch mean
    N, Cin, H, W = x_nchw.shape
    Cout = w_oihw.shape[0]
    assert H % POOL == 0 and W % POOL == 0, "MaxPool2d(2) needs even H and W"
    Cp = _round_up(Cout, LANE)              # lane-dense channel padding
    Ho, Wo = H // POOL, W // POOL

    vmem_limit = _vmem_limit_bytes()
    Nb = _pick_batch_tile(N, H, W, Cin, Cp, vmem_limit)
    G = N // Nb

    # NCHW -> NHWC (single XLA transpose; the 1-pixel pad is handled inside the kernels)
    x_nhwc = jnp.transpose(x_nchw, (0, 2, 3, 1)).astype(jnp.float32)

    # OIHW -> im2col weight (KH*KW*Cin, Cp), bf16 MXU operand; row order (kh, kw, cin)
    # matches the in-kernel patch construction.
    w_mat = jnp.transpose(w_oihw, (2, 3, 1, 0)).astype(jnp.float32)
    w_mat = w_mat.reshape(KH * KW * Cin, Cout)
    w_mat = jnp.pad(w_mat, ((0, 0), (0, Cp - Cout))).astype(jnp.bfloat16)
    gamma_p = jnp.pad(gamma.astype(jnp.float32), (0, Cp - Cout))
    beta_p = jnp.pad(beta.astype(jnp.float32), (0, Cp - Cout))

    cparams = pltpu.CompilerParams(
        dimension_semantics=("parallel",),   # batch-tile axis -> both TCs on v7x
        vmem_limit_bytes=vmem_limit,
    )
    scratch = [
        pltpu.VMEM((Nb, H + 2, W + 2, Cin), jnp.float32),        # zero-halo input
        pltpu.VMEM((Nb * H * W, KH * KW * Cin), jnp.bfloat16),   # im2col patches
    ]

    # ---- pass 1: per-tile partial BN statistics (conv never written to HBM) ----
    stats = pl.pallas_call(
        conv_stats_kernel,
        out_shape=jax.ShapeDtypeStruct((G, 2, Cp), jnp.float32),
        grid_spec=pltpu.PrefetchScalarGridSpec(
            num_scalar_prefetch=0,
            grid=(G,),
            in_specs=[
                pl.BlockSpec((Nb, H, W, Cin), lambda n: (n, 0, 0, 0)),
                pl.BlockSpec((KH * KW * Cin, Cp), lambda n: (0, 0)),
            ],
            out_specs=pl.BlockSpec((1, 2, Cp), lambda n: (n, 0, 0)),
            scratch_shapes=scratch,
        ),
        compiler_params=cparams,
    )(x_nhwc, w_mat)

    # ---- fold BN batch statistics into one per-channel scale + shift ----
    count = N * H * W
    total = jnp.sum(stats, axis=0)                          # (2, Cp)
    mean = total[0] / count
    var = jnp.maximum(total[1] / count - mean * mean, 0.0)  # biased var (PyTorch BN)
    inv_std = lax.rsqrt(var + BN_EPS)
    scale = (gamma_p * inv_std).reshape(1, Cp)
    shift = (beta_p - mean * gamma_p * inv_std).reshape(1, Cp)
    # TODO(synk): running_mean / running_var momentum buffer updates (nn.BatchNorm2d
    # training-side state) are not produced by this forward-only kernel.

    # ---- pass 2: recompute conv -> normalize -> ReLU -> 2x2 max-pool ----
    pooled = pl.pallas_call(
        bn_relu_pool_kernel,
        out_shape=jax.ShapeDtypeStruct((N, Ho, Wo, Cp), jnp.float32),
        grid_spec=pltpu.PrefetchScalarGridSpec(
            num_scalar_prefetch=0,
            grid=(G,),
            in_specs=[
                pl.BlockSpec((Nb, H, W, Cin), lambda n: (n, 0, 0, 0)),
                pl.BlockSpec((KH * KW * Cin, Cp), lambda n: (0, 0)),
                pl.BlockSpec((1, Cp), lambda n: (0, 0)),
                pl.BlockSpec((1, Cp), lambda n: (0, 0)),
            ],
            out_specs=pl.BlockSpec((Nb, Ho, Wo, Cp), lambda n: (n, 0, 0, 0)),
            scratch_shapes=scratch,
        ),
        compiler_params=cparams,
    )(x_nhwc, w_mat, scale, shift)

    # drop channel padding, NHWC -> NCHW
    return jnp.transpose(pooled[:, :, :, :Cout], (0, 3, 1, 2))


def reference_forward(x, w, b, gamma, beta, conv_dtype=jnp.float32):
    """Pure-JAX reference mirroring the PyTorch module forward (f32 by default;
    conv_dtype=bfloat16 mirrors the kernel's bf16 MXU operands with f32 accumulate)."""
    y = lax.conv_general_dilated(
        x.astype(conv_dtype), w.astype(conv_dtype),
        window_strides=(1, 1), padding=((1, 1), (1, 1)),
        dimension_numbers=("NCHW", "OIHW", "NCHW"),
        preferred_element_type=jnp.float32)
    y = y + b[None, :, None, None]
    mean = y.mean(axis=(0, 2, 3), keepdims=True)
    var = ((y - mean) ** 2).mean(axis=(0, 2, 3), keepdims=True)
    y = (y - mean) * lax.rsqrt(var + BN_EPS)
    y = y * gamma[None, :, None, None] + beta[None, :, None, None]
    y = jnp.maximum(y, 0.0)
    N, C, Hh, Ww = y.shape
    return y.reshape(N, C, Hh // 2, 2, Ww // 2, 2).max(axis=(3, 5))


if __name__ == "__main__":
    key = jax.random.PRNGKey(0)
    k_x, k_w, k_b, k_g, k_be = jax.random.split(key, 5)

    N, Cin, Cout, H, W = 2, 4, 8, 16, 16

    x = jax.random.normal(k_x, (N, Cin, H, W), jnp.float32)
    w = jax.random.normal(k_w, (Cout, Cin, KH, KW), jnp.float32) * 0.2
    b = jax.random.normal(k_b, (Cout,), jnp.float32) * 0.1
    gamma = 1.0 + 0.1 * jax.random.normal(k_g, (Cout,), jnp.float32)
    beta = 0.1 * jax.random.normal(k_be, (Cout,), jnp.float32)

    out = jax.block_until_ready(conv_block_forward(x, w, b, gamma, beta))
    assert out.shape == (N, Cout, H // POOL, W // POOL), out.shape

    # Tight check against a reference whose conv operands are rounded to bf16 exactly
    # like the kernel's MXU operands (both accumulate in f32).
    ref_bf16 = reference_forward(x, w, b, gamma, beta, conv_dtype=jnp.bfloat16)
    assert jnp.allclose(out, ref_bf16, atol=2e-3, rtol=2e-3), "mismatch vs bf16-operand reference"

    # Loose check against the exact f32 PyTorch-module semantics (difference is only
    # the bf16 rounding of the conv operands).
    ref_f32 = reference_forward(x, w, b, gamma, beta, conv_dtype=jnp.float32)
    assert jnp.allclose(out, ref_f32, atol=5e-2, rtol=5e-2), "mismatch vs f32 reference"

    print("KERNEL_OK")
</pallas_src>

<mosaic_0001>
module attributes {stable_mosaic.version = 11 : i64} {
  func.func @conv_stats_kernel(%arg0: i32, %arg1: memref<1x16x16x4xf32, #tpu.memory_space<vmem>>, %arg2: memref<36x128xbf16, #tpu.memory_space<vmem>>, %arg3: memref<1x2x128xf32, #tpu.memory_space<vmem>>, %arg4: memref<1x18x18x4xf32, #tpu.memory_space<vmem>>, %arg5: memref<256x36xbf16, #tpu.memory_space<vmem>>) attributes {dimension_semantics = [#tpu.dimension_semantics<parallel>], iteration_bounds = array<i64: 2>, scalar_prefetch = 0 : i64, scratch_operands = 2 : i64, tpu.core_type = #tpu.core_type<tc>, window_params = [{transform_indices = @transform_0, window_bounds = array<i64: 1, 16, 16, 4>}, {pipeline_mode = #tpu.pipeline_mode<synchronous>, transform_indices = @transform_1, window_bounds = array<i64: 36, 128>}, {transform_indices = @transform_2, window_bounds = array<i64: 1, 2, 128>}]} {
    %cst = arith.constant 0.000000e+00 : f32
    %0 = vector.broadcast %cst : f32 to vector<1x18x18x4xf32>
    %c0 = arith.constant 0 : index
    %c0_0 = arith.constant 0 : index
    %c0_1 = arith.constant 0 : index
    %c0_2 = arith.constant 0 : index
    %1 = vector.load %arg4[%c0, %c0_0, %c0_1, %c0_2] : memref<1x18x18x4xf32, #tpu.memory_space<vmem>>, vector<1x18x18x4xf32>
    tpu.vector_store %arg4[%c0, %c0_0, %c0_1, %c0_2], %0 {strides = array<i32>} : memref<1x18x18x4xf32, #tpu.memory_space<vmem>>, vector<1x18x18x4xf32>,
    %c0_3 = arith.constant 0 : index
    %c0_4 = arith.constant 0 : index
    %c0_5 = arith.constant 0 : index
    %c0_6 = arith.constant 0 : index
    %2 = vector.load %arg1[%c0_3, %c0_4, %c0_5, %c0_6] : memref<1x16x16x4xf32, #tpu.memory_space<vmem>>, vector<1x16x16x4xf32>
    %c0_7 = arith.constant 0 : index
    %c1 = arith.constant 1 : index
    %c1_8 = arith.constant 1 : index
    %c0_9 = arith.constant 0 : index
    %3 = vector.load %arg4[%c0_7, %c1, %c1_8, %c0_9] : memref<1x18x18x4xf32, #tpu.memory_space<vmem>>, vector<1x16x16x4xf32>
    tpu.vector_store %arg4[%c0_7, %c1, %c1_8, %c0_9], %2 {strides = array<i32>} : memref<1x18x18x4xf32, #tpu.memory_space<vmem>>, vector<1x16x16x4xf32>,
    %c0_10 = arith.constant 0 : index
    %c0_11 = arith.constant 0 : index
    %c0_12 = arith.constant 0 : index
    %c0_13 = arith.constant 0 : index
    %4 = vector.load %arg4[%c0_10, %c0_11, %c0_12, %c0_13] : memref<1x18x18x4xf32, #tpu.memory_space<vmem>>, vector<1x16x16x4xf32>
    %5 = vector.shape_cast %4 : vector<1x16x16x4xf32> to vector<256x4xf32>
    %6 = arith.truncf %5 : vector<256x4xf32> to vector<256x4xbf16>
    %c0_14 = arith.constant 0 : index
    %c0_15 = arith.constant 0 : index
    %7 = vector.load %arg5[%c0_14, %c0_15] : memref<256x36xbf16, #tpu.memory_space<vmem>>, vector<256x4xbf16>
    tpu.vector_store %arg5[%c0_14, %c0_15], %6 {strides = array<i32>} : memref<256x36xbf16, #tpu.memory_space<vmem>>, vector<256x4xbf16>,
    %c0_16 = arith.constant 0 : index
    %c0_17 = arith.constant 0 : index
    %c1_18 = arith.constant 1 : index
    %c0_19 = arith.constant 0 : index
    %8 = vector.load %arg4[%c0_16, %c0_17, %c1_18, %c0_19] : memref<1x18x18x4xf32, #tpu.memory_space<vmem>>, vector<1x16x16x4xf32>
    %9 = vector.shape_cast %8 : vector<1x16x16x4xf32> to vector<256x4xf32>
    %10 = arith.truncf %9 : vector<256x4xf32> to vector<256x4xbf16>
    %c0_20 = arith.constant 0 : index
    %c4 = arith.constant 4 : index
    %11 = vector.load %arg5[%c0_20, %c4] : memref<256x36xbf16, #tpu.memory_space<vmem>>, vector<256x4xbf16>
    tpu.vector_store %arg5[%c0_20, %c4], %10 {strides = array<i32>} : memref<256x36xbf16, #tpu.memory_space<vmem>>, vector<256x4xbf16>,
    %c0_21 = arith.constant 0 : index
    %c0_22 = arith.constant 0 : index
    %c2 = arith.constant 2 : index
    %c0_23 = arith.constant 0 : index
    %12 = vector.load %arg4[%c0_21, %c0_22, %c2, %c0_23] : memref<1x18x18x4xf32, #tpu.memory_space<vmem>>, vector<1x16x16x4xf32>
    %13 = vector.shape_cast %12 : vector<1x16x16x4xf32> to vector<256x4xf32>
    %14 = arith.truncf %13 : vector<256x4xf32> to vector<256x4xbf16>
    %c0_24 = arith.constant 0 : index
    %c8 = arith.constant 8 : index
    %15 = vector.load %arg5[%c0_24, %c8] : memref<256x36xbf16, #tpu.memory_space<vmem>>, vector<256x4xbf16>
    tpu.vector_store %arg5[%c0_24, %c8], %14 {strides = array<i32>} : memref<256x36xbf16, #tpu.memory_space<vmem>>, vector<256x4xbf16>,
    %c0_25 = arith.constant 0 : index
    %c1_26 = arith.constant 1 : index
    %c0_27 = arith.constant 0 : index
    %c0_28 = arith.constant 0 : index
    %16 = vector.load %arg4[%c0_25, %c1_26, %c0_27, %c0_28] : memref<1x18x18x4xf32, #tpu.memory_space<vmem>>, vector<1x16x16x4xf32>
    %17 = vector.shape_cast %16 : vector<1x16x16x4xf32> to vector<256x4xf32>
    %18 = arith.truncf %17 : vector<256x4xf32> to vector<256x4xbf16>
    %c0_29 = arith.constant 0 : index
    %c12 = arith.constant 12 : index
    %19 = vector.load %arg5[%c0_29, %c12] : memref<256x36xbf16, #tpu.memory_space<vmem>>, vector<256x4xbf16>
    tpu.vector_store %arg5[%c0_29, %c12], %18 {strides = array<i32>} : memref<256x36xbf16, #tpu.memory_space<vmem>>, vector<256x4xbf16>,
    %c0_30 = arith.constant 0 : index
    %c1_31 = arith.constant 1 : index
    %c1_32 = arith.constant 1 : index
    %c0_33 = arith.constant 0 : index
    %20 = vector.load %arg4[%c0_30, %c1_31, %c1_32, %c0_33] : memref<1x18x18x4xf32, #tpu.memory_space<vmem>>, vector<1x16x16x4xf32>
    %21 = vector.shape_cast %20 : vector<1x16x16x4xf32> to vector<256x4xf32>
    %22 = arith.truncf %21 : vector<256x4xf32> to vector<256x4xbf16>
    %c0_34 = arith.constant 0 : index
    %c16 = arith.constant 16 : index
    %23 = vector.load %arg5[%c0_34, %c16] : memref<256x36xbf16, #tpu.memory_space<vmem>>, vector<256x4xbf16>
    tpu.vector_store %arg5[%c0_34, %c16], %22 {strides = array<i32>} : memref<256x36xbf16, #tpu.memory_space<vmem>>, vector<256x4xbf16>,
    %c0_35 = arith.constant 0 : index
    %c1_36 = arith.constant 1 : index
    %c2_37 = arith.constant 2 : index
    %c0_38 = arith.constant 0 : index
    %24 = vector.load %arg4[%c0_35, %c1_36, %c2_37, %c0_38] : memref<1x18x18x4xf32, #tpu.memory_space<vmem>>, vector<1x16x16x4xf32>
    %25 = vector.shape_cast %24 : vector<1x16x16x4xf32> to vector<256x4xf32>
    %26 = arith.truncf %25 : vector<256x4xf32> to vector<256x4xbf16>
    %c0_39 = arith.constant 0 : index
    %c20 = arith.constant 20 : index
    %27 = vector.load %arg5[%c0_39, %c20] : memref<256x36xbf16, #tpu.memory_space<vmem>>, vector<256x4xbf16>
    tpu.vector_store %arg5[%c0_39, %c20], %26 {strides = array<i32>} : memref<256x36xbf16, #tpu.memory_space<vmem>>, vector<256x4xbf16>,
    %c0_40 = arith.constant 0 : index
    %c2_41 = arith.constant 2 : index
    %c0_42 = arith.constant 0 : index
    %c0_43 = arith.constant 0 : index
    %28 = vector.load %arg4[%c0_40, %c2_41, %c0_42, %c0_43] : memref<1x18x18x4xf32, #tpu.memory_space<vmem>>, vector<1x16x16x4xf32>
    %29 = vector.shape_cast %28 : vector<1x16x16x4xf32> to vector<256x4xf32>
    %30 = arith.truncf %29 : vector<256x4xf32> to vector<256x4xbf16>
    %c0_44 = arith.constant 0 : index
    %c24 = arith.constant 24 : index
    %31 = vector.load %arg5[%c0_44, %c24] : memref<256x36xbf16, #tpu.memory_space<vmem>>, vector<256x4xbf16>
    tpu.vector_store %arg5[%c0_44, %c24], %30 {strides = array<i32>} : memref<256x36xbf16, #tpu.memory_space<vmem>>, vector<256x4xbf16>,
    %c0_45 = arith.constant 0 : index
    %c2_46 = arith.constant 2 : index
    %c1_47 = arith.constant 1 : index
    %c0_48 = arith.constant 0 : index
    %32 = vector.load %arg4[%c0_45, %c2_46, %c1_47, %c0_48] : memref<1x18x18x4xf32, #tpu.memory_space<vmem>>, vector<1x16x16x4xf32>
    %33 = vector.shape_cast %32 : vector<1x16x16x4xf32> to vector<256x4xf32>
    %34 = arith.truncf %33 : vector<256x4xf32> to vector<256x4xbf16>
    %c0_49 = arith.constant 0 : index
    %c28 = arith.constant 28 : index
    %35 = vector.load %arg5[%c0_49, %c28] : memref<256x36xbf16, #tpu.memory_space<vmem>>, vector<256x4xbf16>
    tpu.vector_store %arg5[%c0_49, %c28], %34 {strides = array<i32>} : memref<256x36xbf16, #tpu.memory_space<vmem>>, vector<256x4xbf16>,
    %c0_50 = arith.constant 0 : index
    %c2_51 = arith.constant 2 : index
    %c2_52 = arith.constant 2 : index
    %c0_53 = arith.constant 0 : index
    %36 = vector.load %arg4[%c0_50, %c2_51, %c2_52, %c0_53] : memref<1x18x18x4xf32, #tpu.memory_space<vmem>>, vector<1x16x16x4xf32>
    %37 = vector.shape_cast %36 : vector<1x16x16x4xf32> to vector<256x4xf32>
    %38 = arith.truncf %37 : vector<256x4xf32> to vector<256x4xbf16>
    %c0_54 = arith.constant 0 : index
    %c32 = arith.constant 32 : index
    %39 = vector.load %arg5[%c0_54, %c32] : memref<256x36xbf16, #tpu.memory_space<vmem>>, vector<256x4xbf16>
    tpu.vector_store %arg5[%c0_54, %c32], %38 {strides = array<i32>} : memref<256x36xbf16, #tpu.memory_space<vmem>>, vector<256x4xbf16>,
    %c0_55 = arith.constant 0 : index
    %c0_56 = arith.constant 0 : index
    %40 = vector.load %arg5[%c0_55, %c0_56] : memref<256x36xbf16, #tpu.memory_space<vmem>>, vector<256x36xbf16>
    %c0_57 = arith.constant 0 : index
    %c0_58 = arith.constant 0 : index
    %41 = vector.load %arg2[%c0_57, %c0_58] : memref<36x128xbf16, #tpu.memory_space<vmem>>, vector<36x128xbf16>
    %cst_59 = arith.constant dense<0.000000e+00> : vector<256x128xf32>
    %42 = tpu.matmul %40, %41, %cst_59 {dimension_numbers = #tpu.dot_dimension_numbers<[1], [0], [0], [1], [0, 0, 1, 1], [], []>} : vector<256x36xbf16>, vector<36x128xbf16>, vector<256x128xf32> -> vector<256x128xf32>
    %cst_60 = arith.constant dense<0.000000e+00> : vector<128xf32>
    %43 = vector.multi_reduction <add>, %42, %cst_60 [0] : vector<256x128xf32> to vector<128xf32>
    %44 = vector.shape_cast %43 : vector<128xf32> to vector<1x128xf32>
    %c0_61 = arith.constant 0 : index
    %c0_62 = arith.constant 0 : index
    %c0_63 = arith.constant 0 : index
    %45 = vector.load %arg3[%c0_61, %c0_62, %c0_63] : memref<1x2x128xf32, #tpu.memory_space<vmem>>, vector<1x1x128xf32>
    %46 = vector.shape_cast %45 : vector<1x1x128xf32> to vector<1x128xf32>
    %47 = vector.shape_cast %44 : vector<1x128xf32> to vector<1x1x128xf32>
    tpu.vector_store %arg3[%c0_61, %c0_62, %c0_63], %47 {strides = array<i32>} : memref<1x2x128xf32, #tpu.memory_space<vmem>>, vector<1x1x128xf32>,
    %48 = arith.mulf %42, %42 : vector<256x128xf32>
    %cst_64 = arith.constant dense<0.000000e+00> : vector<128xf32>
    %49 = vector.multi_reduction <add>, %48, %cst_64 [0] : vector<256x128xf32> to vector<128xf32>
    %50 = vector.shape_cast %49 : vector<128xf32> to vector<1x128xf32>
    %c0_65 = arith.constant 0 : index
    %c1_66 = arith.constant 1 : index
    %c0_67 = arith.constant 0 : index
    %51 = vector.load %arg3[%c0_65, %c1_66, %c0_67] : memref<1x2x128xf32, #tpu.memory_space<vmem>>, vector<1x1x128xf32>
    %52 = vector.shape_cast %51 : vector<1x1x128xf32> to vector<1x128xf32>
    %53 = vector.shape_cast %50 : vector<1x128xf32> to vector<1x1x128xf32>
    tpu.vector_store %arg3[%c0_65, %c1_66, %c0_67], %53 {strides = array<i32>} : memref<1x2x128xf32, #tpu.memory_space<vmem>>, vector<1x1x128xf32>,
    return
  }
  func.func @transform_0(%arg0: i32) -> (i32, i32, i32, i32) {
    %c0_i32 = arith.constant 0 : i32
    %c0_i32_0 = arith.constant 0 : i32
    %c0_i32_1 = arith.constant 0 : i32
    %c0_i32_2 = arith.constant 0 : i32
    return %arg0, %c0_i32, %c0_i32_0, %c0_i32_1 : i32, i32, i32, i32
  }
  func.func @transform_1(%arg0: i32) -> (i32, i32) {
    %c0_i32 = arith.constant 0 : i32
    %c0_i32_0 = arith.constant 0 : i32
    %c0_i32_1 = arith.constant 0 : i32
    return %c0_i32, %c0_i32_0 : i32, i32
  }
  func.func @transform_2(%arg0: i32) -> (i32, i32, i32) {
    %c0_i32 = arith.constant 0 : i32
    %c0_i32_0 = arith.constant 0 : i32
    %c0_i32_1 = arith.constant 0 : i32
    return %arg0, %c0_i32, %c0_i32_0 : i32, i32, i32
  }
}

module attributes {stable_mosaic.version = 11 : i64} {
  func.func @bn_relu_pool_kernel(%arg0: i32, %arg1: memref<1x16x16x4xf32, #tpu.memory_space<vmem>>, %arg2: memref<36x128xbf16, #tpu.memory_space<vmem>>, %arg3: memref<1x128xf32, #tpu.memory_space<vmem>>, %arg4: memref<1x128xf32, #tpu.memory_space<vmem>>, %arg5: memref<1x8x8x128xf32, #tpu.memory_space<vmem>>, %arg6: memref<1x18x18x4xf32, #tpu.memory_space<vmem>>, %arg7: memref<256x36xbf16, #tpu.memory_space<vmem>>) attributes {dimension_semantics = [#tpu.dimension_semantics<parallel>], iteration_bounds = array<i64: 2>, scalar_prefetch = 0 : i64, scratch_operands = 2 : i64, tpu.core_type = #tpu.core_type<tc>, window_params = [{transform_indices = @transform_0, window_bounds = array<i64: 1, 16, 16, 4>}, {pipeline_mode = #tpu.pipeline_mode<synchronous>, transform_indices = @transform_1, window_bounds = array<i64: 36, 128>}, {pipeline_mode = #tpu.pipeline_mode<synchronous>, transform_indices = @transform_2, window_bounds = array<i64: 1, 128>}, {pipeline_mode = #tpu.pipeline_mode<synchronous>, transform_indices = @transform_3, window_bounds = array<i64: 1, 128>}, {transform_indices = @transform_4, window_bounds = array<i64: 1, 8, 8, 128>}]} {
    %cst = arith.constant 0.000000e+00 : f32
    %0 = vector.broadcast %cst : f32 to vector<1x18x18x4xf32>
    %c0 = arith.constant 0 : index
    %c0_0 = arith.constant 0 : index
    %c0_1 = arith.constant 0 : index
    %c0_2 = arith.constant 0 : index
    %1 = vector.load %arg6[%c0, %c0_0, %c0_1, %c0_2] : memref<1x18x18x4xf32, #tpu.memory_space<vmem>>, vector<1x18x18x4xf32>
    tpu.vector_store %arg6[%c0, %c0_0, %c0_1, %c0_2], %0 {strides = array<i32>} : memref<1x18x18x4xf32, #tpu.memory_space<vmem>>, vector<1x18x18x4xf32>,
    %c0_3 = arith.constant 0 : index
    %c0_4 = arith.constant 0 : index
    %c0_5 = arith.constant 0 : index
    %c0_6 = arith.constant 0 : index
    %2 = vector.load %arg1[%c0_3, %c0_4, %c0_5, %c0_6] : memref<1x16x16x4xf32, #tpu.memory_space<vmem>>, vector<1x16x16x4xf32>
    %c0_7 = arith.constant 0 : index
    %c1 = arith.constant 1 : index
    %c1_8 = arith.constant 1 : index
    %c0_9 = arith.constant 0 : index
    %3 = vector.load %arg6[%c0_7, %c1, %c1_8, %c0_9] : memref<1x18x18x4xf32, #tpu.memory_space<vmem>>, vector<1x16x16x4xf32>
    tpu.vector_store %arg6[%c0_7, %c1, %c1_8, %c0_9], %2 {strides = array<i32>} : memref<1x18x18x4xf32, #tpu.memory_space<vmem>>, vector<1x16x16x4xf32>,
    %c0_10 = arith.constant 0 : index
    %c0_11 = arith.constant 0 : index
    %c0_12 = arith.constant 0 : index
    %c0_13 = arith.constant 0 : index
    %4 = vector.load %arg6[%c0_10, %c0_11, %c0_12, %c0_13] : memref<1x18x18x4xf32, #tpu.memory_space<vmem>>, vector<1x16x16x4xf32>
    %5 = vector.shape_cast %4 : vector<1x16x16x4xf32> to vector<256x4xf32>
    %6 = arith.truncf %5 : vector<256x4xf32> to vector<256x4xbf16>
    %c0_14 = arith.constant 0 : index
    %c0_15 = arith.constant 0 : index
    %7 = vector.load %arg7[%c0_14, %c0_15] : memref<256x36xbf16, #tpu.memory_space<vmem>>, vector<256x4xbf16>
    tpu.vector_store %arg7[%c0_14, %c0_15], %6 {strides = array<i32>} : memref<256x36xbf16, #tpu.memory_space<vmem>>, vector<256x4xbf16>,
    %c0_16 = arith.constant 0 : index
    %c0_17 = arith.constant 0 : index
    %c1_18 = arith.constant 1 : index
    %c0_19 = arith.constant 0 : index
    %8 = vector.load %arg6[%c0_16, %c0_17, %c1_18, %c0_19] : memref<1x18x18x4xf32, #tpu.memory_space<vmem>>, vector<1x16x16x4xf32>
    %9 = vector.shape_cast %8 : vector<1x16x16x4xf32> to vector<256x4xf32>
    %10 = arith.truncf %9 : vector<256x4xf32> to vector<256x4xbf16>
    %c0_20 = arith.constant 0 : index
    %c4 = arith.constant 4 : index
    %11 = vector.load %arg7[%c0_20, %c4] : memref<256x36xbf16, #tpu.memory_space<vmem>>, vector<256x4xbf16>
    tpu.vector_store %arg7[%c0_20, %c4], %10 {strides = array<i32>} : memref<256x36xbf16, #tpu.memory_space<vmem>>, vector<256x4xbf16>,
    %c0_21 = arith.constant 0 : index
    %c0_22 = arith.constant 0 : index
    %c2 = arith.constant 2 : index
    %c0_23 = arith.constant 0 : index
    %12 = vector.load %arg6[%c0_21, %c0_22, %c2, %c0_23] : memref<1x18x18x4xf32, #tpu.memory_space<vmem>>, vector<1x16x16x4xf32>
    %13 = vector.shape_cast %12 : vector<1x16x16x4xf32> to vector<256x4xf32>
    %14 = arith.truncf %13 : vector<256x4xf32> to vector<256x4xbf16>
    %c0_24 = arith.constant 0 : index
    %c8 = arith.constant 8 : index
    %15 = vector.load %arg7[%c0_24, %c8] : memref<256x36xbf16, #tpu.memory_space<vmem>>, vector<256x4xbf16>
    tpu.vector_store %arg7[%c0_24, %c8], %14 {strides = array<i32>} : memref<256x36xbf16, #tpu.memory_space<vmem>>, vector<256x4xbf16>,
    %c0_25 = arith.constant 0 : index
    %c1_26 = arith.constant 1 : index
    %c0_27 = arith.constant 0 : index
    %c0_28 = arith.constant 0 : index
    %16 = vector.load %arg6[%c0_25, %c1_26, %c0_27, %c0_28] : memref<1x18x18x4xf32, #tpu.memory_space<vmem>>, vector<1x16x16x4xf32>
    %17 = vector.shape_cast %16 : vector<1x16x16x4xf32> to vector<256x4xf32>
    %18 = arith.truncf %17 : vector<256x4xf32> to vector<256x4xbf16>
    %c0_29 = arith.constant 0 : index
    %c12 = arith.constant 12 : index
    %19 = vector.load %arg7[%c0_29, %c12] : memref<256x36xbf16, #tpu.memory_space<vmem>>, vector<256x4xbf16>
    tpu.vector_store %arg7[%c0_29, %c12], %18 {strides = array<i32>} : memref<256x36xbf16, #tpu.memory_space<vmem>>, vector<256x4xbf16>,
    %c0_30 = arith.constant 0 : index
    %c1_31 = arith.constant 1 : index
    %c1_32 = arith.constant 1 : index
    %c0_33 = arith.constant 0 : index
    %20 = vector.load %arg6[%c0_30, %c1_31, %c1_32, %c0_33] : memref<1x18x18x4xf32, #tpu.memory_space<vmem>>, vector<1x16x16x4xf32>
    %21 = vector.shape_cast %20 : vector<1x16x16x4xf32> to vector<256x4xf32>
    %22 = arith.truncf %21 : vector<256x4xf32> to vector<256x4xbf16>
    %c0_34 = arith.constant 0 : index
    %c16 = arith.constant 16 : index
    %23 = vector.load %arg7[%c0_34, %c16] : memref<256x36xbf16, #tpu.memory_space<vmem>>, vector<256x4xbf16>
    tpu.vector_store %arg7[%c0_34, %c16], %22 {strides = array<i32>} : memref<256x36xbf16, #tpu.memory_space<vmem>>, vector<256x4xbf16>,
    %c0_35 = arith.constant 0 : index
    %c1_36 = arith.constant 1 : index
    %c2_37 = arith.constant 2 : index
    %c0_38 = arith.constant 0 : index
    %24 = vector.load %arg6[%c0_35, %c1_36, %c2_37, %c0_38] : memref<1x18x18x4xf32, #tpu.memory_space<vmem>>, vector<1x16x16x4xf32>
    %25 = vector.shape_cast %24 : vector<1x16x16x4xf32> to vector<256x4xf32>
    %26 = arith.truncf %25 : vector<256x4xf32> to vector<256x4xbf16>
    %c0_39 = arith.constant 0 : index
    %c20 = arith.constant 20 : index
    %27 = vector.load %arg7[%c0_39, %c20] : memref<256x36xbf16, #tpu.memory_space<vmem>>, vector<256x4xbf16>
    tpu.vector_store %arg7[%c0_39, %c20], %26 {strides = array<i32>} : memref<256x36xbf16, #tpu.memory_space<vmem>>, vector<256x4xbf16>,
    %c0_40 = arith.constant 0 : index
    %c2_41 = arith.constant 2 : index
    %c0_42 = arith.constant 0 : index
    %c0_43 = arith.constant 0 : index
    %28 = vector.load %arg6[%c0_40, %c2_41, %c0_42, %c0_43] : memref<1x18x18x4xf32, #tpu.memory_space<vmem>>, vector<1x16x16x4xf32>
    %29 = vector.shape_cast %28 : vector<1x16x16x4xf32> to vector<256x4xf32>
    %30 = arith.truncf %29 : vector<256x4xf32> to vector<256x4xbf16>
    %c0_44 = arith.constant 0 : index
    %c24 = arith.constant 24 : index
    %31 = vector.load %arg7[%c0_44, %c24] : memref<256x36xbf16, #tpu.memory_space<vmem>>, vector<256x4xbf16>
    tpu.vector_store %arg7[%c0_44, %c24], %30 {strides = array<i32>} : memref<256x36xbf16, #tpu.memory_space<vmem>>, vector<256x4xbf16>,
    %c0_45 = arith.constant 0 : index
    %c2_46 = arith.constant 2 : index
    %c1_47 = arith.constant 1 : index
    %c0_48 = arith.constant 0 : index
    %32 = vector.load %arg6[%c0_45, %c2_46, %c1_47, %c0_48] : memref<1x18x18x4xf32, #tpu.memory_space<vmem>>, vector<1x16x16x4xf32>
    %33 = vector.shape_cast %32 : vector<1x16x16x4xf32> to vector<256x4xf32>
    %34 = arith.truncf %33 : vector<256x4xf32> to vector<256x4xbf16>
    %c0_49 = arith.constant 0 : index
    %c28 = arith.constant 28 : index
    %35 = vector.load %arg7[%c0_49, %c28] : memref<256x36xbf16, #tpu.memory_space<vmem>>, vector<256x4xbf16>
    tpu.vector_store %arg7[%c0_49, %c28], %34 {strides = array<i32>} : memref<256x36xbf16, #tpu.memory_space<vmem>>, vector<256x4xbf16>,
    %c0_50 = arith.constant 0 : index
    %c2_51 = arith.constant 2 : index
    %c2_52 = arith.constant 2 : index
    %c0_53 = arith.constant 0 : index
    %36 = vector.load %arg6[%c0_50, %c2_51, %c2_52, %c0_53] : memref<1x18x18x4xf32, #tpu.memory_space<vmem>>, vector<1x16x16x4xf32>
    %37 = vector.shape_cast %36 : vector<1x16x16x4xf32> to vector<256x4xf32>
    %38 = arith.truncf %37 : vector<256x4xf32> to vector<256x4xbf16>
    %c0_54 = arith.constant 0 : index
    %c32 = arith.constant 32 : index
    %39 = vector.load %arg7[%c0_54, %c32] : memref<256x36xbf16, #tpu.memory_space<vmem>>, vector<256x4xbf16>
    tpu.vector_store %arg7[%c0_54, %c32], %38 {strides = array<i32>} : memref<256x36xbf16, #tpu.memory_space<vmem>>, vector<256x4xbf16>,
    %c0_55 = arith.constant 0 : index
    %c0_56 = arith.constant 0 : index
    %40 = vector.load %arg7[%c0_55, %c0_56] : memref<256x36xbf16, #tpu.memory_space<vmem>>, vector<256x36xbf16>
    %c0_57 = arith.constant 0 : index
    %c0_58 = arith.constant 0 : index
    %41 = vector.load %arg2[%c0_57, %c0_58] : memref<36x128xbf16, #tpu.memory_space<vmem>>, vector<36x128xbf16>
    %cst_59 = arith.constant dense<0.000000e+00> : vector<256x128xf32>
    %42 = tpu.matmul %40, %41, %cst_59 {dimension_numbers = #tpu.dot_dimension_numbers<[1], [0], [0], [1], [0, 0, 1, 1], [], []>} : vector<256x36xbf16>, vector<36x128xbf16>, vector<256x128xf32> -> vector<256x128xf32>
    %c0_60 = arith.constant 0 : index
    %c0_61 = arith.constant 0 : index
    %43 = vector.load %arg3[%c0_60, %c0_61] : memref<1x128xf32, #tpu.memory_space<vmem>>, vector<1x128xf32>
    %44 = vector.broadcast %43 : vector<1x128xf32> to vector<256x128xf32>
    %45 = arith.mulf %42, %44 : vector<256x128xf32>
    %c0_62 = arith.constant 0 : index
    %c0_63 = arith.constant 0 : index
    %46 = vector.load %arg4[%c0_62, %c0_63] : memref<1x128xf32, #tpu.memory_space<vmem>>, vector<1x128xf32>
    %47 = vector.broadcast %46 : vector<1x128xf32> to vector<256x128xf32>
    %48 = arith.addf %45, %47 : vector<256x128xf32>
    %cst_64 = arith.constant 0.000000e+00 : f32
    %49 = vector.broadcast %cst_64 : f32 to vector<256x128xf32>
    %50 = arith.maximumf %48, %49 : vector<256x128xf32>
    %51 = vector.shape_cast %50 : vector<256x128xf32> to vector<128x2x128xf32>
    %cst_65 = arith.constant dense<0xFF800000> : vector<128x128xf32>
    %52 = vector.multi_reduction <maximumf>, %51, %cst_65 [1] : vector<128x2x128xf32> to vector<128x128xf32>
    %53 = vector.shape_cast %52 : vector<128x128xf32> to vector<8x2x8x128xf32>
    %cst_66 = arith.constant dense<0xFF800000> : vector<8x8x128xf32>
    %54 = vector.multi_reduction <maximumf>, %53, %cst_66 [1] : vector<8x2x8x128xf32> to vector<8x8x128xf32>
    %55 = vector.shape_cast %54 : vector<8x8x128xf32> to vector<1x8x8x128xf32>
    %c0_67 = arith.constant 0 : index
    %c0_68 = arith.constant 0 : index
    %c0_69 = arith.constant 0 : index
    %c0_70 = arith.constant 0 : index
    %56 = vector.load %arg5[%c0_67, %c0_68, %c0_69, %c0_70] : memref<1x8x8x128xf32, #tpu.memory_space<vmem>>, vector<1x8x8x128xf32>
    tpu.vector_store %arg5[%c0_67, %c0_68, %c0_69, %c0_70], %55 {strides = array<i32>} : memref<1x8x8x128xf32, #tpu.memory_space<vmem>>, vector<1x8x8x128xf32>,
    return
  }
  func.func @transform_0(%arg0: i32) -> (i32, i32, i32, i32) {
    %c0_i32 = arith.constant 0 : i32
    %c0_i32_0 = arith.constant 0 : i32
    %c0_i32_1 = arith.constant 0 : i32
    %c0_i32_2 = arith.constant 0 : i32
    return %arg0, %c0_i32, %c0_i32_0, %c0_i32_1 : i32, i32, i32, i32
  }
  func.func @transform_1(%arg0: i32) -> (i32, i32) {
    %c0_i32 = arith.constant 0 : i32
    %c0_i32_0 = arith.constant 0 : i32
    %c0_i32_1 = arith.constant 0 : i32
    return %c0_i32, %c0_i32_0 : i32, i32
  }
  func.func @transform_2(%arg0: i32) -> (i32, i32) {
    %c0_i32 = arith.constant 0 : i32
    %c0_i32_0 = arith.constant 0 : i32
    %c0_i32_1 = arith.constant 0 : i32
    return %c0_i32, %c0_i32_0 : i32, i32
  }
  func.func @transform_3(%arg0: i32) -> (i32, i32) {
    %c0_i32 = arith.constant 0 : i32
    %c0_i32_0 = arith.constant 0 : i32
    %c0_i32_1 = arith.constant 0 : i32
    return %c0_i32, %c0_i32_0 : i32, i32
  }
  func.func @transform_4(%arg0: i32) -> (i32, i32, i32, i32) {
    %c0_i32 = arith.constant 0 : i32
    %c0_i32_0 = arith.constant 0 : i32
    %c0_i32_1 = arith.constant 0 : i32
    %c0_i32_2 = arith.constant 0 : i32
    return %arg0, %c0_i32, %c0_i32_0, %c0_i32_1 : i32, i32, i32, i32
  }
}

</mosaic_0001>

<bundles_post_ra>
// kernel: conv_block_forward.2
= control target key start
LH: loop header
LB: loop body
LE: loop exit
PB: predicated region body
PF: predicated region fallthrough
CT: control target
= control target key end

     0   :  { %s2772_s9 = smov 0   ;;  %s3840_s0 = inlined_call_operand.vmem [shape: f32[2,16,16,4], index: 0, kind: input, shape index: {}]   ;;  %s3841_s1 = inlined_call_operand.vmem [shape: bf16[36,128], index: 1, kind: input, shape index: {}]   ;;  %s3842_s2 = inlined_call_operand.vmem [shape: f32[2,2,128], index: 2, kind: output, shape index: {}]  }
   0x1 LB: > { %s2597_s10 = sadd.s32 4294967295, %s2746_s9   ;;  %p2601_p0 = scmp.ge.s32.totalorder %s2746_s9, 1  ;;  %s2746_s9 = sphi %s2772_s9, %s12_s9  }
   0x2   : > { %p112_p1 = scmp.lt.s32.totalorder %s2746_s9, 3 }
   0x4   : > { %p113_p2 = pnand %p2601_p0, %p112_p1 }
   0x5   : > { %s2749_s11 = smov (!%p113_p2), 4   ;;  %p133_p3 = scmp.lt.s32.totalorder (!%p113_p2), %s2597_s10, 1 }
   0x6   : > { %116 = sbr.rel (%p113_p2) target bundleno = 1022 (0x3fe), region = 28  ;;  %s2750_s16 = smov (!%p113_p2), 8  }
   0x7   : > { %s2751_s17 = smov (!%p113_p2), 12   ;;  %s2752_s18 = smov (!%p113_p2), 16  }
   0x8   : > { %s2753_s19 = smov (!%p113_p2), 20   ;;  %s2754_s20 = smov (!%p113_p2), 24  }
   0x9   : > { %s2755_s21 = smov (!%p113_p2), 28   ;;  %s2756_s22 = smov (!%p113_p2), 32  }
   0xb   : > { %vm143_vm0 = vcmask 31744   ;;  %v2748_v0 = vmov 0.0   ;;  %s3844_s10 = smov (!%p133_p3, %s2597_s10), 1  ;;  %vm146_vm1 = vcmask 25600   ;;  %vm328_vm2 = vcmask 27648  }
   0xc   : > { %144 = vst.msk [vmem:[#allocation2] sm:$0xff] %vm143_vm0, %v2748_v0  ;;  %s2695_s12 = sshll.u32 %s3844_s10, 8  ;;  %vm553_vm3 = vcmask 60448   ;;  %vm778_vm4 = vcmask 93248   ;;  %vm1003_vm5 = vcmask 126048   ;;  %vm1228_vm6 = vcmask 158848  }
   0xd   : > { %145 = vst.msk [vmem:[#allocation2 + $0x8] sm:$0xff] %vm143_vm0, %v2748_v0  ;;  %s2853_s15 = scalar_lea.vmem %s3840_s0, %s2695_s12  ;;  %vm1453_vm7 = vcmask 191648   ;;  %vm2343_vm8 = vcmask 1041408   ;;  %vm1679_vm9 = vcmask 224448   ;;  %vm1904_vm10 = vcmask 257248   ;;  %s2604_s29 = sshll.u32 %s3844_s10, 1 }
   0xe   : > { %148 = vst.msk [vmem:[#allocation2 + $0x18] sm:$0xff] %vm143_vm0, %v2748_v0  ;;  %v199_v3 = vld [vmem:[%s2853_s15] sm:$0xff]  ;;  %v200_v8 = vld [vmem:[%s2853_s15 + $0x8] sm:$0xff]  ;;  %v206_v11 = vld [vmem:[%s2853_s15 + $0x38] sm:$0xff]  ;;  %vm2129_vm11 = vcmask 290048   ;;  %vm2294_vm12 = vcmask 293888   ;;  %s141_s4 = scalar_lea.vmem %s3842_s2, %s2604_s29 }
   0xf   : > { %149 = vst.msk [vmem:[#allocation2 + $0x20] sm:$0xff] %vm143_vm0, %v2748_v0  ;;  %v203_v9 = vld [vmem:[%s2853_s15 + $0x20] sm:$0xff]  ;;  %v204_v10 = vld [vmem:[%s2853_s15 + $0x28] sm:$0xff]  ;;  %v201_v12 = vld [vmem:[%s2853_s15 + $0x10] sm:$0xff] }
  0x10   : > { %151 = vst.msk [vmem:[#allocation2 + $0x30] sm:$0xff] %vm143_vm0, %v2748_v0  ;;  %v207_v13 = vld [vmem:[%s2853_s15 + $0x40] sm:$0xff]  ;;  %v209_v14 = vld [vmem:[%s2853_s15 + $0x50] sm:$0xff]  ;;  %v202_v15 = vld [vmem:[%s2853_s15 + $0x18] sm:$0xff] }
  0x11   : > { %152 = vst.msk [vmem:[#allocation2 + $0x38] sm:$0xff] %vm143_vm0, %v2748_v0  ;;  %v210_v16 = vld [vmem:[%s2853_s15 + $0x58] sm:$0xff]  ;;  %v212_v17 = vld [vmem:[%s2853_s15 + $0x68] sm:$0xff]  ;;  %v205_v19 = vld [vmem:[%s2853_s15 + $0x30] sm:$0xff] }
  0x12   : > { %154 = vst.msk [vmem:[#allocation2 + $0x48] sm:$0xff] %vm143_vm0, %v2748_v0  ;;  %v213_v22 = vld [vmem:[%s2853_s15 + $0x70] sm:$0xff]  ;;  %v215_v24 = vld [vmem:[%s2853_s15 + $0x80] sm:$0xff]  ;;  %v208_v25 = vld [vmem:[%s2853_s15 + $0x48] sm:$0xff] }
  0x13   : > { %155 = vst.msk [vmem:[#allocation2 + $0x50] sm:$0xff] %vm143_vm0, %v2748_v0  ;;  %v216_v28 = vld [vmem:[%s2853_s15 + $0x88] sm:$0xff]  ;;  %v218_v31 = vld [vmem:[%s2853_s15 + $0x98] sm:$0xff]  ;;  %v211_v35 = vld [vmem:[%s2853_s15 + $0x60] sm:$0xff] }
  0x14   : > { %v361_v1 = vld [vmem:[#allocation2 + $0x1] sm:$0xff]  ;;  %157 = vst.msk [vmem:[#allocation2 + $0x60] sm:$0xff] %vm143_vm0, %v2748_v0  ;;  %v221_v37 = vld [vmem:[%s2853_s15 + $0xb0] sm:$0xff]  ;;  %v214_v44 = vld [vmem:[%s2853_s15 + $0x78] sm:$0xff] }
  0x15   : > { %v393_v2 = vpack.c.bf16 %v361_v1, %v361_v1  ;;  %158 = vst.msk [vmem:[#allocation2 + $0x68] sm:$0xff] %vm143_vm0, %v2748_v0  ;;  %v219_v36 = vld [vmem:[%s2853_s15 + $0xa0] sm:$0xff]  ;;  %v222_v45 = vld [vmem:[%s2853_s15 + $0xb8] sm:$0xff]  ;;  %v224_v46 = vld [vmem:[%s2853_s15 + $0xc8] sm:$0xff] }
  0x16   : > { %160 = vst.msk [vmem:[#allocation2 + $0x78] sm:$0xff] %vm143_vm0, %v2748_v0  ;;  %v217_v53 = vld [vmem:[%s2853_s15 + $0x90] sm:$0xff]  ;;  %v227_v55 = vld [vmem:[%s2853_s15 + $0xe0] sm:$0xff]  ;;  %v220_v62 = vld [vmem:[%s2853_s15 + $0xa8] sm:$0xff] }
  0x17   : > { %457 = vrot.lane.b32.xlu0 %v393_v2, %s2749_s11  ;;  %161 = vst.msk [vmem:[#allocation2 + $0x80] sm:$0xff] %vm143_vm0, %v2748_v0  ;;  %v225_v54 = vld [vmem:[%s2853_s15 + $0xd0] sm:$0xff]  ;;  %v228_v63 = vld [vmem:[%s2853_s15 + $0xe8] sm:$0xff] }
  0x18   : > { %163 = vst.msk [vmem:[#allocation2 + $0x90] sm:$0xff] %vm143_vm0, %v2748_v0 }
  0x19   : > { %164 = vst.msk [vmem:[#allocation2 + $0x98] sm:$0xff] %vm143_vm0, %v2748_v0 }
  0x1a   : > { %166 = vst.msk [vmem:[#allocation2 + $0xa8] sm:$0xff] %vm143_vm0, %v2748_v0 }
  0x1b   : > { %167 = vst.msk [vmem:[#allocation2 + $0xb0] sm:$0xff] %vm143_vm0, %v2748_v0 }
  0x1c   : > { %169 = vst.msk [vmem:[#allocation2 + $0xc0] sm:$0xff] %vm143_vm0, %v2748_v0 }
  0x1d   : > { %170 = vst.msk [vmem:[#allocation2 + $0xc8] sm:$0xff] %vm143_vm0, %v2748_v0 }
  0x1e   : > { %172 = vst.msk [vmem:[#allocation2 + $0xd8] sm:$0xff] %vm143_vm0, %v2748_v0 }
  0x1f   : > { %173 = vst.msk [vmem:[#allocation2 + $0xe0] sm:$0xff] %vm143_vm0, %v2748_v0 }
  0x20   : > { %175 = vst.msk [vmem:[#allocation2 + $0xf0] sm:$0xff] %vm143_vm0, %v2748_v0 }
  0x21   : > { %176 = vst.msk [vmem:[#allocation2 + $0xf8] sm:$0xff] %vm143_vm0, %v2748_v0 }
  0x22   : > { %178 = vst.msk [vmem:[#allocation2 + $0x108] sm:$0xff] %vm143_vm0, %v2748_v0 }
  0x23   : > { %179 = vst.msk [vmem:[#allocation2 + $0x110] sm:$0xff] %vm143_vm0, %v2748_v0 }
  0x24   : > { %181 = vst.msk [vmem:[#allocation2 + $0x120] sm:$0xff] %vm143_vm0, %v2748_v0 }
  0x25   : > { %182 = vst.msk [vmem:[#allocation2 + $0x128] sm:$0xff] %vm143_vm0, %v2748_v0 }
  0x26   : > { %184 = vst.msk [vmem:[#allocation2 + $0x138] sm:$0xff] %vm143_vm0, %v2748_v0 }
  0x27   : > { %185 = vst.msk [vmem:[#allocation2 + $0x140] sm:$0xff] %vm143_vm0, %v2748_v0 }
  0x28   : > { %187 = vst.msk [vmem:[#allocation2 + $0x150] sm:$0xff] %vm143_vm0, %v2748_v0 }
  0x29   : > { %188 = vst.msk [vmem:[#allocation2 + $0x158] sm:$0xff] %vm143_vm0, %v2748_v0 }
  0x2a   : > { %190 = vst.msk [vmem:[#allocation2 + $0x168] sm:$0xff] %vm143_vm0, %v2748_v0 }
  0x2b   : > { %191 = vst.msk [vmem:[#allocation2 + $0x170] sm:$0xff] %vm143_vm0, %v2748_v0 }
  0x2c   : > { %193 = vst.msk [vmem:[#allocation2 + $0x180] sm:$0xff] %vm143_vm0, %v2748_v0 }
  0x2d   : > { %194 = vst.msk [vmem:[#allocation2 + $0x188] sm:$0xff] %vm143_vm0, %v2748_v0 }
  0x2e   : > { %196 = vst.msk [vmem:[#allocation2 + $0x198] sm:$0xff] %vm143_vm0, %v2748_v0 }
  0x2f   : > { %197 = vst.msk [vmem:[#allocation2 + $0x1a0] sm:$0xff] %vm143_vm0, %v2748_v0 }
  0x30   : > { %232 = vst.msk [vmem:[#allocation2 + $0x19] sm:$0xff] %vm143_vm0, %v199_v3 }
  0x31   : > { %147 = vst.msk [vmem:[#allocation2 + $0x10] sm:$0x3] %vm146_vm1, %v2748_v0 }
  0x32   : > { %150 = vst.msk [vmem:[#allocation2 + $0x28] sm:$0x3] %vm146_vm1, %v2748_v0 }
  0x33   : > { %153 = vst.msk [vmem:[#allocation2 + $0x40] sm:$0x3] %vm146_vm1, %v2748_v0 }
  0x34   : > { %156 = vst.msk [vmem:[#allocation2 + $0x58] sm:$0x3] %vm146_vm1, %v2748_v0 }
  0x35   : > { %159 = vst.msk [vmem:[#allocation2 + $0x70] sm:$0x3] %vm146_vm1, %v2748_v0 }
  0x36   : > { %162 = vst.msk [vmem:[#allocation2 + $0x88] sm:$0x3] %vm146_vm1, %v2748_v0 }
  0x37   : > { %v363_v4 = vld [vmem:[#allocation2 + $0x19] sm:$0xff]  ;;  %165 = vst.msk [vmem:[#allocation2 + $0xa0] sm:$0x3] %vm146_vm1, %v2748_v0 }
  0x38   : > { %v395_v5 = vpack.c.bf16 %v363_v4, %v363_v4  ;;  %v362_v6 = vld [vmem:[#allocation2 + $0x9] sm:$0xff]  ;;  %168 = vst.msk [vmem:[#allocation2 + $0xb8] sm:$0x3] %vm146_vm1, %v2748_v0 }
  0x39   : > { %v394_v7 = vpack.c.bf16 %v362_v6, %v362_v6  ;;  %171 = vst.msk [vmem:[#allocation2 + $0xd0] sm:$0x3] %vm146_vm1, %v2748_v0  ;;  %v223_v6 = vld [vmem:[%s2853_s15 + $0xc0] sm:$0xff] }
  0x3a   : > { %461 = vrot.lane.b32.xlu1 %v395_v5, %s2749_s11  ;;  %174 = vst.msk [vmem:[#allocation2 + $0xe8] sm:$0x3] %vm146_vm1, %v2748_v0 }
  0x3b   : > { %459 = vrot.lane.b32.xlu0 %v394_v7, %s2749_s11  ;;  %177 = vst.msk [vmem:[#allocation2 + $0x100] sm:$0x3] %vm146_vm1, %v2748_v0 }
  0x3c   : > { %180 = vst.msk [vmem:[#allocation2 + $0x118] sm:$0x3] %vm146_vm1, %v2748_v0 }
  0x3d   : > { %183 = vst.msk [vmem:[#allocation2 + $0x130] sm:$0x3] %vm146_vm1, %v2748_v0 }
  0x3e   : > { %186 = vst.msk [vmem:[#allocation2 + $0x148] sm:$0x3] %vm146_vm1, %v2748_v0 }
  0x3f   : > { %189 = vst.msk [vmem:[#allocation2 + $0x160] sm:$0x3] %vm146_vm1, %v2748_v0 }
  0x40   : > { %192 = vst.msk [vmem:[#allocation2 + $0x178] sm:$0x3] %vm146_vm1, %v2748_v0 }
  0x41   : > { %195 = vst.msk [vmem:[#allocation2 + $0x190] sm:$0x3] %vm146_vm1, %v2748_v0 }
  0x42   : > { %198 = vst.msk [vmem:[#allocation2 + $0x1a8] sm:$0x3] %vm146_vm1, %v2748_v0 }
  0x43   : > { %233 = vst.msk [vmem:[#allocation2 + $0x21] sm:$0xff] %vm143_vm0, %v200_v8 }
  0x44   : > { %236 = vst.msk [vmem:[#allocation2 + $0x49] sm:$0xff] %vm143_vm0, %v203_v9 }
  0x45   : > { %237 = vst.msk [vmem:[#allocation2 + $0x51] sm:$0xff] %vm143_vm0, %v204_v10 }
  0x46   : > { %239 = vst.msk [vmem:[#allocation2 + $0x69] sm:$0xff] %vm143_vm0, %v206_v11 }
  0x47   : > { %234 = vst.msk [vmem:[#allocation2 + $0x31] sm:$0xff] %vm143_vm0, %v201_v12 }
  0x48   : > { %240 = vst.msk [vmem:[#allocation2 + $0x79] sm:$0xff] %vm143_vm0, %v207_v13  ;;  %v226_v13 = vld [vmem:[%s2853_s15 + $0xd8] sm:$0xff] }
  0x49   : > { %242 = vst.msk [vmem:[#allocation2 + $0x91] sm:$0xff] %vm143_vm0, %v209_v14 }
  0x4a   : > { %v364_v18 = vld [vmem:[#allocation2 + $0x21] sm:$0xff]  ;;  %235 = vst.msk [vmem:[#allocation2 + $0x39] sm:$0xff] %vm143_vm0, %v202_v15 }
  0x4b   : > { %v396_v20 = vpack.c.bf16 %v364_v18, %v364_v18  ;;  %v367_v21 = vld [vmem:[#allocation2 + $0x49] sm:$0xff]  ;;  %243 = vst.msk [vmem:[#allocation2 + $0x99] sm:$0xff] %vm143_vm0, %v210_v16 }
  0x4c   : > { %v399_v23 = vpack.c.bf16 %v367_v21, %v367_v21  ;;  %245 = vst.msk [vmem:[#allocation2 + $0xb1] sm:$0xff] %vm143_vm0, %v212_v17  ;;  %v368_v26 = vld [vmem:[#allocation2 + $0x51] sm:$0xff] }
  0x4d   : > { %463 = vrot.lane.b32.xlu1 %v396_v20, %s2749_s11  ;;  %238 = vst.msk [vmem:[#allocation2 + $0x61] sm:$0xff] %vm143_vm0, %v205_v19  ;;  %v370_v29 = vld [vmem:[#allocation2 + $0x69] sm:$0xff]  ;;  %v400_v32 = vpack.c.bf16 %v368_v26, %v368_v26 }
  0x4e   : > { %469 = vrot.lane.b32.xlu0 %v399_v23, %s2749_s11  ;;  %v365_v27 = vld [vmem:[#allocation2 + $0x31] sm:$0xff]  ;;  %246 = vst.msk [vmem:[#allocation2 + $0xc1] sm:$0xff] %vm143_vm0, %v213_v22  ;;  %v402_v33 = vpack.c.bf16 %v370_v29, %v370_v29 }
  0x4f   : > { %v397_v30 = vpack.c.bf16 %v365_v27, %v365_v27  ;;  %248 = vst.msk [vmem:[#allocation2 + $0xd9] sm:$0xff] %vm143_vm0, %v215_v24  ;;  %v371_v39 = vld [vmem:[#allocation2 + $0x79] sm:$0xff]  ;;  %v587_v29 = vld [vmem:[#allocation2 + $0xa] sm:$0xff] }
  0x50   : > { %241 = vst.msk [vmem:[#allocation2 + $0x81] sm:$0xff] %vm143_vm0, %v208_v25  ;;  %v373_v40 = vld [vmem:[#allocation2 + $0x91] sm:$0xff]  ;;  %v403_v41 = vpack.c.bf16 %v371_v39, %v371_v39 }
  0x51   : > { %465 = vrot.lane.b32.xlu2 %v397_v30, %s2749_s11  ;;  %249 = vst.msk [vmem:[#allocation2 + $0xe1] sm:$0xff] %vm143_vm0, %v216_v28  ;;  %v366_v34 = vld [vmem:[#allocation2 + $0x39] sm:$0xff]  ;;  %v405_v42 = vpack.c.bf16 %v373_v40, %v373_v40  ;;  %v265_v40 = vld [vmem:[#allocation2 + $0x8] sm:$0xff] }
  0x52   : > { %251 = vst.msk [vmem:[#allocation2 + $0xf9] sm:$0xff] %vm143_vm0, %v218_v31  ;;  %v398_v38 = vpack.c.bf16 %v366_v34, %v366_v34  ;;  %v374_v48 = vld [vmem:[#allocation2 + $0x99] sm:$0xff] }
  0x53   : > { %244 = vst.msk [vmem:[#allocation2 + $0xa9] sm:$0xff] %vm143_vm0, %v211_v35  ;;  %v376_v49 = vld [vmem:[#allocation2 + $0xb1] sm:$0xff]  ;;  %v406_v50 = vpack.c.bf16 %v374_v48, %v374_v48  ;;  %v264_v28 = vld [vmem:[#allocation2] sm:$0xff] }
  0x54   : > { %252 = vst.msk [vmem:[#allocation2 + $0x109] sm:$0xff] %vm143_vm0, %v219_v36  ;;  %v369_v43 = vld [vmem:[#allocation2 + $0x61] sm:$0xff]  ;;  %v408_v51 = vpack.c.bf16 %v376_v49, %v376_v49  ;;  %v296_v31 = vpack.c.bf16 %v264_v28, %v264_v28  ;;  %v266_v36 = vld [vmem:[#allocation2 + $0x18] sm:$0xff] }
  0x55   : > { %471 = vrot.lane.b32.xlu1 %v400_v32, %s2749_s11  ;;  %254 = vst.msk [vmem:[#allocation2 + $0x121] sm:$0xff] %vm143_vm0, %v221_v37  ;;  %v401_v47 = vpack.c.bf16 %v369_v43, %v369_v43  ;;  %v377_v57 = vld [vmem:[#allocation2 + $0xc1] sm:$0xff]  ;;  %v2994_v39 = vpack.c.bf16 %v266_v36, %v266_v36  ;;  %v297_v43 = vpack.c.bf16 %v265_v40, %v265_v40 }
  0x56   : > { %475 = vrot.lane.b32.xlu0 %v402_v33, %s2749_s11  ;;  %247 = vst.msk [vmem:[#allocation2 + $0xc9] sm:$0xff] %vm143_vm0, %v214_v44  ;;  %v379_v58 = vld [vmem:[#allocation2 + $0xd9] sm:$0xff]  ;;  %v409_v59 = vpack.c.bf16 %v377_v57, %v377_v57  ;;  %v619_v33 = vpack.c.bf16 %v587_v29, %v587_v29 }
  0x57   : > { %255 = vst.msk [vmem:[#allocation2 + $0x129] sm:$0xff] %vm143_vm0, %v222_v45  ;;  %v372_v52 = vld [vmem:[#allocation2 + $0x81] sm:$0xff]  ;;  %v411_v60 = vpack.c.bf16 %v379_v58, %v379_v58 }
  0x58   : > { %257 = vst.msk [vmem:[#allocation2 + $0x141] sm:$0xff] %vm143_vm0, %v224_v46  ;;  %v404_v56 = vpack.c.bf16 %v372_v52, %v372_v52  ;;  %v380_v1 = vld [vmem:[#allocation2 + $0xe1] sm:$0xff] }
  0x59   : > { %467 = vrot.lane.b32.xlu2 %v398_v38, %s2749_s11  ;;  %250 = vst.msk [vmem:[#allocation2 + $0xf1] sm:$0xff] %vm143_vm0, %v217_v53  ;;  %v382_v2 = vld [vmem:[#allocation2 + $0xf9] sm:$0xff]  ;;  %v412_v3 = vpack.c.bf16 %v380_v1, %v380_v1  ;;  %v268_v38 = vld [vmem:[#allocation2 + $0x30] sm:$0xff]  ;;  %v586_v46 = vld [vmem:[#allocation2 + $0x2] sm:$0xff] }
  0x5a   : > { %258 = vst.msk [vmem:[#allocation2 + $0x151] sm:$0xff] %vm143_vm0, %v225_v54  ;;  %v375_v61 = vld [vmem:[#allocation2 + $0xa9] sm:$0xff]  ;;  %v414_v4 = vpack.c.bf16 %v382_v2, %v382_v2  ;;  %v588_v37 = vld [vmem:[#allocation2 + $0x1a] sm:$0xff]  ;;  %v593_v53 = vld [vmem:[#allocation2 + $0x52] sm:$0xff] }
  0x5b   : > { %260 = vst.msk [vmem:[#allocation2 + $0x169] sm:$0xff] %vm143_vm0, %v227_v55  ;;  %v407_v0 = vpack.c.bf16 %v375_v61, %v375_v61  ;;  %v383_v8 = vld [vmem:[#allocation2 + $0x109] sm:$0xff]  ;;  %v620_v44 = vpack.c.bf16 %v588_v37, %v588_v37  ;;  %v267_v48 = vld [vmem:[#allocation2 + $0x20] sm:$0xff]  ;;  %v625_v57 = vpack.c.bf16 %v593_v53, %v593_v53 }
  0x5c   : > { %253 = vst.msk [vmem:[#allocation2 + $0x111] sm:$0xff] %vm143_vm0, %v220_v62  ;;  %v385_v9 = vld [vmem:[#allocation2 + $0x121] sm:$0xff]  ;;  %v415_v10 = vpack.c.bf16 %v383_v8, %v383_v8  ;;  %v279_v28 = vld [vmem:[#allocation2 + $0xb0] sm:$0xff] }
  0x5d   : > { %477 = vrot.lane.b32.xlu1 %v403_v41, %s2749_s11  ;;  %261 = vst.msk [vmem:[#allocation2 + $0x171] sm:$0xff] %vm143_vm0, %v228_v63  ;;  %v378_v5 = vld [vmem:[#allocation2 + $0xc9] sm:$0xff]  ;;  %v417_v11 = vpack.c.bf16 %v385_v9, %v385_v9  ;;  %v590_v41 = vld [vmem:[#allocation2 + $0x32] sm:$0xff]  ;;  %v591_v49 = vld [vmem:[#allocation2 + $0x3a] sm:$0xff] }
  0x5e   : > { %481 = vrot.lane.b32.xlu0 %v405_v42, %s2749_s11  ;;  %256 = vst.msk [vmem:[#allocation2 + $0x139] sm:$0xff] %vm143_vm0, %v223_v6  ;;  %v410_v7 = vpack.c.bf16 %v378_v5, %v378_v5  ;;  %v386_v15 = vld [vmem:[#allocation2 + $0x129] sm:$0xff]  ;;  %v2996_v42 = vpack.c.bf16 %v268_v38, %v268_v38  ;;  %v622_v45 = vpack.c.bf16 %v590_v41, %v590_v41  ;;  %v272_v62 = vld [vmem:[#allocation2 + $0x60] sm:$0xff]  ;;  %v282_v41 = vld [vmem:[#allocation2 + $0xd8] sm:$0xff] }
  0x5f   : > { %259 = vst.msk [vmem:[#allocation2 + $0x159] sm:$0xff] %vm143_vm0, %v226_v13  ;;  %v388_v16 = vld [vmem:[#allocation2 + $0x141] sm:$0xff]  ;;  %v418_v17 = vpack.c.bf16 %v386_v15, %v386_v15  ;;  %v3023_v2 = vpack.c.bf16 %v272_v62, %v272_v62  ;;  %v592_v6 = vld [vmem:[#allocation2 + $0x4a] sm:$0xff] }
  0x60   : > { %v381_v12 = vld [vmem:[#allocation2 + $0xf1] sm:$0xff]  ;;  %v420_v18 = vpack.c.bf16 %v388_v16, %v388_v16  ;;  %329 = vst.msk [vmem:[#allocation3] sm:$0xf] %vm328_vm2, %v296_v31  ;;  %v270_v52 = vld [vmem:[#allocation2 + $0x48] sm:$0xff]  ;;  %v596_v1 = vld [vmem:[#allocation2 + $0x7a] sm:$0xff]  ;;  %v3061_v31 = vpack.c.bf16 %v279_v28, %v279_v28 }
  0x61   : > { %473 = vrot.lane.b32.xlu2 %v401_v47, %s2749_s11  ;;  %v413_v14 = vpack.c.bf16 %v381_v12, %v381_v12  ;;  %v389_v21 = vld [vmem:[#allocation2 + $0x151] sm:$0xff]  ;;  %331 = vst.msk [vmem:[#allocation3 + $0x8] sm:$0xf] %vm328_vm2, %v2994_v39  ;;  %v618_v47 = vpack.c.bf16 %v586_v46, %v586_v46  ;;  %v3010_v55 = vpack.c.bf16 %v270_v52, %v270_v52  ;;  %v589_v58 = vld [vmem:[#allocation2 + $0x22] sm:$0xff]  ;;  %v599_v16 = vld [vmem:[#allocation2 + $0x9a] sm:$0xff] }
  0x62   : > { %v391_v22 = vld [vmem:[#allocation2 + $0x169] sm:$0xff]  ;;  %v421_v23 = vpack.c.bf16 %v389_v21, %v389_v21  ;;  %333 = vst.msk [vmem:[#allocation3 + $0x10] sm:$0xf] %vm328_vm2, %v2996_v42  ;;  %v628_v5 = vpack.c.bf16 %v596_v1, %v596_v1  ;;  %v275_v13 = vld [vmem:[#allocation2 + $0x80] sm:$0xff]  ;;  %v601_v52 = vld [vmem:[#allocation2 + $0xb2] sm:$0xff] }
  0x63   : > { %v384_v19 = vld [vmem:[#allocation2 + $0x111] sm:$0xff]  ;;  %v423_v24 = vpack.c.bf16 %v391_v22, %v391_v22  ;;  %330 = vst.msk [vmem:[#allocation3 + $0x4] sm:$0xf] %vm328_vm2, %v297_v43  ;;  %v594_v61 = vld [vmem:[#allocation2 + $0x62] sm:$0xff]  ;;  %v607_v28 = vld [vmem:[#allocation2 + $0xfa] sm:$0xff] }
  0x64   : > { %v416_v20 = vpack.c.bf16 %v384_v19, %v384_v19  ;;  %v392_v27 = vld [vmem:[#allocation2 + $0x171] sm:$0xff]  ;;  %335 = vst.msk [vmem:[#allocation3 + $0x18] sm:$0xf] %vm328_vm2, %v3010_v55  ;;  %v597_v12 = vld [vmem:[#allocation2 + $0x82] sm:$0xff] }
  0x65   : > { %483 = vrot.lane.b32.xlu1 %v406_v50, %s2749_s11  ;;  %v387_v25 = vld [vmem:[#allocation2 + $0x139] sm:$0xff]  ;;  %v424_v32 = vpack.c.bf16 %v392_v27, %v392_v27  ;;  %337 = vst.msk [vmem:[#allocation3 + $0x20] sm:$0xf] %vm328_vm2, %v3023_v2  ;;  %v276_v15 = vld [vmem:[#allocation2 + $0x90] sm:$0xff]  ;;  %v629_v19 = vpack.c.bf16 %v597_v12, %v597_v12  ;;  %v602_v29 = vld [vmem:[#allocation2 + $0xc2] sm:$0xff] }
  0x66   : > { %487 = vrot.lane.b32.xlu0 %v408_v51, %s2749_s11  ;;  %v419_v26 = vpack.c.bf16 %v387_v25, %v387_v25  ;;  %v390_v34 = vld [vmem:[#allocation2 + $0x159] sm:$0xff]  ;;  %v3006_v51 = vpack.c.bf16 %v267_v48, %v267_v48  ;;  %v595_v21 = vld [vmem:[#allocation2 + $0x6a] sm:$0xff]  ;;  %344 = vst.msk [vmem:[#allocation3 + $0x3c] sm:$0xf] %vm328_vm2, %v3061_v31 }
  0x67   : > { %v422_v35 = vpack.c.bf16 %v390_v34, %v390_v34  ;;  %v269_v50 = vld [vmem:[#allocation2 + $0x38] sm:$0xff]  ;;  %v600_v25 = vld [vmem:[#allocation2 + $0xaa] sm:$0xff]  ;;  %v280_v37 = vld [vmem:[#allocation2 + $0xc0] sm:$0xff] }
  0x68   : > { %v3008_v54 = vpack.c.bf16 %v269_v50, %v269_v50  ;;  %332 = vst.msk [vmem:[#allocation3 + $0xc] sm:$0xf] %vm328_vm2, %v3006_v51  ;;  %v598_v34 = vld [vmem:[#allocation2 + $0x92] sm:$0xff]  ;;  %v603_v38 = vld [vmem:[#allocation2 + $0xca] sm:$0xff]  ;;  %v3078_v46 = vpack.c.bf16 %v280_v37, %v280_v37  ;;  %v291_v37 = vld [vmem:[#allocation2 + $0x140] sm:$0xff] }
  0x69   : > { %479 = vrot.lane.b32.xlu2 %v404_v56, %s2749_s11  ;;  %v623_v56 = vpack.c.bf16 %v591_v49, %v591_v49  ;;  %v3073_v36 = vpack.c.bf16 %v598_v34, %v598_v34  ;;  %v281_v40 = vld [vmem:[#allocation2 + $0xc8] sm:$0xff]  ;;  %v635_v48 = vpack.c.bf16 %v603_v38, %v603_v38  ;;  %v3084_v49 = vpack.c.bf16 %v282_v41, %v282_v41  ;;  %v609_v12 = vld [vmem:[#allocation2 + $0x112] sm:$0xff]  ;;  %v612_v34 = vld [vmem:[#allocation2 + $0x13a] sm:$0xff] }
  0x6a   : > { %334 = vst.msk [vmem:[#allocation3 + $0x14] sm:$0xf] %vm328_vm2, %v3008_v54  ;;  %v608_v62 = vld [vmem:[#allocation2 + $0x10a] sm:$0xff] }
  0x6b   : > { %345 = vst.msk [vmem:[#allocation3 + $0x40] sm:$0xf] %vm328_vm2, %v3078_v46 }
  0x6c   : > { %347 = vst.msk [vmem:[#allocation3 + $0x48] sm:$0xf] %vm328_vm2, %v3084_v49 }
  0x6d   : > { %489 = vrot.lane.b32.xlu1 %v409_v59, %s2749_s11  ;;  %v621_v59 = vpack.c.bf16 %v589_v58, %v589_v58  ;;  %v606_v58 = vld [vmem:[#allocation2 + $0xf2] sm:$0xff] }
  0x6e   : > { %493 = vrot.lane.b32.xlu0 %v411_v60, %s2749_s11  ;;  %v271_v60 = vld [vmem:[#allocation2 + $0x50] sm:$0xff] }
  0x6f   : > { %v3021_v63 = vpack.c.bf16 %v271_v60, %v271_v60  ;;  %v285_v60 = vld [vmem:[#allocation2 + $0xf8] sm:$0xff] }
  0x71   : > { %485 = vrot.lane.b32.xlu2 %v407_v0, %s2749_s11  ;;  %v273_v0 = vld [vmem:[#allocation2 + $0x68] sm:$0xff]  ;;  %336 = vst.msk [vmem:[#allocation3 + $0x1c] sm:$0xf] %vm328_vm2, %v3021_v63 }
  0x75   : > { %495 = vrot.lane.b32.xlu1 %v412_v3, %s2749_s11  ;;  %v3025_v3 = vpack.c.bf16 %v273_v0, %v273_v0 }
  0x76   : > { %499 = vrot.lane.b32.xlu0 %v414_v4, %s2749_s11  ;;  %v626_v4 = vpack.c.bf16 %v594_v61, %v594_v61 }
  0x77   : > { %338 = vst.msk [vmem:[#allocation3 + $0x24] sm:$0xf] %vm328_vm2, %v3025_v3 }
  0x79   : > { %491 = vrot.lane.b32.xlu2 %v410_v7, %s2749_s11 }
  0x7d   : > { %501 = vrot.lane.b32.xlu1 %v415_v10, %s2749_s11  ;;  %v624_v10 = vpack.c.bf16 %v592_v6, %v592_v6  ;;  %v3105_v6 = vpack.c.bf16 %v285_v60, %v285_v60  ;;  %v293_v60 = vld [vmem:[#allocation2 + $0x158] sm:$0xff] }
  0x7e   : > { %505 = vrot.lane.b32.xlu0 %v417_v11, %s2749_s11  ;;  %v274_v11 = vld [vmem:[#allocation2 + $0x78] sm:$0xff] }
  0x7f   : > { %350 = vst.msk [vmem:[#allocation3 + $0x54] sm:$0xf] %vm328_vm2, %v3105_v6 }
  0x81   : > { %497 = vrot.lane.b32.xlu2 %v413_v14, %s2749_s11  ;;  %v3039_v14 = vpack.c.bf16 %v274_v11, %v274_v11  ;;  %v286_v11 = vld [vmem:[#allocation2 + $0x108] sm:$0xff] }
  0x83   : > { %339 = vst.msk [vmem:[#allocation3 + $0x28] sm:$0xf] %vm328_vm2, %v3039_v14 }
  0x85   : > { %507 = vrot.lane.b32.xlu1 %v418_v17, %s2749_s11  ;;  %v3041_v17 = vpack.c.bf16 %v275_v13, %v275_v13  ;;  %v287_v13 = vld [vmem:[#allocation2 + $0x110] sm:$0xff] }
  0x86   : > { %511 = vrot.lane.b32.xlu0 %v420_v18, %s2749_s11  ;;  %v3043_v18 = vpack.c.bf16 %v276_v15, %v276_v15  ;;  %v288_v15 = vld [vmem:[#allocation2 + $0x120] sm:$0xff] }
  0x87   : > { %340 = vst.msk [vmem:[#allocation3 + $0x2c] sm:$0xf] %vm328_vm2, %v3041_v17 }
  0x88   : > { %341 = vst.msk [vmem:[#allocation3 + $0x30] sm:$0xf] %vm328_vm2, %v3043_v18 }
  0x89   : > { %503 = vrot.lane.b32.xlu2 %v416_v20, %s2749_s11  ;;  %v458_v30 = vpop.permute.xlu0 %457  ;;  %v631_v20 = vpack.c.bf16 %v599_v16, %v599_v16 }
  0x8a   : > { %554 = vst.msk [vmem:[#allocation3] sm:$0xf] %vm553_vm3, %v458_v30 }
  0x8d   : > { %513 = vrot.lane.b32.xlu1 %v421_v23, %s2749_s11  ;;  %v3054_v23 = vpack.c.bf16 %v595_v21, %v595_v21  ;;  %v3120_v21 = vpack.c.bf16 %v286_v11, %v286_v11 }
  0x8e   : > { %517 = vrot.lane.b32.xlu0 %v423_v24, %s2749_s11  ;;  %v277_v24 = vld [vmem:[#allocation2 + $0x98] sm:$0xff] }
  0x8f   : > { %v3057_v27 = vpack.c.bf16 %v277_v24, %v277_v24  ;;  %v641_v24 = vpack.c.bf16 %v609_v12, %v609_v12  ;;  %351 = vst.msk [vmem:[#allocation3 + $0x58] sm:$0xf] %vm328_vm2, %v3120_v21 }
  0x91   : > { %509 = vrot.lane.b32.xlu2 %v419_v26, %s2749_s11  ;;  %v278_v26 = vld [vmem:[#allocation2 + $0xa8] sm:$0xff]  ;;  %342 = vst.msk [vmem:[#allocation3 + $0x34] sm:$0xf] %vm328_vm2, %v3057_v27 }
  0x92   : > { %v3059_v30 = vpack.c.bf16 %v278_v26, %v278_v26 }
  0x94   : > { %343 = vst.msk [vmem:[#allocation3 + $0x38] sm:$0xf] %vm328_vm2, %v3059_v30 }
  0x95   : > { %519 = vrot.lane.b32.xlu1 %v424_v32, %s2749_s11  ;;  %v632_v32 = vpack.c.bf16 %v600_v25, %v600_v25  ;;  %v3126_v25 = vpack.c.bf16 %v288_v15, %v288_v15 }
  0x96   : > { %684 = vrot.lane.b32.xlu0 %v619_v33, %s2750_s16  ;;  %v634_v33 = vpack.c.bf16 %v602_v29, %v602_v29 }
  0x97   : > { %353 = vst.msk [vmem:[#allocation3 + $0x60] sm:$0xf] %vm328_vm2, %v3126_v25 }
  0x99   : > { %515 = vrot.lane.b32.xlu2 %v422_v35, %s2749_s11 }
  0x9d   : > { %686 = vrot.lane.b32.xlu1 %v620_v44, %s2750_s16  ;;  %v605_v44 = vld [vmem:[#allocation2 + $0xe2] sm:$0xff] }
  0x9e   : > { %690 = vrot.lane.b32.xlu0 %v622_v45, %s2750_s16  ;;  %v3076_v45 = vpack.c.bf16 %v281_v40, %v281_v40  ;;  %v637_v50 = vpack.c.bf16 %v605_v44, %v605_v44  ;;  %v614_v40 = vld [vmem:[#allocation2 + $0x152] sm:$0xff] }
  0xa0   : > { %346 = vst.msk [vmem:[#allocation3 + $0x44] sm:$0xf] %vm328_vm2, %v3076_v45 }
  0xa1   : > { %682 = vrot.lane.b32.xlu2 %v618_v47, %s2750_s16 }
  0xa5   : > { %692 = vrot.lane.b32.xlu1 %v623_v56, %s2750_s16  ;;  %v3092_v56 = vpack.c.bf16 %v601_v52, %v601_v52  ;;  %v610_v52 = vld [vmem:[#allocation2 + $0x122] sm:$0xff] }
  0xa6   : > { %696 = vrot.lane.b32.xlu0 %v625_v57, %s2750_s16  ;;  %v283_v57 = vld [vmem:[#allocation2 + $0xe0] sm:$0xff] }
  0xa7   : > { %v3099_v1 = vpack.c.bf16 %v283_v57, %v283_v57  ;;  %v3155_v57 = vpack.c.bf16 %v610_v52, %v610_v52 }
  0xa9   : > { %688 = vrot.lane.b32.xlu2 %v621_v59, %s2750_s16  ;;  %v284_v59 = vld [vmem:[#allocation2 + $0xf0] sm:$0xff]  ;;  %348 = vst.msk [vmem:[#allocation3 + $0x4c] sm:$0xf] %vm328_vm2, %v3099_v1 }
  0xaa   : > { %v3097_v0 = vpack.c.bf16 %v284_v59, %v284_v59  ;;  %v615_v59 = vld [vmem:[#allocation2 + $0x15a] sm:$0xff] }
  0xab   : > { %v466_v7 = vpop.permute.xlu2 %465 }
  0xac   : > { %558 = vst.msk [vmem:[#allocation3 + $0x10] sm:$0xf] %vm553_vm3, %v466_v7  ;;  %v462_v8 = vpop.permute.xlu1 %461  ;;  %v640_v7 = vpack.c.bf16 %v608_v62, %v608_v62 }
  0xad   : > { %698 = vrot.lane.b32.xlu1 %v626_v4, %s2750_s16  ;;  %556 = vst.msk [vmem:[#allocation3 + $0x8] sm:$0xf] %vm553_vm3, %v462_v8  ;;  %v460_v9 = vpop.permute.xlu0 %459  ;;  %v604_v8 = vld [vmem:[#allocation2 + $0xda] sm:$0xff] }
  0xae   : > { %702 = vrot.lane.b32.xlu0 %v628_v5, %s2750_s16  ;;  %555 = vst.msk [vmem:[#allocation3 + $0x4] sm:$0xf] %vm553_vm3, %v460_v9  ;;  %v638_v5 = vpack.c.bf16 %v606_v58, %v606_v58  ;;  %v292_v58 = vld [vmem:[#allocation2 + $0x150] sm:$0xff] }
  0xaf   : > { %349 = vst.msk [vmem:[#allocation3 + $0x50] sm:$0xf] %vm328_vm2, %v3097_v0 }
  0xb1   : > { %694 = vrot.lane.b32.xlu2 %v624_v10, %s2750_s16  ;;  %v3113_v10 = vpack.c.bf16 %v604_v8, %v604_v8 }
  0xb3   : > { %v468_v22 = vpop.permute.xlu2 %467 }
  0xb4   : > { %559 = vst.msk [vmem:[#allocation3 + $0x14] sm:$0xf] %vm553_vm3, %v468_v22 }
  0xb5   : > { %704 = vrot.lane.b32.xlu1 %v629_v19, %s2750_s16  ;;  %v611_v19 = vld [vmem:[#allocation2 + $0x12a] sm:$0xff] }
  0xb6   : > { %708 = vrot.lane.b32.xlu0 %v631_v20, %s2750_s16  ;;  %v3118_v20 = vpack.c.bf16 %v287_v13, %v287_v13  ;;  %v643_v26 = vpack.c.bf16 %v611_v19, %v611_v19  ;;  %v613_v13 = vld [vmem:[#allocation2 + $0x142] sm:$0xff]  ;;  %v295_v19 = vld [vmem:[#allocation2 + $0x170] sm:$0xff] }
  0xb8   : > { %352 = vst.msk [vmem:[#allocation3 + $0x5c] sm:$0xf] %vm328_vm2, %v3118_v20 }
  0xb9   : > { %700 = vrot.lane.b32.xlu2 %v3054_v23, %s2750_s16 }
  0xbb   : > { %v474_v35 = vpop.permute.xlu2 %473 }
  0xbc   : > { %562 = vst.msk [vmem:[#allocation3 + $0x20] sm:$0xf] %vm553_vm3, %v474_v35  ;;  %v290_v35 = vld [vmem:[#allocation2 + $0x138] sm:$0xff] }
  0xbd   : > { %710 = vrot.lane.b32.xlu1 %v632_v32, %s2750_s16  ;;  %v3134_v32 = vpack.c.bf16 %v607_v28, %v607_v28  ;;  %v3139_v41 = vpack.c.bf16 %v290_v35, %v290_v35  ;;  %v616_v28 = vld [vmem:[#allocation2 + $0x16a] sm:$0xff] }
  0xbe   : > { %714 = vrot.lane.b32.xlu0 %v634_v33, %s2750_s16  ;;  %v289_v33 = vld [vmem:[#allocation2 + $0x128] sm:$0xff] }
  0xbf   : > { %v464_v43 = vpop.permute.xlu1 %463  ;;  %355 = vst.msk [vmem:[#allocation3 + $0x68] sm:$0xf] %vm328_vm2, %v3139_v41 }
  0xc0   : > { %557 = vst.msk [vmem:[#allocation3 + $0xc] sm:$0xf] %vm553_vm3, %v464_v43  ;;  %v470_v47 = vpop.permute.xlu0 %469  ;;  %v3141_v43 = vpack.c.bf16 %v289_v33, %v289_v33  ;;  %v3192_v33 = vpack.c.bf16 %v616_v28, %v616_v28  ;;  %v1043_v28 = vld [vmem:[#allocation2 + $0x69] sm:$0xff] }
  0xc1   : > { %560 = vst.msk [vmem:[#allocation3 + $0x18] sm:$0xf] %vm553_vm3, %v470_v47  ;;  %706 = vrot.lane.b32.xlu2 %v3073_v36, %s2750_s16  ;;  %v644_v47 = vpack.c.bf16 %v612_v34, %v612_v34 }
  0xc2   : > { %354 = vst.msk [vmem:[#allocation3 + $0x64] sm:$0xf] %vm328_vm2, %v3141_v43 }
  0xc3   : > { %v480_v53 = vpop.permute.xlu2 %479 }
  0xc4   : > { %565 = vst.msk [vmem:[#allocation3 + $0x2c] sm:$0xf] %vm553_vm3, %v480_v53 }
  0xc5   : > { %716 = vrot.lane.b32.xlu1 %v635_v48, %s2750_s16  ;;  %v3147_v48 = vpack.c.bf16 %v291_v37, %v291_v37 }
  0xc6   : > { %720 = vrot.lane.b32.xlu0 %v637_v50, %s2750_s16  ;;  %v646_v50 = vpack.c.bf16 %v614_v40, %v614_v40  ;;  %v229_v40 = vld [vmem:[%s2853_s15 + $0xf0] sm:$0xff] }
  0xc7   : > { %v472_v61 = vpop.permute.xlu1 %471  ;;  %356 = vst.msk [vmem:[#allocation3 + $0x6c] sm:$0xf] %vm328_vm2, %v3147_v48 }
  0xc8   : > { %561 = vst.msk [vmem:[#allocation3 + $0x1c] sm:$0xf] %vm553_vm3, %v472_v61  ;;  %v476_v4 = vpop.permute.xlu0 %475  ;;  %v294_v61 = vld [vmem:[#allocation2 + $0x168] sm:$0xff] }
  0xc9   : > { %563 = vst.msk [vmem:[#allocation3 + $0x24] sm:$0xf] %vm553_vm3, %v476_v4  ;;  %712 = vrot.lane.b32.xlu2 %v3092_v56, %s2750_s16  ;;  %v617_v4 = vld [vmem:[#allocation2 + $0x172] sm:$0xff]  ;;  %v3168_v11 = vpack.c.bf16 %v294_v61, %v294_v61 }
  0xca   : > { %v649_v12 = vpack.c.bf16 %v617_v4, %v617_v4  ;;  %262 = vst.msk [vmem:[#allocation2 + $0x181] sm:$0xff] %vm143_vm0, %v229_v40  ;;  %v1039_v61 = vld [vmem:[#allocation2 + $0x39] sm:$0xff] }
  0xcb   : > { %v486_v9 = vpop.permute.xlu2 %485  ;;  %359 = vst.msk [vmem:[#allocation3 + $0x78] sm:$0xf] %vm328_vm2, %v3168_v11 }
  0xcc   : > { %568 = vst.msk [vmem:[#allocation3 + $0x38] sm:$0xf] %vm553_vm3, %v486_v9  ;;  %v647_v9 = vpack.c.bf16 %v615_v59, %v615_v59  ;;  %v1037_v59 = vld [vmem:[#allocation2 + $0x21] sm:$0xff] }
  0xcd   : > { %722 = vrot.lane.b32.xlu1 %v638_v5, %s2750_s16  ;;  %v3160_v5 = vpack.c.bf16 %v293_v60, %v293_v60  ;;  %v1069_v4 = vpack.c.bf16 %v1037_v59, %v1037_v59  ;;  %v1057_v59 = vld [vmem:[#allocation2 + $0x111] sm:$0xff] }
  0xce   : > { %726 = vrot.lane.b32.xlu0 %v640_v7, %s2750_s16  ;;  %v3162_v7 = vpack.c.bf16 %v292_v58, %v292_v58 }
  0xcf   : > { %v478_v16 = vpop.permute.xlu1 %477  ;;  %358 = vst.msk [vmem:[#allocation3 + $0x74] sm:$0xf] %vm328_vm2, %v3160_v5 }
  0xd0   : > { %564 = vst.msk [vmem:[#allocation3 + $0x28] sm:$0xf] %vm553_vm3, %v478_v16  ;;  %v482_v22 = vpop.permute.xlu0 %481  ;;  %v3176_v16 = vpack.c.bf16 %v613_v13, %v613_v13  ;;  %v1042_v13 = vld [vmem:[#allocation2 + $0x61] sm:$0xff] }
  0xd1   : > { %566 = vst.msk [vmem:[#allocation3 + $0x30] sm:$0xf] %vm553_vm3, %v482_v22  ;;  %718 = vrot.lane.b32.xlu2 %v3113_v10, %s2750_s16  ;;  %v3181_v22 = vpack.c.bf16 %v295_v19, %v295_v19  ;;  %v3303_v19 = vpack.c.bf16 %v1042_v13, %v1042_v13 }
  0xd2   : > { %357 = vst.msk [vmem:[#allocation3 + $0x70] sm:$0xf] %vm328_vm2, %v3162_v7 }
  0xd3   : > { %v492_v29 = vpop.permute.xlu2 %491  ;;  %360 = vst.msk [vmem:[#allocation3 + $0x7c] sm:$0xf] %vm328_vm2, %v3181_v22 }
  0xd4   : > { %571 = vst.msk [vmem:[#allocation3 + $0x44] sm:$0xf] %vm553_vm3, %v492_v29 }
  0xd5   : > { %728 = vrot.lane.b32.xlu1 %v641_v24, %s2750_s16 }
  0xd6   : > { %732 = vrot.lane.b32.xlu0 %v643_v26, %s2750_s16 }
  0xd7   : > { %v484_v38 = vpop.permute.xlu1 %483 }
  0xd8   : > { %567 = vst.msk [vmem:[#allocation3 + $0x34] sm:$0xf] %vm553_vm3, %v484_v38  ;;  %v488_v44 = vpop.permute.xlu0 %487 }
  0xd9   : > { %569 = vst.msk [vmem:[#allocation3 + $0x3c] sm:$0xf] %vm553_vm3, %v488_v44  ;;  %724 = vrot.lane.b32.xlu2 %v3134_v32, %s2750_s16  ;;  %v230_v44 = vld [vmem:[%s2853_s15 + $0xf8] sm:$0xff] }
  0xda   : > { %263 = vst.msk [vmem:[#allocation2 + $0x189] sm:$0xff] %vm143_vm0, %v230_v44 }
  0xdb   : > { %v498_v53 = vpop.permute.xlu2 %497 }
  0xdc   : > { %574 = vst.msk [vmem:[#allocation3 + $0x50] sm:$0xf] %vm553_vm3, %v498_v53 }
  0xdd   : > { %734 = vrot.lane.b32.xlu1 %v644_v47, %s2750_s16 }
  0xde   : > { %738 = vrot.lane.b32.xlu0 %v646_v50, %s2750_s16  ;;  %v1036_v50 = vld [vmem:[#allocation2 + $0x19] sm:$0xff] }
  0xdf   : > { %v490_v62 = vpop.permute.xlu1 %489 }
  0xe0   : > { %570 = vst.msk [vmem:[#allocation3 + $0x40] sm:$0xf] %vm553_vm3, %v490_v62  ;;  %v494_v8 = vpop.permute.xlu0 %493 }
  0xe1   : > { %572 = vst.msk [vmem:[#allocation3 + $0x48] sm:$0xf] %vm553_vm3, %v494_v8  ;;  %730 = vrot.lane.b32.xlu2 %v3155_v57, %s2750_s16 }
  0xe3   : > { %v504_v15 = vpop.permute.xlu2 %503 }
  0xe4   : > { %577 = vst.msk [vmem:[#allocation3 + $0x5c] sm:$0xf] %vm553_vm3, %v504_v15 }
  0xe5   : > { %740 = vrot.lane.b32.xlu1 %v647_v9, %s2750_s16  ;;  %v1040_v9 = vld [vmem:[#allocation2 + $0x49] sm:$0xff] }
  0xe6   : > { %744 = vrot.lane.b32.xlu0 %v649_v12, %s2750_s16 }
  0xe7   : > { %v496_v24 = vpop.permute.xlu1 %495 }
  0xe8   : > { %573 = vst.msk [vmem:[#allocation3 + $0x4c] sm:$0xf] %vm553_vm3, %v496_v24  ;;  %v500_v26 = vpop.permute.xlu0 %499 }
  0xe9   : > { %575 = vst.msk [vmem:[#allocation3 + $0x54] sm:$0xf] %vm553_vm3, %v500_v26  ;;  %736 = vrot.lane.b32.xlu2 %v3176_v16, %s2750_s16 }
  0xeb   : > { %v510_v29 = vpop.permute.xlu2 %509 }
  0xec   : > { %580 = vst.msk [vmem:[#allocation3 + $0x68] sm:$0xf] %vm553_vm3, %v510_v29 }
  0xed   : > { %907 = vrot.lane.b32.xlu1 %v2994_v39, %s2751_s17 }
  0xee   : > { %911 = vrot.lane.b32.xlu0 %v2996_v42, %s2751_s17 }
  0xef   : > { %v502_v34 = vpop.permute.xlu1 %501 }
  0xf0   : > { %576 = vst.msk [vmem:[#allocation3 + $0x58] sm:$0xf] %vm553_vm3, %v502_v34  ;;  %v506_v35 = vpop.permute.xlu0 %505  ;;  %v1045_v34 = vld [vmem:[#allocation2 + $0x81] sm:$0xff] }
  0xf1   : > { %578 = vst.msk [vmem:[#allocation3 + $0x60] sm:$0xf] %vm553_vm3, %v506_v35  ;;  %742 = vrot.lane.b32.xlu2 %v3192_v33, %s2750_s16 }
  0xf3   : > { %v516_v37 = vpop.permute.xlu2 %515 }
  0xf4   : > { %583 = vst.msk [vmem:[#allocation3 + $0x74] sm:$0xf] %vm553_vm3, %v516_v37  ;;  %v3314_v37 = vpack.c.bf16 %v1043_v28, %v1043_v28 }
  0xf5   : > { %913 = vrot.lane.b32.xlu1 %v3008_v54, %s2751_s17 }
  0xf6   : > { %917 = vrot.lane.b32.xlu0 %v3021_v63, %s2751_s17 }
  0xf7   : > { %v508_v39 = vpop.permute.xlu1 %507 }
  0xf8   : > { %579 = vst.msk [vmem:[#allocation3 + $0x64] sm:$0xf] %vm553_vm3, %v508_v39  ;;  %v512_v42 = vpop.permute.xlu0 %511  ;;  %v1077_v39 = vpack.c.bf16 %v1045_v34, %v1045_v34  ;;  %v1061_v34 = vld [vmem:[#allocation2 + $0x141] sm:$0xff] }
  0xf9   : > { %581 = vst.msk [vmem:[#allocation3 + $0x6c] sm:$0xf] %vm553_vm3, %v512_v42  ;;  %909 = vrot.lane.b32.xlu2 %v3006_v51, %s2751_s17  ;;  %v1041_v42 = vld [vmem:[#allocation2 + $0x51] sm:$0xff] }
  0xfb   : > { %v683_v38 = vpop.permute.xlu2 %682 }
  0xfc   : > { %779 = vst.msk [vmem:[#allocation3] sm:$0xf] %vm778_vm4, %v683_v38 }
  0xfd   : > { %919 = vrot.lane.b32.xlu1 %v3023_v2, %s2751_s17 }
  0xfe   : > { %923 = vrot.lane.b32.xlu0 %v3039_v14, %s2751_s17 }
  0xff   : > { %v514_v54 = vpop.permute.xlu1 %513 }
 0x100   : > { %582 = vst.msk [vmem:[#allocation3 + $0x70] sm:$0xf] %vm553_vm3, %v514_v54  ;;  %v518_v63 = vpop.permute.xlu0 %517  ;;  %v3321_v54 = vpack.c.bf16 %v1041_v42, %v1041_v42 }
 0x101   : > { %584 = vst.msk [vmem:[#allocation3 + $0x78] sm:$0xf] %vm553_vm3, %v518_v63  ;;  %915 = vrot.lane.b32.xlu2 %v3010_v55, %s2751_s17  ;;  %v1046_v63 = vld [vmem:[#allocation2 + $0x91] sm:$0xff] }
 0x103   : > { %v689_v51 = vpop.permute.xlu2 %688 }
 0x104   : > { %782 = vst.msk [vmem:[#allocation3 + $0xc] sm:$0xf] %vm778_vm4, %v689_v51 }
 0x105   : > { %925 = vrot.lane.b32.xlu1 %v3041_v17, %s2751_s17 }
 0x106   : > { %929 = vrot.lane.b32.xlu0 %v3057_v27, %s2751_s17 }
 0x107   : > { %v520_v2 = vpop.permute.xlu1 %519 }
 0x108   : > { %585 = vst.msk [vmem:[#allocation3 + $0x7c] sm:$0xf] %vm553_vm3, %v520_v2  ;;  %v685_v14 = vpop.permute.xlu0 %684  ;;  %v1048_v2 = vld [vmem:[#allocation2 + $0xa9] sm:$0xff] }
 0x109   : > { %780 = vst.msk [vmem:[#allocation3 + $0x4] sm:$0xf] %vm778_vm4, %v685_v14  ;;  %921 = vrot.lane.b32.xlu2 %v3025_v3, %s2751_s17 }
 0x10b   : > { %v695_v55 = vpop.permute.xlu2 %694 }
 0x10c   : > { %785 = vst.msk [vmem:[#allocation3 + $0x18] sm:$0xf] %vm778_vm4, %v695_v55  ;;  %v3326_v55 = vpack.c.bf16 %v1046_v63, %v1046_v63 }
 0x10d   : > { %931 = vrot.lane.b32.xlu1 %v3059_v30, %s2751_s17 }
 0x10e   : > { %935 = vrot.lane.b32.xlu0 %v3078_v46, %s2751_s17 }
 0x10f   : > { %v687_v17 = vpop.permute.xlu1 %686 }
 0x110   : > { %781 = vst.msk [vmem:[#allocation3 + $0x8] sm:$0xf] %vm778_vm4, %v687_v17  ;;  %v691_v27 = vpop.permute.xlu0 %690  ;;  %v3330_v17 = vpack.c.bf16 %v1048_v2, %v1048_v2 }
 0x111   : > { %783 = vst.msk [vmem:[#allocation3 + $0x10] sm:$0xf] %vm778_vm4, %v691_v27  ;;  %927 = vrot.lane.b32.xlu2 %v3043_v18, %s2751_s17  ;;  %v1044_v27 = vld [vmem:[#allocation2 + $0x79] sm:$0xff] }
 0x113   : > { %v701_v3 = vpop.permute.xlu2 %700 }
 0x114   : > { %788 = vst.msk [vmem:[#allocation3 + $0x24] sm:$0xf] %vm778_vm4, %v701_v3  ;;  %v1076_v3 = vpack.c.bf16 %v1044_v27, %v1044_v27  ;;  %v1064_v27 = vld [vmem:[#allocation2 + $0x169] sm:$0xff] }
 0x115   : > { %937 = vrot.lane.b32.xlu1 %v3076_v45, %s2751_s17 }
 0x116   : > { %941 = vrot.lane.b32.xlu0 %v3099_v1, %s2751_s17 }
 0x117   : > { %v693_v30 = vpop.permute.xlu1 %692 }
 0x118   : > { %784 = vst.msk [vmem:[#allocation3 + $0x14] sm:$0xf] %vm778_vm4, %v693_v30  ;;  %v697_v46 = vpop.permute.xlu0 %696  ;;  %v1049_v30 = vld [vmem:[#allocation2 + $0xb1] sm:$0xff] }
 0x119   : > { %786 = vst.msk [vmem:[#allocation3 + $0x1c] sm:$0xf] %vm778_vm4, %v697_v46  ;;  %933 = vrot.lane.b32.xlu2 %v3061_v31, %s2751_s17 }
 0x11b   : > { %v707_v18 = vpop.permute.xlu2 %706 }
 0x11c   : > { %791 = vst.msk [vmem:[#allocation3 + $0x30] sm:$0xf] %vm778_vm4, %v707_v18  ;;  %v1051_v18 = vld [vmem:[#allocation2 + $0xc9] sm:$0xff] }
 0x11d   : > { %943 = vrot.lane.b32.xlu1 %v3097_v0, %s2751_s17 }
 0x11e   : > { %947 = vrot.lane.b32.xlu0 %v3120_v21, %s2751_s17 }
 0x11f   : > { %v699_v45 = vpop.permute.xlu1 %698 }
 0x120   : > { %787 = vst.msk [vmem:[#allocation3 + $0x20] sm:$0xf] %vm778_vm4, %v699_v45  ;;  %v703_v1 = vpop.permute.xlu0 %702 }
 0x121   : > { %789 = vst.msk [vmem:[#allocation3 + $0x28] sm:$0xf] %vm778_vm4, %v703_v1  ;;  %939 = vrot.lane.b32.xlu2 %v3084_v49, %s2751_s17  ;;  %v3339_v1 = vpack.c.bf16 %v1049_v30, %v1049_v30 }
 0x123   : > { %v713_v31 = vpop.permute.xlu2 %712 }
 0x124   : > { %794 = vst.msk [vmem:[#allocation3 + $0x3c] sm:$0xf] %vm778_vm4, %v713_v31  ;;  %v1083_v31 = vpack.c.bf16 %v1051_v18, %v1051_v18 }
 0x125   : > { %949 = vrot.lane.b32.xlu1 %v3118_v20, %s2751_s17 }
 0x126   : > { %953 = vrot.lane.b32.xlu0 %v3141_v43, %s2751_s17 }
 0x127   : > { %v705_v0 = vpop.permute.xlu1 %704 }
 0x128   : > { %790 = vst.msk [vmem:[#allocation3 + $0x2c] sm:$0xf] %vm778_vm4, %v705_v0  ;;  %v709_v21 = vpop.permute.xlu0 %708  ;;  %v1047_v0 = vld [vmem:[#allocation2 + $0x99] sm:$0xff] }
 0x129   : > { %792 = vst.msk [vmem:[#allocation3 + $0x34] sm:$0xf] %vm778_vm4, %v709_v21  ;;  %945 = vrot.lane.b32.xlu2 %v3105_v6, %s2751_s17  ;;  %v3345_v44 = vpack.c.bf16 %v1047_v0, %v1047_v0 }
 0x12b   : > { %v719_v49 = vpop.permute.xlu2 %718 }
 0x12c   : > { %797 = vst.msk [vmem:[#allocation3 + $0x48] sm:$0xf] %vm778_vm4, %v719_v49  ;;  %v1052_v49 = vld [vmem:[#allocation2 + $0xd9] sm:$0xff] }
 0x12d   : > { %955 = vrot.lane.b32.xlu1 %v3139_v41, %s2751_s17  ;;  %v841_v41 = vld [vmem:[#allocation2 + $0x180] sm:$0xff] }
 0x12e   : > { %959 = vrot.lane.b32.xlu0 %v3162_v7, %s2751_s17  ;;  %v873_v53 = vpack.c.bf16 %v841_v41, %v841_v41  ;;  %v1084_v41 = vpack.c.bf16 %v1052_v49, %v1052_v49 }
 0x12f   : > { %v711_v20 = vpop.permute.xlu1 %710 }
 0x130   : > { %793 = vst.msk [vmem:[#allocation3 + $0x38] sm:$0xf] %vm778_vm4, %v711_v20  ;;  %v715_v43 = vpop.permute.xlu0 %714 }
 0x131   : > { %795 = vst.msk [vmem:[#allocation3 + $0x40] sm:$0xf] %vm778_vm4, %v715_v43  ;;  %951 = vrot.lane.b32.xlu2 %v3126_v25, %s2751_s17  ;;  %v1068_v25 = vpack.c.bf16 %v1036_v50, %v1036_v50  ;;  %v1054_v43 = vld [vmem:[#allocation2 + $0xf1] sm:$0xff]  ;;  %v1050_v50 = vld [vmem:[#allocation2 + $0xc1] sm:$0xff] }
 0x133   : > { %v725_v6 = vpop.permute.xlu2 %724 }
 0x134   : > { %800 = vst.msk [vmem:[#allocation3 + $0x54] sm:$0xf] %vm778_vm4, %v725_v6 }
 0x135   : > { %961 = vrot.lane.b32.xlu1 %v3160_v5, %s2751_s17  ;;  %v842_v5 = vld [vmem:[#allocation2 + $0x188] sm:$0xff] }
 0x136   : > { %965 = vrot.lane.b32.xlu0 %v3181_v22, %s2751_s17  ;;  %v874_v8 = vpack.c.bf16 %v842_v5, %v842_v5  ;;  %v1038_v22 = vld [vmem:[#allocation2 + $0x31] sm:$0xff] }
 0x137   : > { %v717_v47 = vpop.permute.xlu1 %716  ;;  %v3308_v26 = vpack.c.bf16 %v1038_v22, %v1038_v22 }
 0x138   : > { %796 = vst.msk [vmem:[#allocation3 + $0x44] sm:$0xf] %vm778_vm4, %v717_v47  ;;  %v721_v52 = vpop.permute.xlu0 %720  ;;  %v3352_v47 = vpack.c.bf16 %v1054_v43, %v1054_v43 }
 0x139   : > { %798 = vst.msk [vmem:[#allocation3 + $0x4c] sm:$0xf] %vm778_vm4, %v721_v52  ;;  %957 = vrot.lane.b32.xlu2 %v3147_v48, %s2751_s17  ;;  %v3292_v48 = vpack.c.bf16 %v1039_v61, %v1039_v61 }
 0x13b   : > { %v731_v58 = vpop.permute.xlu2 %730 }
 0x13c   : > { %803 = vst.msk [vmem:[#allocation3 + $0x60] sm:$0xf] %vm778_vm4, %v731_v58 }
 0x13d   : > { %967 = vrot.lane.b32.xlu1 %v873_v53, %s2751_s17  ;;  %v3356_v53 = vpack.c.bf16 %v1050_v50, %v1050_v50  ;;  %v1065_v50 = vld [vmem:[#allocation2 + $0x171] sm:$0xff] }
 0x13e   : > { %1132 = vrot.lane.b32.xlu0 %v1068_v25, %s2752_s18  ;;  %v1055_v25 = vld [vmem:[#allocation2 + $0xf9] sm:$0xff] }
 0x13f   : > { %v723_v60 = vpop.permute.xlu1 %722  ;;  %v3362_v61 = vpack.c.bf16 %v1055_v25, %v1055_v25  ;;  %v1097_v25 = vpack.c.bf16 %v1065_v50, %v1065_v50 }
 0x140   : > { %799 = vst.msk [vmem:[#allocation3 + $0x50] sm:$0xf] %vm778_vm4, %v723_v60  ;;  %v727_v62 = vpop.permute.xlu0 %726 }
 0x141   : > { %801 = vst.msk [vmem:[#allocation3 + $0x58] sm:$0xf] %vm778_vm4, %v727_v62  ;;  %963 = vrot.lane.b32.xlu2 %v3168_v11, %s2751_s17  ;;  %v3300_v11 = vpack.c.bf16 %v1040_v9, %v1040_v9  ;;  %v3366_v62 = vpack.c.bf16 %v1057_v59, %v1057_v59 }
 0x143   : > { %v737_v7 = vpop.permute.xlu2 %736 }
 0x144   : > { %806 = vst.msk [vmem:[#allocation3 + $0x6c] sm:$0xf] %vm778_vm4, %v737_v7 }
 0x145   : > { %1134 = vrot.lane.b32.xlu1 %v1069_v4, %s2752_s18  ;;  %v1053_v4 = vld [vmem:[#allocation2 + $0xe1] sm:$0xff] }
 0x146   : > { %1138 = vrot.lane.b32.xlu0 %v3292_v48, %s2752_s18  ;;  %v1085_v7 = vpack.c.bf16 %v1053_v4, %v1053_v4 }
 0x147   : > { %v729_v12 = vpop.permute.xlu1 %728 }
 0x148   : > { %802 = vst.msk [vmem:[#allocation3 + $0x5c] sm:$0xf] %vm778_vm4, %v729_v12  ;;  %v733_v15 = vpop.permute.xlu0 %732  ;;  %v1060_v12 = vld [vmem:[#allocation2 + $0x139] sm:$0xff] }
 0x149   : > { %804 = vst.msk [vmem:[#allocation3 + $0x64] sm:$0xf] %vm778_vm4, %v733_v15  ;;  %969 = vrot.lane.b32.xlu2 %v874_v8, %s2751_s17  ;;  %v1058_v8 = vld [vmem:[#allocation2 + $0x121] sm:$0xff]  ;;  %v1092_v22 = vpack.c.bf16 %v1060_v12, %v1060_v12 }
 0x14a   : > { %v1090_v15 = vpack.c.bf16 %v1058_v8, %v1058_v8  ;;  %v1261_v8 = vld [vmem:[#allocation2 + $0x1a] sm:$0xff] }
 0x14b   : > { %v743_v24 = vpop.permute.xlu2 %742  ;;  %v1293_v12 = vpack.c.bf16 %v1261_v8, %v1261_v8 }
 0x14c   : > { %809 = vst.msk [vmem:[#allocation3 + $0x78] sm:$0xf] %vm778_vm4, %v743_v24  ;;  %v1056_v24 = vld [vmem:[#allocation2 + $0x109] sm:$0xff] }
 0x14d   : > { %1140 = vrot.lane.b32.xlu1 %v3300_v11, %s2752_s18 }
 0x14e   : > { %1144 = vrot.lane.b32.xlu0 %v3303_v19, %s2752_s18 }
 0x14f   : > { %v735_v29 = vpop.permute.xlu1 %734 }
 0x150   : > { %805 = vst.msk [vmem:[#allocation3 + $0x68] sm:$0xf] %vm778_vm4, %v735_v29  ;;  %v739_v35 = vpop.permute.xlu0 %738  ;;  %v3378_v29 = vpack.c.bf16 %v1056_v24, %v1056_v24 }
 0x151   : > { %807 = vst.msk [vmem:[#allocation3 + $0x70] sm:$0xf] %vm778_vm4, %v739_v35  ;;  %1136 = vrot.lane.b32.xlu2 %v3308_v26, %s2752_s18 }
 0x153   : > { %v910_v38 = vpop.permute.xlu2 %909 }
 0x154   : > { %1005 = vst.msk [vmem:[#allocation3 + $0x4] sm:$0xf] %vm1003_vm5, %v910_v38  ;;  %v1093_v38 = vpack.c.bf16 %v1061_v34, %v1061_v34 }
 0x155   : > { %1146 = vrot.lane.b32.xlu1 %v3314_v37, %s2752_s18 }
 0x156   : > { %1150 = vrot.lane.b32.xlu0 %v1077_v39, %s2752_s18  ;;  %v1063_v39 = vld [vmem:[#allocation2 + $0x159] sm:$0xff] }
 0x157   : > { %v741_v51 = vpop.permute.xlu1 %740  ;;  %v3385_v63 = vpack.c.bf16 %v1063_v39, %v1063_v39  ;;  %v1269_v39 = vld [vmem:[#allocation2 + $0x7a] sm:$0xff] }
 0x158   : > { %808 = vst.msk [vmem:[#allocation3 + $0x74] sm:$0xf] %vm778_vm4, %v741_v51  ;;  %v745_v14 = vpop.permute.xlu0 %744  ;;  %v1059_v51 = vld [vmem:[#allocation2 + $0x129] sm:$0xff] }
 0x159   : > { %810 = vst.msk [vmem:[#allocation3 + $0x7c] sm:$0xf] %vm778_vm4, %v745_v14  ;;  %1142 = vrot.lane.b32.xlu2 %v3321_v54, %s2752_s18  ;;  %v3389_v14 = vpack.c.bf16 %v1059_v51, %v1059_v51  ;;  %v3435_v51 = vpack.c.bf16 %v1269_v39, %v1269_v39  ;;  %v1282_v39 = vld [vmem:[#allocation2 + $0x112] sm:$0xff] }
 0x15b   : > { %v916_v40 = vpop.permute.xlu2 %915 }
 0x15c   : > { %1008 = vst.msk [vmem:[#allocation3 + $0x10] sm:$0xf] %vm1003_vm5, %v916_v40 }
 0x15d   : > { %1152 = vrot.lane.b32.xlu1 %v3326_v55, %s2752_s18 }
 0x15e   : > { %1156 = vrot.lane.b32.xlu0 %v3330_v17, %s2752_s18 }
 0x15f   : > { %v908_v46 = vpop.permute.xlu1 %907 }
 0x160   : > { %1004 = vst.msk [vmem:[#allocation3] sm:$0xf] %vm1003_vm5, %v908_v46  ;;  %v912_v45 = vpop.permute.xlu0 %911  ;;  %v1096_v46 = vpack.c.bf16 %v1064_v27, %v1064_v27 }
 0x161   : > { %1006 = vst.msk [vmem:[#allocation3 + $0x8] sm:$0xf] %vm1003_vm5, %v912_v45  ;;  %1148 = vrot.lane.b32.xlu2 %v1076_v3, %s2752_s18  ;;  %v1066_v3 = vld [vmem:[#allocation2 + $0x181] sm:$0xff]  ;;  %v1062_v45 = vld [vmem:[#allocation2 + $0x151] sm:$0xff] }
 0x162   : > { %v1098_v18 = vpack.c.bf16 %v1066_v3, %v1066_v3  ;;  %v3399_v0 = vpack.c.bf16 %v1062_v45, %v1062_v45 }
 0x163   : > { %v922_v21 = vpop.permute.xlu2 %921 }
 0x164   : > { %1011 = vst.msk [vmem:[#allocation3 + $0x1c] sm:$0xf] %vm1003_vm5, %v922_v21  ;;  %v1067_v21 = vld [vmem:[#allocation2 + $0x189] sm:$0xff] }
 0x165   : > { %1158 = vrot.lane.b32.xlu1 %v3339_v1, %s2752_s18 }
 0x166   : > { %1162 = vrot.lane.b32.xlu0 %v1083_v31, %s2752_s18 }
 0x167   : > { %v914_v20 = vpop.permute.xlu1 %913 }
 0x168   : > { %1007 = vst.msk [vmem:[#allocation3 + $0xc] sm:$0xf] %vm1003_vm5, %v914_v20  ;;  %v918_v6 = vpop.permute.xlu0 %917  ;;  %v1262_v20 = vld [vmem:[#allocation2 + $0x22] sm:$0xff] }
 0x169   : > { %1009 = vst.msk [vmem:[#allocation3 + $0x14] sm:$0xf] %vm1003_vm5, %v918_v6  ;;  %1154 = vrot.lane.b32.xlu2 %v3345_v44, %s2752_s18  ;;  %v1099_v6 = vpack.c.bf16 %v1067_v21, %v1067_v21 }
 0x16b   : > { %v928_v52 = vpop.permute.xlu2 %927 }
 0x16c   : > { %1014 = vst.msk [vmem:[#allocation3 + $0x28] sm:$0xf] %vm1003_vm5, %v928_v52 }
 0x16d   : > { %1164 = vrot.lane.b32.xlu1 %v1084_v41, %s2752_s18  ;;  %v1294_v41 = vpack.c.bf16 %v1262_v20, %v1262_v20 }
 0x16e   : > { %1168 = vrot.lane.b32.xlu0 %v3352_v47, %s2752_s18 }
 0x16f   : > { %v920_v58 = vpop.permute.xlu1 %919 }
 0x170   : > { %1010 = vst.msk [vmem:[#allocation3 + $0x18] sm:$0xf] %vm1003_vm5, %v920_v58  ;;  %v924_v60 = vpop.permute.xlu0 %923  ;;  %v1263_v58 = vld [vmem:[#allocation2 + $0x32] sm:$0xff] }
 0x171   : > { %1012 = vst.msk [vmem:[#allocation3 + $0x20] sm:$0xf] %vm1003_vm5, %v924_v60  ;;  %1160 = vrot.lane.b32.xlu2 %v3356_v53, %s2752_s18  ;;  %v1265_v60 = vld [vmem:[#allocation2 + $0x4a] sm:$0xff] }
 0x173   : > { %v934_v5 = vpop.permute.xlu2 %933 }
 0x174   : > { %1017 = vst.msk [vmem:[#allocation3 + $0x34] sm:$0xf] %vm1003_vm5, %v934_v5  ;;  %v3411_v5 = vpack.c.bf16 %v1263_v58, %v1263_v58  ;;  %v1276_v58 = vld [vmem:[#allocation2 + $0xca] sm:$0xff] }
 0x175   : > { %1170 = vrot.lane.b32.xlu1 %v3362_v61, %s2752_s18 }
 0x176   : > { %1174 = vrot.lane.b32.xlu0 %v3366_v62, %s2752_s18 }
 0x177   : > { %v926_v9 = vpop.permute.xlu1 %925 }
 0x178   : > { %1013 = vst.msk [vmem:[#allocation3 + $0x24] sm:$0xf] %vm1003_vm5, %v926_v9  ;;  %v930_v13 = vpop.permute.xlu0 %929 }
 0x179   : > { %1015 = vst.msk [vmem:[#allocation3 + $0x2c] sm:$0xf] %vm1003_vm5, %v930_v13  ;;  %1166 = vrot.lane.b32.xlu2 %v1085_v7, %s2752_s18  ;;  %v3414_v7 = vpack.c.bf16 %v1265_v60, %v1265_v60  ;;  %v1266_v13 = vld [vmem:[#allocation2 + $0x52] sm:$0xff]  ;;  %v1281_v60 = vld [vmem:[#allocation2 + $0x10a] sm:$0xff] }
 0x17a   : > { %v3423_v24 = vpack.c.bf16 %v1266_v13, %v1266_v13 }
 0x17b   : > { %v940_v28 = vpop.permute.xlu2 %939 }
 0x17c   : > { %1020 = vst.msk [vmem:[#allocation3 + $0x40] sm:$0xf] %vm1003_vm5, %v940_v28  ;;  %v1264_v28 = vld [vmem:[#allocation2 + $0x3a] sm:$0xff] }
 0x17d   : > { %1176 = vrot.lane.b32.xlu1 %v1090_v15, %s2752_s18 }
 0x17e   : > { %1180 = vrot.lane.b32.xlu0 %v1092_v22, %s2752_s18 }
 0x17f   : > { %v932_v35 = vpop.permute.xlu1 %931 }
 0x180   : > { %1016 = vst.msk [vmem:[#allocation3 + $0x30] sm:$0xf] %vm1003_vm5, %v932_v35  ;;  %v936_v42 = vpop.permute.xlu0 %935  ;;  %v3429_v35 = vpack.c.bf16 %v1264_v28, %v1264_v28 }
 0x181   : > { %1018 = vst.msk [vmem:[#allocation3 + $0x38] sm:$0xf] %vm1003_vm5, %v936_v42  ;;  %1172 = vrot.lane.b32.xlu2 %v3378_v29, %s2752_s18 }
 0x183   : > { %v946_v2 = vpop.permute.xlu2 %945 }
 0x184   : > { %1023 = vst.msk [vmem:[#allocation3 + $0x4c] sm:$0xf] %vm1003_vm5, %v946_v2  ;;  %v1267_v2 = vld [vmem:[#allocation2 + $0x62] sm:$0xff] }
 0x185   : > { %1182 = vrot.lane.b32.xlu1 %v1093_v38, %s2752_s18 }
 0x186   : > { %1186 = vrot.lane.b32.xlu0 %v3385_v63, %s2752_s18 }
 0x187   : > { %v938_v40 = vpop.permute.xlu1 %937 }
 0x188   : > { %1019 = vst.msk [vmem:[#allocation3 + $0x3c] sm:$0xf] %vm1003_vm5, %v938_v40  ;;  %v942_v30 = vpop.permute.xlu0 %941  ;;  %v1272_v40 = vld [vmem:[#allocation2 + $0x9a] sm:$0xff] }
 0x189   : > { %1021 = vst.msk [vmem:[#allocation3 + $0x44] sm:$0xf] %vm1003_vm5, %v942_v30  ;;  %1178 = vrot.lane.b32.xlu2 %v3389_v14, %s2752_s18 }
 0x18b   : > { %v952_v31 = vpop.permute.xlu2 %951 }
 0x18c   : > { %1026 = vst.msk [vmem:[#allocation3 + $0x58] sm:$0xf] %vm1003_vm5, %v952_v31  ;;  %v1275_v31 = vld [vmem:[#allocation2 + $0xc2] sm:$0xff] }
 0x18d   : > { %1188 = vrot.lane.b32.xlu1 %v1096_v46, %s2752_s18  ;;  %v3448_v46 = vpack.c.bf16 %v1272_v40, %v1272_v40  ;;  %v3461_v20 = vpack.c.bf16 %v1275_v31, %v1275_v31 }
 0x18e   : > { %1192 = vrot.lane.b32.xlu0 %v1098_v18, %s2752_s18  ;;  %v1270_v18 = vld [vmem:[#allocation2 + $0x82] sm:$0xff] }
 0x18f   : > { %v944_v49 = vpop.permute.xlu1 %943 }
 0x190   : > { %1022 = vst.msk [vmem:[#allocation3 + $0x48] sm:$0xf] %vm1003_vm5, %v944_v49  ;;  %v948_v43 = vpop.permute.xlu0 %947 }
 0x191   : > { %1024 = vst.msk [vmem:[#allocation3 + $0x50] sm:$0xf] %vm1003_vm5, %v948_v43  ;;  %1184 = vrot.lane.b32.xlu2 %v3399_v0, %s2752_s18  ;;  %v1273_v43 = vld [vmem:[#allocation2 + $0xaa] sm:$0xff] }
 0x193   : > { %v958_v52 = vpop.permute.xlu2 %957 }
 0x194   : > { %1029 = vst.msk [vmem:[#allocation3 + $0x64] sm:$0xf] %vm1003_vm5, %v958_v52 }
 0x195   : > { %1194 = vrot.lane.b32.xlu1 %v1099_v6, %s2752_s18 }
 0x196   : > { %1359 = vrot.lane.b32.xlu0 %v1294_v41, %s2753_s19  ;;  %v1278_v41 = vld [vmem:[#allocation2 + $0xe2] sm:$0xff] }
 0x197   : > { %v950_v59 = vpop.permute.xlu1 %949 }
 0x198   : > { %1025 = vst.msk [vmem:[#allocation3 + $0x54] sm:$0xf] %vm1003_vm5, %v950_v59  ;;  %v954_v4 = vpop.permute.xlu0 %953 }
 0x199   : > { %1027 = vst.msk [vmem:[#allocation3 + $0x5c] sm:$0xf] %vm1003_vm5, %v954_v4  ;;  %1190 = vrot.lane.b32.xlu2 %v1097_v25, %s2752_s18  ;;  %v3474_v25 = vpack.c.bf16 %v1278_v41, %v1278_v41 }
 0x19b   : > { %v964_v9 = vpop.permute.xlu2 %963 }
 0x19c   : > { %1032 = vst.msk [vmem:[#allocation3 + $0x70] sm:$0xf] %vm1003_vm5, %v964_v9  ;;  %v3487_v9 = vpack.c.bf16 %v1281_v60, %v1281_v60  ;;  %v1495_v60 = vld [vmem:[#allocation2 + $0x90] sm:$0xff] }
 0x19d   : > { %1361 = vrot.lane.b32.xlu1 %v3411_v5, %s2753_s19 }
 0x19e   : > { %1365 = vrot.lane.b32.xlu0 %v3414_v7, %s2753_s19 }
 0x19f   : > { %v956_v15 = vpop.permute.xlu1 %955 }
 0x1a0   : > { %1028 = vst.msk [vmem:[#allocation3 + $0x60] sm:$0xf] %vm1003_vm5, %v956_v15  ;;  %v960_v22 = vpop.permute.xlu0 %959  ;;  %v1284_v15 = vld [vmem:[#allocation2 + $0x12a] sm:$0xff] }
 0x1a1   : > { %1030 = vst.msk [vmem:[#allocation3 + $0x68] sm:$0xf] %vm1003_vm5, %v960_v22  ;;  %1357 = vrot.lane.b32.xlu2 %v1293_v12, %s2753_s19  ;;  %v1279_v12 = vld [vmem:[#allocation2 + $0xf2] sm:$0xff] }
 0x1a3   : > { %v970_v34 = vpop.permute.xlu2 %969 }
 0x1a4   : > { %1035 = vst.msk [vmem:[#allocation3 + $0x7c] sm:$0xf] %vm1003_vm5, %v970_v34  ;;  %v3500_v34 = vpack.c.bf16 %v1284_v15, %v1284_v15 }
 0x1a5   : > { %1367 = vrot.lane.b32.xlu1 %v3423_v24, %s2753_s19 }
 0x1a6   : > { %1371 = vrot.lane.b32.xlu0 %v3054_v23, %s2753_s19  ;;  %v3442_v23 = vpack.c.bf16 %v1267_v2, %v1267_v2 }
 0x1a7   : > { %v962_v42 = vpop.permute.xlu1 %961 }
 0x1a8   : > { %1031 = vst.msk [vmem:[#allocation3 + $0x6c] sm:$0xf] %vm1003_vm5, %v962_v42  ;;  %v966_v38 = vpop.permute.xlu0 %965 }
 0x1a9   : > { %1033 = vst.msk [vmem:[#allocation3 + $0x74] sm:$0xf] %vm1003_vm5, %v966_v38  ;;  %1363 = vrot.lane.b32.xlu2 %v3429_v35, %s2753_s19  ;;  %v1287_v38 = vld [vmem:[#allocation2 + $0x152] sm:$0xff] }
 0x1aa   : > { %v3513_v40 = vpack.c.bf16 %v1287_v38, %v1287_v38 }
 0x1ab   : > { %v1137_v27 = vpop.permute.xlu2 %1136 }
 0x1ac   : > { %1231 = vst.msk [vmem:[#allocation3 + $0x8] sm:$0xf] %vm1228_vm6, %v1137_v27 }
 0x1ad   : > { %1373 = vrot.lane.b32.xlu1 %v3435_v51, %s2753_s19 }
 0x1ae   : > { %1377 = vrot.lane.b32.xlu0 %v3073_v36, %s2753_s19  ;;  %v3455_v36 = vpack.c.bf16 %v1270_v18, %v1270_v18  ;;  %v1487_v18 = vld [vmem:[#allocation2 + $0x30] sm:$0xff] }
 0x1af   : > { %v968_v3 = vpop.permute.xlu1 %967 }
 0x1b0   : > { %1034 = vst.msk [vmem:[#allocation3 + $0x78] sm:$0xf] %vm1003_vm5, %v968_v3  ;;  %v1133_v30 = vpop.permute.xlu0 %1132  ;;  %v1285_v3 = vld [vmem:[#allocation2 + $0x13a] sm:$0xff] }
 0x1b1   : > { %1229 = vst.msk [vmem:[#allocation3] sm:$0xf] %vm1228_vm6, %v1133_v30  ;;  %1369 = vrot.lane.b32.xlu2 %v3442_v23, %s2753_s19 }
 0x1b3   : > { %v1143_v45 = vpop.permute.xlu2 %1142 }
 0x1b4   : > { %1234 = vst.msk [vmem:[#allocation3 + $0x14] sm:$0xf] %vm1228_vm6, %v1143_v45 }
 0x1b5   : > { %1379 = vrot.lane.b32.xlu1 %v3448_v46, %s2753_s19 }
 0x1b6   : > { %1383 = vrot.lane.b32.xlu0 %v3092_v56, %s2753_s19  ;;  %v3468_v56 = vpack.c.bf16 %v1273_v43, %v1273_v43 }
 0x1b7   : > { %v1135_v21 = vpop.permute.xlu1 %1134 }
 0x1b8   : > { %1230 = vst.msk [vmem:[#allocation3 + $0x4] sm:$0xf] %vm1228_vm6, %v1135_v21  ;;  %v1139_v49 = vpop.permute.xlu0 %1138  ;;  %v1519_v21 = vpack.c.bf16 %v1487_v18, %v1487_v18 }
 0x1b9   : > { %1232 = vst.msk [vmem:[#allocation3 + $0xc] sm:$0xf] %vm1228_vm6, %v1139_v49  ;;  %1375 = vrot.lane.b32.xlu2 %v3455_v36, %s2753_s19  ;;  %v1288_v49 = vld [vmem:[#allocation2 + $0x15a] sm:$0xff] }
 0x1bb   : > { %v1149_v6 = vpop.permute.xlu2 %1148 }
 0x1bc   : > { %1237 = vst.msk [vmem:[#allocation3 + $0x20] sm:$0xf] %vm1228_vm6, %v1149_v6  ;;  %v3530_v6 = vpack.c.bf16 %v1288_v49, %v1288_v49  ;;  %v1504_v49 = vld [vmem:[#allocation2 + $0xf8] sm:$0xff] }
 0x1bd   : > { %1385 = vrot.lane.b32.xlu1 %v3461_v20, %s2753_s19 }
 0x1be   : > { %1389 = vrot.lane.b32.xlu0 %v3113_v10, %s2753_s19  ;;  %v3481_v10 = vpack.c.bf16 %v1276_v58, %v1276_v58 }
 0x1bf   : > { %v1141_v50 = vpop.permute.xlu1 %1140 }
 0x1c0   : > { %1233 = vst.msk [vmem:[#allocation3 + $0x10] sm:$0xf] %vm1228_vm6, %v1141_v50  ;;  %v1145_v52 = vpop.permute.xlu0 %1144  ;;  %v1488_v50 = vld [vmem:[#allocation2 + $0x38] sm:$0xff] }
 0x1c1   : > { %1235 = vst.msk [vmem:[#allocation3 + $0x18] sm:$0xf] %vm1228_vm6, %v1145_v52  ;;  %1381 = vrot.lane.b32.xlu2 %v3468_v56, %s2753_s19  ;;  %v1520_v58 = vpack.c.bf16 %v1488_v50, %v1488_v50  ;;  %v1497_v50 = vld [vmem:[#allocation2 + $0xa8] sm:$0xff] }
 0x1c3   : > { %v1155_v59 = vpop.permute.xlu2 %1154 }
 0x1c4   : > { %1240 = vst.msk [vmem:[#allocation3 + $0x2c] sm:$0xf] %vm1228_vm6, %v1155_v59 }
 0x1c5   : > { %1391 = vrot.lane.b32.xlu1 %v3474_v25, %s2753_s19 }
 0x1c6   : > { %1395 = vrot.lane.b32.xlu0 %v3134_v32, %s2753_s19  ;;  %v3494_v32 = vpack.c.bf16 %v1279_v12, %v1279_v12  ;;  %v1527_v12 = vpack.c.bf16 %v1495_v60, %v1495_v60 }
 0x1c7   : > { %v1147_v4 = vpop.permute.xlu1 %1146 }
 0x1c8   : > { %1236 = vst.msk [vmem:[#allocation3 + $0x1c] sm:$0xf] %vm1228_vm6, %v1147_v4  ;;  %v1151_v8 = vpop.permute.xlu0 %1150 }
 0x1c9   : > { %1238 = vst.msk [vmem:[#allocation3 + $0x24] sm:$0xf] %vm1228_vm6, %v1151_v8  ;;  %1387 = vrot.lane.b32.xlu2 %v3481_v10, %s2753_s19 }
 0x1cb   : > { %v1161_v13 = vpop.permute.xlu2 %1160 }
 0x1cc   : > { %1243 = vst.msk [vmem:[#allocation3 + $0x38] sm:$0xf] %vm1228_vm6, %v1161_v13 }
 0x1cd   : > { %1397 = vrot.lane.b32.xlu1 %v3487_v9, %s2753_s19 }
 0x1ce   : > { %1401 = vrot.lane.b32.xlu0 %v3155_v57, %s2753_s19  ;;  %v3507_v57 = vpack.c.bf16 %v1282_v39, %v1282_v39 }
 0x1cf   : > { %v1153_v22 = vpop.permute.xlu1 %1152 }
 0x1d0   : > { %1239 = vst.msk [vmem:[#allocation3 + $0x28] sm:$0xf] %vm1228_vm6, %v1153_v22  ;;  %v1157_v28 = vpop.permute.xlu0 %1156 }
 0x1d1   : > { %1241 = vst.msk [vmem:[#allocation3 + $0x30] sm:$0xf] %vm1228_vm6, %v1157_v28  ;;  %1393 = vrot.lane.b32.xlu2 %v3494_v32, %s2753_s19  ;;  %v1490_v28 = vld [vmem:[#allocation2 + $0x50] sm:$0xff] }
 0x1d3   : > { %v1167_v42 = vpop.permute.xlu2 %1166 }
 0x1d4   : > { %1246 = vst.msk [vmem:[#allocation3 + $0x44] sm:$0xf] %vm1228_vm6, %v1167_v42  ;;  %v1522_v42 = vpack.c.bf16 %v1490_v28, %v1490_v28 }
 0x1d5   : > { %1403 = vrot.lane.b32.xlu1 %v3500_v34, %s2753_s19 }
 0x1d6   : > { %1407 = vrot.lane.b32.xlu0 %v3176_v16, %s2753_s19  ;;  %v3520_v16 = vpack.c.bf16 %v1285_v3, %v1285_v3 }
 0x1d7   : > { %v1159_v2 = vpop.permute.xlu1 %1158 }
 0x1d8   : > { %1242 = vst.msk [vmem:[#allocation3 + $0x34] sm:$0xf] %vm1228_vm6, %v1159_v2  ;;  %v1163_v27 = vpop.permute.xlu0 %1162 }
 0x1d9   : > { %1244 = vst.msk [vmem:[#allocation3 + $0x3c] sm:$0xf] %vm1228_vm6, %v1163_v27  ;;  %1399 = vrot.lane.b32.xlu2 %v3507_v57, %s2753_s19 }
 0x1db   : > { %v1173_v30 = vpop.permute.xlu2 %1172 }
 0x1dc   : > { %1249 = vst.msk [vmem:[#allocation3 + $0x50] sm:$0xf] %vm1228_vm6, %v1173_v30 }
 0x1dd   : > { %1409 = vrot.lane.b32.xlu1 %v3513_v40, %s2753_s19 }
 0x1de   : > { %1413 = vrot.lane.b32.xlu0 %v3192_v33, %s2753_s19 }
 0x1df   : > { %v1165_v45 = vpop.permute.xlu1 %1164 }
 0x1e0   : > { %1245 = vst.msk [vmem:[#allocation3 + $0x40] sm:$0xf] %vm1228_vm6, %v1165_v45  ;;  %v1169_v31 = vpop.permute.xlu0 %1168 }
 0x1e1   : > { %1247 = vst.msk [vmem:[#allocation3 + $0x48] sm:$0xf] %vm1228_vm6, %v1169_v31  ;;  %1405 = vrot.lane.b32.xlu2 %v3520_v16, %s2753_s19  ;;  %v1954_v31 = vld [vmem:[#allocation2 + $0xfa] sm:$0xff] }
 0x1e3   : > { %v1179_v43 = vpop.permute.xlu2 %1178 }
 0x1e4   : > { %1252 = vst.msk [vmem:[#allocation3 + $0x5c] sm:$0xf] %vm1228_vm6, %v1179_v43 }
 0x1e5   : > { %1583 = vrot.lane.b32.xlu1 %v1519_v21, %s2754_s20 }
 0x1e6   : > { %1808 = vrot.lane.b32.xlu0 %v3308_v26, %s2755_s21  ;;  %v1489_v26 = vld [vmem:[#allocation2 + $0x48] sm:$0xff] }
 0x1e7   : > { %v1171_v33 = vpop.permute.xlu1 %1170  ;;  %v1521_v8 = vpack.c.bf16 %v1489_v26, %v1489_v26  ;;  %v1529_v26 = vpack.c.bf16 %v1497_v50, %v1497_v50  ;;  %v1499_v50 = vld [vmem:[#allocation2 + $0xc0] sm:$0xff] }
 0x1e8   : > { %1248 = vst.msk [vmem:[#allocation3 + $0x4c] sm:$0xf] %vm1228_vm6, %v1171_v33  ;;  %v1175_v41 = vpop.permute.xlu0 %1174  ;;  %v1536_v33 = vpack.c.bf16 %v1504_v49, %v1504_v49 }
 0x1e9   : > { %1250 = vst.msk [vmem:[#allocation3 + $0x54] sm:$0xf] %vm1228_vm6, %v1175_v41  ;;  %1411 = vrot.lane.b32.xlu2 %v3530_v6, %s2753_s19 }
 0x1eb   : > { %v1185_v52 = vpop.permute.xlu2 %1184 }
 0x1ec   : > { %1255 = vst.msk [vmem:[#allocation3 + $0x68] sm:$0xf] %vm1228_vm6, %v1185_v52 }
 0x1ed   : > { %1810 = vrot.lane.b32.xlu1 %v3292_v48, %s2755_s21  ;;  %v1496_v48 = vld [vmem:[#allocation2 + $0x98] sm:$0xff] }
 0x1ee   : > { %2035 = vrot.lane.b32.xlu0 %v3429_v35, %s2756_s22  ;;  %v1528_v22 = vpack.c.bf16 %v1496_v48, %v1496_v48 }
 0x1ef   : > { %v1177_v59 = vpop.permute.xlu1 %1176 }
 0x1f0   : > { %1251 = vst.msk [vmem:[#allocation3 + $0x58] sm:$0xf] %vm1228_vm6, %v1177_v59  ;;  %v1181_v4 = vpop.permute.xlu0 %1180 }
 0x1f1   : > { %1253 = vst.msk [vmem:[#allocation3 + $0x60] sm:$0xf] %vm1228_vm6, %v1181_v4  ;;  %1585 = vrot.lane.b32.xlu2 %v1520_v58, %s2754_s20 }
 0x1f3   : > { %v1191_v13 = vpop.permute.xlu2 %1190 }
 0x1f4   : > { %1258 = vst.msk [vmem:[#allocation3 + $0x74] sm:$0xf] %vm1228_vm6, %v1191_v13 }
 0x1f5   : > { %1587 = vrot.lane.b32.xlu1 %v1521_v8, %s2754_s20 }
 0x1f6   : > { %1599 = vrot.lane.b32.xlu0 %v1527_v12, %s2754_s20  ;;  %v1492_v12 = vld [vmem:[#allocation2 + $0x68] sm:$0xff] }
 0x1f7   : > { %v1183_v35 = vpop.permute.xlu1 %1182  ;;  %v1524_v48 = vpack.c.bf16 %v1492_v12, %v1492_v12 }
 0x1f8   : > { %1254 = vst.msk [vmem:[#allocation3 + $0x64] sm:$0xf] %vm1228_vm6, %v1183_v35  ;;  %v1187_v15 = vpop.permute.xlu0 %1186 }
 0x1f9   : > { %1256 = vst.msk [vmem:[#allocation3 + $0x6c] sm:$0xf] %vm1228_vm6, %v1187_v15  ;;  %2033 = vrot.lane.b32.xlu2 %v3411_v5, %s2756_s22 }
 0x1fb   : > { %v1358_v39 = vpop.permute.xlu2 %1357 }
 0x1fc   : > { %1454 = vst.msk [vmem:[#allocation3] sm:$0xf] %vm1453_vm7, %v1358_v39 }
 0x1fd   : > { %1601 = vrot.lane.b32.xlu1 %v1528_v22, %s2754_s20 }
 0x1fe   : > { %1814 = vrot.lane.b32.xlu0 %v3321_v54, %s2755_s21 }
 0x1ff   : > { %v1189_v38 = vpop.permute.xlu1 %1188 }
 0x200   : > { %1257 = vst.msk [vmem:[#allocation3 + $0x70] sm:$0xf] %vm1228_vm6, %v1189_v38  ;;  %v1193_v2 = vpop.permute.xlu0 %1192 }
 0x201   : > { %1259 = vst.msk [vmem:[#allocation3 + $0x78] sm:$0xf] %vm1228_vm6, %v1193_v2  ;;  %1589 = vrot.lane.b32.xlu2 %v1522_v42, %s2754_s20 }
 0x203   : > { %v1364_v5 = vpop.permute.xlu2 %1363 }
 0x204   : > { %1457 = vst.msk [vmem:[#allocation3 + $0xc] sm:$0xf] %vm1453_vm7, %v1364_v5 }
 0x205   : > { %1824 = vrot.lane.b32.xlu1 %v3326_v55, %s2755_s21  ;;  %v1503_v55 = vld [vmem:[#allocation2 + $0xf0] sm:$0xff] }
 0x206   : > { %2037 = vrot.lane.b32.xlu0 %v3414_v7, %s2756_s22  ;;  %v1535_v18 = vpack.c.bf16 %v1503_v55, %v1503_v55 }
 0x207   : > { %v1195_v27 = vpop.permute.xlu1 %1194 }
 0x208   : > { %1260 = vst.msk [vmem:[#allocation3 + $0x7c] sm:$0xf] %vm1228_vm6, %v1195_v27  ;;  %v1360_v54 = vpop.permute.xlu0 %1359  ;;  %v1505_v27 = vld [vmem:[#allocation2 + $0x108] sm:$0xff] }
 0x209   : > { %1455 = vst.msk [vmem:[#allocation3 + $0x4] sm:$0xf] %vm1453_vm7, %v1360_v54  ;;  %1812 = vrot.lane.b32.xlu2 %v3300_v11, %s2755_s21  ;;  %v1945_v11 = vld [vmem:[#allocation2 + $0x92] sm:$0xff] }
 0x20b   : > { %v1370_v3 = vpop.permute.xlu2 %1369 }
 0x20c   : > { %1460 = vst.msk [vmem:[#allocation3 + $0x18] sm:$0xf] %vm1453_vm7, %v1370_v3  ;;  %v1511_v3 = vld [vmem:[#allocation2 + $0x150] sm:$0xff] }
 0x20d   : > { %2039 = vrot.lane.b32.xlu1 %v3423_v24, %s2756_s22  ;;  %v1977_v24 = vpack.c.bf16 %v1945_v11, %v1945_v11 }
 0x20e   : > { %2051 = vrot.lane.b32.xlu0 %v3448_v46, %s2756_s22 }
 0x20f   : > { %v1362_v7 = vpop.permute.xlu1 %1361 }
 0x210   : > { %1456 = vst.msk [vmem:[#allocation3 + $0x8] sm:$0xf] %vm1453_vm7, %v1362_v7  ;;  %v1366_v30 = vpop.permute.xlu0 %1365  ;;  %v1537_v7 = vpack.c.bf16 %v1505_v27, %v1505_v27 }
 0x211   : > { %1458 = vst.msk [vmem:[#allocation3 + $0x10] sm:$0xf] %vm1453_vm7, %v1366_v30  ;;  %1826 = vrot.lane.b32.xlu2 %v3345_v44, %s2755_s21  ;;  %v1986_v44 = vpack.c.bf16 %v1954_v31, %v1954_v31  ;;  %v2713_v30 = vld [vmem:[%s3841_s1 + $0x8] sm:$0xff] }
 0x213   : > { %v1376_v45 = vpop.permute.xlu2 %1375 }
 0x214   : > { %1463 = vst.msk [vmem:[#allocation3 + $0x24] sm:$0xf] %vm1453_vm7, %v1376_v45  ;;  %v1512_v45 = vld [vmem:[#allocation2 + $0x158] sm:$0xff] }
 0x215   : > { %1615 = vrot.lane.b32.xlu1 %v1535_v18, %s2754_s20  ;;  %v1543_v18 = vpack.c.bf16 %v1511_v3, %v1511_v3  ;;  %v1544_v31 = vpack.c.bf16 %v1512_v45, %v1512_v45  ;;  %v1957_v45 = vld [vmem:[#allocation2 + $0x122] sm:$0xff] }
 0x216   : > { %1840 = vrot.lane.b32.xlu0 %v3352_v47, %s2755_s21  ;;  %v1491_v47 = vld [vmem:[#allocation2 + $0x60] sm:$0xff] }
 0x217   : > { %v1368_v46 = vpop.permute.xlu1 %1367  ;;  %v1523_v58 = vpack.c.bf16 %v1491_v47, %v1491_v47 }
 0x218   : > { %1459 = vst.msk [vmem:[#allocation3 + $0x14] sm:$0xf] %vm1453_vm7, %v1368_v46  ;;  %v1372_v21 = vpop.permute.xlu0 %1371 }
 0x219   : > { %1461 = vst.msk [vmem:[#allocation3 + $0x1c] sm:$0xf] %vm1453_vm7, %v1372_v21  ;;  %2049 = vrot.lane.b32.xlu2 %v1977_v24, %s2756_s22  ;;  %v1506_v21 = vld [vmem:[#allocation2 + $0x110] sm:$0xff] }
 0x21a   : > { %v1538_v49 = vpack.c.bf16 %v1506_v21, %v1506_v21 }
 0x21b   : > { %v1382_v43 = vpop.permute.xlu2 %1381 }
 0x21c   : > { %1466 = vst.msk [vmem:[#allocation3 + $0x30] sm:$0xf] %vm1453_vm7, %v1382_v43 }
 0x21d   : > { %1842 = vrot.lane.b32.xlu1 %v3362_v61, %s2755_s21  ;;  %v1498_v61 = vld [vmem:[#allocation2 + $0xb0] sm:$0xff] }
 0x21e   : > { %2067 = vrot.lane.b32.xlu0 %v1986_v44, %s2756_s22  ;;  %v1530_v8 = vpack.c.bf16 %v1498_v61, %v1498_v61 }
 0x21f   : > { %v1374_v41 = vpop.permute.xlu1 %1373 }
 0x220   : > { %1462 = vst.msk [vmem:[#allocation3 + $0x20] sm:$0xf] %vm1453_vm7, %v1374_v41  ;;  %v1378_v52 = vpop.permute.xlu0 %1377 }
 0x221   : > { %1464 = vst.msk [vmem:[#allocation3 + $0x28] sm:$0xf] %vm1453_vm7, %v1378_v52  ;;  %1617 = vrot.lane.b32.xlu2 %v1536_v33, %s2754_s20 }
 0x223   : > { %v1388_v59 = vpop.permute.xlu2 %1387 }
 0x224   : > { %1469 = vst.msk [vmem:[#allocation3 + $0x3c] sm:$0xf] %vm1453_vm7, %v1388_v59  ;;  %v1719_v59 = vld [vmem:[#allocation2 + $0x81] sm:$0xff] }
 0x225   : > { %1591 = vrot.lane.b32.xlu1 %v1523_v58, %s2754_s20  ;;  %v1531_v58 = vpack.c.bf16 %v1499_v50, %v1499_v50 }
 0x226   : > { %1603 = vrot.lane.b32.xlu0 %v1529_v26, %s2754_s20 }
 0x227   : > { %v1380_v60 = vpop.permute.xlu1 %1379 }
 0x228   : > { %1465 = vst.msk [vmem:[#allocation3 + $0x2c] sm:$0xf] %vm1453_vm7, %v1380_v60  ;;  %v1384_v4 = vpop.permute.xlu0 %1383 }
 0x229   : > { %1467 = vst.msk [vmem:[#allocation3 + $0x34] sm:$0xf] %vm1453_vm7, %v1384_v4  ;;  %2065 = vrot.lane.b32.xlu2 %v3494_v32, %s2756_s22  ;;  %v1942_v32 = vld [vmem:[#allocation2 + $0x6a] sm:$0xff] }
 0x22a   : > { %v1974_v42 = vpack.c.bf16 %v1942_v32, %v1942_v32 }
 0x22b   : > { %v1394_v13 = vpop.permute.xlu2 %1393 }
 0x22c   : > { %1472 = vst.msk [vmem:[#allocation3 + $0x48] sm:$0xf] %vm1453_vm7, %v1394_v13 }
 0x22d   : > { %1605 = vrot.lane.b32.xlu1 %v1530_v8, %s2754_s20  ;;  %v1494_v8 = vld [vmem:[#allocation2 + $0x80] sm:$0xff] }
 0x22e   : > { %1818 = vrot.lane.b32.xlu0 %v3314_v37, %s2755_s21  ;;  %v1948_v37 = vld [vmem:[#allocation2 + $0xb2] sm:$0xff]  ;;  %v1526_v13 = vpack.c.bf16 %v1494_v8, %v1494_v8 }
 0x22f   : > { %v1386_v35 = vpop.permute.xlu1 %1385  ;;  %v1980_v38 = vpack.c.bf16 %v1948_v37, %v1948_v37  ;;  %v1725_v37 = vld [vmem:[#allocation2 + $0xc9] sm:$0xff] }
 0x230   : > { %1468 = vst.msk [vmem:[#allocation3 + $0x38] sm:$0xf] %vm1453_vm7, %v1386_v35  ;;  %v1390_v15 = vpop.permute.xlu0 %1389 }
 0x231   : > { %1470 = vst.msk [vmem:[#allocation3 + $0x40] sm:$0xf] %vm1453_vm7, %v1390_v15  ;;  %1593 = vrot.lane.b32.xlu2 %v1524_v48, %s2754_s20 }
 0x233   : > { %v1400_v22 = vpop.permute.xlu2 %1399 }
 0x234   : > { %1475 = vst.msk [vmem:[#allocation3 + $0x54] sm:$0xf] %vm1453_vm7, %v1400_v22 }
 0x235   : > { %1828 = vrot.lane.b32.xlu1 %v3330_v17, %s2755_s21  ;;  %v2198_v17 = vld [vmem:[%s3841_s1 + $0x10] sm:$0x3] }
 0x236   : > { %2041 = vrot.lane.b32.xlu0 %v3442_v23, %s2756_s22  ;;  %v2288_v5 = vunpack.c.l.b16 %v2198_v17 }
 0x237   : > { %v1392_v28 = vpop.permute.xlu1 %1391 }
 0x238   : > { %1471 = vst.msk [vmem:[#allocation3 + $0x44] sm:$0xf] %vm1453_vm7, %v1392_v28  ;;  %v1396_v39 = vpop.permute.xlu0 %1395  ;;  %v2291_v23 = vpack.c.b16 %v2288_v5, %v2288_v5 }
 0x239   : > { %1473 = vst.msk [vmem:[#allocation3 + $0x4c] sm:$0xf] %vm1453_vm7, %v1396_v39  ;;  %1816 = vrot.lane.b32.xlu2 %v3303_v19, %s2755_s21 }
 0x23a   : > { %v2345_v55 = vsel %vm2343_vm8, %v2291_v23, 0 }
 0x23b   : > { %v1406_v2 = vpop.permute.xlu2 %1405  ;;  %2352 = vmatpush.bf16.msra.mxu0 %v2345_v55  ;;  %2714 = vmatpush.bf16.msra.mxu1 %v2345_v55 }
 0x23c   : > { %1478 = vst.msk [vmem:[#allocation3 + $0x60] sm:$0xf] %vm1453_vm7, %v1406_v2  ;;  %2715 = vmatpush.bf16.msra.mxu2 %v2345_v55  ;;  %2716 = vmatpush.bf16.msra.mxu3 %v2345_v55 }
 0x23d   : > { %2043 = vrot.lane.b32.xlu1 %v1974_v42, %s2756_s22 }
 0x23e   : > { %2055 = vrot.lane.b32.xlu0 %v1980_v38, %s2756_s22  ;;  %v1513_v38 = vld [vmem:[#allocation2 + $0x168] sm:$0xff] }
 0x23f   : > { %v1398_v54 = vpop.permute.xlu1 %1397  ;;  %2353 = vmatpush.bf16.msra.mxu0 %v2713_v30  ;;  %2717 = vmatpush.bf16.msra.mxu1 %v2713_v30  ;;  %v1545_v5 = vpack.c.bf16 %v1513_v38, %v1513_v38 }
 0x240   : > { %1474 = vst.msk [vmem:[#allocation3 + $0x50] sm:$0xf] %vm1453_vm7, %v1398_v54  ;;  %v1402_v19 = vpop.permute.xlu0 %1401  ;;  %2718 = vmatpush.bf16.msra.mxu2 %v2713_v30  ;;  %2719 = vmatpush.bf16.msra.mxu3 %v2713_v30 }
 0x241   : > { %1476 = vst.msk [vmem:[#allocation3 + $0x58] sm:$0xf] %vm1453_vm7, %v1402_v19  ;;  %1830 = vrot.lane.b32.xlu2 %v3339_v1, %s2755_s21  ;;  %v2712_v1 = vld [vmem:[%s3841_s1] sm:$0xff]  ;;  %v1508_v19 = vld [vmem:[#allocation2 + $0x128] sm:$0xff] }
 0x242   : > { %v1540_v30 = vpack.c.bf16 %v1508_v19, %v1508_v19 }
 0x243   : > { %v1412_v11 = vpop.permute.xlu2 %1411  ;;  %2354 = vmatpush.bf16.msra.mxu0 %v2712_v1  ;;  %2720 = vmatpush.bf16.msra.mxu1 %v2712_v1 }
 0x244   : > { %1481 = vst.msk [vmem:[#allocation3 + $0x6c] sm:$0xf] %vm1453_vm7, %v1412_v11  ;;  %2721 = vmatpush.bf16.msra.mxu2 %v2712_v1  ;;  %2722 = vmatpush.bf16.msra.mxu3 %v2712_v1 }
 0x245   : > { %1619 = vrot.lane.b32.xlu1 %v1537_v7, %s2754_s20 }
 0x246   : > { %1631 = vrot.lane.b32.xlu0 %v1543_v18, %s2754_s20  ;;  %v1738_v18 = vld [vmem:[#allocation2 + $0x169] sm:$0xff] }
 0x247   : > { %v1404_v24 = vpop.permute.xlu1 %1403  ;;  %v1770_v1 = vpack.c.bf16 %v1738_v18, %v1738_v18 }
 0x248   : > { %1477 = vst.msk [vmem:[#allocation3 + $0x5c] sm:$0xf] %vm1453_vm7, %v1404_v24  ;;  %v1408_v46 = vpop.permute.xlu0 %1407  ;;  %v1989_v24 = vpack.c.bf16 %v1957_v45, %v1957_v45 }
 0x249   : > { %1479 = vst.msk [vmem:[#allocation3 + $0x64] sm:$0xf] %vm1453_vm7, %v1408_v46  ;;  %2053 = vrot.lane.b32.xlu2 %v3468_v56, %s2756_s22  ;;  %v1732_v46 = vld [vmem:[#allocation2 + $0x121] sm:$0xff] }
 0x24a   : > { %v1764_v21 = vpack.c.bf16 %v1732_v46, %v1732_v46 }
 0x24b   : > { %v1586_v44 = vpop.permute.xlu2 %1585 }
 0x24c   : > { %1681 = vst.msk [vmem:[#allocation3 + $0x4] sm:$0xf] %vm1679_vm9, %v1586_v44  ;;  %v1964_v44 = vld [vmem:[#allocation2 + $0x172] sm:$0xff] }
 0x24d   : > { %1633 = vrot.lane.b32.xlu1 %v1544_v31, %s2754_s20 }
 0x24e   : > { %1846 = vrot.lane.b32.xlu0 %v3366_v62, %s2755_s21 }
 0x24f   : > { %v1410_v43 = vpop.permute.xlu1 %1409 }
 0x250   : > { %1480 = vst.msk [vmem:[#allocation3 + $0x68] sm:$0xf] %vm1453_vm7, %v1410_v43  ;;  %v1414_v33 = vpop.permute.xlu0 %1413 }
 0x251   : > { %1482 = vst.msk [vmem:[#allocation3 + $0x70] sm:$0xf] %vm1453_vm7, %v1414_v33  ;;  %1621 = vrot.lane.b32.xlu2 %v1538_v49, %s2754_s20  ;;  %v1996_v33 = vpack.c.bf16 %v1964_v44, %v1964_v44 }
 0x253   : > { %v2034_v56 = vpop.permute.xlu2 %2033 }
 0x255   : > { %1856 = vrot.lane.b32.xlu1 %v3399_v0, %s2755_s21  ;;  %v1493_v0 = vld [vmem:[#allocation2 + $0x78] sm:$0xff] }
 0x256   : > { %2069 = vrot.lane.b32.xlu0 %v3487_v9, %s2756_s22 }
 0x257   : > { %v1584_v47 = vpop.permute.xlu1 %1583 }
 0x258   : > { %1680 = vst.msk [vmem:[#allocation3] sm:$0xf] %vm1679_vm9, %v1584_v47  ;;  %v1809_v62 = vpop.permute.xlu0 %1808 }
 0x259   : > { %1905 = vst.msk [vmem:[#allocation3] sm:$0xf] %vm1904_vm10, %v1809_v62  ;;  %1844 = vrot.lane.b32.xlu2 %v3378_v29, %s2755_s21  ;;  %v1525_v29 = vpack.c.bf16 %v1493_v0, %v1493_v0 }
 0x25a   : > { %2130 = vst.msk [vmem:[#allocation3] sm:$0xf] %vm2129_vm11, %v2034_v56  ;;  %v1739_v56 = vld [vmem:[#allocation2 + $0x171] sm:$0xff] }
 0x25b   : > { %v1590_v41 = vpop.permute.xlu2 %1589  ;;  %v1771_v62 = vpack.c.bf16 %v1739_v56, %v1739_v56 }
 0x25c   : > { %1683 = vst.msk [vmem:[#allocation3 + $0xc] sm:$0xf] %vm1679_vm9, %v1590_v41  ;;  %v1501_v41 = vld [vmem:[#allocation2 + $0xd8] sm:$0xff] }
 0x25d   : > { %2071 = vrot.lane.b32.xlu1 %v3507_v57, %s2756_s22  ;;  %v1500_v57 = vld [vmem:[#allocation2 + $0xc8] sm:$0xff] }
 0x25e   : > { %2083 = vrot.lane.b32.xlu0 %v3530_v6, %s2756_s22  ;;  %v1532_v4 = vpack.c.bf16 %v1500_v57, %v1500_v57  ;;  %v1727_v57 = vld [vmem:[#allocation2 + $0xe1] sm:$0xff] }
 0x25f   : > { %v1811_v9 = vpop.permute.xlu1 %1810 }
 0x260   : > { %1906 = vst.msk [vmem:[#allocation3 + $0x4] sm:$0xf] %vm1904_vm10, %v1811_v9  ;;  %v2036_v52 = vpop.permute.xlu0 %2035  ;;  %v1726_v9 = vld [vmem:[#allocation2 + $0xd9] sm:$0xff] }
 0x261   : > { %2131 = vst.msk [vmem:[#allocation3 + $0x4] sm:$0xf] %vm2129_vm11, %v2036_v52  ;;  %1858 = vrot.lane.b32.xlu2 %v3385_v63, %s2755_s21  ;;  %v1751_v63 = vpack.c.bf16 %v1719_v59, %v1719_v59  ;;  %v1533_v52 = vpack.c.bf16 %v1501_v41, %v1501_v41 }
 0x263   : > { %v1813_v26 = vpop.permute.xlu2 %1812 }
 0x265   : > { %1595 = vrot.lane.b32.xlu1 %v1525_v29, %s2754_s20  ;;  %v1758_v29 = vpack.c.bf16 %v1726_v9, %v1726_v9  ;;  %v1743_v9 = vld [vmem:[#allocation2 + $0x1a1] sm:$0xff] }
 0x266   : > { %1607 = vrot.lane.b32.xlu0 %v1531_v58, %s2754_s20  ;;  %v1963_v58 = vld [vmem:[#allocation2 + $0x16a] sm:$0xff] }
 0x267   : > { %v1588_v6 = vpop.permute.xlu1 %1587 }
 0x268   : > { %1682 = vst.msk [vmem:[#allocation3 + $0x8] sm:$0xf] %vm1679_vm9, %v1588_v6  ;;  %v1600_v61 = vpop.permute.xlu0 %1599  ;;  %v2696_v60 = vld [vmem:[#allocation3] sm:$0xff] }
 0x269   : > { %1688 = vst.msk [vmem:[#allocation3 + $0x20] sm:$0xf] %vm1679_vm9, %v1600_v61  ;;  %2081 = vrot.lane.b32.xlu2 %v3513_v40, %s2756_s22  ;;  %2677 = vmatmul.msk.bf16.vlgmr.msra.gmra.mxu0 %vm2294_vm12, %v2696_v60  ;;  %v1718_v40 = vld [vmem:[#allocation2 + $0x79] sm:$0xff]  ;;  %v1759_v61 = vpack.c.bf16 %v1727_v57, %v1727_v57 }
 0x26a   : > { %1907 = vst.msk [vmem:[#allocation3 + $0x8] sm:$0xf] %vm1904_vm10, %v1813_v26  ;;  %v1750_v22 = vpack.c.bf16 %v1718_v40, %v1718_v40  ;;  %v1502_v60 = vld [vmem:[#allocation2 + $0xe0] sm:$0xff] }
 0x26b   : > { %v1827_v12 = vpop.permute.xlu2 %1826 }
 0x26d   : > { %1609 = vrot.lane.b32.xlu1 %v1532_v4, %s2754_s20 }
 0x26e   : > { %1822 = vrot.lane.b32.xlu0 %v1751_v63, %s2755_s21  ;;  %v1534_v63 = vpack.c.bf16 %v1502_v60, %v1502_v60  ;;  %v1967_v60 = vld [vmem:[#allocation2 + $0x19a] sm:$0xff] }
 0x26f   : > { %v1602_v48 = vpop.permute.xlu1 %1601 }
 0x270   : > { %1689 = vst.msk [vmem:[#allocation3 + $0x24] sm:$0xf] %vm1679_vm9, %v1602_v48  ;;  %v1815_v35 = vpop.permute.xlu0 %1814 }
 0x271   : > { %1908 = vst.msk [vmem:[#allocation3 + $0xc] sm:$0xf] %vm1904_vm10, %v1815_v35  ;;  %1597 = vrot.lane.b32.xlu2 %v1526_v13, %s2754_s20  ;;  %v1951_v35 = vld [vmem:[#allocation2 + $0xda] sm:$0xff] }
 0x272   : > { %1914 = vst.msk [vmem:[#allocation3 + $0x24] sm:$0xf] %vm1904_vm10, %v1827_v12  ;;  %v1510_v12 = vld [vmem:[#allocation2 + $0x140] sm:$0xff] }
 0x273   : > { %v2050_v15 = vpop.permute.xlu2 %2049  ;;  %v1542_v48 = vpack.c.bf16 %v1510_v12, %v1510_v12 }
 0x275   : > { %1832 = vrot.lane.b32.xlu1 %v3356_v53, %s2755_s21  ;;  %v1757_v53 = vpack.c.bf16 %v1725_v37, %v1725_v37 }
 0x276   : > { %2045 = vrot.lane.b32.xlu0 %v3435_v51, %s2756_s22  ;;  %v1507_v51 = vld [vmem:[#allocation2 + $0x120] sm:$0xff] }
 0x277   : > { %v1825_v32 = vpop.permute.xlu1 %1824  ;;  %v1539_v2 = vpack.c.bf16 %v1507_v51, %v1507_v51 }
 0x278   : > { %1913 = vst.msk [vmem:[#allocation3 + $0x20] sm:$0xf] %vm1904_vm10, %v1825_v32  ;;  %v2038_v28 = vpop.permute.xlu0 %2037 }
 0x279   : > { %2132 = vst.msk [vmem:[#allocation3 + $0x8] sm:$0xf] %vm2129_vm11, %v2038_v28  ;;  %1820 = vrot.lane.b32.xlu2 %v1750_v22, %s2755_s21  ;;  %v1515_v22 = vld [vmem:[#allocation2 + $0x180] sm:$0xff] }
 0x27a   : > { %2138 = vst.msk [vmem:[#allocation3 + $0x20] sm:$0xf] %vm2129_vm11, %v2050_v15  ;;  %v1983_v15 = vpack.c.bf16 %v1951_v35, %v1951_v35  ;;  %v1734_v28 = vld [vmem:[#allocation2 + $0x139] sm:$0xff] }
 0x27b   : > { %v1618_v39 = vpop.permute.xlu2 %1617  ;;  %v1766_v51 = vpack.c.bf16 %v1734_v28, %v1734_v28 }
 0x27c   : > { %1697 = vst.msk [vmem:[#allocation3 + $0x44] sm:$0xf] %vm1679_vm9, %v1618_v39 }
 0x27d   : > { %2047 = vrot.lane.b32.xlu1 %v3455_v36, %s2756_s22  ;;  %v1514_v36 = vld [vmem:[#allocation2 + $0x170] sm:$0xff] }
 0x27e   : > { %2059 = vrot.lane.b32.xlu0 %v3481_v10, %s2756_s22  ;;  %v1546_v55 = vpack.c.bf16 %v1514_v36, %v1514_v36 }
 0x27f   : > { %v2040_v42 = vpop.permute.xlu1 %2039 }
 0x280   : > { %2133 = vst.msk [vmem:[#allocation3 + $0xc] sm:$0xf] %vm2129_vm11, %v2040_v42  ;;  %v2052_v17 = vpop.permute.xlu0 %2051  ;;  %v1509_v42 = vld [vmem:[#allocation2 + $0x138] sm:$0xff] }
 0x281   : > { %2139 = vst.msk [vmem:[#allocation3 + $0x24] sm:$0xf] %vm2129_vm11, %v2052_v17  ;;  %1834 = vrot.lane.b32.xlu2 %v1757_v53, %s2755_s21  ;;  %v1547_v53 = vpack.c.bf16 %v1515_v22, %v1515_v22  ;;  %v1541_v17 = vpack.c.bf16 %v1509_v42, %v1509_v42 }
 0x283   : > { %v2066_v23 = vpop.permute.xlu2 %2065 }
 0x285   : > { %1623 = vrot.lane.b32.xlu1 %v1539_v2, %s2754_s20  ;;  %v1735_v2 = vld [vmem:[#allocation2 + $0x141] sm:$0xff] }
 0x286   : > { %1635 = vrot.lane.b32.xlu0 %v1545_v5, %s2754_s20 }
 0x287   : > { %v1616_v27 = vpop.permute.xlu1 %1615  ;;  %v2697_v10 = vld [vmem:[#allocation3 + $0x8] sm:$0xff] }
 0x288   : > { %1696 = vst.msk [vmem:[#allocation3 + $0x40] sm:$0xf] %vm1679_vm9, %v1616_v27  ;;  %v1841_v54 = vpop.permute.xlu0 %1840  ;;  %v2700_v3 = vld [vmem:[#allocation3 + $0x20] sm:$0xff]  ;;  %2678 = vmatmul.msk.bf16.gmra.mxu0 %vm2294_vm12, %v2697_v10  ;;  %v1767_v27 = vpack.c.bf16 %v1735_v2, %v1735_v2 }
 0x289   : > { %1921 = vst.msk [vmem:[#allocation3 + $0x40] sm:$0xf] %vm1904_vm10, %v1841_v54  ;;  %2057 = vrot.lane.b32.xlu2 %v3461_v20, %s2756_s22  ;;  %2681 = vmatmul.msk.bf16.vlgmr.msra.gmra.mxu1 %vm2294_vm12, %v2700_v3  ;;  %v1516_v54 = vld [vmem:[#allocation2 + $0x188] sm:$0xff] }
 0x28a   : > { %2146 = vst.msk [vmem:[#allocation3 + $0x40] sm:$0xf] %vm2129_vm11, %v2066_v23  ;;  %v1741_v23 = vld [vmem:[#allocation2 + $0x189] sm:$0xff] }
 0x28b   : > { %v1594_v7 = vpop.permute.xlu2 %1593  ;;  %v1773_v10 = vpack.c.bf16 %v1741_v23, %v1741_v23 }
 0x28c   : > { %1685 = vst.msk [vmem:[#allocation3 + $0x14] sm:$0xf] %vm1679_vm9, %v1594_v7  ;;  %v1965_v7 = vld [vmem:[#allocation2 + $0x182] sm:$0xff] }
 0x28d   : > { %1637 = vrot.lane.b32.xlu1 %v1546_v55, %s2754_s20  ;;  %v1548_v55 = vpack.c.bf16 %v1516_v54, %v1516_v54  ;;  %v1997_v18 = vpack.c.bf16 %v1965_v7, %v1965_v7 }
 0x28e   : > { %1850 = vrot.lane.b32.xlu0 %v3389_v14, %s2755_s21 }
 0x28f   : > { %v1843_v11 = vpop.permute.xlu1 %1842 }
 0x290   : > { %1922 = vst.msk [vmem:[#allocation3 + $0x44] sm:$0xf] %vm1904_vm10, %v1843_v11  ;;  %v2068_v20 = vpop.permute.xlu0 %2067  ;;  %v1740_v11 = vld [vmem:[#allocation2 + $0x181] sm:$0xff] }
 0x291   : > { %2147 = vst.msk [vmem:[#allocation3 + $0x44] sm:$0xf] %vm2129_vm11, %v2068_v20  ;;  %1625 = vrot.lane.b32.xlu2 %v1540_v30, %s2754_s20  ;;  %v1772_v20 = vpack.c.bf16 %v1740_v11, %v1740_v11 }
 0x293   : > { %v1817_v31 = vpop.permute.xlu2 %1816 }
 0x295   : > { %1860 = vrot.lane.b32.xlu1 %v1770_v1, %s2755_s21  ;;  %v1966_v1 = vld [vmem:[#allocation2 + $0x18a] sm:$0xff] }
 0x296   : > { %2073 = vrot.lane.b32.xlu0 %v1989_v24, %s2756_s22 }
 0x297   : > { %v1592_v14 = vpop.permute.xlu1 %1591 }
 0x298   : > { %1684 = vst.msk [vmem:[#allocation3 + $0x10] sm:$0xf] %vm1679_vm9, %v1592_v14  ;;  %v1604_v49 = vpop.permute.xlu0 %1603  ;;  %v2704_v43 = vld [vmem:[#allocation3 + $0x40] sm:$0xff] }
 0x299   : > { %1690 = vst.msk [vmem:[#allocation3 + $0x28] sm:$0xf] %vm1679_vm9, %v1604_v49  ;;  %1848 = vrot.lane.b32.xlu2 %v1764_v21, %s2755_s21  ;;  %2685 = vmatmul.msk.bf16.vlgmr.msra.gmra.mxu2 %vm2294_vm12, %v2704_v43  ;;  %v1960_v21 = vld [vmem:[#allocation2 + $0x142] sm:$0xff] }
 0x29a   : > { %1909 = vst.msk [vmem:[#allocation3 + $0x10] sm:$0xf] %vm1904_vm10, %v1817_v31  ;;  %v1998_v31 = vpack.c.bf16 %v1966_v1, %v1966_v1  ;;  %v1992_v44 = vpack.c.bf16 %v1960_v21, %v1960_v21 }
 0x29b   : > { %v1831_v47 = vpop.permute.xlu2 %1830 }
 0x29d   : > { %2075 = vrot.lane.b32.xlu1 %v3500_v34, %s2756_s22  ;;  %v1995_v34 = vpack.c.bf16 %v1963_v58, %v1963_v58  ;;  %v1775_v58 = vpack.c.bf16 %v1743_v9, %v1743_v9 }
 0x29e   : > { %2087 = vrot.lane.b32.xlu0 %v1996_v33, %s2756_s22 }
 0x29f   : > { %v1606_v0 = vpop.permute.xlu1 %1605 }
 0x2a0   : > { %1691 = vst.msk [vmem:[#allocation3 + $0x2c] sm:$0xf] %vm1679_vm9, %v1606_v0  ;;  %v1819_v50 = vpop.permute.xlu0 %1818 }
 0x2a1   : > { %1910 = vst.msk [vmem:[#allocation3 + $0x14] sm:$0xf] %vm1904_vm10, %v1819_v50  ;;  %1862 = vrot.lane.b32.xlu2 %v1771_v62, %s2755_s21 }
 0x2a2   : > { %1916 = vst.msk [vmem:[#allocation3 + $0x2c] sm:$0xf] %vm1904_vm10, %v1831_v47 }
 0x2a3   : > { %v2054_v26 = vpop.permute.xlu2 %2053 }
 0x2a5   : > { %1611 = vrot.lane.b32.xlu1 %v1533_v52, %s2754_s20  ;;  %v1968_v52 = vld [vmem:[#allocation2 + $0x1a2] sm:$0xff] }
 0x2a6   : > { %1836 = vrot.lane.b32.xlu0 %v1758_v29, %s2755_s21 }
 0x2a7   : > { %v1829_v6 = vpop.permute.xlu1 %1828 }
 0x2a8   : > { %1915 = vst.msk [vmem:[#allocation3 + $0x28] sm:$0xf] %vm1904_vm10, %v1829_v6  ;;  %v2042_v59 = vpop.permute.xlu0 %2041 }
 0x2a9   : > { %2134 = vst.msk [vmem:[#allocation3 + $0x10] sm:$0xf] %vm2129_vm11, %v2042_v59  ;;  %2085 = vrot.lane.b32.xlu2 %v1995_v34, %s2756_s22  ;;  %v1518_v34 = vld [vmem:[#allocation2 + $0x1a0] sm:$0xff] }
 0x2aa   : > { %2140 = vst.msk [vmem:[#allocation3 + $0x28] sm:$0xf] %vm2129_vm11, %v2054_v26  ;;  %v2000_v26 = vpack.c.bf16 %v1968_v52, %v1968_v52  ;;  %v1550_v6 = vpack.c.bf16 %v1518_v34, %v1518_v34 }
 0x2ab   : > { %v1622_v4 = vpop.permute.xlu2 %1621 }
 0x2ac   : > { %1699 = vst.msk [vmem:[#allocation3 + $0x4c] sm:$0xf] %vm1679_vm9, %v1622_v4 }
 0x2ad   : > { %1838 = vrot.lane.b32.xlu1 %v1759_v61, %s2755_s21 }
 0x2ae   : > { %2063 = vrot.lane.b32.xlu0 %v3474_v25, %s2756_s22 }
 0x2af   : > { %v2044_v8 = vpop.permute.xlu1 %2043 }
 0x2b0   : > { %2135 = vst.msk [vmem:[#allocation3 + $0x14] sm:$0xf] %vm2129_vm11, %v2044_v8  ;;  %v2056_v13 = vpop.permute.xlu0 %2055 }
 0x2b1   : > { %2141 = vst.msk [vmem:[#allocation3 + $0x2c] sm:$0xf] %vm2129_vm11, %v2056_v13  ;;  %1613 = vrot.lane.b32.xlu2 %v1534_v63, %s2754_s20  ;;  %v1999_v63 = vpack.c.bf16 %v1967_v60, %v1967_v60 }
 0x2b3   : > { %v1845_v40 = vpop.permute.xlu2 %1844 }
 0x2b5   : > { %1415 = vrot.lane.b32.xlu1 %v1996_v33, %s2753_s19  ;;  %v1742_v33 = vld [vmem:[#allocation2 + $0x199] sm:$0xff] }
 0x2b6   : > { %1629 = vrot.lane.b32.xlu0 %v1542_v48, %s2754_s20  ;;  %v1774_v41 = vpack.c.bf16 %v1742_v33, %v1742_v33 }
 0x2b7   : > { %v1620_v32 = vpop.permute.xlu1 %1619  ;;  %v2698_v25 = vld [vmem:[#allocation3 + $0x10] sm:$0xff] }
 0x2b8   : > { %1698 = vst.msk [vmem:[#allocation3 + $0x48] sm:$0xf] %vm1679_vm9, %v1620_v32  ;;  %v1632_v37 = vpop.permute.xlu0 %1631  ;;  %v2701_v39 = vld [vmem:[#allocation3 + $0x28] sm:$0xff]  ;;  %2679 = vmatmul.msk.bf16.gmra.mxu0 %vm2294_vm12, %v2698_v25 }
 0x2b9   : > { %1704 = vst.msk [vmem:[#allocation3 + $0x60] sm:$0xf] %vm1679_vm9, %v1632_v37  ;;  %2061 = vrot.lane.b32.xlu2 %v1983_v15, %s2756_s22  ;;  %2682 = vmatmul.msk.bf16.gmra.mxu1 %vm2294_vm12, %v2701_v39 }
 0x2ba   : > { %1923 = vst.msk [vmem:[#allocation3 + $0x48] sm:$0xf] %vm1904_vm10, %v1845_v40 }
 0x2bb   : > { %v1859_v38 = vpop.permute.xlu2 %1858 }
 0x2bd   : > { %1639 = vrot.lane.b32.xlu1 %v1547_v53, %s2754_s20 }
 0x2be   : > { %1852 = vrot.lane.b32.xlu0 %v1766_v51, %s2755_s21 }
 0x2bf   : > { %v1634_v5 = vpop.permute.xlu1 %1633 }
 0x2c0   : > { %1705 = vst.msk [vmem:[#allocation3 + $0x64] sm:$0xf] %vm1679_vm9, %v1634_v5  ;;  %v1847_v36 = vpop.permute.xlu0 %1846 }
 0x2c1   : > { %1924 = vst.msk [vmem:[#allocation3 + $0x4c] sm:$0xf] %vm1904_vm10, %v1847_v36  ;;  %1627 = vrot.lane.b32.xlu2 %v1541_v17, %s2754_s20 }
 0x2c2   : > { %1930 = vst.msk [vmem:[#allocation3 + $0x64] sm:$0xf] %vm1904_vm10, %v1859_v38 }
 0x2c3   : > { %v2082_v3 = vpop.permute.xlu2 %2081 }
 0x2c5   : > { %1854 = vrot.lane.b32.xlu1 %v1767_v27, %s2755_s21 }
 0x2c6   : > { %1866 = vrot.lane.b32.xlu0 %v1773_v10, %s2755_s21 }
 0x2c7   : > { %v1857_v19 = vpop.permute.xlu1 %1856 }
 0x2c8   : > { %1929 = vst.msk [vmem:[#allocation3 + $0x60] sm:$0xf] %vm1904_vm10, %v1857_v19  ;;  %v2070_v30 = vpop.permute.xlu0 %2069 }
 0x2c9   : > { %2148 = vst.msk [vmem:[#allocation3 + $0x48] sm:$0xf] %vm2129_vm11, %v2070_v30  ;;  %1641 = vrot.lane.b32.xlu2 %v1548_v55, %s2754_s20 }
 0x2ca   : > { %2154 = vst.msk [vmem:[#allocation3 + $0x60] sm:$0xf] %vm2129_vm11, %v2082_v3 }
 0x2cb   : > { %v1598_v45 = vpop.permute.xlu2 %1597 }
 0x2cc   : > { %1687 = vst.msk [vmem:[#allocation3 + $0x1c] sm:$0xf] %vm1679_vm9, %v1598_v45 }
 0x2cd   : > { %2077 = vrot.lane.b32.xlu1 %v3520_v16, %s2756_s22  ;;  %v1517_v16 = vld [vmem:[#allocation2 + $0x198] sm:$0xff] }
 0x2ce   : > { %2089 = vrot.lane.b32.xlu0 %v1997_v18, %s2756_s22  ;;  %v1549_v62 = vpack.c.bf16 %v1517_v16, %v1517_v16 }
 0x2cf   : > { %v2072_v24 = vpop.permute.xlu1 %2071 }
 0x2d0   : > { %2149 = vst.msk [vmem:[#allocation3 + $0x4c] sm:$0xf] %vm2129_vm11, %v2072_v24  ;;  %v2084_v46 = vpop.permute.xlu0 %2083 }
 0x2d1   : > { %2155 = vst.msk [vmem:[#allocation3 + $0x64] sm:$0xf] %vm2129_vm11, %v2084_v46  ;;  %1864 = vrot.lane.b32.xlu2 %v1772_v20, %s2755_s21 }
 0x2d3   : > { %v1821_v14 = vpop.permute.xlu2 %1820 }
 0x2d5   : > { %2091 = vrot.lane.b32.xlu1 %v1998_v31, %s2756_s22 }
 0x2d6   : > { %1419 = vrot.lane.b32.xlu0 %v1998_v31, %s2753_s19 }
 0x2d7   : > { %v1596_v49 = vpop.permute.xlu1 %1595  ;;  %v2705_v43 = vld [vmem:[#allocation3 + $0x48] sm:$0xff] }
 0x2d8   : > { %1686 = vst.msk [vmem:[#allocation3 + $0x18] sm:$0xf] %vm1679_vm9, %v1596_v49  ;;  %v1608_v56 = vpop.permute.xlu0 %1607  ;;  %v2708_v47 = vld [vmem:[#allocation3 + $0x60] sm:$0xff]  ;;  %2686 = vmatmul.msk.bf16.gmra.mxu2 %vm2294_vm12, %v2705_v43 }
 0x2d9   : > { %1692 = vst.msk [vmem:[#allocation3 + $0x30] sm:$0xf] %vm1679_vm9, %v1608_v56  ;;  %2079 = vrot.lane.b32.xlu2 %v1992_v44, %s2756_s22  ;;  %2689 = vmatmul.msk.bf16.vlgmr.msra.gmra.mxu3 %vm2294_vm12, %v2708_v47 }
 0x2da   : > { %1911 = vst.msk [vmem:[#allocation3 + $0x18] sm:$0xf] %vm1904_vm10, %v1821_v14 }
 0x2db   : > { %v1835_v0 = vpop.permute.xlu2 %1834 }
 0x2dd   : > { %1643 = vrot.lane.b32.xlu1 %v1549_v62, %s2754_s20 }
 0x2de   : > { %1868 = vrot.lane.b32.xlu0 %v1774_v41, %s2755_s21 }
 0x2df   : > { %v1610_v50 = vpop.permute.xlu1 %1609 }
 0x2e0   : > { %1693 = vst.msk [vmem:[#allocation3 + $0x34] sm:$0xf] %vm1679_vm9, %v1610_v50  ;;  %v1823_v29 = vpop.permute.xlu0 %1822 }
 0x2e1   : > { %1912 = vst.msk [vmem:[#allocation3 + $0x1c] sm:$0xf] %vm1904_vm10, %v1823_v29  ;;  %1417 = vrot.lane.b32.xlu2 %v1997_v18, %s2753_s19 }
 0x2e2   : > { %1918 = vst.msk [vmem:[#allocation3 + $0x34] sm:$0xf] %vm1904_vm10, %v1835_v0 }
 0x2e3   : > { %v2058_v57 = vpop.permute.xlu2 %2057 }
 0x2e5   : > { %1870 = vrot.lane.b32.xlu1 %v1775_v58, %s2755_s21 }
 0x2e6   : > { %2095 = vrot.lane.b32.xlu0 %v2000_v26, %s2756_s22  ;;  %v2356_v47 = vpop.f32.mrf.mxu0 }
 0x2e7   : > { %v1833_v59 = vpop.permute.xlu1 %1832 }
 0x2e8   : > { %1917 = vst.msk [vmem:[#allocation3 + $0x30] sm:$0xf] %vm1904_vm10, %v1833_v59  ;;  %v2046_v61 = vpop.permute.xlu0 %2045 }
 0x2e9   : > { %2136 = vst.msk [vmem:[#allocation3 + $0x18] sm:$0xf] %vm2129_vm11, %v2046_v61  ;;  %1645 = vrot.lane.b32.xlu2 %v1550_v6, %s2754_s20  ;;  %v2474_v61 = vmul.f32 %v2356_v47, %v2356_v47 }
 0x2ea   : > { %2142 = vst.msk [vmem:[#allocation3 + $0x30] sm:$0xf] %vm2129_vm11, %v2058_v57 }
 0x2eb   : > { %v1626_v4 = vpop.permute.xlu2 %1625 }
 0x2ec   : > { %1701 = vst.msk [vmem:[#allocation3 + $0x54] sm:$0xf] %vm1679_vm9, %v1626_v4 }
 0x2ee   : > { %v2358_v0 = vpop.f32.mrf.mxu0 }
 0x2ef   : > { %v2048_v8 = vpop.permute.xlu1 %2047  ;;  %v2475_v6 = vmul.f32 %v2358_v0, %v2358_v0  ;;  %v2436_v60 = vadd.f32 %v2358_v0, %v2356_v47 }
 0x2f0   : > { %2137 = vst.msk [vmem:[#allocation3 + $0x1c] sm:$0xf] %vm2129_vm11, %v2048_v8  ;;  %v2060_v12 = vpop.permute.xlu0 %2059 }
 0x2f1   : > { %2143 = vst.msk [vmem:[#allocation3 + $0x34] sm:$0xf] %vm2129_vm11, %v2060_v12  ;;  %2093 = vrot.lane.b32.xlu2 %v1999_v63, %s2756_s22  ;;  %v2506_v63 = vadd.f32 %v2475_v6, %v2474_v61 }
 0x2f3   : > { %v1849_v13 = vpop.permute.xlu2 %1848 }
 0x2f7   : > { %v1624_v48 = vpop.permute.xlu1 %1623  ;;  %v2699_v35 = vld [vmem:[#allocation3 + $0x18] sm:$0xff] }
 0x2f8   : > { %1700 = vst.msk [vmem:[#allocation3 + $0x50] sm:$0xf] %vm1679_vm9, %v1624_v48  ;;  %v1636_v40 = vpop.permute.xlu0 %1635  ;;  %v2702_v15 = vld [vmem:[#allocation3 + $0x30] sm:$0xff]  ;;  %2680 = vmatmul.msk.bf16.gmra.mxu0 %vm2294_vm12, %v2699_v35 }
 0x2f9   : > { %1706 = vst.msk [vmem:[#allocation3 + $0x68] sm:$0xf] %vm1679_vm9, %v1636_v40  ;;  %2683 = vmatmul.msk.bf16.gmra.mxu1 %vm2294_vm12, %v2702_v15 }
 0x2fa   : > { %1925 = vst.msk [vmem:[#allocation3 + $0x50] sm:$0xf] %vm1904_vm10, %v1849_v13 }
 0x2fb   : > { %v1863_v22 = vpop.permute.xlu2 %1862 }
 0x2ff   : > { %v1638_v32 = vpop.permute.xlu1 %1637 }
 0x300   : > { %1707 = vst.msk [vmem:[#allocation3 + $0x6c] sm:$0xf] %vm1679_vm9, %v1638_v32  ;;  %v1851_v25 = vpop.permute.xlu0 %1850 }
 0x301   : > { %1926 = vst.msk [vmem:[#allocation3 + $0x54] sm:$0xf] %vm1904_vm10, %v1851_v25 }
 0x302   : > { %1932 = vst.msk [vmem:[#allocation3 + $0x6c] sm:$0xf] %vm1904_vm10, %v1863_v22 }
 0x303   : > { %v2086_v28 = vpop.permute.xlu2 %2085 }
 0x305   : > { %v2361_v9 = vpop.f32.mrf.mxu0 }
 0x306   : > { %v2376_v50 = vpop.f32.mrf.mxu1  ;;  %v2476_v4 = vmul.f32 %v2361_v9, %v2361_v9  ;;  %v2437_v8 = vadd.f32 %v2436_v60, %v2361_v9 }
 0x307   : > { %v1861_v37 = vpop.permute.xlu1 %1860 }
 0x308   : > { %1931 = vst.msk [vmem:[#allocation3 + $0x68] sm:$0xf] %vm1904_vm10, %v1861_v37  ;;  %v2074_v39 = vpop.permute.xlu0 %2073  ;;  %v2507_v13 = vadd.f32 %v2506_v63, %v2476_v4 }
 0x309   : > { %2150 = vst.msk [vmem:[#allocation3 + $0x50] sm:$0xf] %vm2129_vm11, %v2074_v39 }
 0x30a   : > { %2156 = vst.msk [vmem:[#allocation3 + $0x68] sm:$0xf] %vm2129_vm11, %v2086_v28 }
 0x30b   : > { %v1614_v53 = vpop.permute.xlu2 %1613 }
 0x30c   : > { %1695 = vst.msk [vmem:[#allocation3 + $0x3c] sm:$0xf] %vm1679_vm9, %v1614_v53 }
 0x30d   : > { %v2363_v52 = vpop.f32.mrf.mxu0 }
 0x30e   : > { %v2378_v58 = vpop.f32.mrf.mxu1  ;;  %v2477_v12 = vmul.f32 %v2363_v52, %v2363_v52  ;;  %v2438_v48 = vadd.f32 %v2437_v8, %v2363_v52 }
 0x30f   : > { %v2076_v51 = vpop.permute.xlu1 %2075 }
 0x310   : > { %2151 = vst.msk [vmem:[#allocation3 + $0x54] sm:$0xf] %vm2129_vm11, %v2076_v51  ;;  %v2088_v42 = vpop.permute.xlu0 %2087  ;;  %v2508_v15 = vadd.f32 %v2507_v13, %v2477_v12 }
 0x311   : > { %2157 = vst.msk [vmem:[#allocation3 + $0x6c] sm:$0xf] %vm2129_vm11, %v2088_v42 }
 0x313   : > { %v2062_v38 = vpop.permute.xlu2 %2061 }
 0x317   : > { %v1612_v17 = vpop.permute.xlu1 %1611  ;;  %v2706_v2 = vld [vmem:[#allocation3 + $0x50] sm:$0xff] }
 0x318   : > { %1694 = vst.msk [vmem:[#allocation3 + $0x38] sm:$0xf] %vm1679_vm9, %v1612_v17  ;;  %v1837_v5 = vpop.permute.xlu0 %1836  ;;  %v2709_v23 = vld [vmem:[#allocation3 + $0x68] sm:$0xff]  ;;  %2687 = vmatmul.msk.bf16.gmra.mxu2 %vm2294_vm12, %v2706_v2 }
 0x319   : > { %1919 = vst.msk [vmem:[#allocation3 + $0x38] sm:$0xf] %vm1904_vm10, %v1837_v5  ;;  %2690 = vmatmul.msk.bf16.gmra.mxu3 %vm2294_vm12, %v2709_v23 }
 0x31a   : > { %2144 = vst.msk [vmem:[#allocation3 + $0x38] sm:$0xf] %vm2129_vm11, %v2062_v38 }
 0x31b   : > { %v1628_v36 = vpop.permute.xlu2 %1627 }
 0x31c   : > { %1702 = vst.msk [vmem:[#allocation3 + $0x58] sm:$0xf] %vm1679_vm9, %v1628_v36  ;;  %v2396_v40 = vpop.f32.mrf.mxu2  ;;  %v2482_v36 = vmul.f32 %v2376_v50, %v2376_v50 }
 0x31f   : > { %v1839_v27 = vpop.permute.xlu1 %1838 }
 0x320   : > { %1920 = vst.msk [vmem:[#allocation3 + $0x3c] sm:$0xf] %vm1904_vm10, %v1839_v27  ;;  %v2064_v10 = vpop.permute.xlu0 %2063 }
 0x321   : > { %2145 = vst.msk [vmem:[#allocation3 + $0x3c] sm:$0xf] %vm2129_vm11, %v2064_v10 }
 0x323   : > { %v1642_v54 = vpop.permute.xlu2 %1641 }
 0x324   : > { %v2398_v23 = vpop.f32.mrf.mxu2 }
 0x327   : > { %v1416_v3 = vpop.permute.xlu1 %1415 }
 0x328   : > { %1483 = vst.msk [vmem:[#allocation3 + $0x74] sm:$0xf] %vm1453_vm7, %v1416_v3  ;;  %v1630_v55 = vpop.permute.xlu0 %1629  ;;  %v2703_v19 = vld [vmem:[#allocation3 + $0x38] sm:$0xff]  ;;  %v2483_v3 = vmul.f32 %v2378_v58, %v2378_v58 }
 0x329   : > { %1703 = vst.msk [vmem:[#allocation3 + $0x5c] sm:$0xf] %vm1679_vm9, %v1630_v55  ;;  %2684 = vmatmul.msk.bf16.gmra.mxu1 %vm2294_vm12, %v2703_v19 }
 0x32a   : > { %1709 = vst.msk [vmem:[#allocation3 + $0x74] sm:$0xf] %vm1679_vm9, %v1642_v54 }
 0x32b   : > { %v1865_v7 = vpop.permute.xlu2 %1864 }
 0x32f   : > { %v1640_v30 = vpop.permute.xlu1 %1639 }
 0x330   : > { %1708 = vst.msk [vmem:[#allocation3 + $0x70] sm:$0xf] %vm1679_vm9, %v1640_v30  ;;  %v1853_v18 = vpop.permute.xlu0 %1852 }
 0x331   : > { %1927 = vst.msk [vmem:[#allocation3 + $0x58] sm:$0xf] %vm1904_vm10, %v1853_v18 }
 0x332   : > { %1933 = vst.msk [vmem:[#allocation3 + $0x70] sm:$0xf] %vm1904_vm10, %v1865_v7 }
 0x333   : > { %v2080_v11 = vpop.permute.xlu2 %2079 }
 0x335   : > { %v2366_v29 = vpop.f32.mrf.mxu0 }
 0x336   : > { %v2381_v26 = vpop.f32.mrf.mxu1  ;;  %v2478_v35 = vmul.f32 %v2366_v29, %v2366_v29  ;;  %v2439_v22 = vadd.f32 %v2438_v48, %v2366_v29  ;;  %v2490_v29 = vmul.f32 %v2396_v40, %v2396_v40 }
 0x337   : > { %v1855_v45 = vpop.permute.xlu1 %1854  ;;  %v2484_v30 = vmul.f32 %v2381_v26, %v2381_v26 }
 0x338   : > { %1928 = vst.msk [vmem:[#allocation3 + $0x5c] sm:$0xf] %vm1904_vm10, %v1855_v45  ;;  %v1867_v20 = vpop.permute.xlu0 %1866  ;;  %v2509_v37 = vadd.f32 %v2508_v15, %v2478_v35 }
 0x339   : > { %1934 = vst.msk [vmem:[#allocation3 + $0x74] sm:$0xf] %vm1904_vm10, %v1867_v20 }
 0x33a   : > { %2153 = vst.msk [vmem:[#allocation3 + $0x5c] sm:$0xf] %vm2129_vm11, %v2080_v11 }
 0x33b   : > { %v1418_v1 = vpop.permute.xlu2 %1417 }
 0x33c   : > { %1484 = vst.msk [vmem:[#allocation3 + $0x78] sm:$0xf] %vm1453_vm7, %v1418_v1 }
 0x33d   : > { %v2368_v34 = vpop.f32.mrf.mxu0 }
 0x33e   : > { %v2383_v59 = vpop.f32.mrf.mxu1  ;;  %v2479_v32 = vmul.f32 %v2368_v34, %v2368_v34  ;;  %v2440_v39 = vadd.f32 %v2439_v22, %v2368_v34  ;;  %v2491_v34 = vmul.f32 %v2398_v23, %v2398_v23 }
 0x33f   : > { %v2078_v24 = vpop.permute.xlu1 %2077  ;;  %v2485_v20 = vmul.f32 %v2383_v59, %v2383_v59 }
 0x340   : > { %2152 = vst.msk [vmem:[#allocation3 + $0x58] sm:$0xf] %vm2129_vm11, %v2078_v24  ;;  %v2090_v46 = vpop.permute.xlu0 %2089  ;;  %v2510_v51 = vadd.f32 %v2509_v37, %v2479_v32 }
 0x341   : > { %2158 = vst.msk [vmem:[#allocation3 + $0x70] sm:$0xf] %vm2129_vm11, %v2090_v46 }
 0x343   : > { %v1646_v31 = vpop.permute.xlu2 %1645 }
 0x347   : > { %v2092_v21 = vpop.permute.xlu1 %2091  ;;  %v2707_v14 = vld [vmem:[#allocation3 + $0x58] sm:$0xff] }
 0x348   : > { %2159 = vst.msk [vmem:[#allocation3 + $0x74] sm:$0xf] %vm2129_vm11, %v2092_v21  ;;  %v1420_v44 = vpop.permute.xlu0 %1419  ;;  %2688 = vmatmul.msk.bf16.gmra.mxu2 %vm2294_vm12, %v2707_v14 }
 0x349   : > { %1485 = vst.msk [vmem:[#allocation3 + $0x7c] sm:$0xf] %vm1453_vm7, %v1420_v44 }
 0x34a   : > { %1711 = vst.msk [vmem:[#allocation3 + $0x7c] sm:$0xf] %vm1679_vm9, %v1646_v31 }
 0x34b   : > { %v2094_v43 = vpop.permute.xlu2 %2093 }
 0x34f   : > { %v1644_v16 = vpop.permute.xlu1 %1643  ;;  %v2710_v49 = vld [vmem:[#allocation3 + $0x70] sm:$0xff] }
 0x350   : > { %1710 = vst.msk [vmem:[#allocation3 + $0x78] sm:$0xf] %vm1679_vm9, %v1644_v16  ;;  %v1869_v33 = vpop.permute.xlu0 %1868  ;;  %2691 = vmatmul.msk.bf16.gmra.mxu3 %vm2294_vm12, %v2710_v49 }
 0x351   : > { %1935 = vst.msk [vmem:[#allocation3 + $0x78] sm:$0xf] %vm1904_vm10, %v1869_v33 }
 0x352   : > { %2160 = vst.msk [vmem:[#allocation3 + $0x78] sm:$0xf] %vm2129_vm11, %v2094_v43 }
 0x357   : > { %v1871_v56 = vpop.permute.xlu1 %1870 }
 0x358   : > { %1936 = vst.msk [vmem:[#allocation3 + $0x7c] sm:$0xf] %vm1904_vm10, %v1871_v56  ;;  %v2096_v62 = vpop.permute.xlu0 %2095 }
 0x359   : > { %2161 = vst.msk [vmem:[#allocation3 + $0x7c] sm:$0xf] %vm2129_vm11, %v2096_v62 }
 0x35b   : > { %v2401_v7 = vpop.f32.mrf.mxu2 }
 0x35c   : > { %v2416_v46 = vpop.f32.mrf.mxu3  ;;  %v2492_v60 = vmul.f32 %v2401_v7, %v2401_v7 }
 0x360   : > { %v2711_v41 = vld [vmem:[#allocation3 + $0x78] sm:$0xff] }
 0x361   : > { %2692 = vmatmul.msk.bf16.gmra.mxu3 %vm2294_vm12, %v2711_v41 }
 0x363   : > { %v2403_v14 = vpop.f32.mrf.mxu2 }
 0x364   : > { %v2418_v9 = vpop.f32.mrf.mxu3  ;;  %v2493_v8 = vmul.f32 %v2403_v14, %v2403_v14 }
 0x375   : > { %v2371_v57 = vpop.f32.mrf.mxu0 }
 0x376   : > { %v2386_v25 = vpop.f32.mrf.mxu1  ;;  %v2480_v53 = vmul.f32 %v2371_v57, %v2371_v57  ;;  %v2441_v42 = vadd.f32 %v2440_v39, %v2371_v57 }
 0x377   : > { %v2486_v31 = vmul.f32 %v2386_v25, %v2386_v25 }
 0x378   : > { %v2511_v17 = vadd.f32 %v2510_v51, %v2480_v53 }
 0x37d   : > { %v2373_v28 = vpop.f32.mrf.mxu0 }
 0x37e   : > { %v2481_v38 = vmul.f32 %v2373_v28, %v2373_v28  ;;  %v2442_v2 = vadd.f32 %v2441_v42, %v2373_v28  ;;  %v2388_v10 = vpop.f32.mrf.mxu1 }
 0x37f   : > { %v2487_v43 = vmul.f32 %v2388_v10, %v2388_v10 }
 0x380   : > { %v2512_v5 = vadd.f32 %v2511_v17, %v2481_v38  ;;  %v2443_v27 = vadd.f32 %v2442_v2, %v2376_v50  ;;  %v2498_v2 = vmul.f32 %v2416_v46, %v2416_v46 }
 0x382   : > { %v2513_v54 = vadd.f32 %v2512_v5, %v2482_v36  ;;  %v2444_v55 = vadd.f32 %v2443_v27, %v2378_v58  ;;  %v2499_v27 = vmul.f32 %v2418_v9, %v2418_v9 }
 0x384   : > { %v2514_v19 = vadd.f32 %v2513_v54, %v2483_v3  ;;  %v2445_v18 = vadd.f32 %v2444_v55, %v2381_v26 }
 0x386   : > { %v2515_v45 = vadd.f32 %v2514_v19, %v2484_v30  ;;  %v2446_v1 = vadd.f32 %v2445_v18, %v2383_v59 }
 0x388   : > { %v2516_v24 = vadd.f32 %v2515_v45, %v2485_v20  ;;  %v2447_v21 = vadd.f32 %v2446_v1, %v2386_v25 }
 0x38a   : > { %v2517_v44 = vadd.f32 %v2516_v24, %v2486_v31  ;;  %v2448_v49 = vadd.f32 %v2447_v21, %v2388_v10 }
 0x38c   : > { %v2518_v56 = vadd.f32 %v2517_v44, %v2487_v43 }
 0x39b   : > { %v2406_v50 = vpop.f32.mrf.mxu2 }
 0x39c   : > { %v2421_v6 = vpop.f32.mrf.mxu3  ;;  %v2494_v15 = vmul.f32 %v2406_v50, %v2406_v50 }
 0x39d   : > { %v2500_v55 = vmul.f32 %v2421_v6, %v2421_v6 }
 0x3a3   : > { %v2408_v61 = vpop.f32.mrf.mxu2 }
 0x3a4   : > { %v2423_v48 = vpop.f32.mrf.mxu3  ;;  %v2495_v25 = vmul.f32 %v2408_v61, %v2408_v61 }
 0x3a5   : > { %v2501_v30 = vmul.f32 %v2423_v48, %v2423_v48 }
 0x3a6   : > { %v2391_v11 = vpop.f32.mrf.mxu1 }
 0x3a7   : > { %v2488_v33 = vmul.f32 %v2391_v11, %v2391_v11  ;;  %v2449_v47 = vadd.f32 %v2448_v49, %v2391_v11 }
 0x3a9   : > { %v2519_v41 = vadd.f32 %v2518_v56, %v2488_v33 }
 0x3ae   : > { %v2393_v16 = vpop.f32.mrf.mxu1 }
 0x3af   : > { %v2489_v62 = vmul.f32 %v2393_v16, %v2393_v16  ;;  %v2450_v0 = vadd.f32 %v2449_v47, %v2393_v16 }
 0x3b1   : > { %v2520_v52 = vadd.f32 %v2519_v41, %v2489_v62  ;;  %v2451_v58 = vadd.f32 %v2450_v0, %v2396_v40 }
 0x3b3   : > { %v2521_v26 = vadd.f32 %v2520_v52, %v2490_v29  ;;  %v2452_v57 = vadd.f32 %v2451_v58, %v2398_v23 }
 0x3b5   : > { %v2522_v59 = vadd.f32 %v2521_v26, %v2491_v34  ;;  %v2453_v4 = vadd.f32 %v2452_v57, %v2401_v7 }
 0x3b7   : > { %v2523_v63 = vadd.f32 %v2522_v59, %v2492_v60  ;;  %v2454_v12 = vadd.f32 %v2453_v4, %v2403_v14 }
 0x3b9   : > { %v2524_v13 = vadd.f32 %v2523_v63, %v2493_v8  ;;  %v2455_v22 = vadd.f32 %v2454_v12, %v2406_v50 }
 0x3bb   : > { %v2525_v32 = vadd.f32 %v2524_v13, %v2494_v15  ;;  %v2456_v28 = vadd.f32 %v2455_v22, %v2408_v61 }
 0x3bd   : > { %v2526_v39 = vadd.f32 %v2525_v32, %v2495_v25 }
 0x3cb   : > { %v2411_v35 = vpop.f32.mrf.mxu2 }
 0x3cc   : > { %v2496_v40 = vmul.f32 %v2411_v35, %v2411_v35  ;;  %v2457_v37 = vadd.f32 %v2456_v28, %v2411_v35 }
 0x3ce   : > { %v2527_v42 = vadd.f32 %v2526_v39, %v2496_v40 }
 0x3d3   : > { %v2413_v53 = vpop.f32.mrf.mxu2  ;;  %v2426_v51 = vpop.f32.mrf.mxu3 }
 0x3d4   : > { %v2458_v38 = vadd.f32 %v2457_v37, %v2413_v53  ;;  %v2497_v17 = vmul.f32 %v2413_v53, %v2413_v53  ;;  %v2502_v1 = vmul.f32 %v2426_v51, %v2426_v51 }
 0x3d6   : > { %v2459_v5 = vadd.f32 %v2458_v38, %v2416_v46  ;;  %v2528_v23 = vadd.f32 %v2527_v42, %v2497_v17 }
 0x3d8   : > { %v2529_v36 = vadd.f32 %v2528_v23, %v2498_v2  ;;  %v2460_v10 = vadd.f32 %v2459_v5, %v2418_v9 }
 0x3da   : > { %v2530_v54 = vadd.f32 %v2529_v36, %v2499_v27  ;;  %v2461_v19 = vadd.f32 %v2460_v10, %v2421_v6 }
 0x3db   : > { %v2428_v3 = vpop.f32.mrf.mxu3 }
 0x3dc   : > { %v2531_v7 = vadd.f32 %v2530_v54, %v2500_v55  ;;  %v2462_v18 = vadd.f32 %v2461_v19, %v2423_v48  ;;  %v2503_v21 = vmul.f32 %v2428_v3, %v2428_v3 }
 0x3de   : > { %v2532_v11 = vadd.f32 %v2531_v7, %v2501_v30  ;;  %v2463_v20 = vadd.f32 %v2462_v18, %v2426_v51 }
 0x3e0   : > { %v2533_v24 = vadd.f32 %v2532_v11, %v2502_v1  ;;  %v2464_v31 = vadd.f32 %v2463_v20, %v2428_v3 }
 0x3e2   : > { %v2534_v14 = vadd.f32 %v2533_v24, %v2503_v21 }
 0x3e4   : > { %v2431_v45 = vpop.f32.mrf.mxu3 }
 0x3e5   : > { %v2504_v46 = vmul.f32 %v2431_v45, %v2431_v45  ;;  %v2465_v44 = vadd.f32 %v2464_v31, %v2431_v45 }
 0x3e7   : > { %v2535_v49 = vadd.f32 %v2534_v14, %v2504_v46 }
 0x3ec   : > { %v2433_v16 = vpop.f32.mrf.mxu3 }
 0x3ed   : > { %v2466_v43 = vadd.f32 %v2465_v44, %v2433_v16  ;;  %v2505_v33 = vmul.f32 %v2433_v16, %v2433_v16 }
 0x3ef   : > { %v2467_v56 = vrot.slane %v2466_v43, 4  ;;  %v2536_v47 = vadd.f32 %v2535_v49, %v2505_v33 }
 0x3f1   : > { %v2468_v62 = vadd.f32 %v2467_v56, %v2466_v43  ;;  %v2537_v41 = vrot.slane %v2536_v47, 4 }
 0x3f3   : > { %v2469_v0 = vrot.slane %v2468_v62, 2  ;;  %v2538_v9 = vadd.f32 %v2537_v41, %v2536_v47 }
 0x3f5   : > { %v2470_v50 = vadd.f32 %v2469_v0, %v2468_v62  ;;  %v2539_v52 = vrot.slane %v2538_v9, 2 }
 0x3f7   : > { %v2471_v29 = vrot.slane %v2470_v50, 1  ;;  %v2540_v58 = vadd.f32 %v2539_v52, %v2538_v9 }
 0x3f9   : > { %v2472_v26 = vadd.f32 %v2471_v29, %v2470_v50  ;;  %v2541_v34 = vrot.slane %v2540_v58, 1 }
 0x3fb   : > { %2473 = vst [vmem:[%s141_s4] sm:$0x1] %v2472_v26  ;;  %v2542_v57 = vadd.f32 %v2541_v34, %v2540_v58 }
 0x3fd   : > { %2543 = vst [vmem:[%s141_s4 + $0x1] sm:$0x1] %v2542_v57 }
 0x3fe PF: > { %s12_s9 = sadd.s32 1, %s2746_s9  }
 0x3ff   : > { %p9_p4 = scmp.ge.s32.totalorder %s12_s9, 4  }
 0x401   :  { %11 = sbr.rel (!%p9_p4) target bundleno = 1 (0x1), region = 60 }

// kernel: conv_block_forward.3
= control target key start
LH: loop header
LB: loop body
LE: loop exit
PB: predicated region body
PF: predicated region fallthrough
CT: control target
= control target key end

     0   :  { %s4171_s15 = smov 0   ;;  %s5824_s0 = inlined_call_operand.vmem [shape: f32[2,16,16,4], index: 0, kind: input, shape index: {}]   ;;  %s5825_s1 = inlined_call_operand.vmem [shape: bf16[36,128], index: 1, kind: input, shape index: {}]   ;;  %s5826_s2 = inlined_call_operand.vmem [shape: f32[1,128], index: 2, kind: input, shape index: {}]   ;;  %s5827_s3 = inlined_call_operand.vmem [shape: f32[1,128], index: 3, kind: input, shape index: {}]   ;;  %s5828_s4 = inlined_call_operand.vmem [shape: f32[2,8,8,128], index: 4, kind: output, shape index: {}]  }
   0x1 LB: > { %s3978_s16 = sadd.s32 4294967295, %s4135_s15   ;;  %p3982_p0 = scmp.ge.s32.totalorder %s4135_s15, 1  ;;  %s4135_s15 = sphi %s4171_s15, %s14_s15  }
   0x2   : > { %p162_p1 = scmp.lt.s32.totalorder %s4135_s15, 3 }
   0x4   : > { %p163_p2 = pnand %p3982_p0, %p162_p1 }
   0x6   : > { %166 = sbr.rel (%p163_p2) target bundleno = 1104 (0x450), region = 36 }
   0xb   : > { %vm199_vm0 = vcmask 31744   ;;  %v4137_v0 = vmov 0.0   ;;  %s4138_s17 = smov 4   ;;  %p188_p3 = scmp.lt.s32.totalorder %s3978_s16, 1  ;;  %vm202_vm1 = vcmask 25600   ;;  %vm384_vm2 = vcmask 27648  }
   0xc   : > { %200 = vst.msk [vmem:[#allocation2] sm:$0xff] %vm199_vm0, %v4137_v0  ;;  %vm609_vm3 = vcmask 60448   ;;  %s4139_s22 = smov 8   ;;  %s4140_s23 = smov 12   ;;  %vm834_vm4 = vcmask 93248   ;;  %vm1059_vm5 = vcmask 126048  }
   0xd   : > { %201 = vst.msk [vmem:[#allocation2 + $0x8] sm:$0xff] %vm199_vm0, %v4137_v0  ;;  %s5840_s16 = smov (!%p188_p3, %s3978_s16), 1  ;;  %s4141_s24 = smov 16   ;;  %vm1284_vm6 = vcmask 158848   ;;  %vm1509_vm7 = vcmask 191648   ;;  %vm1735_vm8 = vcmask 224448  }
   0xe   : > { %204 = vst.msk [vmem:[#allocation2 + $0x18] sm:$0xff] %vm199_vm0, %v4137_v0  ;;  %s4077_s18 = sshll.u32 %s5840_s16, 8  ;;  %s4142_s25 = smov 20   ;;  %vm2399_vm9 = vcmask 1041408   ;;  %vm1960_vm10 = vcmask 257248   ;;  %vm2185_vm11 = vcmask 290048  }
   0xf   : > { %205 = vst.msk [vmem:[#allocation2 + $0x20] sm:$0xff] %vm199_vm0, %v4137_v0  ;;  %s4252_s21 = scalar_lea.vmem %s5824_s0, %s4077_s18  ;;  %s4143_s26 = smov 24   ;;  %vm2350_vm12 = vcmask 293888   ;;  %vm3844_vm13 = vcmask 1041409   ;;  %vm3846_vm14 = vcmask 1042434   ;;  %vm3848_vm15 = vcmask 1043459  }
  0x10   : > { %207 = vst.msk [vmem:[#allocation2 + $0x30] sm:$0xff] %vm199_vm0, %v4137_v0  ;;  %v255_v3 = vld [vmem:[%s4252_s21] sm:$0xff]  ;;  %v256_v8 = vld [vmem:[%s4252_s21 + $0x8] sm:$0xff]  ;;  %v262_v11 = vld [vmem:[%s4252_s21 + $0x38] sm:$0xff]  ;;  %s4144_s27 = smov 28   ;;  %s4145_s28 = smov 32  }
  0x11   : > { %208 = vst.msk [vmem:[#allocation2 + $0x38] sm:$0xff] %vm199_vm0, %v4137_v0  ;;  %v259_v9 = vld [vmem:[%s4252_s21 + $0x20] sm:$0xff]  ;;  %v260_v10 = vld [vmem:[%s4252_s21 + $0x28] sm:$0xff]  ;;  %v257_v12 = vld [vmem:[%s4252_s21 + $0x10] sm:$0xff]  ;;  %s4078_s13 = sshll.u32 %s5840_s16, 6 }
  0x12   : > { %210 = vst.msk [vmem:[#allocation2 + $0x48] sm:$0xff] %vm199_vm0, %v4137_v0  ;;  %v263_v13 = vld [vmem:[%s4252_s21 + $0x40] sm:$0xff]  ;;  %v265_v14 = vld [vmem:[%s4252_s21 + $0x50] sm:$0xff]  ;;  %v258_v15 = vld [vmem:[%s4252_s21 + $0x18] sm:$0xff] }
  0x13   : > { %211 = vst.msk [vmem:[#allocation2 + $0x50] sm:$0xff] %vm199_vm0, %v4137_v0  ;;  %v266_v16 = vld [vmem:[%s4252_s21 + $0x58] sm:$0xff]  ;;  %v268_v17 = vld [vmem:[%s4252_s21 + $0x68] sm:$0xff]  ;;  %v261_v19 = vld [vmem:[%s4252_s21 + $0x30] sm:$0xff] }
  0x14   : > { %v417_v1 = vld [vmem:[#allocation2 + $0x1] sm:$0xff]  ;;  %213 = vst.msk [vmem:[#allocation2 + $0x60] sm:$0xff] %vm199_vm0, %v4137_v0  ;;  %v269_v22 = vld [vmem:[%s4252_s21 + $0x70] sm:$0xff]  ;;  %v274_v31 = vld [vmem:[%s4252_s21 + $0x98] sm:$0xff] }
  0x15   : > { %v449_v2 = vpack.c.bf16 %v417_v1, %v417_v1  ;;  %214 = vst.msk [vmem:[#allocation2 + $0x68] sm:$0xff] %vm199_vm0, %v4137_v0  ;;  %v271_v24 = vld [vmem:[%s4252_s21 + $0x80] sm:$0xff]  ;;  %v264_v25 = vld [vmem:[%s4252_s21 + $0x48] sm:$0xff]  ;;  %v277_v37 = vld [vmem:[%s4252_s21 + $0xb0] sm:$0xff] }
  0x16   : > { %216 = vst.msk [vmem:[#allocation2 + $0x78] sm:$0xff] %vm199_vm0, %v4137_v0  ;;  %v272_v28 = vld [vmem:[%s4252_s21 + $0x88] sm:$0xff]  ;;  %v267_v35 = vld [vmem:[%s4252_s21 + $0x60] sm:$0xff]  ;;  %v270_v44 = vld [vmem:[%s4252_s21 + $0x78] sm:$0xff] }
  0x17   : > { %513 = vrot.lane.b32.xlu0 %v449_v2, %s4138_s17  ;;  %217 = vst.msk [vmem:[#allocation2 + $0x80] sm:$0xff] %vm199_vm0, %v4137_v0  ;;  %v275_v36 = vld [vmem:[%s4252_s21 + $0xa0] sm:$0xff]  ;;  %v278_v45 = vld [vmem:[%s4252_s21 + $0xb8] sm:$0xff]  ;;  %v280_v46 = vld [vmem:[%s4252_s21 + $0xc8] sm:$0xff] }
  0x18   : > { %219 = vst.msk [vmem:[#allocation2 + $0x90] sm:$0xff] %vm199_vm0, %v4137_v0  ;;  %v273_v53 = vld [vmem:[%s4252_s21 + $0x90] sm:$0xff]  ;;  %v283_v55 = vld [vmem:[%s4252_s21 + $0xe0] sm:$0xff]  ;;  %v276_v62 = vld [vmem:[%s4252_s21 + $0xa8] sm:$0xff] }
  0x19   : > { %220 = vst.msk [vmem:[#allocation2 + $0x98] sm:$0xff] %vm199_vm0, %v4137_v0  ;;  %v281_v54 = vld [vmem:[%s4252_s21 + $0xd0] sm:$0xff]  ;;  %v284_v63 = vld [vmem:[%s4252_s21 + $0xe8] sm:$0xff] }
  0x1a   : > { %222 = vst.msk [vmem:[#allocation2 + $0xa8] sm:$0xff] %vm199_vm0, %v4137_v0 }
  0x1b   : > { %223 = vst.msk [vmem:[#allocation2 + $0xb0] sm:$0xff] %vm199_vm0, %v4137_v0 }
  0x1c   : > { %225 = vst.msk [vmem:[#allocation2 + $0xc0] sm:$0xff] %vm199_vm0, %v4137_v0 }
  0x1d   : > { %226 = vst.msk [vmem:[#allocation2 + $0xc8] sm:$0xff] %vm199_vm0, %v4137_v0 }
  0x1e   : > { %228 = vst.msk [vmem:[#allocation2 + $0xd8] sm:$0xff] %vm199_vm0, %v4137_v0 }
  0x1f   : > { %229 = vst.msk [vmem:[#allocation2 + $0xe0] sm:$0xff] %vm199_vm0, %v4137_v0 }
  0x20   : > { %231 = vst.msk [vmem:[#allocation2 + $0xf0] sm:$0xff] %vm199_vm0, %v4137_v0 }
  0x21   : > { %232 = vst.msk [vmem:[#allocation2 + $0xf8] sm:$0xff] %vm199_vm0, %v4137_v0 }
  0x22   : > { %234 = vst.msk [vmem:[#allocation2 + $0x108] sm:$0xff] %vm199_vm0, %v4137_v0 }
  0x23   : > { %235 = vst.msk [vmem:[#allocation2 + $0x110] sm:$0xff] %vm199_vm0, %v4137_v0 }
  0x24   : > { %237 = vst.msk [vmem:[#allocation2 + $0x120] sm:$0xff] %vm199_vm0, %v4137_v0 }
  0x25   : > { %238 = vst.msk [vmem:[#allocation2 + $0x128] sm:$0xff] %vm199_vm0, %v4137_v0 }
  0x26   : > { %240 = vst.msk [vmem:[#allocation2 + $0x138] sm:$0xff] %vm199_vm0, %v4137_v0 }
  0x27   : > { %241 = vst.msk [vmem:[#allocation2 + $0x140] sm:$0xff] %vm199_vm0, %v4137_v0 }
  0x28   : > { %243 = vst.msk [vmem:[#allocation2 + $0x150] sm:$0xff] %vm199_vm0, %v4137_v0 }
  0x29   : > { %244 = vst.msk [vmem:[#allocation2 + $0x158] sm:$0xff] %vm199_vm0, %v4137_v0 }
  0x2a   : > { %246 = vst.msk [vmem:[#allocation2 + $0x168] sm:$0xff] %vm199_vm0, %v4137_v0 }
  0x2b   : > { %247 = vst.msk [vmem:[#allocation2 + $0x170] sm:$0xff] %vm199_vm0, %v4137_v0 }
  0x2c   : > { %249 = vst.msk [vmem:[#allocation2 + $0x180] sm:$0xff] %vm199_vm0, %v4137_v0 }
  0x2d   : > { %250 = vst.msk [vmem:[#allocation2 + $0x188] sm:$0xff] %vm199_vm0, %v4137_v0 }
  0x2e   : > { %252 = vst.msk [vmem:[#allocation2 + $0x198] sm:$0xff] %vm199_vm0, %v4137_v0 }
  0x2f   : > { %253 = vst.msk [vmem:[#allocation2 + $0x1a0] sm:$0xff] %vm199_vm0, %v4137_v0 }
  0x30   : > { %288 = vst.msk [vmem:[#allocation2 + $0x19] sm:$0xff] %vm199_vm0, %v255_v3 }
  0x31   : > { %203 = vst.msk [vmem:[#allocation2 + $0x10] sm:$0x3] %vm202_vm1, %v4137_v0 }
  0x32   : > { %206 = vst.msk [vmem:[#allocation2 + $0x28] sm:$0x3] %vm202_vm1, %v4137_v0 }
  0x33   : > { %209 = vst.msk [vmem:[#allocation2 + $0x40] sm:$0x3] %vm202_vm1, %v4137_v0 }
  0x34   : > { %212 = vst.msk [vmem:[#allocation2 + $0x58] sm:$0x3] %vm202_vm1, %v4137_v0 }
  0x35   : > { %215 = vst.msk [vmem:[#allocation2 + $0x70] sm:$0x3] %vm202_vm1, %v4137_v0 }
  0x36   : > { %218 = vst.msk [vmem:[#allocation2 + $0x88] sm:$0x3] %vm202_vm1, %v4137_v0 }
  0x37   : > { %v419_v4 = vld [vmem:[#allocation2 + $0x19] sm:$0xff]  ;;  %221 = vst.msk [vmem:[#allocation2 + $0xa0] sm:$0x3] %vm202_vm1, %v4137_v0 }
  0x38   : > { %v451_v5 = vpack.c.bf16 %v419_v4, %v419_v4  ;;  %v418_v6 = vld [vmem:[#allocation2 + $0x9] sm:$0xff]  ;;  %224 = vst.msk [vmem:[#allocation2 + $0xb8] sm:$0x3] %vm202_vm1, %v4137_v0 }
  0x39   : > { %v450_v7 = vpack.c.bf16 %v418_v6, %v418_v6  ;;  %227 = vst.msk [vmem:[#allocation2 + $0xd0] sm:$0x3] %vm202_vm1, %v4137_v0  ;;  %v279_v6 = vld [vmem:[%s4252_s21 + $0xc0] sm:$0xff] }
  0x3a   : > { %517 = vrot.lane.b32.xlu1 %v451_v5, %s4138_s17  ;;  %230 = vst.msk [vmem:[#allocation2 + $0xe8] sm:$0x3] %vm202_vm1, %v4137_v0 }
  0x3b   : > { %515 = vrot.lane.b32.xlu0 %v450_v7, %s4138_s17  ;;  %233 = vst.msk [vmem:[#allocation2 + $0x100] sm:$0x3] %vm202_vm1, %v4137_v0 }
  0x3c   : > { %236 = vst.msk [vmem:[#allocation2 + $0x118] sm:$0x3] %vm202_vm1, %v4137_v0 }
  0x3d   : > { %239 = vst.msk [vmem:[#allocation2 + $0x130] sm:$0x3] %vm202_vm1, %v4137_v0 }
  0x3e   : > { %242 = vst.msk [vmem:[#allocation2 + $0x148] sm:$0x3] %vm202_vm1, %v4137_v0 }
  0x3f   : > { %245 = vst.msk [vmem:[#allocation2 + $0x160] sm:$0x3] %vm202_vm1, %v4137_v0 }
  0x40   : > { %248 = vst.msk [vmem:[#allocation2 + $0x178] sm:$0x3] %vm202_vm1, %v4137_v0 }
  0x41   : > { %251 = vst.msk [vmem:[#allocation2 + $0x190] sm:$0x3] %vm202_vm1, %v4137_v0 }
  0x42   : > { %254 = vst.msk [vmem:[#allocation2 + $0x1a8] sm:$0x3] %vm202_vm1, %v4137_v0  ;;  %vm3852_vm1 = vcmask 1045509  }
  0x43   : > { %289 = vst.msk [vmem:[#allocation2 + $0x21] sm:$0xff] %vm199_vm0, %v256_v8 }
  0x44   : > { %292 = vst.msk [vmem:[#allocation2 + $0x49] sm:$0xff] %vm199_vm0, %v259_v9 }
  0x45   : > { %293 = vst.msk [vmem:[#allocation2 + $0x51] sm:$0xff] %vm199_vm0, %v260_v10 }
  0x46   : > { %295 = vst.msk [vmem:[#allocation2 + $0x69] sm:$0xff] %vm199_vm0, %v262_v11 }
  0x47   : > { %290 = vst.msk [vmem:[#allocation2 + $0x31] sm:$0xff] %vm199_vm0, %v257_v12 }
  0x48   : > { %296 = vst.msk [vmem:[#allocation2 + $0x79] sm:$0xff] %vm199_vm0, %v263_v13  ;;  %v282_v13 = vld [vmem:[%s4252_s21 + $0xd8] sm:$0xff] }
  0x49   : > { %298 = vst.msk [vmem:[#allocation2 + $0x91] sm:$0xff] %vm199_vm0, %v265_v14 }
  0x4a   : > { %v420_v18 = vld [vmem:[#allocation2 + $0x21] sm:$0xff]  ;;  %291 = vst.msk [vmem:[#allocation2 + $0x39] sm:$0xff] %vm199_vm0, %v258_v15 }
  0x4b   : > { %v452_v20 = vpack.c.bf16 %v420_v18, %v420_v18  ;;  %v423_v21 = vld [vmem:[#allocation2 + $0x49] sm:$0xff]  ;;  %299 = vst.msk [vmem:[#allocation2 + $0x99] sm:$0xff] %vm199_vm0, %v266_v16 }
  0x4c   : > { %v455_v23 = vpack.c.bf16 %v423_v21, %v423_v21  ;;  %301 = vst.msk [vmem:[#allocation2 + $0xb1] sm:$0xff] %vm199_vm0, %v268_v17  ;;  %v424_v26 = vld [vmem:[#allocation2 + $0x51] sm:$0xff] }
  0x4d   : > { %519 = vrot.lane.b32.xlu1 %v452_v20, %s4138_s17  ;;  %294 = vst.msk [vmem:[#allocation2 + $0x61] sm:$0xff] %vm199_vm0, %v261_v19  ;;  %v426_v29 = vld [vmem:[#allocation2 + $0x69] sm:$0xff]  ;;  %v456_v32 = vpack.c.bf16 %v424_v26, %v424_v26 }
  0x4e   : > { %525 = vrot.lane.b32.xlu0 %v455_v23, %s4138_s17  ;;  %v421_v27 = vld [vmem:[#allocation2 + $0x31] sm:$0xff]  ;;  %302 = vst.msk [vmem:[#allocation2 + $0xc1] sm:$0xff] %vm199_vm0, %v269_v22  ;;  %v458_v33 = vpack.c.bf16 %v426_v29, %v426_v29 }
  0x4f   : > { %v453_v30 = vpack.c.bf16 %v421_v27, %v421_v27  ;;  %304 = vst.msk [vmem:[#allocation2 + $0xd9] sm:$0xff] %vm199_vm0, %v271_v24  ;;  %v427_v39 = vld [vmem:[#allocation2 + $0x79] sm:$0xff]  ;;  %v643_v29 = vld [vmem:[#allocation2 + $0xa] sm:$0xff] }
  0x50   : > { %297 = vst.msk [vmem:[#allocation2 + $0x81] sm:$0xff] %vm199_vm0, %v264_v25  ;;  %v429_v40 = vld [vmem:[#allocation2 + $0x91] sm:$0xff]  ;;  %v459_v41 = vpack.c.bf16 %v427_v39, %v427_v39  ;;  %v321_v39 = vld [vmem:[#allocation2 + $0x8] sm:$0xff] }
  0x51   : > { %521 = vrot.lane.b32.xlu2 %v453_v30, %s4138_s17  ;;  %305 = vst.msk [vmem:[#allocation2 + $0xe1] sm:$0xff] %vm199_vm0, %v272_v28  ;;  %v422_v34 = vld [vmem:[#allocation2 + $0x39] sm:$0xff]  ;;  %v461_v42 = vpack.c.bf16 %v429_v40, %v429_v40 }
  0x52   : > { %307 = vst.msk [vmem:[#allocation2 + $0xf9] sm:$0xff] %vm199_vm0, %v274_v31  ;;  %v454_v38 = vpack.c.bf16 %v422_v34, %v422_v34  ;;  %v430_v48 = vld [vmem:[#allocation2 + $0x99] sm:$0xff] }
  0x53   : > { %300 = vst.msk [vmem:[#allocation2 + $0xa9] sm:$0xff] %vm199_vm0, %v267_v35  ;;  %v432_v49 = vld [vmem:[#allocation2 + $0xb1] sm:$0xff]  ;;  %v462_v50 = vpack.c.bf16 %v430_v48, %v430_v48  ;;  %v320_v28 = vld [vmem:[#allocation2] sm:$0xff] }
  0x54   : > { %308 = vst.msk [vmem:[#allocation2 + $0x109] sm:$0xff] %vm199_vm0, %v275_v36  ;;  %v425_v43 = vld [vmem:[#allocation2 + $0x61] sm:$0xff]  ;;  %v464_v51 = vpack.c.bf16 %v432_v49, %v432_v49  ;;  %v352_v31 = vpack.c.bf16 %v320_v28, %v320_v28  ;;  %v646_v40 = vld [vmem:[#allocation2 + $0x32] sm:$0xff] }
  0x55   : > { %527 = vrot.lane.b32.xlu1 %v456_v32, %s4138_s17  ;;  %310 = vst.msk [vmem:[#allocation2 + $0x121] sm:$0xff] %vm199_vm0, %v277_v37  ;;  %v457_v47 = vpack.c.bf16 %v425_v43, %v425_v43  ;;  %v433_v57 = vld [vmem:[#allocation2 + $0xc1] sm:$0xff]  ;;  %v324_v37 = vld [vmem:[#allocation2 + $0x30] sm:$0xff]  ;;  %v353_v43 = vpack.c.bf16 %v321_v39, %v321_v39  ;;  %v325_v49 = vld [vmem:[#allocation2 + $0x38] sm:$0xff] }
  0x56   : > { %531 = vrot.lane.b32.xlu0 %v458_v33, %s4138_s17  ;;  %303 = vst.msk [vmem:[#allocation2 + $0xc9] sm:$0xff] %vm199_vm0, %v270_v44  ;;  %v435_v58 = vld [vmem:[#allocation2 + $0xd9] sm:$0xff]  ;;  %v465_v59 = vpack.c.bf16 %v433_v57, %v433_v57  ;;  %v675_v33 = vpack.c.bf16 %v643_v29, %v643_v29 }
  0x57   : > { %311 = vst.msk [vmem:[#allocation2 + $0x129] sm:$0xff] %vm199_vm0, %v278_v45  ;;  %v428_v52 = vld [vmem:[#allocation2 + $0x81] sm:$0xff]  ;;  %v467_v60 = vpack.c.bf16 %v435_v58, %v435_v58  ;;  %v678_v45 = vpack.c.bf16 %v646_v40, %v646_v40  ;;  %v338_v40 = vld [vmem:[#allocation2 + $0xd8] sm:$0xff] }
  0x58   : > { %313 = vst.msk [vmem:[#allocation2 + $0x141] sm:$0xff] %vm199_vm0, %v280_v46  ;;  %v460_v56 = vpack.c.bf16 %v428_v52, %v428_v52  ;;  %v436_v1 = vld [vmem:[#allocation2 + $0xe1] sm:$0xff]  ;;  %v649_v52 = vld [vmem:[#allocation2 + $0x52] sm:$0xff] }
  0x59   : > { %523 = vrot.lane.b32.xlu2 %v454_v38, %s4138_s17  ;;  %306 = vst.msk [vmem:[#allocation2 + $0xf1] sm:$0xff] %vm199_vm0, %v273_v53  ;;  %v438_v2 = vld [vmem:[#allocation2 + $0xf9] sm:$0xff]  ;;  %v468_v3 = vpack.c.bf16 %v436_v1, %v436_v1  ;;  %v642_v46 = vld [vmem:[#allocation2 + $0x2] sm:$0xff]  ;;  %v4405_v53 = vpack.c.bf16 %v325_v49, %v325_v49  ;;  %v681_v57 = vpack.c.bf16 %v649_v52, %v649_v52 }
  0x5a   : > { %314 = vst.msk [vmem:[#allocation2 + $0x151] sm:$0xff] %vm199_vm0, %v281_v54  ;;  %v431_v61 = vld [vmem:[#allocation2 + $0xa9] sm:$0xff]  ;;  %v470_v4 = vpack.c.bf16 %v438_v2, %v438_v2  ;;  %v644_v35 = vld [vmem:[#allocation2 + $0x1a] sm:$0xff]  ;;  %v674_v48 = vpack.c.bf16 %v642_v46, %v642_v46  ;;  %v4483_v49 = vpack.c.bf16 %v338_v40, %v338_v40 }
  0x5b   : > { %316 = vst.msk [vmem:[#allocation2 + $0x169] sm:$0xff] %vm199_vm0, %v283_v55  ;;  %v463_v0 = vpack.c.bf16 %v431_v61, %v431_v61  ;;  %v439_v8 = vld [vmem:[#allocation2 + $0x109] sm:$0xff]  ;;  %v322_v38 = vld [vmem:[#allocation2 + $0x18] sm:$0xff]  ;;  %v676_v44 = vpack.c.bf16 %v644_v35, %v644_v35  ;;  %v328_v61 = vld [vmem:[#allocation2 + $0x60] sm:$0xff] }
  0x5c   : > { %309 = vst.msk [vmem:[#allocation2 + $0x111] sm:$0xff] %vm199_vm0, %v276_v62  ;;  %v441_v9 = vld [vmem:[#allocation2 + $0x121] sm:$0xff]  ;;  %v471_v10 = vpack.c.bf16 %v439_v8, %v439_v8  ;;  %v327_v62 = vld [vmem:[#allocation2 + $0x50] sm:$0xff]  ;;  %v4420_v1 = vpack.c.bf16 %v328_v61, %v328_v61 }
  0x5d   : > { %533 = vrot.lane.b32.xlu1 %v459_v41, %s4138_s17  ;;  %317 = vst.msk [vmem:[#allocation2 + $0x171] sm:$0xff] %vm199_vm0, %v284_v63  ;;  %v434_v5 = vld [vmem:[#allocation2 + $0xc9] sm:$0xff]  ;;  %v473_v11 = vpack.c.bf16 %v441_v9, %v441_v9  ;;  %v4393_v41 = vpack.c.bf16 %v324_v37, %v324_v37  ;;  %v4422_v2 = vpack.c.bf16 %v327_v62, %v327_v62  ;;  %v336_v39 = vld [vmem:[#allocation2 + $0xc0] sm:$0xff] }
  0x5e   : > { %537 = vrot.lane.b32.xlu0 %v461_v42, %s4138_s17  ;;  %312 = vst.msk [vmem:[#allocation2 + $0x139] sm:$0xff] %vm199_vm0, %v279_v6  ;;  %v466_v7 = vpack.c.bf16 %v434_v5, %v434_v5  ;;  %v442_v15 = vld [vmem:[#allocation2 + $0x129] sm:$0xff]  ;;  %v4395_v42 = vpack.c.bf16 %v322_v38, %v322_v38  ;;  %v4477_v46 = vpack.c.bf16 %v336_v39, %v336_v39 }
  0x5f   : > { %315 = vst.msk [vmem:[#allocation2 + $0x159] sm:$0xff] %vm199_vm0, %v282_v13  ;;  %v444_v16 = vld [vmem:[#allocation2 + $0x141] sm:$0xff]  ;;  %v474_v17 = vpack.c.bf16 %v442_v15, %v442_v15  ;;  %v648_v6 = vld [vmem:[#allocation2 + $0x4a] sm:$0xff]  ;;  %v330_v13 = vld [vmem:[#allocation2 + $0x78] sm:$0xff] }
  0x60   : > { %v437_v12 = vld [vmem:[#allocation2 + $0xf1] sm:$0xff]  ;;  %v476_v18 = vpack.c.bf16 %v444_v16, %v444_v16  ;;  %385 = vst.msk [vmem:[#allocation3] sm:$0xf] %vm384_vm2, %v352_v31  ;;  %v645_v58 = vld [vmem:[#allocation2 + $0x22] sm:$0xff]  ;;  %v655_v15 = vld [vmem:[#allocation2 + $0x9a] sm:$0xff] }
  0x61   : > { %529 = vrot.lane.b32.xlu2 %v457_v47, %s4138_s17  ;;  %v469_v14 = vpack.c.bf16 %v437_v12, %v437_v12  ;;  %v445_v21 = vld [vmem:[#allocation2 + $0x151] sm:$0xff]  ;;  %389 = vst.msk [vmem:[#allocation3 + $0x10] sm:$0xf] %vm384_vm2, %v4393_v41  ;;  %v647_v47 = vld [vmem:[#allocation2 + $0x3a] sm:$0xff]  ;;  %v329_v63 = vld [vmem:[#allocation2 + $0x68] sm:$0xff] }
  0x62   : > { %v447_v22 = vld [vmem:[#allocation2 + $0x169] sm:$0xff]  ;;  %v477_v23 = vpack.c.bf16 %v445_v21, %v445_v21  ;;  %387 = vst.msk [vmem:[#allocation3 + $0x8] sm:$0xf] %vm384_vm2, %v4395_v42  ;;  %v331_v12 = vld [vmem:[#allocation2 + $0x80] sm:$0xff] }
  0x63   : > { %v440_v19 = vld [vmem:[#allocation2 + $0x111] sm:$0xff]  ;;  %v479_v24 = vpack.c.bf16 %v447_v22, %v447_v22  ;;  %386 = vst.msk [vmem:[#allocation3 + $0x4] sm:$0xf] %vm384_vm2, %v353_v43  ;;  %v653_v9 = vld [vmem:[#allocation2 + $0x82] sm:$0xff]  ;;  %v4438_v16 = vpack.c.bf16 %v331_v12, %v331_v12 }
  0x64   : > { %v472_v20 = vpack.c.bf16 %v440_v19, %v440_v19  ;;  %v448_v27 = vld [vmem:[#allocation2 + $0x171] sm:$0xff]  ;;  %390 = vst.msk [vmem:[#allocation3 + $0x14] sm:$0xf] %vm384_vm2, %v4405_v53  ;;  %v685_v19 = vpack.c.bf16 %v653_v9, %v653_v9  ;;  %v658_v28 = vld [vmem:[#allocation2 + $0xc2] sm:$0xff] }
  0x65   : > { %539 = vrot.lane.b32.xlu1 %v462_v50, %s4138_s17  ;;  %v443_v25 = vld [vmem:[#allocation2 + $0x139] sm:$0xff]  ;;  %v480_v32 = vpack.c.bf16 %v448_v27, %v448_v27  ;;  %393 = vst.msk [vmem:[#allocation3 + $0x20] sm:$0xf] %vm384_vm2, %v4420_v1  ;;  %v651_v21 = vld [vmem:[#allocation2 + $0x6a] sm:$0xff] }
  0x66   : > { %543 = vrot.lane.b32.xlu0 %v464_v51, %s4138_s17  ;;  %v475_v26 = vpack.c.bf16 %v443_v25, %v443_v25  ;;  %v446_v34 = vld [vmem:[#allocation2 + $0x159] sm:$0xff]  ;;  %v326_v51 = vld [vmem:[#allocation2 + $0x48] sm:$0xff]  ;;  %392 = vst.msk [vmem:[#allocation3 + $0x1c] sm:$0xf] %vm384_vm2, %v4422_v2  ;;  %v335_v27 = vld [vmem:[#allocation2 + $0xb0] sm:$0xff] }
  0x67   : > { %v478_v36 = vpack.c.bf16 %v446_v34, %v446_v34  ;;  %v323_v50 = vld [vmem:[#allocation2 + $0x20] sm:$0xff]  ;;  %v4409_v55 = vpack.c.bf16 %v326_v51, %v326_v51  ;;  %396 = vst.msk [vmem:[#allocation3 + $0x2c] sm:$0xf] %vm384_vm2, %v4438_v16  ;;  %v334_v25 = vld [vmem:[#allocation2 + $0xa8] sm:$0xff]  ;;  %v4460_v31 = vpack.c.bf16 %v335_v27, %v335_v27  ;;  %v654_v34 = vld [vmem:[#allocation2 + $0x92] sm:$0xff] }
  0x68   : > { %v4407_v54 = vpack.c.bf16 %v323_v50, %v323_v50  ;;  %v4456_v29 = vpack.c.bf16 %v334_v25, %v334_v25  ;;  %v4472_v37 = vpack.c.bf16 %v654_v34, %v654_v34  ;;  %v337_v38 = vld [vmem:[#allocation2 + $0xc8] sm:$0xff]  ;;  %v657_v51 = vld [vmem:[#allocation2 + $0xb2] sm:$0xff]  ;;  %401 = vst.msk [vmem:[#allocation3 + $0x40] sm:$0xf] %vm384_vm2, %v4477_v46  ;;  %v663_v27 = vld [vmem:[#allocation2 + $0xfa] sm:$0xff] }
  0x69   : > { %535 = vrot.lane.b32.xlu2 %v460_v56, %s4138_s17  ;;  %v679_v56 = vpack.c.bf16 %v647_v47, %v647_v47  ;;  %391 = vst.msk [vmem:[#allocation3 + $0x18] sm:$0xf] %vm384_vm2, %v4409_v55  ;;  %v664_v62 = vld [vmem:[#allocation2 + $0x10a] sm:$0xff]  ;;  %v346_v34 = vld [vmem:[#allocation2 + $0x138] sm:$0xff] }
  0x6a   : > { %388 = vst.msk [vmem:[#allocation3 + $0xc] sm:$0xf] %vm384_vm2, %v4407_v54  ;;  %v343_v12 = vld [vmem:[#allocation2 + $0x110] sm:$0xff]  ;;  %v4538_v40 = vpack.c.bf16 %v346_v34, %v346_v34 }
  0x6b   : > { %399 = vst.msk [vmem:[#allocation3 + $0x38] sm:$0xf] %vm384_vm2, %v4456_v29  ;;  %v670_v39 = vld [vmem:[#allocation2 + $0x152] sm:$0xff] }
  0x6c   : > { %400 = vst.msk [vmem:[#allocation3 + $0x3c] sm:$0xf] %vm384_vm2, %v4460_v31 }
  0x6d   : > { %545 = vrot.lane.b32.xlu1 %v465_v59, %s4138_s17  ;;  %v650_v59 = vld [vmem:[#allocation2 + $0x62] sm:$0xff]  ;;  %403 = vst.msk [vmem:[#allocation3 + $0x48] sm:$0xf] %vm384_vm2, %v4483_v49 }
  0x6e   : > { %549 = vrot.lane.b32.xlu0 %v467_v60, %s4138_s17  ;;  %v677_v60 = vpack.c.bf16 %v645_v58, %v645_v58  ;;  %v340_v58 = vld [vmem:[#allocation2 + $0xf0] sm:$0xff]  ;;  %411 = vst.msk [vmem:[#allocation3 + $0x68] sm:$0xf] %vm384_vm2, %v4538_v40 }
  0x71   : > { %541 = vrot.lane.b32.xlu2 %v463_v0, %s4138_s17  ;;  %v652_v0 = vld [vmem:[#allocation2 + $0x7a] sm:$0xff] }
  0x72   : > { %v684_v5 = vpack.c.bf16 %v652_v0, %v652_v0 }
  0x75   : > { %551 = vrot.lane.b32.xlu1 %v468_v3, %s4138_s17  ;;  %v4424_v3 = vpack.c.bf16 %v329_v63, %v329_v63  ;;  %v4496_v63 = vpack.c.bf16 %v340_v58, %v340_v58 }
  0x76   : > { %555 = vrot.lane.b32.xlu0 %v470_v4, %s4138_s17  ;;  %v682_v4 = vpack.c.bf16 %v650_v59, %v650_v59  ;;  %v339_v59 = vld [vmem:[#allocation2 + $0xe0] sm:$0xff] }
  0x77   : > { %394 = vst.msk [vmem:[#allocation3 + $0x24] sm:$0xf] %vm384_vm2, %v4424_v3  ;;  %v4498_v0 = vpack.c.bf16 %v339_v59, %v339_v59  ;;  %v349_v59 = vld [vmem:[#allocation2 + $0x158] sm:$0xff] }
  0x78   : > { %405 = vst.msk [vmem:[#allocation3 + $0x50] sm:$0xf] %vm384_vm2, %v4496_v63 }
  0x79   : > { %547 = vrot.lane.b32.xlu2 %v466_v7, %s4138_s17  ;;  %404 = vst.msk [vmem:[#allocation3 + $0x4c] sm:$0xf] %vm384_vm2, %v4498_v0 }
  0x7d   : > { %557 = vrot.lane.b32.xlu1 %v471_v10, %s4138_s17 }
  0x7e   : > { %561 = vrot.lane.b32.xlu0 %v473_v11, %s4138_s17  ;;  %v680_v11 = vpack.c.bf16 %v648_v6, %v648_v6 }
  0x81   : > { %553 = vrot.lane.b32.xlu2 %v469_v14, %s4138_s17  ;;  %v332_v14 = vld [vmem:[#allocation2 + $0x90] sm:$0xff] }
  0x85   : > { %563 = vrot.lane.b32.xlu1 %v474_v17, %s4138_s17  ;;  %v4440_v17 = vpack.c.bf16 %v330_v13, %v330_v13  ;;  %v342_v13 = vld [vmem:[#allocation2 + $0x108] sm:$0xff] }
  0x86   : > { %567 = vrot.lane.b32.xlu0 %v476_v18, %s4138_s17  ;;  %v4442_v18 = vpack.c.bf16 %v332_v14, %v332_v14  ;;  %v344_v14 = vld [vmem:[#allocation2 + $0x120] sm:$0xff] }
  0x87   : > { %395 = vst.msk [vmem:[#allocation3 + $0x28] sm:$0xf] %vm384_vm2, %v4440_v17  ;;  %v4525_v25 = vpack.c.bf16 %v344_v14, %v344_v14 }
  0x88   : > { %397 = vst.msk [vmem:[#allocation3 + $0x30] sm:$0xf] %vm384_vm2, %v4442_v18 }
  0x89   : > { %559 = vrot.lane.b32.xlu2 %v472_v20, %s4138_s17  ;;  %v514_v30 = vpop.permute.xlu0 %513  ;;  %v687_v20 = vpack.c.bf16 %v655_v15, %v655_v15  ;;  %409 = vst.msk [vmem:[#allocation3 + $0x60] sm:$0xf] %vm384_vm2, %v4525_v25 }
  0x8a   : > { %610 = vst.msk [vmem:[#allocation3] sm:$0xf] %vm609_vm3, %v514_v30 }
  0x8d   : > { %569 = vrot.lane.b32.xlu1 %v477_v23, %s4138_s17  ;;  %v656_v23 = vld [vmem:[#allocation2 + $0xaa] sm:$0xff] }
  0x8e   : > { %573 = vrot.lane.b32.xlu0 %v479_v24, %s4138_s17  ;;  %v4453_v24 = vpack.c.bf16 %v651_v21, %v651_v21  ;;  %v4519_v21 = vpack.c.bf16 %v342_v13, %v342_v13  ;;  %v669_v13 = vld [vmem:[#allocation2 + $0x142] sm:$0xff] }
  0x90   : > { %407 = vst.msk [vmem:[#allocation3 + $0x58] sm:$0xf] %vm384_vm2, %v4519_v21 }
  0x91   : > { %565 = vrot.lane.b32.xlu2 %v475_v26, %s4138_s17  ;;  %v333_v26 = vld [vmem:[#allocation2 + $0x98] sm:$0xff] }
  0x92   : > { %v4458_v30 = vpack.c.bf16 %v333_v26, %v333_v26 }
  0x94   : > { %398 = vst.msk [vmem:[#allocation3 + $0x34] sm:$0xf] %vm384_vm2, %v4458_v30 }
  0x95   : > { %575 = vrot.lane.b32.xlu1 %v480_v32, %s4138_s17  ;;  %v688_v32 = vpack.c.bf16 %v656_v23, %v656_v23 }
  0x96   : > { %740 = vrot.lane.b32.xlu0 %v675_v33, %s4139_s22  ;;  %v690_v33 = vpack.c.bf16 %v658_v28, %v658_v28 }
  0x99   : > { %571 = vrot.lane.b32.xlu2 %v478_v36, %s4138_s17  ;;  %v659_v36 = vld [vmem:[#allocation2 + $0xca] sm:$0xff]  ;;  %s5446_s17 = scalar_lea.vmem %s5828_s4, %s4078_s13 }
  0x9d   : > { %742 = vrot.lane.b32.xlu1 %v676_v44, %s4139_s22  ;;  %v661_v44 = vld [vmem:[#allocation2 + $0xe2] sm:$0xff] }
  0x9e   : > { %746 = vrot.lane.b32.xlu0 %v678_v45, %s4139_s22  ;;  %v4475_v45 = vpack.c.bf16 %v337_v38, %v337_v38  ;;  %v693_v50 = vpack.c.bf16 %v661_v44, %v661_v44 }
  0xa0   : > { %402 = vst.msk [vmem:[#allocation3 + $0x44] sm:$0xf] %vm384_vm2, %v4475_v45 }
  0xa1   : > { %738 = vrot.lane.b32.xlu2 %v674_v48, %s4139_s22  ;;  %v691_v48 = vpack.c.bf16 %v659_v36, %v659_v36  ;;  %v347_v36 = vld [vmem:[#allocation2 + $0x140] sm:$0xff] }
  0xa5   : > { %748 = vrot.lane.b32.xlu1 %v679_v56, %s4139_s22  ;;  %v662_v56 = vld [vmem:[#allocation2 + $0xf2] sm:$0xff] }
  0xa6   : > { %752 = vrot.lane.b32.xlu0 %v681_v57, %s4139_s22  ;;  %v4491_v57 = vpack.c.bf16 %v657_v51, %v657_v51  ;;  %v666_v51 = vld [vmem:[#allocation2 + $0x122] sm:$0xff] }
  0xa7   : > { %v4554_v58 = vpack.c.bf16 %v666_v51, %v666_v51 }
  0xa9   : > { %744 = vrot.lane.b32.xlu2 %v677_v60, %s4139_s22  ;;  %v341_v60 = vld [vmem:[#allocation2 + $0xf8] sm:$0xff] }
  0xaa   : > { %v4504_v6 = vpack.c.bf16 %v341_v60, %v341_v60  ;;  %v348_v60 = vld [vmem:[#allocation2 + $0x150] sm:$0xff] }
  0xab   : > { %v522_v7 = vpop.permute.xlu2 %521 }
  0xac   : > { %614 = vst.msk [vmem:[#allocation3 + $0x10] sm:$0xf] %vm609_vm3, %v522_v7  ;;  %v518_v8 = vpop.permute.xlu1 %517  ;;  %v696_v7 = vpack.c.bf16 %v664_v62, %v664_v62 }
  0xad   : > { %754 = vrot.lane.b32.xlu1 %v682_v4, %s4139_s22  ;;  %612 = vst.msk [vmem:[#allocation3 + $0x8] sm:$0xf] %vm609_vm3, %v518_v8  ;;  %v516_v10 = vpop.permute.xlu0 %515  ;;  %v660_v8 = vld [vmem:[#allocation2 + $0xda] sm:$0xff] }
  0xae   : > { %758 = vrot.lane.b32.xlu0 %v684_v5, %s4139_s22  ;;  %611 = vst.msk [vmem:[#allocation3 + $0x4] sm:$0xf] %vm609_vm3, %v516_v10  ;;  %v694_v5 = vpack.c.bf16 %v662_v56, %v662_v56  ;;  %v665_v10 = vld [vmem:[#allocation2 + $0x112] sm:$0xff]  ;;  %v671_v56 = vld [vmem:[#allocation2 + $0x15a] sm:$0xff] }
  0xaf   : > { %406 = vst.msk [vmem:[#allocation3 + $0x54] sm:$0xf] %vm384_vm2, %v4504_v6  ;;  %v697_v23 = vpack.c.bf16 %v665_v10, %v665_v10 }
  0xb1   : > { %750 = vrot.lane.b32.xlu2 %v680_v11, %s4139_s22  ;;  %v4512_v11 = vpack.c.bf16 %v660_v8, %v660_v8 }
  0xb3   : > { %v524_v22 = vpop.permute.xlu2 %523 }
  0xb4   : > { %615 = vst.msk [vmem:[#allocation3 + $0x14] sm:$0xf] %vm609_vm3, %v524_v22 }
  0xb5   : > { %760 = vrot.lane.b32.xlu1 %v685_v19, %s4139_s22  ;;  %v667_v19 = vld [vmem:[#allocation2 + $0x12a] sm:$0xff] }
  0xb6   : > { %764 = vrot.lane.b32.xlu0 %v687_v20, %s4139_s22  ;;  %v4517_v20 = vpack.c.bf16 %v343_v12, %v343_v12  ;;  %v699_v26 = vpack.c.bf16 %v667_v19, %v667_v19  ;;  %v351_v19 = vld [vmem:[#allocation2 + $0x170] sm:$0xff] }
  0xb8   : > { %408 = vst.msk [vmem:[#allocation3 + $0x5c] sm:$0xf] %vm384_vm2, %v4517_v20 }
  0xb9   : > { %756 = vrot.lane.b32.xlu2 %v4453_v24, %s4139_s22 }
  0xbb   : > { %v530_v35 = vpop.permute.xlu2 %529 }
  0xbc   : > { %618 = vst.msk [vmem:[#allocation3 + $0x20] sm:$0xf] %vm609_vm3, %v530_v35  ;;  %v345_v35 = vld [vmem:[#allocation2 + $0x128] sm:$0xff] }
  0xbd   : > { %766 = vrot.lane.b32.xlu1 %v688_v32, %s4139_s22  ;;  %v668_v32 = vld [vmem:[#allocation2 + $0x13a] sm:$0xff] }
  0xbe   : > { %770 = vrot.lane.b32.xlu0 %v690_v33, %s4139_s22  ;;  %v4533_v33 = vpack.c.bf16 %v663_v27, %v663_v27  ;;  %v672_v27 = vld [vmem:[#allocation2 + $0x16a] sm:$0xff] }
  0xbf   : > { %v520_v43 = vpop.permute.xlu1 %519 }
  0xc0   : > { %613 = vst.msk [vmem:[#allocation3 + $0xc] sm:$0xf] %vm609_vm3, %v520_v43  ;;  %v526_v47 = vpop.permute.xlu0 %525  ;;  %v4540_v43 = vpack.c.bf16 %v345_v35, %v345_v35 }
  0xc1   : > { %616 = vst.msk [vmem:[#allocation3 + $0x18] sm:$0xf] %vm609_vm3, %v526_v47  ;;  %762 = vrot.lane.b32.xlu2 %v4472_v37, %s4139_s22  ;;  %v700_v47 = vpack.c.bf16 %v668_v32, %v668_v32  ;;  %v4591_v32 = vpack.c.bf16 %v672_v27, %v672_v27  ;;  %v1099_v27 = vld [vmem:[#allocation2 + $0x69] sm:$0xff] }
  0xc2   : > { %410 = vst.msk [vmem:[#allocation3 + $0x64] sm:$0xf] %vm384_vm2, %v4540_v43 }
  0xc3   : > { %v536_v52 = vpop.permute.xlu2 %535 }
  0xc4   : > { %621 = vst.msk [vmem:[#allocation3 + $0x2c] sm:$0xf] %vm609_vm3, %v536_v52 }
  0xc5   : > { %772 = vrot.lane.b32.xlu1 %v691_v48, %s4139_s22  ;;  %v4546_v48 = vpack.c.bf16 %v347_v36, %v347_v36 }
  0xc6   : > { %776 = vrot.lane.b32.xlu0 %v693_v50, %s4139_s22  ;;  %v702_v50 = vpack.c.bf16 %v670_v39, %v670_v39  ;;  %v285_v39 = vld [vmem:[%s4252_s21 + $0xf0] sm:$0xff] }
  0xc7   : > { %v528_v61 = vpop.permute.xlu1 %527  ;;  %412 = vst.msk [vmem:[#allocation3 + $0x6c] sm:$0xf] %vm384_vm2, %v4546_v48 }
  0xc8   : > { %617 = vst.msk [vmem:[#allocation3 + $0x1c] sm:$0xf] %vm609_vm3, %v528_v61  ;;  %v532_v4 = vpop.permute.xlu0 %531  ;;  %v350_v61 = vld [vmem:[#allocation2 + $0x168] sm:$0xff] }
  0xc9   : > { %619 = vst.msk [vmem:[#allocation3 + $0x24] sm:$0xf] %vm609_vm3, %v532_v4  ;;  %768 = vrot.lane.b32.xlu2 %v4491_v57, %s4139_s22  ;;  %v673_v4 = vld [vmem:[#allocation2 + $0x172] sm:$0xff]  ;;  %v4567_v10 = vpack.c.bf16 %v350_v61, %v350_v61 }
  0xca   : > { %v705_v12 = vpack.c.bf16 %v673_v4, %v673_v4  ;;  %318 = vst.msk [vmem:[#allocation2 + $0x181] sm:$0xff] %vm199_vm0, %v285_v39  ;;  %v1095_v61 = vld [vmem:[#allocation2 + $0x39] sm:$0xff] }
  0xcb   : > { %v542_v9 = vpop.permute.xlu2 %541  ;;  %415 = vst.msk [vmem:[#allocation3 + $0x78] sm:$0xf] %vm384_vm2, %v4567_v10 }
  0xcc   : > { %624 = vst.msk [vmem:[#allocation3 + $0x38] sm:$0xf] %vm609_vm3, %v542_v9  ;;  %v703_v9 = vpack.c.bf16 %v671_v56, %v671_v56 }
  0xcd   : > { %778 = vrot.lane.b32.xlu1 %v694_v5, %s4139_s22  ;;  %v4559_v5 = vpack.c.bf16 %v349_v59, %v349_v59  ;;  %v1093_v59 = vld [vmem:[#allocation2 + $0x21] sm:$0xff] }
  0xce   : > { %782 = vrot.lane.b32.xlu0 %v696_v7, %s4139_s22  ;;  %v4561_v7 = vpack.c.bf16 %v348_v60, %v348_v60  ;;  %v1125_v4 = vpack.c.bf16 %v1093_v59, %v1093_v59  ;;  %v1113_v59 = vld [vmem:[#allocation2 + $0x111] sm:$0xff] }
  0xcf   : > { %v534_v15 = vpop.permute.xlu1 %533  ;;  %414 = vst.msk [vmem:[#allocation3 + $0x74] sm:$0xf] %vm384_vm2, %v4559_v5 }
  0xd0   : > { %620 = vst.msk [vmem:[#allocation3 + $0x28] sm:$0xf] %vm609_vm3, %v534_v15  ;;  %v538_v22 = vpop.permute.xlu0 %537  ;;  %v4575_v15 = vpack.c.bf16 %v669_v13, %v669_v13  ;;  %v1098_v13 = vld [vmem:[#allocation2 + $0x61] sm:$0xff] }
  0xd1   : > { %622 = vst.msk [vmem:[#allocation3 + $0x30] sm:$0xf] %vm609_vm3, %v538_v22  ;;  %774 = vrot.lane.b32.xlu2 %v4512_v11, %s4139_s22 }
  0xd2   : > { %413 = vst.msk [vmem:[#allocation3 + $0x70] sm:$0xf] %vm384_vm2, %v4561_v7 }
  0xd3   : > { %v548_v28 = vpop.permute.xlu2 %547 }
  0xd4   : > { %627 = vst.msk [vmem:[#allocation3 + $0x44] sm:$0xf] %vm609_vm3, %v548_v28 }
  0xd5   : > { %784 = vrot.lane.b32.xlu1 %v697_v23, %s4139_s22  ;;  %v4580_v23 = vpack.c.bf16 %v351_v19, %v351_v19  ;;  %v1130_v19 = vpack.c.bf16 %v1098_v13, %v1098_v13 }
  0xd6   : > { %788 = vrot.lane.b32.xlu0 %v699_v26, %s4139_s22 }
  0xd7   : > { %v540_v38 = vpop.permute.xlu1 %539  ;;  %416 = vst.msk [vmem:[#allocation3 + $0x7c] sm:$0xf] %vm384_vm2, %v4580_v23  ;;  %vm3854_vm2 = vcmask 1046534  }
  0xd8   : > { %623 = vst.msk [vmem:[#allocation3 + $0x34] sm:$0xf] %vm609_vm3, %v540_v38  ;;  %v544_v44 = vpop.permute.xlu0 %543 }
  0xd9   : > { %625 = vst.msk [vmem:[#allocation3 + $0x3c] sm:$0xf] %vm609_vm3, %v544_v44  ;;  %780 = vrot.lane.b32.xlu2 %v4533_v33, %s4139_s22  ;;  %v286_v44 = vld [vmem:[%s4252_s21 + $0xf8] sm:$0xff] }
  0xda   : > { %319 = vst.msk [vmem:[#allocation2 + $0x189] sm:$0xff] %vm199_vm0, %v286_v44  ;;  %vm3850_vm0 = vcmask 1044484  }
  0xdb   : > { %v554_v52 = vpop.permute.xlu2 %553 }
  0xdc   : > { %630 = vst.msk [vmem:[#allocation3 + $0x50] sm:$0xf] %vm609_vm3, %v554_v52 }
  0xdd   : > { %790 = vrot.lane.b32.xlu1 %v700_v47, %s4139_s22 }
  0xde   : > { %794 = vrot.lane.b32.xlu0 %v702_v50, %s4139_s22  ;;  %v1092_v50 = vld [vmem:[#allocation2 + $0x19] sm:$0xff] }
  0xdf   : > { %v546_v62 = vpop.permute.xlu1 %545 }
  0xe0   : > { %626 = vst.msk [vmem:[#allocation3 + $0x40] sm:$0xf] %vm609_vm3, %v546_v62  ;;  %v550_v8 = vpop.permute.xlu0 %549 }
  0xe1   : > { %628 = vst.msk [vmem:[#allocation3 + $0x48] sm:$0xf] %vm609_vm3, %v550_v8  ;;  %786 = vrot.lane.b32.xlu2 %v4554_v58, %s4139_s22 }
  0xe3   : > { %v560_v14 = vpop.permute.xlu2 %559 }
  0xe4   : > { %633 = vst.msk [vmem:[#allocation3 + $0x5c] sm:$0xf] %vm609_vm3, %v560_v14 }
  0xe5   : > { %796 = vrot.lane.b32.xlu1 %v703_v9, %s4139_s22  ;;  %v1096_v9 = vld [vmem:[#allocation2 + $0x49] sm:$0xff] }
  0xe6   : > { %800 = vrot.lane.b32.xlu0 %v705_v12, %s4139_s22 }
  0xe7   : > { %v552_v22 = vpop.permute.xlu1 %551 }
  0xe8   : > { %629 = vst.msk [vmem:[#allocation3 + $0x4c] sm:$0xf] %vm609_vm3, %v552_v22  ;;  %v556_v26 = vpop.permute.xlu0 %555  ;;  %v1094_v22 = vld [vmem:[#allocation2 + $0x31] sm:$0xff] }
  0xe9   : > { %631 = vst.msk [vmem:[#allocation3 + $0x54] sm:$0xf] %vm609_vm3, %v556_v26  ;;  %792 = vrot.lane.b32.xlu2 %v4575_v15, %s4139_s22  ;;  %v4702_v26 = vpack.c.bf16 %v1094_v22, %v1094_v22 }
  0xeb   : > { %v566_v28 = vpop.permute.xlu2 %565 }
  0xec   : > { %636 = vst.msk [vmem:[#allocation3 + $0x68] sm:$0xf] %vm609_vm3, %v566_v28 }
  0xed   : > { %963 = vrot.lane.b32.xlu1 %v4395_v42, %s4140_s23 }
  0xee   : > { %967 = vrot.lane.b32.xlu0 %v4393_v41, %s4140_s23 }
  0xef   : > { %v558_v34 = vpop.permute.xlu1 %557 }
  0xf0   : > { %632 = vst.msk [vmem:[#allocation3 + $0x58] sm:$0xf] %vm609_vm3, %v558_v34  ;;  %v562_v35 = vpop.permute.xlu0 %561  ;;  %v1101_v34 = vld [vmem:[#allocation2 + $0x81] sm:$0xff] }
  0xf1   : > { %634 = vst.msk [vmem:[#allocation3 + $0x60] sm:$0xf] %vm609_vm3, %v562_v35  ;;  %798 = vrot.lane.b32.xlu2 %v4591_v32, %s4139_s22 }
  0xf3   : > { %v572_v36 = vpop.permute.xlu2 %571 }
  0xf4   : > { %639 = vst.msk [vmem:[#allocation3 + $0x74] sm:$0xf] %vm609_vm3, %v572_v36  ;;  %v1131_v36 = vpack.c.bf16 %v1099_v27, %v1099_v27  ;;  %v1117_v27 = vld [vmem:[#allocation2 + $0x141] sm:$0xff] }
  0xf5   : > { %969 = vrot.lane.b32.xlu1 %v4405_v53, %s4140_s23 }
  0xf6   : > { %973 = vrot.lane.b32.xlu0 %v4422_v2, %s4140_s23 }
  0xf7   : > { %v564_v42 = vpop.permute.xlu1 %563 }
  0xf8   : > { %635 = vst.msk [vmem:[#allocation3 + $0x64] sm:$0xf] %vm609_vm3, %v564_v42  ;;  %v568_v41 = vpop.permute.xlu0 %567  ;;  %v1133_v42 = vpack.c.bf16 %v1101_v34, %v1101_v34  ;;  %v1119_v34 = vld [vmem:[#allocation2 + $0x159] sm:$0xff] }
  0xf9   : > { %637 = vst.msk [vmem:[#allocation3 + $0x6c] sm:$0xf] %vm609_vm3, %v568_v41  ;;  %965 = vrot.lane.b32.xlu2 %v4407_v54, %s4140_s23  ;;  %v1097_v41 = vld [vmem:[#allocation2 + $0x51] sm:$0xff] }
  0xfb   : > { %v739_v38 = vpop.permute.xlu2 %738 }
  0xfc   : > { %835 = vst.msk [vmem:[#allocation3] sm:$0xf] %vm834_vm4, %v739_v38 }
  0xfd   : > { %975 = vrot.lane.b32.xlu1 %v4420_v1, %s4140_s23 }
  0xfe   : > { %979 = vrot.lane.b32.xlu0 %v4440_v17, %s4140_s23 }
  0xff   : > { %v570_v53 = vpop.permute.xlu1 %569 }
 0x100   : > { %638 = vst.msk [vmem:[#allocation3 + $0x70] sm:$0xf] %vm609_vm3, %v570_v53  ;;  %v574_v2 = vpop.permute.xlu0 %573  ;;  %v4711_v53 = vpack.c.bf16 %v1097_v41, %v1097_v41  ;;  %v1115_v41 = vld [vmem:[#allocation2 + $0x129] sm:$0xff] }
 0x101   : > { %640 = vst.msk [vmem:[#allocation3 + $0x78] sm:$0xf] %vm609_vm3, %v574_v2  ;;  %971 = vrot.lane.b32.xlu2 %v4409_v55, %s4140_s23  ;;  %v1102_v2 = vld [vmem:[#allocation2 + $0x91] sm:$0xff] }
 0x103   : > { %v745_v54 = vpop.permute.xlu2 %744 }
 0x104   : > { %838 = vst.msk [vmem:[#allocation3 + $0xc] sm:$0xf] %vm834_vm4, %v745_v54 }
 0x105   : > { %981 = vrot.lane.b32.xlu1 %v4438_v16, %s4140_s23 }
 0x106   : > { %985 = vrot.lane.b32.xlu0 %v4458_v30, %s4140_s23 }
 0x107   : > { %v576_v1 = vpop.permute.xlu1 %575 }
 0x108   : > { %641 = vst.msk [vmem:[#allocation3 + $0x7c] sm:$0xf] %vm609_vm3, %v576_v1  ;;  %v741_v17 = vpop.permute.xlu0 %740  ;;  %v1104_v1 = vld [vmem:[#allocation2 + $0xa9] sm:$0xff]  ;;  %vm3856_vm3 = vcmask 1047559  }
 0x109   : > { %836 = vst.msk [vmem:[#allocation3 + $0x4] sm:$0xf] %vm834_vm4, %v741_v17  ;;  %977 = vrot.lane.b32.xlu2 %v4424_v3, %s4140_s23 }
 0x10b   : > { %v751_v55 = vpop.permute.xlu2 %750 }
 0x10c   : > { %841 = vst.msk [vmem:[#allocation3 + $0x18] sm:$0xf] %vm834_vm4, %v751_v55  ;;  %v4716_v55 = vpack.c.bf16 %v1102_v2, %v1102_v2  ;;  %v4776_v2 = vpack.c.bf16 %v1115_v41, %v1115_v41 }
 0x10d   : > { %987 = vrot.lane.b32.xlu1 %v4456_v29, %s4140_s23 }
 0x10e   : > { %991 = vrot.lane.b32.xlu0 %v4477_v46, %s4140_s23 }
 0x10f   : > { %v743_v16 = vpop.permute.xlu1 %742 }
 0x110   : > { %837 = vst.msk [vmem:[#allocation3 + $0x8] sm:$0xf] %vm834_vm4, %v743_v16  ;;  %v747_v30 = vpop.permute.xlu0 %746  ;;  %v1136_v16 = vpack.c.bf16 %v1104_v1, %v1104_v1 }
 0x111   : > { %839 = vst.msk [vmem:[#allocation3 + $0x10] sm:$0xf] %vm834_vm4, %v747_v30  ;;  %983 = vrot.lane.b32.xlu2 %v4442_v18, %s4140_s23  ;;  %v1100_v30 = vld [vmem:[#allocation2 + $0x79] sm:$0xff] }
 0x113   : > { %v757_v3 = vpop.permute.xlu2 %756 }
 0x114   : > { %844 = vst.msk [vmem:[#allocation3 + $0x24] sm:$0xf] %vm834_vm4, %v757_v3  ;;  %v1132_v3 = vpack.c.bf16 %v1100_v30, %v1100_v30 }
 0x115   : > { %993 = vrot.lane.b32.xlu1 %v4475_v45, %s4140_s23 }
 0x116   : > { %997 = vrot.lane.b32.xlu0 %v4498_v0, %s4140_s23 }
 0x117   : > { %v749_v29 = vpop.permute.xlu1 %748 }
 0x118   : > { %840 = vst.msk [vmem:[#allocation3 + $0x14] sm:$0xf] %vm834_vm4, %v749_v29  ;;  %v753_v46 = vpop.permute.xlu0 %752  ;;  %v1105_v29 = vld [vmem:[#allocation2 + $0xb1] sm:$0xff] }
 0x119   : > { %842 = vst.msk [vmem:[#allocation3 + $0x1c] sm:$0xf] %vm834_vm4, %v753_v46  ;;  %989 = vrot.lane.b32.xlu2 %v4460_v31, %s4140_s23 }
 0x11b   : > { %v763_v18 = vpop.permute.xlu2 %762 }
 0x11c   : > { %847 = vst.msk [vmem:[#allocation3 + $0x30] sm:$0xf] %vm834_vm4, %v763_v18  ;;  %v1107_v18 = vld [vmem:[#allocation2 + $0xc9] sm:$0xff] }
 0x11d   : > { %999 = vrot.lane.b32.xlu1 %v4496_v63, %s4140_s23 }
 0x11e   : > { %1003 = vrot.lane.b32.xlu0 %v4519_v21, %s4140_s23 }
 0x11f   : > { %v755_v45 = vpop.permute.xlu1 %754 }
 0x120   : > { %843 = vst.msk [vmem:[#allocation3 + $0x20] sm:$0xf] %vm834_vm4, %v755_v45  ;;  %v759_v0 = vpop.permute.xlu0 %758 }
 0x121   : > { %845 = vst.msk [vmem:[#allocation3 + $0x28] sm:$0xf] %vm834_vm4, %v759_v0  ;;  %995 = vrot.lane.b32.xlu2 %v4483_v49, %s4140_s23  ;;  %v4726_v0 = vpack.c.bf16 %v1105_v29, %v1105_v29 }
 0x123   : > { %v769_v31 = vpop.permute.xlu2 %768 }
 0x124   : > { %850 = vst.msk [vmem:[#allocation3 + $0x3c] sm:$0xf] %vm834_vm4, %v769_v31  ;;  %v1139_v31 = vpack.c.bf16 %v1107_v18, %v1107_v18  ;;  %v1123_v18 = vld [vmem:[#allocation2 + $0x189] sm:$0xff] }
 0x125   : > { %1005 = vrot.lane.b32.xlu1 %v4517_v20, %s4140_s23 }
 0x126   : > { %1009 = vrot.lane.b32.xlu0 %v4540_v43, %s4140_s23 }
 0x127   : > { %v761_v63 = vpop.permute.xlu1 %760 }
 0x128   : > { %846 = vst.msk [vmem:[#allocation3 + $0x2c] sm:$0xf] %vm834_vm4, %v761_v63  ;;  %v765_v21 = vpop.permute.xlu0 %764  ;;  %v1103_v63 = vld [vmem:[#allocation2 + $0x99] sm:$0xff] }
 0x129   : > { %848 = vst.msk [vmem:[#allocation3 + $0x34] sm:$0xf] %vm834_vm4, %v765_v21  ;;  %1001 = vrot.lane.b32.xlu2 %v4504_v6, %s4140_s23  ;;  %v4732_v44 = vpack.c.bf16 %v1103_v63, %v1103_v63 }
 0x12b   : > { %v775_v49 = vpop.permute.xlu2 %774 }
 0x12c   : > { %853 = vst.msk [vmem:[#allocation3 + $0x48] sm:$0xf] %vm834_vm4, %v775_v49  ;;  %v1108_v49 = vld [vmem:[#allocation2 + $0xd9] sm:$0xff] }
 0x12d   : > { %1011 = vrot.lane.b32.xlu1 %v4538_v40, %s4140_s23  ;;  %v897_v40 = vld [vmem:[#allocation2 + $0x180] sm:$0xff] }
 0x12e   : > { %1015 = vrot.lane.b32.xlu0 %v4561_v7, %s4140_s23  ;;  %v929_v52 = vpack.c.bf16 %v897_v40, %v897_v40  ;;  %v1140_v40 = vpack.c.bf16 %v1108_v49, %v1108_v49 }
 0x12f   : > { %v767_v20 = vpop.permute.xlu1 %766 }
 0x130   : > { %849 = vst.msk [vmem:[#allocation3 + $0x38] sm:$0xf] %vm834_vm4, %v767_v20  ;;  %v771_v43 = vpop.permute.xlu0 %770 }
 0x131   : > { %851 = vst.msk [vmem:[#allocation3 + $0x40] sm:$0xf] %vm834_vm4, %v771_v43  ;;  %1007 = vrot.lane.b32.xlu2 %v4525_v25, %s4140_s23  ;;  %v1124_v25 = vpack.c.bf16 %v1092_v50, %v1092_v50  ;;  %v1110_v43 = vld [vmem:[#allocation2 + $0xf1] sm:$0xff]  ;;  %v1106_v50 = vld [vmem:[#allocation2 + $0xc1] sm:$0xff] }
 0x133   : > { %v781_v6 = vpop.permute.xlu2 %780 }
 0x134   : > { %856 = vst.msk [vmem:[#allocation3 + $0x54] sm:$0xf] %vm834_vm4, %v781_v6 }
 0x135   : > { %1017 = vrot.lane.b32.xlu1 %v4559_v5, %s4140_s23  ;;  %v898_v5 = vld [vmem:[#allocation2 + $0x188] sm:$0xff] }
 0x136   : > { %1021 = vrot.lane.b32.xlu0 %v4580_v23, %s4140_s23  ;;  %v930_v8 = vpack.c.bf16 %v898_v5, %v898_v5 }
 0x137   : > { %v773_v47 = vpop.permute.xlu1 %772 }
 0x138   : > { %852 = vst.msk [vmem:[#allocation3 + $0x44] sm:$0xf] %vm834_vm4, %v773_v47  ;;  %v777_v51 = vpop.permute.xlu0 %776  ;;  %v4739_v47 = vpack.c.bf16 %v1110_v43, %v1110_v43 }
 0x139   : > { %854 = vst.msk [vmem:[#allocation3 + $0x4c] sm:$0xf] %vm834_vm4, %v777_v51  ;;  %1013 = vrot.lane.b32.xlu2 %v4546_v48, %s4140_s23  ;;  %v4691_v48 = vpack.c.bf16 %v1095_v61, %v1095_v61 }
 0x13b   : > { %v787_v56 = vpop.permute.xlu2 %786 }
 0x13c   : > { %859 = vst.msk [vmem:[#allocation3 + $0x60] sm:$0xf] %vm834_vm4, %v787_v56 }
 0x13d   : > { %1023 = vrot.lane.b32.xlu1 %v929_v52, %s4140_s23  ;;  %v1138_v52 = vpack.c.bf16 %v1106_v50, %v1106_v50 }
 0x13e   : > { %1188 = vrot.lane.b32.xlu0 %v1124_v25, %s4141_s24  ;;  %v1111_v25 = vld [vmem:[#allocation2 + $0xf9] sm:$0xff] }
 0x13f   : > { %v779_v60 = vpop.permute.xlu1 %778  ;;  %v4747_v61 = vpack.c.bf16 %v1111_v25, %v1111_v25 }
 0x140   : > { %855 = vst.msk [vmem:[#allocation3 + $0x50] sm:$0xf] %vm834_vm4, %v779_v60  ;;  %v783_v62 = vpop.permute.xlu0 %782 }
 0x141   : > { %857 = vst.msk [vmem:[#allocation3 + $0x58] sm:$0xf] %vm834_vm4, %v783_v62  ;;  %1019 = vrot.lane.b32.xlu2 %v4567_v10, %s4140_s23  ;;  %v1128_v10 = vpack.c.bf16 %v1096_v9, %v1096_v9  ;;  %v4750_v62 = vpack.c.bf16 %v1113_v59, %v1113_v59  ;;  %v1317_v59 = vld [vmem:[#allocation2 + $0x1a] sm:$0xff] }
 0x143   : > { %v793_v7 = vpop.permute.xlu2 %792 }
 0x144   : > { %862 = vst.msk [vmem:[#allocation3 + $0x6c] sm:$0xf] %vm834_vm4, %v793_v7 }
 0x145   : > { %1190 = vrot.lane.b32.xlu1 %v1125_v4, %s4141_s24  ;;  %v1109_v4 = vld [vmem:[#allocation2 + $0xe1] sm:$0xff] }
 0x146   : > { %1194 = vrot.lane.b32.xlu0 %v4691_v48, %s4141_s24  ;;  %v1141_v7 = vpack.c.bf16 %v1109_v4, %v1109_v4  ;;  %v1349_v4 = vpack.c.bf16 %v1317_v59, %v1317_v59 }
 0x147   : > { %v785_v12 = vpop.permute.xlu1 %784 }
 0x148   : > { %858 = vst.msk [vmem:[#allocation3 + $0x5c] sm:$0xf] %vm834_vm4, %v785_v12  ;;  %v789_v14 = vpop.permute.xlu0 %788  ;;  %v1116_v12 = vld [vmem:[#allocation2 + $0x139] sm:$0xff] }
 0x149   : > { %860 = vst.msk [vmem:[#allocation3 + $0x64] sm:$0xf] %vm834_vm4, %v789_v14  ;;  %1025 = vrot.lane.b32.xlu2 %v930_v8, %s4140_s23  ;;  %v1114_v8 = vld [vmem:[#allocation2 + $0x121] sm:$0xff] }
 0x14a   : > { %v4759_v14 = vpack.c.bf16 %v1114_v8, %v1114_v8 }
 0x14b   : > { %v799_v23 = vpop.permute.xlu2 %798 }
 0x14c   : > { %865 = vst.msk [vmem:[#allocation3 + $0x78] sm:$0xf] %vm834_vm4, %v799_v23 }
 0x14d   : > { %1196 = vrot.lane.b32.xlu1 %v1128_v10, %s4141_s24  ;;  %v1148_v10 = vpack.c.bf16 %v1116_v12, %v1116_v12  ;;  %v1320_v12 = vld [vmem:[#allocation2 + $0x3a] sm:$0xff] }
 0x14e   : > { %1200 = vrot.lane.b32.xlu0 %v1130_v19, %s4141_s24  ;;  %v1112_v19 = vld [vmem:[#allocation2 + $0x109] sm:$0xff] }
 0x14f   : > { %v791_v28 = vpop.permute.xlu1 %790  ;;  %v4765_v23 = vpack.c.bf16 %v1112_v19, %v1112_v19  ;;  %v1325_v19 = vld [vmem:[#allocation2 + $0x7a] sm:$0xff] }
 0x150   : > { %861 = vst.msk [vmem:[#allocation3 + $0x68] sm:$0xf] %vm834_vm4, %v791_v28  ;;  %v795_v35 = vpop.permute.xlu0 %794 }
 0x151   : > { %863 = vst.msk [vmem:[#allocation3 + $0x70] sm:$0xf] %vm834_vm4, %v795_v35  ;;  %1192 = vrot.lane.b32.xlu2 %v4702_v26, %s4141_s24 }
 0x153   : > { %v966_v38 = vpop.permute.xlu2 %965 }
 0x154   : > { %1061 = vst.msk [vmem:[#allocation3 + $0x4] sm:$0xf] %vm1059_vm5, %v966_v38 }
 0x155   : > { %1202 = vrot.lane.b32.xlu1 %v1131_v36, %s4141_s24  ;;  %v1149_v36 = vpack.c.bf16 %v1117_v27, %v1117_v27 }
 0x156   : > { %1206 = vrot.lane.b32.xlu0 %v1133_v42, %s4141_s24  ;;  %v4772_v42 = vpack.c.bf16 %v1119_v34, %v1119_v34  ;;  %v1323_v34 = vld [vmem:[#allocation2 + $0x62] sm:$0xff] }
 0x157   : > { %v797_v54 = vpop.permute.xlu1 %796 }
 0x158   : > { %864 = vst.msk [vmem:[#allocation3 + $0x74] sm:$0xf] %vm834_vm4, %v797_v54  ;;  %v801_v17 = vpop.permute.xlu0 %800  ;;  %v1120_v54 = vld [vmem:[#allocation2 + $0x169] sm:$0xff] }
 0x159   : > { %866 = vst.msk [vmem:[#allocation3 + $0x7c] sm:$0xf] %vm834_vm4, %v801_v17  ;;  %1198 = vrot.lane.b32.xlu2 %v4711_v53, %s4141_s24  ;;  %v1122_v17 = vld [vmem:[#allocation2 + $0x181] sm:$0xff]  ;;  %v4782_v30 = vpack.c.bf16 %v1120_v54, %v1120_v54 }
 0x15b   : > { %v972_v39 = vpop.permute.xlu2 %971 }
 0x15c   : > { %1064 = vst.msk [vmem:[#allocation3 + $0x10] sm:$0xf] %vm1059_vm5, %v972_v39  ;;  %v1154_v39 = vpack.c.bf16 %v1122_v17, %v1122_v17 }
 0x15d   : > { %1208 = vrot.lane.b32.xlu1 %v4716_v55, %s4141_s24 }
 0x15e   : > { %1212 = vrot.lane.b32.xlu0 %v1136_v16, %s4141_s24 }
 0x15f   : > { %v964_v46 = vpop.permute.xlu1 %963 }
 0x160   : > { %1060 = vst.msk [vmem:[#allocation3] sm:$0xf] %vm1059_vm5, %v964_v46  ;;  %v968_v45 = vpop.permute.xlu0 %967 }
 0x161   : > { %1062 = vst.msk [vmem:[#allocation3 + $0x8] sm:$0xf] %vm1059_vm5, %v968_v45  ;;  %1204 = vrot.lane.b32.xlu2 %v1132_v3, %s4141_s24  ;;  %v1118_v3 = vld [vmem:[#allocation2 + $0x151] sm:$0xff] }
 0x162   : > { %v4789_v46 = vpack.c.bf16 %v1118_v3, %v1118_v3 }
 0x163   : > { %v978_v21 = vpop.permute.xlu2 %977 }
 0x164   : > { %1067 = vst.msk [vmem:[#allocation3 + $0x1c] sm:$0xf] %vm1059_vm5, %v978_v21  ;;  %v4794_v21 = vpack.c.bf16 %v1123_v18, %v1123_v18  ;;  %v1329_v18 = vld [vmem:[#allocation2 + $0xaa] sm:$0xff] }
 0x165   : > { %1214 = vrot.lane.b32.xlu1 %v4726_v0, %s4141_s24 }
 0x166   : > { %1218 = vrot.lane.b32.xlu0 %v1139_v31, %s4141_s24  ;;  %v1318_v31 = vld [vmem:[#allocation2 + $0x22] sm:$0xff] }
 0x167   : > { %v970_v20 = vpop.permute.xlu1 %969  ;;  %v1350_v49 = vpack.c.bf16 %v1318_v31, %v1318_v31  ;;  %v4855_v31 = vpack.c.bf16 %v1329_v18, %v1329_v18 }
 0x168   : > { %1063 = vst.msk [vmem:[#allocation3 + $0xc] sm:$0xf] %vm1059_vm5, %v970_v20  ;;  %v974_v6 = vpop.permute.xlu0 %973  ;;  %v1121_v20 = vld [vmem:[#allocation2 + $0x171] sm:$0xff] }
 0x169   : > { %1065 = vst.msk [vmem:[#allocation3 + $0x14] sm:$0xf] %vm1059_vm5, %v974_v6  ;;  %1210 = vrot.lane.b32.xlu2 %v4732_v44, %s4141_s24  ;;  %v4801_v6 = vpack.c.bf16 %v1121_v20, %v1121_v20 }
 0x16b   : > { %v984_v51 = vpop.permute.xlu2 %983 }
 0x16c   : > { %1070 = vst.msk [vmem:[#allocation3 + $0x28] sm:$0xf] %vm1059_vm5, %v984_v51  ;;  %v1321_v51 = vld [vmem:[#allocation2 + $0x4a] sm:$0xff] }
 0x16d   : > { %1220 = vrot.lane.b32.xlu1 %v1140_v40, %s4141_s24  ;;  %v1319_v40 = vld [vmem:[#allocation2 + $0x32] sm:$0xff] }
 0x16e   : > { %1224 = vrot.lane.b32.xlu0 %v4739_v47, %s4141_s24  ;;  %v4806_v25 = vpack.c.bf16 %v1319_v40, %v1319_v40 }
 0x16f   : > { %v976_v56 = vpop.permute.xlu1 %975 }
 0x170   : > { %1066 = vst.msk [vmem:[#allocation3 + $0x18] sm:$0xf] %vm1059_vm5, %v976_v56  ;;  %v980_v60 = vpop.permute.xlu0 %979  ;;  %v4810_v56 = vpack.c.bf16 %v1321_v51, %v1321_v51 }
 0x171   : > { %1068 = vst.msk [vmem:[#allocation3 + $0x20] sm:$0xf] %vm1059_vm5, %v980_v60  ;;  %1216 = vrot.lane.b32.xlu2 %v1138_v52, %s4141_s24 }
 0x173   : > { %v990_v5 = vpop.permute.xlu2 %989 }
 0x174   : > { %1073 = vst.msk [vmem:[#allocation3 + $0x34] sm:$0xf] %vm1059_vm5, %v990_v5  ;;  %v1322_v5 = vld [vmem:[#allocation2 + $0x52] sm:$0xff] }
 0x175   : > { %1226 = vrot.lane.b32.xlu1 %v4747_v61, %s4141_s24 }
 0x176   : > { %1230 = vrot.lane.b32.xlu0 %v4750_v62, %s4141_s24 }
 0x177   : > { %v982_v9 = vpop.permute.xlu1 %981 }
 0x178   : > { %1069 = vst.msk [vmem:[#allocation3 + $0x24] sm:$0xf] %vm1059_vm5, %v982_v9  ;;  %v986_v13 = vpop.permute.xlu0 %985  ;;  %v4819_v9 = vpack.c.bf16 %v1322_v5, %v1322_v5  ;;  %v1340_v5 = vld [vmem:[#allocation2 + $0x12a] sm:$0xff] }
 0x179   : > { %1071 = vst.msk [vmem:[#allocation3 + $0x2c] sm:$0xf] %vm1059_vm5, %v986_v13  ;;  %1222 = vrot.lane.b32.xlu2 %v1141_v7, %s4141_s24 }
 0x17b   : > { %v996_v22 = vpop.permute.xlu2 %995 }
 0x17c   : > { %1076 = vst.msk [vmem:[#allocation3 + $0x40] sm:$0xf] %vm1059_vm5, %v996_v22 }
 0x17d   : > { %1232 = vrot.lane.b32.xlu1 %v4759_v14, %s4141_s24 }
 0x17e   : > { %1236 = vrot.lane.b32.xlu0 %v1148_v10, %s4141_s24  ;;  %v4825_v10 = vpack.c.bf16 %v1320_v12, %v1320_v12  ;;  %v4884_v12 = vpack.c.bf16 %v1340_v5, %v1340_v5 }
 0x17f   : > { %v988_v28 = vpop.permute.xlu1 %987 }
 0x180   : > { %1072 = vst.msk [vmem:[#allocation3 + $0x30] sm:$0xf] %vm1059_vm5, %v988_v28  ;;  %v992_v35 = vpop.permute.xlu0 %991  ;;  %v1357_v28 = vpack.c.bf16 %v1325_v19, %v1325_v19 }
 0x181   : > { %1074 = vst.msk [vmem:[#allocation3 + $0x38] sm:$0xf] %vm1059_vm5, %v992_v35  ;;  %1228 = vrot.lane.b32.xlu2 %v4765_v23, %s4141_s24 }
 0x183   : > { %v1002_v38 = vpop.permute.xlu2 %1001 }
 0x184   : > { %1079 = vst.msk [vmem:[#allocation3 + $0x4c] sm:$0xf] %vm1059_vm5, %v1002_v38 }
 0x185   : > { %1238 = vrot.lane.b32.xlu1 %v1149_v36, %s4141_s24  ;;  %v1355_v36 = vpack.c.bf16 %v1323_v34, %v1323_v34 }
 0x186   : > { %1242 = vrot.lane.b32.xlu0 %v4772_v42, %s4141_s24 }
 0x187   : > { %v994_v1 = vpop.permute.xlu1 %993 }
 0x188   : > { %1075 = vst.msk [vmem:[#allocation3 + $0x3c] sm:$0xf] %vm1059_vm5, %v994_v1  ;;  %v998_v16 = vpop.permute.xlu0 %997  ;;  %v1326_v1 = vld [vmem:[#allocation2 + $0x82] sm:$0xff] }
 0x189   : > { %1077 = vst.msk [vmem:[#allocation3 + $0x44] sm:$0xf] %vm1059_vm5, %v998_v16  ;;  %1234 = vrot.lane.b32.xlu2 %v4776_v2, %s4141_s24  ;;  %v1358_v16 = vpack.c.bf16 %v1326_v1, %v1326_v1 }
 0x18b   : > { %v1008_v29 = vpop.permute.xlu2 %1007 }
 0x18c   : > { %1082 = vst.msk [vmem:[#allocation3 + $0x58] sm:$0xf] %vm1059_vm5, %v1008_v29 }
 0x18d   : > { %1244 = vrot.lane.b32.xlu1 %v4782_v30, %s4141_s24 }
 0x18e   : > { %1248 = vrot.lane.b32.xlu0 %v1154_v39, %s4141_s24 }
 0x18f   : > { %v1000_v45 = vpop.permute.xlu1 %999 }
 0x190   : > { %1078 = vst.msk [vmem:[#allocation3 + $0x48] sm:$0xf] %vm1059_vm5, %v1000_v45  ;;  %v1004_v63 = vpop.permute.xlu0 %1003 }
 0x191   : > { %1080 = vst.msk [vmem:[#allocation3 + $0x50] sm:$0xf] %vm1059_vm5, %v1004_v63  ;;  %1240 = vrot.lane.b32.xlu2 %v4789_v46, %s4141_s24 }
 0x193   : > { %v1014_v43 = vpop.permute.xlu2 %1013 }
 0x194   : > { %1085 = vst.msk [vmem:[#allocation3 + $0x64] sm:$0xf] %vm1059_vm5, %v1014_v43  ;;  %v1332_v43 = vld [vmem:[#allocation2 + $0xca] sm:$0xff] }
 0x195   : > { %1250 = vrot.lane.b32.xlu1 %v4794_v21, %s4141_s24 }
 0x196   : > { %1415 = vrot.lane.b32.xlu0 %v1350_v49, %s4142_s25 }
 0x197   : > { %v1006_v50 = vpop.permute.xlu1 %1005 }
 0x198   : > { %1081 = vst.msk [vmem:[#allocation3 + $0x54] sm:$0xf] %vm1059_vm5, %v1006_v50  ;;  %v1010_v52 = vpop.permute.xlu0 %1009  ;;  %v4865_v50 = vpack.c.bf16 %v1332_v43, %v1332_v43 }
 0x199   : > { %1083 = vst.msk [vmem:[#allocation3 + $0x5c] sm:$0xf] %vm1059_vm5, %v1010_v52  ;;  %1246 = vrot.lane.b32.xlu2 %v4801_v6, %s4141_s24 }
 0x19b   : > { %v1020_v60 = vpop.permute.xlu2 %1019 }
 0x19c   : > { %1088 = vst.msk [vmem:[#allocation3 + $0x70] sm:$0xf] %vm1059_vm5, %v1020_v60  ;;  %v1335_v60 = vld [vmem:[#allocation2 + $0xf2] sm:$0xff] }
 0x19d   : > { %1417 = vrot.lane.b32.xlu1 %v4806_v25, %s4142_s25 }
 0x19e   : > { %1421 = vrot.lane.b32.xlu0 %v4810_v56, %s4142_s25 }
 0x19f   : > { %v1012_v7 = vpop.permute.xlu1 %1011 }
 0x1a0   : > { %1084 = vst.msk [vmem:[#allocation3 + $0x60] sm:$0xf] %vm1059_vm5, %v1012_v7  ;;  %v1016_v8 = vpop.permute.xlu0 %1015 }
 0x1a1   : > { %1086 = vst.msk [vmem:[#allocation3 + $0x68] sm:$0xf] %vm1059_vm5, %v1016_v8  ;;  %1413 = vrot.lane.b32.xlu2 %v1349_v4, %s4142_s25 }
 0x1a3   : > { %v1026_v13 = vpop.permute.xlu2 %1025 }
 0x1a4   : > { %1091 = vst.msk [vmem:[#allocation3 + $0x7c] sm:$0xf] %vm1059_vm5, %v1026_v13  ;;  %v1338_v13 = vld [vmem:[#allocation2 + $0x112] sm:$0xff] }
 0x1a5   : > { %1423 = vrot.lane.b32.xlu1 %v4819_v9, %s4142_s25 }
 0x1a6   : > { %1427 = vrot.lane.b32.xlu0 %v4453_v24, %s4142_s25  ;;  %v1328_v24 = vld [vmem:[#allocation2 + $0x9a] sm:$0xff] }
 0x1a7   : > { %v1018_v22 = vpop.permute.xlu1 %1017  ;;  %v4839_v54 = vpack.c.bf16 %v1328_v24, %v1328_v24  ;;  %v1346_v24 = vld [vmem:[#allocation2 + $0x172] sm:$0xff] }
 0x1a8   : > { %1087 = vst.msk [vmem:[#allocation3 + $0x6c] sm:$0xf] %vm1059_vm5, %v1018_v22  ;;  %v1022_v27 = vpop.permute.xlu0 %1021  ;;  %v1343_v22 = vld [vmem:[#allocation2 + $0x152] sm:$0xff] }
 0x1a9   : > { %1089 = vst.msk [vmem:[#allocation3 + $0x74] sm:$0xf] %vm1059_vm5, %v1022_v27  ;;  %1419 = vrot.lane.b32.xlu2 %v4825_v10, %s4142_s25  ;;  %v4897_v34 = vpack.c.bf16 %v1343_v22, %v1343_v22 }
 0x1ab   : > { %v1193_v35 = vpop.permute.xlu2 %1192 }
 0x1ac   : > { %1287 = vst.msk [vmem:[#allocation3 + $0x8] sm:$0xf] %vm1284_vm6, %v1193_v35  ;;  %v1341_v35 = vld [vmem:[#allocation2 + $0x13a] sm:$0xff] }
 0x1ad   : > { %1429 = vrot.lane.b32.xlu1 %v1357_v28, %s4142_s25 }
 0x1ae   : > { %1433 = vrot.lane.b32.xlu0 %v4472_v37, %s4142_s25  ;;  %v1331_v37 = vld [vmem:[#allocation2 + $0xc2] sm:$0xff] }
 0x1af   : > { %v1024_v41 = vpop.permute.xlu1 %1023  ;;  %v4849_v29 = vpack.c.bf16 %v1331_v37, %v1331_v37  ;;  %v1344_v37 = vld [vmem:[#allocation2 + $0x15a] sm:$0xff] }
 0x1b0   : > { %1090 = vst.msk [vmem:[#allocation3 + $0x78] sm:$0xf] %vm1059_vm5, %v1024_v41  ;;  %v1189_v38 = vpop.permute.xlu0 %1188 }
 0x1b1   : > { %1285 = vst.msk [vmem:[#allocation3] sm:$0xf] %vm1284_vm6, %v1189_v38  ;;  %1425 = vrot.lane.b32.xlu2 %v1355_v36, %s4142_s25  ;;  %v1348_v38 = vld [vmem:[#allocation2 + $0x18a] sm:$0xff] }
 0x1b3   : > { %v1199_v17 = vpop.permute.xlu2 %1198 }
 0x1b4   : > { %1290 = vst.msk [vmem:[#allocation3 + $0x14] sm:$0xf] %vm1284_vm6, %v1199_v17  ;;  %v4910_v17 = vpack.c.bf16 %v1346_v24, %v1346_v24  ;;  %v1547_v24 = vld [vmem:[#allocation2 + $0x60] sm:$0xff] }
 0x1b5   : > { %1435 = vrot.lane.b32.xlu1 %v4839_v54, %s4142_s25 }
 0x1b6   : > { %1439 = vrot.lane.b32.xlu0 %v4491_v57, %s4142_s25  ;;  %v1334_v57 = vld [vmem:[#allocation2 + $0xe2] sm:$0xff] }
 0x1b7   : > { %v1191_v39 = vpop.permute.xlu1 %1190  ;;  %v1366_v20 = vpack.c.bf16 %v1334_v57, %v1334_v57 }
 0x1b8   : > { %1286 = vst.msk [vmem:[#allocation3 + $0x4] sm:$0xf] %vm1284_vm6, %v1191_v39  ;;  %v1195_v3 = vpop.permute.xlu0 %1194 }
 0x1b9   : > { %1288 = vst.msk [vmem:[#allocation3 + $0xc] sm:$0xf] %vm1284_vm6, %v1195_v3  ;;  %1431 = vrot.lane.b32.xlu2 %v1358_v16, %s4142_s25  ;;  %v4914_v16 = vpack.c.bf16 %v1348_v38, %v1348_v38  ;;  %v1543_v3 = vld [vmem:[#allocation2 + $0x30] sm:$0xff]  ;;  %v1579_v38 = vpack.c.bf16 %v1547_v24, %v1547_v24 }
 0x1bb   : > { %v1205_v45 = vpop.permute.xlu2 %1204 }
 0x1bc   : > { %1293 = vst.msk [vmem:[#allocation3 + $0x20] sm:$0xf] %vm1284_vm6, %v1205_v45  ;;  %v1545_v45 = vld [vmem:[#allocation2 + $0x48] sm:$0xff] }
 0x1bd   : > { %1441 = vrot.lane.b32.xlu1 %v4849_v29, %s4142_s25 }
 0x1be   : > { %1445 = vrot.lane.b32.xlu0 %v4512_v11, %s4142_s25  ;;  %v1337_v11 = vld [vmem:[#allocation2 + $0x10a] sm:$0xff] }
 0x1bf   : > { %v1197_v63 = vpop.permute.xlu1 %1196  ;;  %v4871_v59 = vpack.c.bf16 %v1337_v11, %v1337_v11  ;;  %v1546_v11 = vld [vmem:[#allocation2 + $0x50] sm:$0xff] }
 0x1c0   : > { %1289 = vst.msk [vmem:[#allocation3 + $0x10] sm:$0xf] %vm1284_vm6, %v1197_v63  ;;  %v1201_v49 = vpop.permute.xlu0 %1200  ;;  %v1575_v63 = vpack.c.bf16 %v1543_v3, %v1543_v3 }
 0x1c1   : > { %1291 = vst.msk [vmem:[#allocation3 + $0x18] sm:$0xf] %vm1284_vm6, %v1201_v49  ;;  %1437 = vrot.lane.b32.xlu2 %v4855_v31, %s4142_s25  ;;  %v1577_v49 = vpack.c.bf16 %v1545_v45, %v1545_v45 }
 0x1c3   : > { %v1211_v40 = vpop.permute.xlu2 %1210 }
 0x1c4   : > { %1296 = vst.msk [vmem:[#allocation3 + $0x2c] sm:$0xf] %vm1284_vm6, %v1211_v40 }
 0x1c5   : > { %1447 = vrot.lane.b32.xlu1 %v1366_v20, %s4142_s25  ;;  %v1347_v20 = vld [vmem:[#allocation2 + $0x182] sm:$0xff] }
 0x1c6   : > { %1451 = vrot.lane.b32.xlu0 %v4533_v33, %s4142_s25  ;;  %v4878_v33 = vpack.c.bf16 %v1335_v60, %v1335_v60  ;;  %v4929_v40 = vpack.c.bf16 %v1347_v20, %v1347_v20 }
 0x1c7   : > { %v1203_v51 = vpop.permute.xlu1 %1202 }
 0x1c8   : > { %1292 = vst.msk [vmem:[#allocation3 + $0x1c] sm:$0xf] %vm1284_vm6, %v1203_v51  ;;  %v1207_v52 = vpop.permute.xlu0 %1206 }
 0x1c9   : > { %1294 = vst.msk [vmem:[#allocation3 + $0x24] sm:$0xf] %vm1284_vm6, %v1207_v52  ;;  %1443 = vrot.lane.b32.xlu2 %v4865_v50, %s4142_s25  ;;  %v1548_v52 = vld [vmem:[#allocation2 + $0x68] sm:$0xff] }
 0x1ca   : > { %v1580_v5 = vpack.c.bf16 %v1548_v52, %v1548_v52 }
 0x1cb   : > { %v1217_v4 = vpop.permute.xlu2 %1216 }
 0x1cc   : > { %1299 = vst.msk [vmem:[#allocation3 + $0x38] sm:$0xf] %vm1284_vm6, %v1217_v4  ;;  %v1578_v4 = vpack.c.bf16 %v1546_v11, %v1546_v11  ;;  %v1567_v11 = vld [vmem:[#allocation2 + $0x150] sm:$0xff] }
 0x1cd   : > { %1453 = vrot.lane.b32.xlu1 %v4871_v59, %s4142_s25  ;;  %v1599_v52 = vpack.c.bf16 %v1567_v11, %v1567_v11 }
 0x1ce   : > { %1457 = vrot.lane.b32.xlu0 %v4554_v58, %s4142_s25  ;;  %v4891_v58 = vpack.c.bf16 %v1338_v13, %v1338_v13 }
 0x1cf   : > { %v1209_v7 = vpop.permute.xlu1 %1208 }
 0x1d0   : > { %1295 = vst.msk [vmem:[#allocation3 + $0x28] sm:$0xf] %vm1284_vm6, %v1209_v7  ;;  %v1213_v8 = vpop.permute.xlu0 %1212  ;;  %v1544_v7 = vld [vmem:[#allocation2 + $0x38] sm:$0xff] }
 0x1d1   : > { %1297 = vst.msk [vmem:[#allocation3 + $0x30] sm:$0xf] %vm1284_vm6, %v1213_v8  ;;  %1449 = vrot.lane.b32.xlu2 %v4878_v33, %s4142_s25  ;;  %v1576_v13 = vpack.c.bf16 %v1544_v7, %v1544_v7 }
 0x1d3   : > { %v1223_v19 = vpop.permute.xlu2 %1222 }
 0x1d4   : > { %1302 = vst.msk [vmem:[#allocation3 + $0x44] sm:$0xf] %vm1284_vm6, %v1223_v19  ;;  %v1549_v19 = vld [vmem:[#allocation2 + $0x78] sm:$0xff] }
 0x1d5   : > { %1459 = vrot.lane.b32.xlu1 %v4884_v12, %s4142_s25 }
 0x1d6   : > { %1463 = vrot.lane.b32.xlu0 %v4575_v15, %s4142_s25  ;;  %v4904_v15 = vpack.c.bf16 %v1341_v35, %v1341_v35  ;;  %v1581_v35 = vpack.c.bf16 %v1549_v19, %v1549_v19 }
 0x1d7   : > { %v1215_v27 = vpop.permute.xlu1 %1214 }
 0x1d8   : > { %1298 = vst.msk [vmem:[#allocation3 + $0x34] sm:$0xf] %vm1284_vm6, %v1215_v27  ;;  %v1219_v28 = vpop.permute.xlu0 %1218  ;;  %v1559_v27 = vld [vmem:[#allocation2 + $0xf0] sm:$0xff] }
 0x1d9   : > { %1300 = vst.msk [vmem:[#allocation3 + $0x3c] sm:$0xf] %vm1284_vm6, %v1219_v28  ;;  %1455 = vrot.lane.b32.xlu2 %v4891_v58, %s4142_s25 }
 0x1db   : > { %v1229_v36 = vpop.permute.xlu2 %1228 }
 0x1dc   : > { %1305 = vst.msk [vmem:[#allocation3 + $0x50] sm:$0xf] %vm1284_vm6, %v1229_v36  ;;  %v1591_v36 = vpack.c.bf16 %v1559_v27, %v1559_v27 }
 0x1dd   : > { %1465 = vrot.lane.b32.xlu1 %v4897_v34, %s4142_s25 }
 0x1de   : > { %1469 = vrot.lane.b32.xlu0 %v4591_v32, %s4142_s25  ;;  %v4919_v32 = vpack.c.bf16 %v1344_v37, %v1344_v37 }
 0x1df   : > { %v1221_v41 = vpop.permute.xlu1 %1220 }
 0x1e0   : > { %1301 = vst.msk [vmem:[#allocation3 + $0x40] sm:$0xf] %vm1284_vm6, %v1221_v41  ;;  %v1225_v1 = vpop.permute.xlu0 %1224 }
 0x1e1   : > { %1303 = vst.msk [vmem:[#allocation3 + $0x48] sm:$0xf] %vm1284_vm6, %v1225_v1  ;;  %1461 = vrot.lane.b32.xlu2 %v4904_v15, %s4142_s25  ;;  %v1560_v1 = vld [vmem:[#allocation2 + $0xf8] sm:$0xff] }
 0x1e3   : > { %v1235_v39 = vpop.permute.xlu2 %1234 }
 0x1e4   : > { %1308 = vst.msk [vmem:[#allocation3 + $0x5c] sm:$0xf] %vm1284_vm6, %v1235_v39  ;;  %v1568_v39 = vld [vmem:[#allocation2 + $0x158] sm:$0xff] }
 0x1e5   : > { %1471 = vrot.lane.b32.xlu1 %v4910_v17, %s4142_s25  ;;  %v1600_v45 = vpack.c.bf16 %v1568_v39, %v1568_v39 }
 0x1e6   : > { %1475 = vrot.lane.b32.xlu0 %v4914_v16, %s4142_s25 }
 0x1e7   : > { %v1227_v18 = vpop.permute.xlu1 %1226 }
 0x1e8   : > { %1304 = vst.msk [vmem:[#allocation3 + $0x4c] sm:$0xf] %vm1284_vm6, %v1227_v18  ;;  %v1231_v57 = vpop.permute.xlu0 %1230  ;;  %v1592_v18 = vpack.c.bf16 %v1560_v1, %v1560_v1 }
 0x1e9   : > { %1306 = vst.msk [vmem:[#allocation3 + $0x54] sm:$0xf] %vm1284_vm6, %v1231_v57  ;;  %1467 = vrot.lane.b32.xlu2 %v4919_v32, %s4142_s25  ;;  %v1550_v57 = vld [vmem:[#allocation2 + $0x80] sm:$0xff] }
 0x1eb   : > { %v1241_v43 = vpop.permute.xlu2 %1240 }
 0x1ec   : > { %1311 = vst.msk [vmem:[#allocation3 + $0x68] sm:$0xf] %vm1284_vm6, %v1241_v43 }
 0x1ed   : > { %1639 = vrot.lane.b32.xlu1 %v1575_v63, %s4143_s26 }
 0x1ee   : > { %1643 = vrot.lane.b32.xlu0 %v1577_v49, %s4143_s26  ;;  %v1582_v49 = vpack.c.bf16 %v1550_v57, %v1550_v57 }
 0x1ef   : > { %v1233_v51 = vpop.permute.xlu1 %1232 }
 0x1f0   : > { %1307 = vst.msk [vmem:[#allocation3 + $0x58] sm:$0xf] %vm1284_vm6, %v1233_v51  ;;  %v1237_v60 = vpop.permute.xlu0 %1236 }
 0x1f1   : > { %1309 = vst.msk [vmem:[#allocation3 + $0x60] sm:$0xf] %vm1284_vm6, %v1237_v60  ;;  %1473 = vrot.lane.b32.xlu2 %v4929_v40, %s4142_s25 }
 0x1f3   : > { %v1247_v8 = vpop.permute.xlu2 %1246 }
 0x1f4   : > { %1314 = vst.msk [vmem:[#allocation3 + $0x74] sm:$0xf] %vm1284_vm6, %v1247_v8 }
 0x1f5   : > { %1645 = vrot.lane.b32.xlu1 %v1578_v4, %s4143_s26  ;;  %v2010_v4 = vld [vmem:[#allocation2 + $0xfa] sm:$0xff] }
 0x1f6   : > { %1649 = vrot.lane.b32.xlu0 %v1580_v5, %s4143_s26  ;;  %v2042_v7 = vpack.c.bf16 %v2010_v4, %v2010_v4 }
 0x1f7   : > { %v1239_v22 = vpop.permute.xlu1 %1238 }
 0x1f8   : > { %1310 = vst.msk [vmem:[#allocation3 + $0x64] sm:$0xf] %vm1284_vm6, %v1239_v22  ;;  %v1243_v28 = vpop.permute.xlu0 %1242 }
 0x1f9   : > { %1312 = vst.msk [vmem:[#allocation3 + $0x6c] sm:$0xf] %vm1284_vm6, %v1243_v28  ;;  %1641 = vrot.lane.b32.xlu2 %v1576_v13, %s4143_s26 }
 0x1fb   : > { %v1414_v41 = vpop.permute.xlu2 %1413 }
 0x1fc   : > { %1510 = vst.msk [vmem:[#allocation3] sm:$0xf] %vm1509_vm7, %v1414_v41 }
 0x1fd   : > { %1651 = vrot.lane.b32.xlu1 %v1581_v35, %s4143_s26 }
 0x1fe   : > { %1671 = vrot.lane.b32.xlu0 %v1591_v36, %s4143_s26 }
 0x1ff   : > { %v1245_v37 = vpop.permute.xlu1 %1244 }
 0x200   : > { %1313 = vst.msk [vmem:[#allocation3 + $0x70] sm:$0xf] %vm1284_vm6, %v1245_v37  ;;  %v1249_v3 = vpop.permute.xlu0 %1248  ;;  %v2001_v37 = vld [vmem:[#allocation2 + $0x92] sm:$0xff] }
 0x201   : > { %1315 = vst.msk [vmem:[#allocation3 + $0x78] sm:$0xf] %vm1284_vm6, %v1249_v3  ;;  %1647 = vrot.lane.b32.xlu2 %v1579_v38, %s4143_s26 }
 0x203   : > { %v1420_v63 = vpop.permute.xlu2 %1419 }
 0x204   : > { %1513 = vst.msk [vmem:[#allocation3 + $0xc] sm:$0xf] %vm1509_vm7, %v1420_v63 }
 0x205   : > { %1673 = vrot.lane.b32.xlu1 %v1592_v18, %s4143_s26 }
 0x206   : > { %1689 = vrot.lane.b32.xlu0 %v1600_v45, %s4143_s26 }
 0x207   : > { %v1251_v20 = vpop.permute.xlu1 %1250 }
 0x208   : > { %1316 = vst.msk [vmem:[#allocation3 + $0x7c] sm:$0xf] %vm1284_vm6, %v1251_v20  ;;  %v1416_v43 = vpop.permute.xlu0 %1415 }
 0x209   : > { %1511 = vst.msk [vmem:[#allocation3 + $0x4] sm:$0xf] %vm1509_vm7, %v1416_v43  ;;  %1653 = vrot.lane.b32.xlu2 %v1582_v49, %s4143_s26 }
 0x20b   : > { %v1426_v51 = vpop.permute.xlu2 %1425 }
 0x20c   : > { %1516 = vst.msk [vmem:[#allocation3 + $0x18] sm:$0xf] %vm1509_vm7, %v1426_v51 }
 0x20d   : > { %1896 = vrot.lane.b32.xlu1 %v4739_v47, %s4144_s27 }
 0x20e   : > { %1912 = vrot.lane.b32.xlu0 %v4789_v46, %s4144_s27  ;;  %v1551_v46 = vld [vmem:[#allocation2 + $0x90] sm:$0xff] }
 0x20f   : > { %v1418_v60 = vpop.permute.xlu1 %1417  ;;  %v1583_v19 = vpack.c.bf16 %v1551_v46, %v1551_v46 }
 0x210   : > { %1512 = vst.msk [vmem:[#allocation3 + $0x8] sm:$0xf] %vm1509_vm7, %v1418_v60  ;;  %v1422_v5 = vpop.permute.xlu0 %1421 }
 0x211   : > { %1514 = vst.msk [vmem:[#allocation3 + $0x10] sm:$0xf] %vm1509_vm7, %v1422_v5  ;;  %1687 = vrot.lane.b32.xlu2 %v1599_v52, %s4143_s26  ;;  %v1770_v52 = vld [vmem:[#allocation2 + $0x49] sm:$0xff] }
 0x212   : > { %v2019_v5 = vld [vmem:[#allocation2 + $0x16a] sm:$0xff] }
 0x213   : > { %v1432_v8 = vpop.permute.xlu2 %1431 }
 0x214   : > { %1519 = vst.msk [vmem:[#allocation3 + $0x24] sm:$0xf] %vm1509_vm7, %v1432_v8 }
 0x215   : > { %1914 = vrot.lane.b32.xlu1 %v4772_v42, %s4144_s27  ;;  %v1552_v42 = vld [vmem:[#allocation2 + $0x98] sm:$0xff] }
 0x216   : > { %2123 = vrot.lane.b32.xlu0 %v2042_v7, %s4145_s28  ;;  %v1584_v35 = vpack.c.bf16 %v1552_v42, %v1552_v42 }
 0x217   : > { %v1424_v47 = vpop.permute.xlu1 %1423 }
 0x218   : > { %1515 = vst.msk [vmem:[#allocation3 + $0x14] sm:$0xf] %vm1509_vm7, %v1424_v47  ;;  %v1428_v13 = vpop.permute.xlu0 %1427  ;;  %v1554_v47 = vld [vmem:[#allocation2 + $0xb0] sm:$0xff] }
 0x219   : > { %1517 = vst.msk [vmem:[#allocation3 + $0x1c] sm:$0xf] %vm1509_vm7, %v1428_v13  ;;  %1898 = vrot.lane.b32.xlu2 %v4747_v61, %s4144_s27 }
 0x21b   : > { %v1438_v22 = vpop.permute.xlu2 %1437 }
 0x21c   : > { %1522 = vst.msk [vmem:[#allocation3 + $0x30] sm:$0xf] %vm1509_vm7, %v1438_v22 }
 0x21d   : > { %2137 = vrot.lane.b32.xlu1 %v4897_v34, %s4145_s28 }
 0x21e   : > { %1655 = vrot.lane.b32.xlu0 %v1583_v19, %s4143_s26  ;;  %v1586_v19 = vpack.c.bf16 %v1554_v47, %v1554_v47 }
 0x21f   : > { %v1430_v27 = vpop.permute.xlu1 %1429 }
 0x220   : > { %1518 = vst.msk [vmem:[#allocation3 + $0x20] sm:$0xf] %vm1509_vm7, %v1430_v27  ;;  %v1434_v28 = vpop.permute.xlu0 %1433 }
 0x221   : > { %1520 = vst.msk [vmem:[#allocation3 + $0x28] sm:$0xf] %vm1509_vm7, %v1434_v28  ;;  %2121 = vrot.lane.b32.xlu2 %v4878_v33, %s4145_s28 }
 0x223   : > { %v1444_v61 = vpop.permute.xlu2 %1443 }
 0x224   : > { %1525 = vst.msk [vmem:[#allocation3 + $0x3c] sm:$0xf] %vm1509_vm7, %v1444_v61 }
 0x225   : > { %1657 = vrot.lane.b32.xlu1 %v1584_v35, %s4143_s26  ;;  %v1778_v35 = vld [vmem:[#allocation2 + $0xa9] sm:$0xff] }
 0x226   : > { %1866 = vrot.lane.b32.xlu0 %v4691_v48, %s4144_s27  ;;  %v1810_v61 = vpack.c.bf16 %v1778_v35, %v1778_v35 }
 0x227   : > { %v1436_v34 = vpop.permute.xlu1 %1435 }
 0x228   : > { %1521 = vst.msk [vmem:[#allocation3 + $0x2c] sm:$0xf] %vm1509_vm7, %v1436_v34  ;;  %v1440_v36 = vpop.permute.xlu0 %1439  ;;  %v2004_v34 = vld [vmem:[#allocation2 + $0xb2] sm:$0xff] }
 0x229   : > { %1523 = vst.msk [vmem:[#allocation3 + $0x34] sm:$0xf] %vm1509_vm7, %v1440_v36  ;;  %2139 = vrot.lane.b32.xlu2 %v4919_v32, %s4145_s28  ;;  %v1569_v32 = vld [vmem:[#allocation2 + $0x168] sm:$0xff]  ;;  %v4095_v36 = vld [vmem:[%s5825_s1] sm:$0xff] }
 0x22b   : > { %v1450_v24 = vpop.permute.xlu2 %1449 }
 0x22c   : > { %1528 = vst.msk [vmem:[#allocation3 + $0x48] sm:$0xf] %vm1509_vm7, %v1450_v24 }
 0x22d   : > { %1880 = vrot.lane.b32.xlu1 %v4716_v55, %s4144_s27  ;;  %v1561_v55 = vld [vmem:[#allocation2 + $0x108] sm:$0xff] }
 0x22e   : > { %2089 = vrot.lane.b32.xlu0 %v4806_v25, %s4145_s28  ;;  %v1593_v1 = vpack.c.bf16 %v1561_v55, %v1561_v55  ;;  %v1571_v55 = vld [vmem:[#allocation2 + $0x180] sm:$0xff] }
 0x22f   : > { %v1442_v33 = vpop.permute.xlu1 %1441 }
 0x230   : > { %1524 = vst.msk [vmem:[#allocation3 + $0x38] sm:$0xf] %vm1509_vm7, %v1442_v33  ;;  %v1446_v48 = vpop.permute.xlu0 %1445  ;;  %v1564_v33 = vld [vmem:[#allocation2 + $0x128] sm:$0xff] }
 0x231   : > { %1526 = vst.msk [vmem:[#allocation3 + $0x40] sm:$0xf] %vm1509_vm7, %v1446_v48  ;;  %1864 = vrot.lane.b32.xlu2 %v4702_v26, %s4144_s27  ;;  %v1601_v26 = vpack.c.bf16 %v1569_v32, %v1569_v32 }
 0x233   : > { %v1456_v41 = vpop.permute.xlu2 %1455 }
 0x234   : > { %1531 = vst.msk [vmem:[#allocation3 + $0x54] sm:$0xf] %vm1509_vm7, %v1456_v41 }
 0x235   : > { %2091 = vrot.lane.b32.xlu1 %v4825_v10, %s4145_s28  ;;  %v2033_v10 = vpack.c.bf16 %v2001_v37, %v2001_v37 }
 0x236   : > { %2107 = vrot.lane.b32.xlu0 %v4839_v54, %s4145_s28  ;;  %v1570_v54 = vld [vmem:[#allocation2 + $0x170] sm:$0xff] }
 0x237   : > { %v1448_v25 = vpop.permute.xlu1 %1447  ;;  %v1602_v45 = vpack.c.bf16 %v1570_v54, %v1570_v54 }
 0x238   : > { %1527 = vst.msk [vmem:[#allocation3 + $0x44] sm:$0xf] %vm1509_vm7, %v1448_v25  ;;  %v1452_v38 = vpop.permute.xlu0 %1451 }
 0x239   : > { %1529 = vst.msk [vmem:[#allocation3 + $0x4c] sm:$0xf] %vm1509_vm7, %v1452_v38  ;;  %1882 = vrot.lane.b32.xlu2 %v4732_v44, %s4144_s27  ;;  %v1562_v44 = vld [vmem:[#allocation2 + $0x110] sm:$0xff]  ;;  %v1603_v38 = vpack.c.bf16 %v1571_v55, %v1571_v55  ;;  %v1798_v55 = vld [vmem:[#allocation2 + $0x199] sm:$0xff] }
 0x23a   : > { %v1594_v63 = vpack.c.bf16 %v1562_v44, %v1562_v44 }
 0x23b   : > { %v1462_v39 = vpop.permute.xlu2 %1461 }
 0x23c   : > { %1534 = vst.msk [vmem:[#allocation3 + $0x60] sm:$0xf] %vm1509_vm7, %v1462_v39 }
 0x23d   : > { %1675 = vrot.lane.b32.xlu1 %v1593_v1, %s4143_s26  ;;  %v1563_v1 = vld [vmem:[#allocation2 + $0x120] sm:$0xff] }
 0x23e   : > { %1691 = vrot.lane.b32.xlu0 %v1601_v26, %s4143_s26  ;;  %v1595_v37 = vpack.c.bf16 %v1563_v1, %v1563_v1  ;;  %v1573_v1 = vld [vmem:[#allocation2 + $0x198] sm:$0xff] }
 0x23f   : > { %v1454_v3 = vpop.permute.xlu1 %1453 }
 0x240   : > { %1530 = vst.msk [vmem:[#allocation3 + $0x50] sm:$0xf] %vm1509_vm7, %v1454_v3  ;;  %v1458_v18 = vpop.permute.xlu0 %1457 }
 0x241   : > { %1532 = vst.msk [vmem:[#allocation3 + $0x58] sm:$0xf] %vm1509_vm7, %v1458_v18  ;;  %2105 = vrot.lane.b32.xlu2 %v2033_v10, %s4145_s28 }
 0x243   : > { %v1468_v57 = vpop.permute.xlu2 %1467 }
 0x244   : > { %1537 = vst.msk [vmem:[#allocation3 + $0x6c] sm:$0xf] %vm1509_vm7, %v1468_v57  ;;  %v1796_v57 = vld [vmem:[#allocation2 + $0x181] sm:$0xff] }
 0x245   : > { %1693 = vrot.lane.b32.xlu1 %v1602_v45, %s4143_s26 }
 0x246   : > { %1902 = vrot.lane.b32.xlu0 %v4750_v62, %s4144_s27 }
 0x247   : > { %v1460_v49 = vpop.permute.xlu1 %1459 }
 0x248   : > { %1533 = vst.msk [vmem:[#allocation3 + $0x5c] sm:$0xf] %vm1509_vm7, %v1460_v49  ;;  %v1464_v20 = vpop.permute.xlu0 %1463  ;;  %v1556_v49 = vld [vmem:[#allocation2 + $0xc8] sm:$0xff] }
 0x249   : > { %1535 = vst.msk [vmem:[#allocation3 + $0x64] sm:$0xf] %vm1509_vm7, %v1464_v20  ;;  %1677 = vrot.lane.b32.xlu2 %v1594_v63, %s4143_s26 }
 0x24b   : > { %v1474_v43 = vpop.permute.xlu2 %1473 }
 0x24c   : > { %1540 = vst.msk [vmem:[#allocation3 + $0x78] sm:$0xf] %vm1509_vm7, %v1474_v43 }
 0x24d   : > { %1916 = vrot.lane.b32.xlu1 %v4782_v30, %s4144_s27  ;;  %v1553_v30 = vld [vmem:[#allocation2 + $0xa8] sm:$0xff] }
 0x24e   : > { %2125 = vrot.lane.b32.xlu0 %v4871_v59, %s4145_s28  ;;  %v1585_v4 = vpack.c.bf16 %v1553_v30, %v1553_v30 }
 0x24f   : > { %v1466_v11 = vpop.permute.xlu1 %1465 }
 0x250   : > { %1536 = vst.msk [vmem:[#allocation3 + $0x68] sm:$0xf] %vm1509_vm7, %v1466_v11  ;;  %v1470_v62 = vpop.permute.xlu0 %1469  ;;  %v1588_v11 = vpack.c.bf16 %v1556_v49, %v1556_v49 }
 0x251   : > { %1538 = vst.msk [vmem:[#allocation3 + $0x70] sm:$0xf] %vm1509_vm7, %v1470_v62  ;;  %1900 = vrot.lane.b32.xlu2 %v4765_v23, %s4144_s27  ;;  %v1802_v23 = vpack.c.bf16 %v1770_v52, %v1770_v52 }
 0x253   : > { %v1642_v51 = vpop.permute.xlu2 %1641 }
 0x254   : > { %1737 = vst.msk [vmem:[#allocation3 + $0x4] sm:$0xf] %vm1735_vm8, %v1642_v51 }
 0x255   : > { %2127 = vrot.lane.b32.xlu1 %v4891_v58, %s4145_s28  ;;  %v2051_v58 = vpack.c.bf16 %v2019_v5, %v2019_v5 }
 0x256   : > { %2143 = vrot.lane.b32.xlu0 %v4910_v17, %s4145_s28 }
 0x257   : > { %v1472_v59 = vpop.permute.xlu1 %1471 }
 0x258   : > { %1539 = vst.msk [vmem:[#allocation3 + $0x74] sm:$0xf] %vm1509_vm7, %v1472_v59  ;;  %v1476_v60 = vpop.permute.xlu0 %1475  ;;  %v1780_v59 = vld [vmem:[#allocation2 + $0xc1] sm:$0xff] }
 0x259   : > { %1541 = vst.msk [vmem:[#allocation3 + $0x7c] sm:$0xf] %vm1509_vm7, %v1476_v60  ;;  %1918 = vrot.lane.b32.xlu2 %v4801_v6, %s4144_s27  ;;  %v2254_v6 = vld [vmem:[%s5825_s1 + $0x10] sm:$0x3] }
 0x25a   : > { %v2344_v13 = vunpack.c.l.b16 %v2254_v6  ;;  %v1773_v6 = vld [vmem:[#allocation2 + $0x69] sm:$0xff] }
 0x25b   : > { %v1648_v7 = vpop.permute.xlu2 %1647 }
 0x25c   : > { %1740 = vst.msk [vmem:[#allocation3 + $0x10] sm:$0xf] %vm1735_vm8, %v1648_v7  ;;  %v2347_v22 = vpack.c.b16 %v2344_v13, %v2344_v13  ;;  %v1781_v7 = vld [vmem:[#allocation2 + $0xc9] sm:$0xff]  ;;  %v1805_v13 = vpack.c.bf16 %v1773_v6, %v1773_v6 }
 0x25d   : > { %1659 = vrot.lane.b32.xlu1 %v1585_v4, %s4143_s26  ;;  %v1812_v4 = vpack.c.bf16 %v1780_v59, %v1780_v59  ;;  %v1813_v47 = vpack.c.bf16 %v1781_v7, %v1781_v7  ;;  %v1999_v7 = vld [vmem:[#allocation2 + $0x7a] sm:$0xff]  ;;  %v2000_v6 = vld [vmem:[#allocation2 + $0x82] sm:$0xff] }
 0x25e   : > { %1868 = vrot.lane.b32.xlu0 %v1802_v23, %s4144_s27  ;;  %v2401_v27 = vsel %vm2399_vm9, %v2347_v22, 0  ;;  %v1565_v22 = vld [vmem:[#allocation2 + $0x138] sm:$0xff] }
 0x25f   : > { %v1640_v17 = vpop.permute.xlu1 %1639  ;;  %4098 = vmatpush.bf16.msra.mxu2 %v2401_v27  ;;  %4099 = vmatpush.bf16.msra.mxu3 %v2401_v27 }
 0x260   : > { %1736 = vst.msk [vmem:[#allocation3] sm:$0xf] %vm1735_vm8, %v1640_v17  ;;  %v1644_v8 = vpop.permute.xlu0 %1643  ;;  %2408 = vmatpush.bf16.msra.mxu0 %v2401_v27  ;;  %4097 = vmatpush.bf16.msra.mxu1 %v2401_v27  ;;  %v1998_v17 = vld [vmem:[#allocation2 + $0x6a] sm:$0xff]  ;;  %v1597_v27 = vpack.c.bf16 %v1565_v22, %v1565_v22  ;;  %v2032_v22 = vpack.c.bf16 %v2000_v6, %v2000_v6 }
 0x261   : > { %1738 = vst.msk [vmem:[#allocation3 + $0x8] sm:$0xf] %vm1735_vm8, %v1644_v8  ;;  %2141 = vrot.lane.b32.xlu2 %v2051_v58, %s4145_s28 }
 0x263   : > { %v1654_v46 = vpop.permute.xlu2 %1653 }
 0x264   : > { %1743 = vst.msk [vmem:[#allocation3 + $0x1c] sm:$0xf] %vm1735_vm8, %v1654_v46 }
 0x265   : > { %1870 = vrot.lane.b32.xlu1 %v4711_v53, %s4144_s27  ;;  %v4096_v53 = vld [vmem:[%s5825_s1 + $0x8] sm:$0xff] }
 0x266   : > { %1886 = vrot.lane.b32.xlu0 %v4726_v0, %s4144_s27  ;;  %4101 = vmatpush.bf16.msra.mxu2 %v4096_v53 }
 0x267   : > { %v1646_v42 = vpop.permute.xlu1 %1645  ;;  %4102 = vmatpush.bf16.msra.mxu3 %v4096_v53  ;;  %2409 = vmatpush.bf16.msra.mxu0 %v4096_v53 }
 0x268   : > { %1739 = vst.msk [vmem:[#allocation3 + $0xc] sm:$0xf] %vm1735_vm8, %v1646_v42  ;;  %v1650_v28 = vpop.permute.xlu0 %1649  ;;  %4100 = vmatpush.bf16.msra.mxu1 %v4096_v53 }
 0x269   : > { %1741 = vst.msk [vmem:[#allocation3 + $0x14] sm:$0xf] %vm1735_vm8, %v1650_v28  ;;  %1661 = vrot.lane.b32.xlu2 %v1586_v19, %s4143_s26  ;;  %v1997_v28 = vld [vmem:[#allocation2 + $0x62] sm:$0xff] }
 0x26a   : > { %4104 = vmatpush.bf16.msra.mxu2 %v4095_v36  ;;  %v2029_v35 = vpack.c.bf16 %v1997_v28, %v1997_v28 }
 0x26b   : > { %v1688_v0 = vpop.permute.xlu2 %1687  ;;  %4105 = vmatpush.bf16.msra.mxu3 %v4095_v36  ;;  %2410 = vmatpush.bf16.msra.mxu0 %v4095_v36 }
 0x26c   : > { %1760 = vst.msk [vmem:[#allocation3 + $0x60] sm:$0xf] %vm1735_vm8, %v1688_v0  ;;  %4103 = vmatpush.bf16.msra.mxu1 %v4095_v36  ;;  %v1566_v0 = vld [vmem:[#allocation2 + $0x140] sm:$0xff] }
 0x26d   : > { %2093 = vrot.lane.b32.xlu1 %v4810_v56, %s4145_s28  ;;  %v2036_v56 = vpack.c.bf16 %v2004_v34, %v2004_v34  ;;  %v1574_v36 = vld [vmem:[#allocation2 + $0x1a0] sm:$0xff] }
 0x26e   : > { %2109 = vrot.lane.b32.xlu0 %v4855_v31, %s4145_s28  ;;  %v1596_v31 = vpack.c.bf16 %v1564_v33, %v1564_v33 }
 0x26f   : > { %v1652_v24 = vpop.permute.xlu1 %1651 }
 0x270   : > { %1742 = vst.msk [vmem:[#allocation3 + $0x18] sm:$0xf] %vm1735_vm8, %v1652_v24  ;;  %v1672_v48 = vpop.permute.xlu0 %1671 }
 0x271   : > { %1752 = vst.msk [vmem:[#allocation3 + $0x40] sm:$0xf] %vm1735_vm8, %v1672_v48  ;;  %1884 = vrot.lane.b32.xlu2 %v1810_v61, %s4144_s27  ;;  %v1598_v48 = vpack.c.bf16 %v1566_v0, %v1566_v0 }
 0x273   : > { %v1899_v41 = vpop.permute.xlu2 %1898 }
 0x275   : > { %2111 = vrot.lane.b32.xlu1 %v2036_v56, %s4145_s28 }
 0x276   : > { %1681 = vrot.lane.b32.xlu0 %v1596_v31, %s4143_s26  ;;  %v1790_v31 = vld [vmem:[#allocation2 + $0x139] sm:$0xff] }
 0x277   : > { %v1674_v25 = vpop.permute.xlu1 %1673 }
 0x278   : > { %1753 = vst.msk [vmem:[#allocation3 + $0x44] sm:$0xf] %vm1735_vm8, %v1674_v25  ;;  %v1690_v32 = vpop.permute.xlu0 %1689 }
 0x279   : > { %1761 = vst.msk [vmem:[#allocation3 + $0x64] sm:$0xf] %vm1735_vm8, %v1690_v32  ;;  %2095 = vrot.lane.b32.xlu2 %v4819_v9, %s4145_s28  ;;  %v1572_v9 = vld [vmem:[#allocation2 + $0x188] sm:$0xff]  ;;  %v1822_v32 = vpack.c.bf16 %v1790_v31, %v1790_v31 }
 0x27a   : > { %1978 = vst.msk [vmem:[#allocation3 + $0x44] sm:$0xf] %vm1960_vm10, %v1899_v41  ;;  %v1604_v3 = vpack.c.bf16 %v1572_v9, %v1572_v9  ;;  %v2016_v9 = vld [vmem:[#allocation2 + $0x142] sm:$0xff] }
 0x27b   : > { %v2122_v26 = vpop.permute.xlu2 %2121 }
 0x27d   : > { %1695 = vrot.lane.b32.xlu1 %v1603_v38, %s4143_s26  ;;  %v1830_v38 = vpack.c.bf16 %v1798_v55, %v1798_v55 }
 0x27e   : > { %1904 = vrot.lane.b32.xlu0 %v4759_v14, %s4144_s27  ;;  %v2013_v14 = vld [vmem:[#allocation2 + $0x122] sm:$0xff] }
 0x27f   : > { %v1897_v39 = vpop.permute.xlu1 %1896  ;;  %v2045_v44 = vpack.c.bf16 %v2013_v14, %v2013_v14  ;;  %v1791_v14 = vld [vmem:[#allocation2 + $0x141] sm:$0xff] }
 0x280   : > { %1977 = vst.msk [vmem:[#allocation3 + $0x40] sm:$0xf] %vm1960_vm10, %v1897_v39  ;;  %v1913_v10 = vpop.permute.xlu0 %1912  ;;  %v1799_v39 = vld [vmem:[#allocation2 + $0x1a1] sm:$0xff] }
 0x281   : > { %1985 = vst.msk [vmem:[#allocation3 + $0x60] sm:$0xf] %vm1960_vm10, %v1913_v10  ;;  %1679 = vrot.lane.b32.xlu2 %v1595_v37, %s4143_s26  ;;  %v1605_v37 = vpack.c.bf16 %v1573_v1, %v1573_v1 }
 0x282   : > { %2202 = vst.msk [vmem:[#allocation3 + $0x40] sm:$0xf] %vm2185_vm11, %v2122_v26 }
 0x283   : > { %v2140_v54 = vpop.permute.xlu2 %2139 }
 0x285   : > { %1906 = vrot.lane.b32.xlu1 %v4776_v2, %s4144_s27  ;;  %v1828_v2 = vpack.c.bf16 %v1796_v57, %v1796_v57 }
 0x286   : > { %1922 = vrot.lane.b32.xlu0 %v4794_v21, %s4144_s27 }
 0x287   : > { %v1915_v18 = vpop.permute.xlu1 %1914 }
 0x288   : > { %1986 = vst.msk [vmem:[#allocation3 + $0x64] sm:$0xf] %vm1960_vm10, %v1915_v18  ;;  %v2124_v45 = vpop.permute.xlu0 %2123 }
 0x289   : > { %2203 = vst.msk [vmem:[#allocation3 + $0x44] sm:$0xf] %vm2185_vm11, %v2124_v45  ;;  %1697 = vrot.lane.b32.xlu2 %v1604_v3, %s4143_s26  ;;  %v1831_v3 = vpack.c.bf16 %v1799_v39, %v1799_v39  ;;  %v1823_v45 = vpack.c.bf16 %v1791_v14, %v1791_v14  ;;  %v5201_v14 = vld [vmem:[%s5827_s3] ss:$0 sm:$0xff] }
 0x28a   : > { %2211 = vst.msk [vmem:[#allocation3 + $0x64] sm:$0xf] %vm2185_vm11, %v2140_v54 }
 0x28b   : > { %v1865_v63 = vpop.permute.xlu2 %1864 }
 0x28c   : > { %1961 = vst.msk [vmem:[#allocation3] sm:$0xf] %vm1960_vm10, %v1865_v63  ;;  %v1557_v63 = vld [vmem:[#allocation2 + $0xd8] sm:$0xff] }
 0x28d   : > { %2129 = vrot.lane.b32.xlu1 %v2045_v44, %s4145_s28  ;;  %v2023_v44 = vld [vmem:[#allocation2 + $0x19a] sm:$0xff]  ;;  %v1589_v49 = vpack.c.bf16 %v1557_v63, %v1557_v63 }
 0x28e   : > { %2145 = vrot.lane.b32.xlu0 %v4929_v40, %s4145_s28  ;;  %v1772_v40 = vld [vmem:[#allocation2 + $0x61] sm:$0xff] }
 0x28f   : > { %v2138_v21 = vpop.permute.xlu1 %2137  ;;  %v1804_v60 = vpack.c.bf16 %v1772_v40, %v1772_v40  ;;  %v1775_v40 = vld [vmem:[#allocation2 + $0x81] sm:$0xff] }
 0x290   : > { %2210 = vst.msk [vmem:[#allocation3 + $0x60] sm:$0xf] %vm2185_vm11, %v2138_v21  ;;  %v1656_v20 = vpop.permute.xlu0 %1655  ;;  %v4087_v43 = vld [vmem:[#allocation3 + $0x40] sm:$0xff]  ;;  %v2055_v21 = vpack.c.bf16 %v2023_v44, %v2023_v44 }
 0x291   : > { %1744 = vst.msk [vmem:[#allocation3 + $0x20] sm:$0xf] %vm1735_vm8, %v1656_v20  ;;  %1920 = vrot.lane.b32.xlu2 %v1828_v2, %s4144_s27  ;;  %4067 = vmatmul.msk.bf16.vlgmr.msra.gmra.mxu2 %vm2350_vm12, %v4087_v43  ;;  %v1558_v43 = vld [vmem:[#allocation2 + $0xe0] sm:$0xff] }
 0x292   : > { %v1590_v59 = vpack.c.bf16 %v1558_v43, %v1558_v43 }
 0x293   : > { %v1883_v62 = vpop.permute.xlu2 %1882 }
 0x295   : > { %2147 = vrot.lane.b32.xlu1 %v4914_v16, %s4145_s28  ;;  %v1555_v16 = vld [vmem:[#allocation2 + $0xc0] sm:$0xff] }
 0x296   : > { %1665 = vrot.lane.b32.xlu0 %v1588_v11, %s4143_s26  ;;  %v1587_v5 = vpack.c.bf16 %v1555_v16, %v1555_v16 }
 0x297   : > { %v1658_v51 = vpop.permute.xlu1 %1657  ;;  %v4091_v30 = vld [vmem:[#allocation3 + $0x60] sm:$0xff] }
 0x298   : > { %1745 = vst.msk [vmem:[#allocation3 + $0x24] sm:$0xf] %vm1735_vm8, %v1658_v51  ;;  %v1867_v52 = vpop.permute.xlu0 %1866  ;;  %4071 = vmatmul.msk.bf16.vlgmr.msra.gmra.mxu3 %vm2350_vm12, %v4091_v30 }
 0x299   : > { %1962 = vst.msk [vmem:[#allocation3 + $0x4] sm:$0xf] %vm1960_vm10, %v1867_v52  ;;  %2131 = vrot.lane.b32.xlu2 %v4884_v12, %s4145_s28  ;;  %v2030_v12 = vpack.c.bf16 %v1998_v17, %v1998_v17  ;;  %v1807_v52 = vpack.c.bf16 %v1775_v40, %v1775_v40  ;;  %v2031_v17 = vpack.c.bf16 %v1999_v7, %v1999_v7 }
 0x29a   : > { %1970 = vst.msk [vmem:[#allocation3 + $0x24] sm:$0xf] %vm1960_vm10, %v1883_v62 }
 0x29b   : > { %v2106_v23 = vpop.permute.xlu2 %2105 }
 0x29d   : > { %1872 = vrot.lane.b32.xlu1 %v1804_v60, %s4144_s27  ;;  %v2024_v60 = vld [vmem:[#allocation2 + $0x1a2] sm:$0xff] }
 0x29e   : > { %1888 = vrot.lane.b32.xlu0 %v1812_v4, %s4144_s27  ;;  %v2056_v16 = vpack.c.bf16 %v2024_v60, %v2024_v60 }
 0x29f   : > { %v1881_v58 = vpop.permute.xlu1 %1880 }
 0x2a0   : > { %1969 = vst.msk [vmem:[#allocation3 + $0x20] sm:$0xf] %vm1960_vm10, %v1881_v58  ;;  %v2090_v8 = vpop.permute.xlu0 %2089 }
 0x2a1   : > { %2186 = vst.msk [vmem:[#allocation3] sm:$0xf] %vm2185_vm11, %v2090_v8  ;;  %1663 = vrot.lane.b32.xlu2 %v1587_v5, %s4143_s26  ;;  %v1774_v8 = vld [vmem:[#allocation2 + $0x79] sm:$0xff] }
 0x2a2   : > { %2194 = vst.msk [vmem:[#allocation3 + $0x20] sm:$0xf] %vm2185_vm11, %v2106_v23  ;;  %v1782_v23 = vld [vmem:[#allocation2 + $0xd9] sm:$0xff] }
 0x2a3   : > { %v1678_v46 = vpop.permute.xlu2 %1677 }
 0x2a4   : > { %1755 = vst.msk [vmem:[#allocation3 + $0x4c] sm:$0xf] %vm1735_vm8, %v1678_v46 }
 0x2a5   : > { %1890 = vrot.lane.b32.xlu1 %v1813_v47, %s4144_s27 }
 0x2a6   : > { %2099 = vrot.lane.b32.xlu0 %v2030_v12, %s4145_s28  ;;  %v1806_v12 = vpack.c.bf16 %v1774_v8, %v1774_v8 }
 0x2a7   : > { %v2092_v19 = vpop.permute.xlu1 %2091 }
 0x2a8   : > { %2187 = vst.msk [vmem:[#allocation3 + $0x4] sm:$0xf] %vm2185_vm11, %v2092_v19  ;;  %v2108_v42 = vpop.permute.xlu0 %2107 }
 0x2a9   : > { %2195 = vst.msk [vmem:[#allocation3 + $0x24] sm:$0xf] %vm2185_vm11, %v2108_v42  ;;  %1874 = vrot.lane.b32.xlu2 %v1805_v13, %s4144_s27  ;;  %v2008_v13 = vld [vmem:[#allocation2 + $0xe2] sm:$0xff] }
 0x2aa   : > { %v2040_v42 = vpack.c.bf16 %v2008_v13, %v2008_v13 }
 0x2ab   : > { %v1901_v53 = vpop.permute.xlu2 %1900 }
 0x2ad   : > { %2113 = vrot.lane.b32.xlu1 %v4849_v29, %s4145_s28  ;;  %v1606_v29 = vpack.c.bf16 %v1574_v36, %v1574_v36 }
 0x2ae   : > { %1683 = vrot.lane.b32.xlu0 %v1597_v27, %s4143_s26  ;;  %v1783_v27 = vld [vmem:[#allocation2 + $0xe1] sm:$0xff] }
 0x2af   : > { %v1676_v61 = vpop.permute.xlu1 %1675  ;;  %v4079_v34 = vld [vmem:[#allocation3] sm:$0xff] }
 0x2b0   : > { %1754 = vst.msk [vmem:[#allocation3 + $0x48] sm:$0xf] %vm1735_vm8, %v1676_v61  ;;  %v1692_v24 = vpop.permute.xlu0 %1691  ;;  %v4083_v33 = vld [vmem:[#allocation3 + $0x20] sm:$0xff]  ;;  %4059 = vmatmul.msk.bf16.vlgmr.msra.gmra.mxu0 %vm2350_vm12, %v4079_v34  ;;  %v2007_v34 = vld [vmem:[#allocation2 + $0xda] sm:$0xff] }
 0x2b1   : > { %1762 = vst.msk [vmem:[#allocation3 + $0x68] sm:$0xf] %vm1735_vm8, %v1692_v24  ;;  %2097 = vrot.lane.b32.xlu2 %v2029_v35, %s4145_s28  ;;  %4063 = vmatmul.msk.bf16.vlgmr.msra.gmra.mxu1 %vm2350_vm12, %v4083_v33  ;;  %v2039_v24 = vpack.c.bf16 %v2007_v34, %v2007_v34 }
 0x2b2   : > { %1979 = vst.msk [vmem:[#allocation3 + $0x48] sm:$0xf] %vm1960_vm10, %v1901_v53  ;;  %v1815_v53 = vpack.c.bf16 %v1783_v27, %v1783_v27 }
 0x2b3   : > { %v1919_v56 = vpop.permute.xlu2 %1918 }
 0x2b5   : > { %1685 = vrot.lane.b32.xlu1 %v1598_v48, %s4143_s26 }
 0x2b6   : > { %1701 = vrot.lane.b32.xlu0 %v1606_v29, %s4143_s26 }
 0x2b7   : > { %v1694_v41 = vpop.permute.xlu1 %1693 }
 0x2b8   : > { %1763 = vst.msk [vmem:[#allocation3 + $0x6c] sm:$0xf] %vm1735_vm8, %v1694_v41  ;;  %v1903_v25 = vpop.permute.xlu0 %1902 }
 0x2b9   : > { %1980 = vst.msk [vmem:[#allocation3 + $0x4c] sm:$0xf] %vm1960_vm10, %v1903_v25  ;;  %2115 = vrot.lane.b32.xlu2 %v4865_v50, %s4145_s28  ;;  %v2048_v50 = vpack.c.bf16 %v2016_v9, %v2016_v9 }
 0x2ba   : > { %1988 = vst.msk [vmem:[#allocation3 + $0x6c] sm:$0xf] %vm1960_vm10, %v1919_v56 }
 0x2bb   : > { %v2142_v26 = vpop.permute.xlu2 %2141 }
 0x2bd   : > { %1908 = vrot.lane.b32.xlu1 %v1822_v32, %s4144_s27 }
 0x2be   : > { %1924 = vrot.lane.b32.xlu0 %v1830_v38, %s4144_s27 }
 0x2bf   : > { %v1917_v10 = vpop.permute.xlu1 %1916 }
 0x2c0   : > { %1987 = vst.msk [vmem:[#allocation3 + $0x68] sm:$0xf] %vm1960_vm10, %v1917_v10  ;;  %v2126_v54 = vpop.permute.xlu0 %2125 }
 0x2c1   : > { %2204 = vst.msk [vmem:[#allocation3 + $0x48] sm:$0xf] %vm2185_vm11, %v2126_v54  ;;  %1699 = vrot.lane.b32.xlu2 %v1605_v37, %s4143_s26 }
 0x2c2   : > { %2212 = vst.msk [vmem:[#allocation3 + $0x68] sm:$0xf] %vm2185_vm11, %v2142_v26 }
 0x2c3   : > { %v1662_v18 = vpop.permute.xlu2 %1661 }
 0x2c4   : > { %1747 = vst.msk [vmem:[#allocation3 + $0x2c] sm:$0xf] %vm1735_vm8, %v1662_v18 }
 0x2c5   : > { %1926 = vrot.lane.b32.xlu1 %v1831_v3, %s4144_s27  ;;  %v5196_v3 = vld [vmem:[%s5826_s2] ss:$0 sm:$0xff] }
 0x2c6   : > { %2135 = vrot.lane.b32.xlu0 %v2048_v50, %s4145_s28 }
 0x2c7   : > { %v2128_v57 = vpop.permute.xlu1 %2127 }
 0x2c8   : > { %2205 = vst.msk [vmem:[#allocation3 + $0x4c] sm:$0xf] %vm2185_vm11, %v2128_v57  ;;  %v2144_v2 = vpop.permute.xlu0 %2143 }
 0x2c9   : > { %2213 = vst.msk [vmem:[#allocation3 + $0x6c] sm:$0xf] %vm2185_vm11, %v2144_v2  ;;  %1910 = vrot.lane.b32.xlu2 %v1823_v45, %s4144_s27 }
 0x2cb   : > { %v1885_v20 = vpop.permute.xlu2 %1884 }
 0x2cd   : > { %2149 = vrot.lane.b32.xlu1 %v2055_v21, %s4145_s28 }
 0x2ce   : > { %1667 = vrot.lane.b32.xlu0 %v1589_v49, %s4143_s26 }
 0x2cf   : > { %v1660_v11 = vpop.permute.xlu1 %1659  ;;  %v4088_v62 = vld [vmem:[#allocation3 + $0x48] sm:$0xff] }
 0x2d0   : > { %1746 = vst.msk [vmem:[#allocation3 + $0x28] sm:$0xf] %vm1735_vm8, %v1660_v11  ;;  %v1869_v51 = vpop.permute.xlu0 %1868  ;;  %v4092_v30 = vld [vmem:[#allocation3 + $0x68] sm:$0xff]  ;;  %4068 = vmatmul.msk.bf16.gmra.mxu2 %vm2350_vm12, %v4088_v62 }
 0x2d1   : > { %1963 = vst.msk [vmem:[#allocation3 + $0x8] sm:$0xf] %vm1960_vm10, %v1869_v51  ;;  %2133 = vrot.lane.b32.xlu2 %v4904_v15, %s4145_s28  ;;  %4072 = vmatmul.msk.bf16.gmra.mxu3 %vm2350_vm12, %v4092_v30  ;;  %v1814_v15 = vpack.c.bf16 %v1782_v23, %v1782_v23 }
 0x2d2   : > { %1971 = vst.msk [vmem:[#allocation3 + $0x28] sm:$0xf] %vm1960_vm10, %v1885_v20 }
 0x2d3   : > { %v2096_v4 = vpop.permute.xlu2 %2095 }
 0x2d5   : > { %1669 = vrot.lane.b32.xlu1 %v1590_v59, %s4143_s26 }
 0x2d6   : > { %1878 = vrot.lane.b32.xlu0 %v1807_v52, %s4144_s27 }
 0x2d7   : > { %v1871_v5 = vpop.permute.xlu1 %1870 }
 0x2d8   : > { %1964 = vst.msk [vmem:[#allocation3 + $0xc] sm:$0xf] %vm1960_vm10, %v1871_v5  ;;  %v1887_v58 = vpop.permute.xlu0 %1886 }
 0x2d9   : > { %1972 = vst.msk [vmem:[#allocation3 + $0x2c] sm:$0xf] %vm1960_vm10, %v1887_v58  ;;  %2151 = vrot.lane.b32.xlu2 %v2056_v16, %s4145_s28 }
 0x2da   : > { %2189 = vst.msk [vmem:[#allocation3 + $0xc] sm:$0xf] %vm2185_vm11, %v2096_v4 }
 0x2db   : > { %v1680_v47 = vpop.permute.xlu2 %1679 }
 0x2dc   : > { %1756 = vst.msk [vmem:[#allocation3 + $0x50] sm:$0xf] %vm1735_vm8, %v1680_v47 }
 0x2dd   : > { %1892 = vrot.lane.b32.xlu1 %v1814_v15, %s4144_s27 }
 0x2de   : > { %2101 = vrot.lane.b32.xlu0 %v2031_v17, %s4145_s28 }
 0x2df   : > { %v2094_v46 = vpop.permute.xlu1 %2093 }
 0x2e0   : > { %2188 = vst.msk [vmem:[#allocation3 + $0x8] sm:$0xf] %vm2185_vm11, %v2094_v46  ;;  %v2110_v19 = vpop.permute.xlu0 %2109 }
 0x2e1   : > { %2196 = vst.msk [vmem:[#allocation3 + $0x28] sm:$0xf] %vm2185_vm11, %v2110_v19  ;;  %1876 = vrot.lane.b32.xlu2 %v1806_v12, %s4144_s27 }
 0x2e3   : > { %v1698_v28 = vpop.permute.xlu2 %1697 }
 0x2e4   : > { %1765 = vst.msk [vmem:[#allocation3 + $0x74] sm:$0xf] %vm1735_vm8, %v1698_v28 }
 0x2e5   : > { %2103 = vrot.lane.b32.xlu1 %v2032_v22, %s4145_s28 }
 0x2e6   : > { %2119 = vrot.lane.b32.xlu0 %v2040_v42, %s4145_s28 }
 0x2e7   : > { %v2112_v35 = vpop.permute.xlu1 %2111  ;;  %v4080_v0 = vld [vmem:[#allocation3 + $0x8] sm:$0xff] }
 0x2e8   : > { %2197 = vst.msk [vmem:[#allocation3 + $0x2c] sm:$0xf] %vm2185_vm11, %v2112_v35  ;;  %v1682_v61 = vpop.permute.xlu0 %1681  ;;  %4060 = vmatmul.msk.bf16.gmra.mxu0 %vm2350_vm12, %v4080_v0 }
 0x2e9   : > { %1757 = vst.msk [vmem:[#allocation3 + $0x54] sm:$0xf] %vm1735_vm8, %v1682_v61  ;;  %1894 = vrot.lane.b32.xlu2 %v1815_v53, %s4144_s27 }
 0x2eb   : > { %v1921_v36 = vpop.permute.xlu2 %1920 }
 0x2ef   : > { %v1696_v33 = vpop.permute.xlu1 %1695  ;;  %v4084_v48 = vld [vmem:[#allocation3 + $0x28] sm:$0xff] }
 0x2f0   : > { %1764 = vst.msk [vmem:[#allocation3 + $0x70] sm:$0xf] %vm1735_vm8, %v1696_v33  ;;  %v1905_v29 = vpop.permute.xlu0 %1904  ;;  %4064 = vmatmul.msk.bf16.gmra.mxu1 %vm2350_vm12, %v4084_v48 }
 0x2f1   : > { %1981 = vst.msk [vmem:[#allocation3 + $0x50] sm:$0xf] %vm1960_vm10, %v1905_v29  ;;  %2117 = vrot.lane.b32.xlu2 %v2039_v24, %s4145_s28 }
 0x2f2   : > { %1989 = vst.msk [vmem:[#allocation3 + $0x70] sm:$0xf] %vm1960_vm10, %v1921_v36 }
 0x2f3   : > { %v2132_v56 = vpop.permute.xlu2 %2131 }
 0x2f7   : > { %v1907_v31 = vpop.permute.xlu1 %1906 }
 0x2f8   : > { %1982 = vst.msk [vmem:[#allocation3 + $0x54] sm:$0xf] %vm1960_vm10, %v1907_v31  ;;  %v1923_v41 = vpop.permute.xlu0 %1922 }
 0x2f9   : > { %1990 = vst.msk [vmem:[#allocation3 + $0x74] sm:$0xf] %vm1960_vm10, %v1923_v41 }
 0x2fa   : > { %2207 = vst.msk [vmem:[#allocation3 + $0x54] sm:$0xf] %vm2185_vm11, %v2132_v56 }
 0x2fb   : > { %v1664_v55 = vpop.permute.xlu2 %1663 }
 0x2fc   : > { %1748 = vst.msk [vmem:[#allocation3 + $0x30] sm:$0xf] %vm1735_vm8, %v1664_v55 }
 0x2ff   : > { %v2130_v25 = vpop.permute.xlu1 %2129 }
 0x300   : > { %2206 = vst.msk [vmem:[#allocation3 + $0x50] sm:$0xf] %vm2185_vm11, %v2130_v25  ;;  %v2146_v32 = vpop.permute.xlu0 %2145 }
 0x301   : > { %2214 = vst.msk [vmem:[#allocation3 + $0x70] sm:$0xf] %vm2185_vm11, %v2146_v32 }
 0x303   : > { %v1875_v38 = vpop.permute.xlu2 %1874 }
 0x304   : > { %1966 = vst.msk [vmem:[#allocation3 + $0x14] sm:$0xf] %vm1960_vm10, %v1875_v38 }
 0x307   : > { %v2148_v1 = vpop.permute.xlu1 %2147  ;;  %v4089_v26 = vld [vmem:[#allocation3 + $0x50] sm:$0xff] }
 0x308   : > { %2215 = vst.msk [vmem:[#allocation3 + $0x74] sm:$0xf] %vm2185_vm11, %v2148_v1  ;;  %v1666_v37 = vpop.permute.xlu0 %1665  ;;  %4069 = vmatmul.msk.bf16.gmra.mxu2 %vm2350_vm12, %v4089_v26 }
 0x309   : > { %1749 = vst.msk [vmem:[#allocation3 + $0x34] sm:$0xf] %vm1735_vm8, %v1666_v37 }
 0x30b   : > { %v2098_v39 = vpop.permute.xlu2 %2097 }
 0x30f   : > { %v1873_v10 = vpop.permute.xlu1 %1872  ;;  %v4093_v9 = vld [vmem:[#allocation3 + $0x70] sm:$0xff] }
 0x310   : > { %1965 = vst.msk [vmem:[#allocation3 + $0x10] sm:$0xf] %vm1960_vm10, %v1873_v10  ;;  %v1889_v54 = vpop.permute.xlu0 %1888  ;;  %4073 = vmatmul.msk.bf16.gmra.mxu3 %vm2350_vm12, %v4093_v9 }
 0x311   : > { %1973 = vst.msk [vmem:[#allocation3 + $0x30] sm:$0xf] %vm1960_vm10, %v1889_v54 }
 0x312   : > { %2190 = vst.msk [vmem:[#allocation3 + $0x10] sm:$0xf] %vm2185_vm11, %v2098_v39 }
 0x313   : > { %v2116_v50 = vpop.permute.xlu2 %2115 }
 0x314   : > { %v2452_v18 = vpop.f32.mrf.mxu2 }
 0x315   : > { %v2512_v45 = vmul.f32 %v5196_v3, %v2452_v18 }
 0x317   : > { %v1891_v44 = vpop.permute.xlu1 %1890  ;;  %v2548_v57 = vadd.f32 %v5201_v14, %v2512_v45 }
 0x318   : > { %1974 = vst.msk [vmem:[#allocation3 + $0x34] sm:$0xf] %vm1960_vm10, %v1891_v44  ;;  %v2100_v63 = vpop.permute.xlu0 %2099 }
 0x319   : > { %2191 = vst.msk [vmem:[#allocation3 + $0x14] sm:$0xf] %vm2185_vm11, %v2100_v63  ;;  %v2580_v2 = vmax.f32 %v2548_v57, 0.0 }
 0x31a   : > { %2199 = vst.msk [vmem:[#allocation3 + $0x34] sm:$0xf] %vm2185_vm11, %v2116_v50 }
 0x31b   : > { %v1700_v21 = vpop.permute.xlu2 %1699  ;;  %v2676_v49 = vrot.slane %v2580_v2, 2  ;;  %v2677_v20 = vrot.slane %v2580_v2, 4  ;;  %v2678_v43 = vrot.slane %v2580_v2, 6  ;;  %v3268_v11 = vsel %vm2399_vm9, %v2580_v2, -inf  ;;  %v2472_v62 = vpop.f32.mrf.mxu3 }
 0x31c   : > { %1766 = vst.msk [vmem:[#allocation3 + $0x78] sm:$0xf] %vm1735_vm8, %v1700_v21  ;;  %v2520_v40 = vmul.f32 %v5196_v3, %v2472_v62  ;;  %v2454_v51 = vpop.f32.mrf.mxu2  ;;  %v3269_v4 = vrot.slane %v3268_v11, 4 }
 0x31d   : > { %v3275_v30 = vsel %vm2399_vm9, %v2676_v49, -inf  ;;  %v3282_v59 = vsel %vm2399_vm9, %v2677_v20, -inf  ;;  %v3289_v52 = vsel %vm2399_vm9, %v2678_v43, -inf  ;;  %v2513_v60 = vmul.f32 %v5196_v3, %v2454_v51 }
 0x31e   : > { %v3276_v16 = vrot.slane %v3275_v30, 4  ;;  %v2556_v5 = vadd.f32 %v5201_v14, %v2520_v40  ;;  %v3283_v15 = vrot.slane %v3282_v59, 4  ;;  %v3290_v17 = vrot.slane %v3289_v52, 4 }
 0x31f   : > { %v2114_v23 = vpop.permute.xlu1 %2113  ;;  %v2549_v8 = vadd.f32 %v5201_v14, %v2513_v60  ;;  %v3270_v12 = vmax.f32 %v3268_v11, %v3269_v4 }
 0x320   : > { %2198 = vst.msk [vmem:[#allocation3 + $0x30] sm:$0xf] %vm2185_vm11, %v2114_v23  ;;  %v1684_v7 = vpop.permute.xlu0 %1683  ;;  %v4081_v58 = vld [vmem:[#allocation3 + $0x10] sm:$0xff]  ;;  %v2588_v47 = vmax.f32 %v2556_v5, 0.0  ;;  %v3277_v6 = vmax.f32 %v3275_v30, %v3276_v16  ;;  %v3284_v42 = vmax.f32 %v3282_v59, %v3283_v15  ;;  %v3291_v27 = vmax.f32 %v3289_v52, %v3290_v17 }
 0x321   : > { %1758 = vst.msk [vmem:[#allocation3 + $0x58] sm:$0xf] %vm1735_vm8, %v1684_v7  ;;  %4061 = vmatmul.msk.bf16.gmra.mxu0 %vm2350_vm12, %v4081_v58  ;;  %v2581_v28 = vmax.f32 %v2549_v8, 0.0  ;;  %v3271_v33 = vrot.slane %v3270_v12, 2 }
 0x322   : > { %v2700_v46 = vrot.slane %v2588_v47, 2  ;;  %v2701_v13 = vrot.slane %v2588_v47, 4  ;;  %v2702_v19 = vrot.slane %v2588_v47, 6  ;;  %v3492_v22 = vsel %vm2399_vm9, %v2588_v47, -inf }
 0x323   : > { %v1911_v53 = vpop.permute.xlu2 %1910  ;;  %v3493_v35 = vrot.slane %v3492_v22, 4  ;;  %v3278_v48 = vrot.slane %v3277_v6, 2  ;;  %v3285_v41 = vrot.slane %v3284_v42, 2  ;;  %v3292_v55 = vrot.slane %v3291_v27, 2  ;;  %v2474_v49 = vpop.f32.mrf.mxu3 }
 0x324   : > { %v3499_v0 = vsel %vm2399_vm9, %v2700_v46, -inf  ;;  %v3506_v61 = vsel %vm2399_vm9, %v2701_v13, -inf  ;;  %v3513_v34 = vsel %vm2399_vm9, %v2702_v19, -inf  ;;  %v2679_v32 = vrot.slane %v2581_v28, 2 }
 0x325   : > { %v3494_v29 = vmax.f32 %v3492_v22, %v3493_v35  ;;  %v3500_v56 = vrot.slane %v3499_v0, 4  ;;  %v3507_v25 = vrot.slane %v3506_v61, 4  ;;  %v3514_v1 = vrot.slane %v3513_v34, 4 }
 0x326   : > { %v2680_v37 = vrot.slane %v2581_v28, 4  ;;  %v3296_v39 = vsel %vm2399_vm9, %v2581_v28, -inf  ;;  %v3303_v10 = vsel %vm2399_vm9, %v2679_v32, -inf  ;;  %v3272_v9 = vmax.f32 %v3270_v12, %v3271_v33 }
 0x327   : > { %v1686_v36 = vpop.permute.xlu1 %1685  ;;  %v4085_v24 = vld [vmem:[#allocation3 + $0x30] sm:$0xff]  ;;  %v3495_v38 = vrot.slane %v3494_v29, 2  ;;  %v3501_v26 = vmax.f32 %v3499_v0, %v3500_v56  ;;  %v3279_v54 = vmax.f32 %v3277_v6, %v3278_v48  ;;  %v2681_v50 = vrot.slane %v2581_v28, 6 }
 0x328   : > { %1759 = vst.msk [vmem:[#allocation3 + $0x5c] sm:$0xf] %vm1735_vm8, %v1686_v36  ;;  %v1702_v31 = vpop.permute.xlu0 %1701  ;;  %4065 = vmatmul.msk.bf16.gmra.mxu1 %vm2350_vm12, %v4085_v24  ;;  %v3286_v18 = vmax.f32 %v3284_v42, %v3285_v41  ;;  %v3293_v45 = vmax.f32 %v3291_v27, %v3292_v55  ;;  %v3508_v44 = vmax.f32 %v3506_v61, %v3507_v25  ;;  %v3297_v57 = vrot.slane %v3296_v39, 4 }
 0x329   : > { %1767 = vst.msk [vmem:[#allocation3 + $0x7c] sm:$0xf] %vm1735_vm8, %v1702_v31  ;;  %v3515_v63 = vmax.f32 %v3513_v34, %v3514_v1  ;;  %v3304_v2 = vrot.slane %v3303_v10, 4  ;;  %v3310_v21 = vsel %vm2399_vm9, %v2680_v37, -inf  ;;  %v3496_v20 = vmax.f32 %v3494_v29, %v3495_v38 }
 0x32a   : > { %1984 = vst.msk [vmem:[#allocation3 + $0x5c] sm:$0xf] %vm1960_vm10, %v1911_v53  ;;  %v3502_v43 = vrot.slane %v3501_v26, 2  ;;  %v3298_v11 = vmax.f32 %v3296_v39, %v3297_v57  ;;  %v3273_v51 = vrot.slane %v3272_v9, 1  ;;  %v3280_v30 = vrot.slane %v3279_v54, 1 }
 0x32b   : > { %v2134_v40 = vpop.permute.xlu2 %2133  ;;  %v3317_v59 = vsel %vm2399_vm9, %v2681_v50, -inf  ;;  %v3287_v60 = vrot.slane %v3286_v18, 1  ;;  %v3294_v4 = vrot.slane %v3293_v45, 1  ;;  %v3509_v16 = vrot.slane %v3508_v44, 2 }
 0x32c   : > { %v3311_v23 = vrot.slane %v3310_v21, 4  ;;  %v3516_v7 = vrot.slane %v3515_v63, 2  ;;  %v3305_v58 = vmax.f32 %v3303_v10, %v3304_v2  ;;  %v2521_v15 = vmul.f32 %v5196_v3, %v2474_v49 }
 0x32d   : > { %v2412_v5 = vpop.f32.mrf.mxu0  ;;  %v3497_v17 = vrot.slane %v3496_v20, 1  ;;  %v5236_v8 = vmax.f32 %v3501_v26, %v3502_v43  ;;  %v3299_v47 = vrot.slane %v3298_v11, 2  ;;  %v3318_v12 = vrot.slane %v3317_v59, 4 }
 0x32e   : > { %v5238_v6 = vmax.f32 %v3272_v9, %v3273_v51  ;;  %v5240_v46 = vmax.f32 %v3279_v54, %v3280_v30  ;;  %v2557_v13 = vadd.f32 %v5201_v14, %v2521_v15  ;;  %v2496_v19 = vmul.f32 %v5196_v3, %v2412_v5  ;;  %v2432_v34 = vpop.f32.mrf.mxu1 }
 0x32f   : > { %v1909_v62 = vpop.permute.xlu1 %1908  ;;  %v5244_v22 = vmax.f32 %v3286_v18, %v3287_v60  ;;  %v5246_v42 = vmax.f32 %v3293_v45, %v3294_v4  ;;  %v5248_v27 = vmax.f32 %v3508_v44, %v3509_v16  ;;  %v3312_v28 = vmax.f32 %v3310_v21, %v3311_v23 }
 0x330   : > { %1983 = vst.msk [vmem:[#allocation3 + $0x58] sm:$0xf] %vm1960_vm10, %v1909_v62  ;;  %v1925_v52 = vpop.permute.xlu0 %1924  ;;  %v5250_v53 = vmax.f32 %v3515_v63, %v3516_v7  ;;  %v3306_v35 = vrot.slane %v3305_v58, 2  ;;  %v2589_v0 = vmax.f32 %v2557_v13, 0.0  ;;  %v2532_v61 = vadd.f32 %v5201_v14, %v2496_v19 }
 0x331   : > { %1991 = vst.msk [vmem:[#allocation3 + $0x78] sm:$0xf] %vm1960_vm10, %v1925_v52  ;;  %v5253_v36 = vmax.f32 %v3496_v20, %v3497_v17  ;;  %v3504_v24 = vrot.slane %v5236_v8, 1  ;;  %v3300_v33 = vmax.f32 %v3298_v11, %v3299_v47  ;;  %v3319_v48 = vmax.f32 %v3317_v59, %v3318_v12 }
 0x332   : > { %2208 = vst.msk [vmem:[#allocation3 + $0x58] sm:$0xf] %vm2185_vm11, %v2134_v40  ;;  %v2703_v56 = vrot.slane %v2589_v0, 2  ;;  %v2704_v31 = vrot.slane %v2589_v0, 4  ;;  %v2705_v41 = vrot.slane %v2589_v0, 6  ;;  %v3520_v55 = vsel %vm2399_vm9, %v2589_v0, -inf }
 0x333   : > { %v3313_v32 = vrot.slane %v3312_v28, 2  ;;  %v3521_v38 = vrot.slane %v3520_v55, 4  ;;  %v2564_v1 = vmax.f32 %v2532_v61, 0.0  ;;  %v2504_v26 = vmul.f32 %v5196_v3, %v2432_v34  ;;  %v2152_v37 = vpop.permute.xlu2 %2151 }
 0x334   : > { %v3307_v39 = vmax.f32 %v3305_v58, %v3306_v35  ;;  %v3527_v10 = vsel %vm2399_vm9, %v2703_v56, -inf  ;;  %v3534_v9 = vsel %vm2399_vm9, %v2704_v31, -inf  ;;  %v3541_v54 = vsel %vm2399_vm9, %v2705_v41, -inf }
 0x335   : > { %v3320_v50 = vrot.slane %v3319_v48, 2  ;;  %v3522_v18 = vmax.f32 %v3520_v55, %v3521_v38  ;;  %v3528_v45 = vrot.slane %v3527_v10, 4  ;;  %v3535_v44 = vrot.slane %v3534_v9, 4 }
 0x336   : > { %v3542_v57 = vrot.slane %v3541_v54, 4  ;;  %v2628_v63 = vrot.slane %v2564_v1, 2  ;;  %v2629_v2 = vrot.slane %v2564_v1, 4  ;;  %v2820_v21 = vsel %vm2399_vm9, %v2564_v1, -inf }
 0x337   : > { %v1927_v29 = vpop.permute.xlu1 %1926  ;;  %v3314_v49 = vmax.f32 %v3312_v28, %v3313_v32  ;;  %v3523_v20 = vrot.slane %v3522_v18, 2  ;;  %v2630_v43 = vrot.slane %v2564_v1, 6  ;;  %v2540_v11 = vadd.f32 %v5201_v14, %v2504_v26 }
 0x338   : > { %1992 = vst.msk [vmem:[#allocation3 + $0x7c] sm:$0xf] %vm1960_vm10, %v1927_v29  ;;  %v2136_v25 = vpop.permute.xlu0 %2135  ;;  %v3529_v62 = vmax.f32 %v3527_v10, %v3528_v45  ;;  %v3536_v40 = vmax.f32 %v3534_v9, %v3535_v44  ;;  %v2821_v51 = vrot.slane %v2820_v21, 4  ;;  %v2827_v30 = vsel %vm2399_vm9, %v2628_v63, -inf  ;;  %v2414_v63 = vpop.f32.mrf.mxu0 }
 0x339   : > { %2209 = vst.msk [vmem:[#allocation3 + $0x5c] sm:$0xf] %vm2185_vm11, %v2136_v25  ;;  %v3511_v59 = vrot.slane %v5248_v27, 1  ;;  %v3518_v52 = vrot.slane %v5250_v53, 1  ;;  %v3301_v60 = vrot.slane %v3300_v33, 1  ;;  %v2834_v4 = vsel %vm2399_vm9, %v2629_v2, -inf }
 0x33a   : > { %2217 = vst.msk [vmem:[#allocation3 + $0x7c] sm:$0xf] %vm2185_vm11, %v2152_v37  ;;  %v3308_v23 = vrot.slane %v3307_v39, 1  ;;  %v3543_v5 = vmax.f32 %v3541_v54, %v3542_v57  ;;  %v2822_v7 = vmax.f32 %v2820_v21, %v2821_v51  ;;  %v2828_v58 = vrot.slane %v2827_v30, 4 }
 0x33b   : > { %v3315_v47 = vrot.slane %v3314_v49, 1  ;;  %v5271_v12 = vmax.f32 %v3319_v48, %v3320_v50  ;;  %v2841_v13 = vsel %vm2399_vm9, %v2630_v43, -inf  ;;  %v2572_v19 = vmax.f32 %v2540_v11, 0.0  ;;  %v1877_v31 = vpop.permute.xlu2 %1876  ;;  %v2434_v11 = vpop.f32.mrf.mxu1 }
 0x33c   : > { %v3524_v28 = vmax.f32 %v3522_v18, %v3523_v20  ;;  %v3530_v35 = vrot.slane %v3529_v62, 2  ;;  %v3537_v0 = vrot.slane %v3536_v40, 2  ;;  %v2835_v61 = vrot.slane %v2834_v4, 4  ;;  %1967 = vst.msk [vmem:[#allocation3 + $0x18] sm:$0xf] %vm1960_vm10, %v1877_v31 }
 0x33d   : > { %v5277_v34 = vmax.f32 %v5236_v8, %v3504_v24  ;;  %v5280_v29 = vmax.f32 %v5248_v27, %v3511_v59  ;;  %v5283_v48 = vmax.f32 %v5250_v53, %v3518_v52  ;;  %v5285_v56 = vmax.f32 %v3300_v33, %v3301_v60 }
 0x33e   : > { %v3544_v41 = vrot.slane %v3543_v5, 2  ;;  %v2823_v55 = vrot.slane %v2822_v7, 2  ;;  %v2829_v25 = vmax.f32 %v2827_v30, %v2828_v58  ;;  %v2842_v32 = vrot.slane %v2841_v13, 4 }
 0x33f   : > { %v2150_v16 = vpop.permute.xlu1 %2149  ;;  %v5288_v38 = vmax.f32 %v3307_v39, %v3308_v23  ;;  %v5290_v1 = vmax.f32 %v3314_v49, %v3315_v47  ;;  %v3322_v8 = vrot.slane %v5271_v12, 1  ;;  %v2652_v27 = vrot.slane %v2572_v19, 2 }
 0x340   : > { %2216 = vst.msk [vmem:[#allocation3 + $0x78] sm:$0xf] %vm2185_vm11, %v2150_v16  ;;  %v1668_v15 = vpop.permute.xlu0 %1667  ;;  %v4090_v17 = vld [vmem:[#allocation3 + $0x58] sm:$0xff]  ;;  %v3525_v24 = vrot.slane %v3524_v28, 1  ;;  %v3531_v26 = vmax.f32 %v3529_v62, %v3530_v35  ;;  %v3538_v53 = vmax.f32 %v3536_v40, %v3537_v0  ;;  %v2836_v37 = vmax.f32 %v2834_v4, %v2835_v61 }
 0x341   : > { %1750 = vst.msk [vmem:[#allocation3 + $0x38] sm:$0xf] %vm1735_vm8, %v1668_v15  ;;  %4070 = vmatmul.msk.bf16.gmra.mxu2 %vm2350_vm12, %v4090_v17  ;;  %v2653_v33 = vrot.slane %v2572_v19, 4  ;;  %v2654_v10 = vrot.slane %v2572_v19, 6  ;;  %v3044_v9 = vsel %vm2399_vm9, %v2572_v19, -inf  ;;  %v3051_v54 = vsel %vm2399_vm9, %v2652_v27, -inf }
 0x342   : > { %v3545_v45 = vmax.f32 %v3543_v5, %v3544_v41  ;;  %v2824_v39 = vmax.f32 %v2822_v7, %v2823_v55  ;;  %v2830_v44 = vrot.slane %v2829_v25, 2  ;;  %v2843_v57 = vmax.f32 %v2841_v13, %v2842_v32 }
 0x343   : > { %v3045_v21 = vrot.slane %v3044_v9, 4  ;;  %v3052_v49 = vrot.slane %v3051_v54, 4  ;;  %v3058_v20 = vsel %vm2399_vm9, %v2653_v33, -inf  ;;  %v3065_v43 = vsel %vm2399_vm9, %v2654_v10, -inf  ;;  %v1895_v16 = vpop.permute.xlu2 %1894 }
 0x344   : > { %v3532_v62 = vrot.slane %v3531_v26, 1  ;;  %v3539_v40 = vrot.slane %v3538_v53, 1  ;;  %v2837_v51 = vrot.slane %v2836_v37, 2  ;;  %v3059_v30 = vrot.slane %v3058_v20, 4 }
 0x345   : > { %v3046_v59 = vmax.f32 %v3044_v9, %v3045_v21  ;;  %v3053_v52 = vmax.f32 %v3051_v54, %v3052_v49  ;;  %v3066_v60 = vrot.slane %v3065_v43, 4  ;;  %v2497_v4 = vmul.f32 %v5196_v3, %v2414_v63 }
 0x346   : > { %v3546_v23 = vrot.slane %v3545_v45, 1  ;;  %v2844_v5 = vrot.slane %v2843_v57, 2  ;;  %v3060_v7 = vmax.f32 %v3058_v20, %v3059_v30  ;;  %v2505_v58 = vmul.f32 %v5196_v3, %v2434_v11 }
 0x347   : > { %v1670_v50 = vpop.permute.xlu1 %1669  ;;  %v4094_v18 = vld [vmem:[#allocation3 + $0x78] sm:$0xff]  ;;  %v2825_v15 = vrot.slane %v2824_v39, 1  ;;  %v5303_v17 = vmax.f32 %v2829_v25, %v2830_v44  ;;  %v3067_v47 = vmax.f32 %v3065_v43, %v3066_v60  ;;  %v2533_v13 = vadd.f32 %v5201_v14, %v2497_v4 }
 0x348   : > { %1751 = vst.msk [vmem:[#allocation3 + $0x3c] sm:$0xf] %vm1735_vm8, %v1670_v50  ;;  %v1879_v2 = vpop.permute.xlu0 %1878  ;;  %4074 = vmatmul.msk.bf16.gmra.mxu3 %vm2350_vm12, %v4094_v18  ;;  %v5307_v19 = vmax.f32 %v5271_v12, %v3322_v8  ;;  %v5309_v35 = vmax.f32 %v3524_v28, %v3525_v24  ;;  %v5311_v0 = vmax.f32 %v3531_v26, %v3532_v62  ;;  %v3047_v41 = vrot.slane %v3046_v59, 2 }
 0x349   : > { %1968 = vst.msk [vmem:[#allocation3 + $0x1c] sm:$0xf] %vm1960_vm10, %v1879_v2  ;;  %v2541_v61 = vadd.f32 %v5201_v14, %v2505_v58  ;;  %v5314_v31 = vmax.f32 %v2836_v37, %v2837_v51  ;;  %v3054_v55 = vrot.slane %v3053_v52, 2  ;;  %v2565_v32 = vmax.f32 %v2533_v13, 0.0 }
 0x34a   : > { %1976 = vst.msk [vmem:[#allocation3 + $0x3c] sm:$0xf] %vm1960_vm10, %v1895_v16  ;;  %v5316_v25 = vmax.f32 %v3538_v53, %v3539_v40  ;;  %v5318_v33 = vmax.f32 %v3545_v45, %v3546_v23  ;;  %v5320_v10 = vmax.f32 %v2843_v57, %v2844_v5  ;;  %v3061_v12 = vrot.slane %v3060_v7, 2 }
 0x34b   : > { %v5323_v8 = vmax.f32 %v2824_v39, %v2825_v15  ;;  %v2832_v24 = vrot.slane %v5303_v17, 1  ;;  %v3068_v26 = vrot.slane %v3067_v47, 2  ;;  %v2631_v37 = vrot.slane %v2565_v32, 2  ;;  %v2118_v39 = vpop.permute.xlu2 %2117 }
 0x34c   : > { %v2632_v9 = vrot.slane %v2565_v32, 4  ;;  %v2633_v54 = vrot.slane %v2565_v32, 6  ;;  %v2848_v53 = vsel %vm2399_vm9, %v2565_v32, -inf  ;;  %v2573_v50 = vmax.f32 %v2541_v61, 0.0 }
 0x34d   : > { %v2839_v18 = vrot.slane %v5314_v31, 1  ;;  %v5329_v45 = vmax.f32 %v3046_v59, %v3047_v41  ;;  %v5331_v44 = vmax.f32 %v3053_v52, %v3054_v55  ;;  %v2849_v57 = vrot.slane %v2848_v53, 4 }
 0x34e   : > { %v5333_v63 = vmax.f32 %v3060_v7, %v3061_v12  ;;  %v2855_v2 = vsel %vm2399_vm9, %v2631_v37, -inf  ;;  %v2862_v21 = vsel %vm2399_vm9, %v2632_v9, -inf  ;;  %v2869_v49 = vsel %vm2399_vm9, %v2633_v54, -inf }
 0x34f   : > { %v1893_v27 = vpop.permute.xlu1 %1892  ;;  %v3069_v20 = vmax.f32 %v3067_v47, %v3068_v26  ;;  %v2850_v43 = vmax.f32 %v2848_v53, %v2849_v57  ;;  %v2856_v11 = vrot.slane %v2855_v2, 4  ;;  %v2863_v62 = vrot.slane %v2862_v21, 4 }
 0x350   : > { %1975 = vst.msk [vmem:[#allocation3 + $0x38] sm:$0xf] %vm1960_vm10, %v1893_v27  ;;  %v2102_v28 = vpop.permute.xlu0 %2101  ;;  %v2870_v40 = vrot.slane %v2869_v49, 4  ;;  %v2655_v51 = vrot.slane %v2573_v50, 2  ;;  %v2656_v30 = vrot.slane %v2573_v50, 4  ;;  %v2657_v59 = vrot.slane %v2573_v50, 6 }
 0x351   : > { %2192 = vst.msk [vmem:[#allocation3 + $0x18] sm:$0xf] %vm2185_vm11, %v2102_v28  ;;  %v2851_v60 = vrot.slane %v2850_v43, 2  ;;  %v2857_v4 = vmax.f32 %v2855_v2, %v2856_v11  ;;  %v2864_v16 = vmax.f32 %v2862_v21, %v2863_v62  ;;  %v3072_v23 = vsel %vm2399_vm9, %v2573_v50, -inf }
 0x352   : > { %2200 = vst.msk [vmem:[#allocation3 + $0x38] sm:$0xf] %vm2185_vm11, %v2118_v39  ;;  %v2871_v7 = vmax.f32 %v2869_v49, %v2870_v40  ;;  %v3073_v58 = vrot.slane %v3072_v23, 4  ;;  %v3079_v15 = vsel %vm2399_vm9, %v2655_v51, -inf  ;;  %v3086_v47 = vsel %vm2399_vm9, %v2656_v30, -inf }
 0x353   : > { %v2457_v52 = vpop.f32.mrf.mxu2  ;;  %v2852_v61 = vmax.f32 %v2850_v43, %v2851_v60  ;;  %v2858_v41 = vrot.slane %v2857_v4, 2  ;;  %v2865_v55 = vrot.slane %v2864_v16, 2  ;;  %v3080_v32 = vrot.slane %v3079_v15, 4 }
 0x354   : > { %v2872_v27 = vrot.slane %v2871_v7, 2  ;;  %v3074_v12 = vmax.f32 %v3072_v23, %v3073_v58  ;;  %v3087_v28 = vrot.slane %v3086_v47, 4  ;;  %v3093_v26 = vsel %vm2399_vm9, %v2657_v59, -inf  ;;  %v2477_v21 = vpop.f32.mrf.mxu3 }
 0x355   : > { %v2846_v37 = vrot.slane %v5320_v10, 1  ;;  %v2859_v9 = vmax.f32 %v2857_v4, %v2858_v41  ;;  %v2866_v54 = vmax.f32 %v2864_v16, %v2865_v55  ;;  %v3081_v53 = vmax.f32 %v3079_v15, %v3080_v32 }
 0x356   : > { %v2873_v50 = vmax.f32 %v2871_v7, %v2872_v27  ;;  %v3075_v57 = vrot.slane %v3074_v12, 2  ;;  %v3088_v39 = vmax.f32 %v3086_v47, %v3087_v28  ;;  %v3094_v2 = vrot.slane %v3093_v26, 4 }
 0x357   : > { %v2104_v5 = vpop.permute.xlu1 %2103  ;;  %v5347_v49 = vmax.f32 %v5303_v17, %v2832_v24  ;;  %v3049_v43 = vrot.slane %v5329_v45, 1  ;;  %v3056_v11 = vrot.slane %v5331_v44, 1  ;;  %v3063_v62 = vrot.slane %v5333_v63, 1 }
 0x358   : > { %2193 = vst.msk [vmem:[#allocation3 + $0x1c] sm:$0xf] %vm2185_vm11, %v2104_v5  ;;  %v2120_v13 = vpop.permute.xlu0 %2119  ;;  %v3070_v40 = vrot.slane %v3069_v20, 1  ;;  %v2853_v51 = vrot.slane %v2852_v61, 1  ;;  %v2860_v30 = vrot.slane %v2859_v9, 1  ;;  %v3082_v59 = vrot.slane %v3081_v53, 2 }
 0x359   : > { %2201 = vst.msk [vmem:[#allocation3 + $0x3c] sm:$0xf] %vm2185_vm11, %v2120_v13  ;;  %v5353_v60 = vmax.f32 %v5314_v31, %v2839_v18  ;;  %v5356_v4 = vmax.f32 %v5320_v10, %v2846_v37  ;;  %v3076_v16 = vmax.f32 %v3074_v12, %v3075_v57  ;;  %v2514_v17 = vmul.f32 %v5196_v3, %v2457_v52 }
 0x35a   : > { %v2867_v23 = vrot.slane %v2866_v54, 1  ;;  %v2874_v5 = vrot.slane %v2873_v50, 1  ;;  %v3089_v7 = vrot.slane %v3088_v39, 2  ;;  %v5359_v58 = vmax.f32 %v3093_v26, %v3094_v2 }
 0x35b   : > { %v2459_v15 = vpop.f32.mrf.mxu2  ;;  %v5362_v13 = vmax.f32 %v5329_v45, %v3049_v43  ;;  %v5365_v31 = vmax.f32 %v5331_v44, %v3056_v11  ;;  %v5368_v10 = vmax.f32 %v5333_v63, %v3063_v62  ;;  %v2550_v18 = vadd.f32 %v5201_v14, %v2514_v17 }
 0x35c   : > { %v5372_v52 = vmax.f32 %v3069_v20, %v3070_v40  ;;  %v5374_v41 = vmax.f32 %v2852_v61, %v2853_v51  ;;  %v5376_v55 = vmax.f32 %v2859_v9, %v2860_v30  ;;  %v5378_v32 = vmax.f32 %v3081_v53, %v3082_v59 }
 0x35d   : > { %5829 = vst [vmem:[#allocation4_spill] sm:$0xff] %v5368_v10  ;;  %v3077_v45 = vrot.slane %v3076_v16, 1  ;;  %v2582_v44 = vmax.f32 %v2550_v18, 0.0  ;;  %v2522_v27 = vmul.f32 %v5196_v3, %v2477_v21  ;;  %v2515_v63 = vmul.f32 %v5196_v3, %v2459_v15 }
 0x35e   : > { %5830 = vst [vmem:[#allocation5_spill] sm:$0xff] %v5372_v52  ;;  %v5383_v12 = vmax.f32 %v2866_v54, %v2867_v23  ;;  %v5385_v28 = vmax.f32 %v2873_v50, %v2874_v5  ;;  %v5387_v20 = vmax.f32 %v3088_v39, %v3089_v7  ;;  %v2479_v54 = vpop.f32.mrf.mxu3 }
 0x35f   : > { %v4082_v24 = vld [vmem:[#allocation3 + $0x18] sm:$0xff]  ;;  %v2682_v26 = vrot.slane %v2582_v44, 2  ;;  %v2683_v37 = vrot.slane %v2582_v44, 4  ;;  %v2684_v9 = vrot.slane %v2582_v44, 6  ;;  %v3324_v53 = vsel %vm2399_vm9, %v2582_v44, -inf }
 0x360   : > { %v4086_v47 = vld [vmem:[#allocation3 + $0x38] sm:$0xff]  ;;  %4062 = vmatmul.msk.bf16.gmra.mxu0 %vm2350_vm12, %v4082_v24  ;;  %v3325_v2 = vrot.slane %v3324_v53, 4  ;;  %v2558_v21 = vadd.f32 %v5201_v14, %v2522_v27  ;;  %v2551_v43 = vadd.f32 %v5201_v14, %v2515_v63  ;;  %v5394_v11 = vmax.f32 %v3076_v16, %v3077_v45 }
 0x361   : > { %4066 = vmatmul.msk.bf16.gmra.mxu1 %vm2350_vm12, %v4086_v47  ;;  %v3331_v50 = vsel %vm2399_vm9, %v2682_v26, -inf  ;;  %v3338_v39 = vsel %vm2399_vm9, %v2683_v37, -inf  ;;  %v3345_v62 = vsel %vm2399_vm9, %v2684_v9, -inf  ;;  %v2523_v5 = vmul.f32 %v5196_v3, %v2479_v54 }
 0x362   : > { %5831 = vst [vmem:[#allocation6_spill] sm:$0xff] %v5394_v11  ;;  %v3326_v40 = vmax.f32 %v3324_v53, %v3325_v2  ;;  %v3332_v51 = vrot.slane %v3331_v50, 4  ;;  %v3339_v30 = vrot.slane %v3338_v39, 4  ;;  %v3346_v59 = vrot.slane %v3345_v62, 4 }
 0x363   : > { %v2590_v24 = vmax.f32 %v2558_v21, 0.0  ;;  %v5400_v23 = vmax.f32 %v2551_v43, 0.0 }
 0x364   : > { %v3327_v7 = vrot.slane %v3326_v40, 2  ;;  %v3333_v16 = vmax.f32 %v3331_v50, %v3332_v51  ;;  %v3340_v15 = vmax.f32 %v3338_v39, %v3339_v30  ;;  %v3347_v47 = vmax.f32 %v3345_v62, %v3346_v59 }
 0x365   : > { %v2706_v18 = vrot.slane %v2590_v24, 2  ;;  %v2707_v45 = vrot.slane %v2590_v24, 4  ;;  %v2708_v44 = vrot.slane %v2590_v24, 6  ;;  %v3548_v27 = vsel %vm2399_vm9, %v2590_v24, -inf }
 0x366   : > { %v3328_v63 = vmax.f32 %v3326_v40, %v3327_v7  ;;  %v3334_v26 = vrot.slane %v3333_v16, 2  ;;  %v3341_v37 = vrot.slane %v3340_v15, 2  ;;  %v3348_v9 = vrot.slane %v3347_v47, 2 }
 0x367   : > { %v3549_v53 = vrot.slane %v3548_v27, 4  ;;  %v3555_v2 = vsel %vm2399_vm9, %v2706_v18, -inf  ;;  %v3562_v21 = vsel %vm2399_vm9, %v2707_v45, -inf  ;;  %v3569_v43 = vsel %vm2399_vm9, %v2708_v44, -inf }
 0x368   : > { %v3329_v54 = vrot.slane %v3328_v63, 1  ;;  %v3335_v50 = vmax.f32 %v3333_v16, %v3334_v26  ;;  %v3342_v39 = vmax.f32 %v3340_v15, %v3341_v37  ;;  %v3349_v62 = vmax.f32 %v3347_v47, %v3348_v9 }
 0x369   : > { %v3550_v51 = vmax.f32 %v3548_v27, %v3549_v53  ;;  %v3556_v30 = vrot.slane %v3555_v2, 4  ;;  %v3563_v59 = vrot.slane %v3562_v21, 4  ;;  %v3570_v24 = vrot.slane %v3569_v43, 4 }
 0x36a   : > { %v3330_v40 = vmax.f32 %v3328_v63, %v3329_v54  ;;  %v3336_v7 = vrot.slane %v3335_v50, 1  ;;  %v3343_v17 = vrot.slane %v3342_v39, 1  ;;  %v3350_v57 = vrot.slane %v3349_v62, 1 }
 0x36b   : > { %v3551_v61 = vrot.slane %v3550_v51, 2  ;;  %v3557_v11 = vmax.f32 %v3555_v2, %v3556_v30  ;;  %v3564_v18 = vmax.f32 %v3562_v21, %v3563_v59  ;;  %v3571_v52 = vmax.f32 %v3569_v43, %v3570_v24 }
 0x36c   : > { %v3337_v45 = vmax.f32 %v3335_v50, %v3336_v7  ;;  %v3344_v10 = vmax.f32 %v3342_v39, %v3343_v17  ;;  %v3351_v44 = vmax.f32 %v3349_v62, %v3350_v57  ;;  %v2559_v16 = vadd.f32 %v5201_v14, %v2523_v5 }
 0x36d   : > { %v3552_v15 = vmax.f32 %v3550_v51, %v3551_v61  ;;  %v3558_v47 = vrot.slane %v3557_v11, 2  ;;  %v3565_v27 = vrot.slane %v3564_v18, 2  ;;  %v3572_v26 = vrot.slane %v3571_v52, 2 }
 0x36e   : > { %v3748_v37 = vmax.f32 %v5238_v6, %v3330_v40  ;;  %v3749_v63 = vmax.f32 %v5240_v46, %v3337_v45  ;;  %v3750_v9 = vmax.f32 %v5244_v22, %v3344_v10  ;;  %v2685_v53 = vrot.slane %v5400_v23, 2 }
 0x36f   : > { %v3553_v2 = vrot.slane %v3552_v15, 1  ;;  %v3559_v21 = vmax.f32 %v3557_v11, %v3558_v47  ;;  %v3566_v43 = vmax.f32 %v3564_v18, %v3565_v27  ;;  %v3573_v54 = vmax.f32 %v3571_v52, %v3572_v26 }
 0x370   : > { %v3879_v57 = vsel %vm3844_vm13, %v3749_v63, %v3748_v37  ;;  %v2686_v17 = vrot.slane %v5400_v23, 4  ;;  %v2687_v61 = vrot.slane %v5400_v23, 6  ;;  %v3352_v5 = vsel %vm2399_vm9, %v5400_v23, -inf }
 0x371   : > { %v3751_v6 = vmax.f32 %v5246_v42, %v3351_v44  ;;  %v3554_v46 = vmax.f32 %v3552_v15, %v3553_v2  ;;  %v3560_v50 = vrot.slane %v3559_v21, 1  ;;  %v3567_v22 = vrot.slane %v3566_v43, 1 }
 0x372   : > { %v3880_v10 = vsel %vm3846_vm14, %v3750_v9, %v3879_v57  ;;  %v3574_v39 = vrot.slane %v3573_v54, 1  ;;  %v3353_v11 = vrot.slane %v3352_v5, 4  ;;  %v3359_v52 = vsel %vm2399_vm9, %v2685_v53, -inf }
 0x373   : > { %v3561_v62 = vmax.f32 %v3559_v21, %v3560_v50  ;;  %v3568_v51 = vmax.f32 %v3566_v43, %v3567_v22  ;;  %v3764_v30 = vmax.f32 %v5253_v36, %v3554_v46  ;;  %v3360_v59 = vrot.slane %v3359_v52, 4  ;;  %v2417_v36 = vpop.f32.mrf.mxu0 }
 0x374   : > { %v3575_v24 = vmax.f32 %v3573_v54, %v3574_v39  ;;  %v3354_v40 = vmax.f32 %v3352_v5, %v3353_v11  ;;  %v3366_v23 = vsel %vm2399_vm9, %v2686_v17, -inf  ;;  %v3373_v42 = vsel %vm2399_vm9, %v2687_v61, -inf }
 0x375   : > { %v3765_v7 = vmax.f32 %v5277_v34, %v3561_v62  ;;  %v3766_v18 = vmax.f32 %v5280_v29, %v3568_v51  ;;  %v3361_v45 = vmax.f32 %v3359_v52, %v3360_v59  ;;  %v3367_v44 = vrot.slane %v3366_v23, 4 }
 0x376   : > { %v3881_v15 = vsel %vm3848_vm15, %v3751_v6, %v3880_v10  ;;  %v3355_v47 = vrot.slane %v3354_v40, 2  ;;  %v3374_v27 = vrot.slane %v3373_v42, 4  ;;  %v3767_v26 = vmax.f32 %v5283_v48, %v3575_v24 }
 0x377   : > { %v3893_v37 = vsel %vm3844_vm13, %v3765_v7, %v3764_v30  ;;  %v3362_v63 = vrot.slane %v3361_v45, 2  ;;  %v3368_v9 = vmax.f32 %v3366_v23, %v3367_v44  ;;  %v2591_v29 = vmax.f32 %v2559_v16, 0.0 }
 0x378   : > { %v3894_v53 = vsel %vm3846_vm14, %v3766_v18, %v3893_v37  ;;  %v3356_v34 = vmax.f32 %v3354_v40, %v3355_v47  ;;  %v3375_v2 = vmax.f32 %v3373_v42, %v3374_v27  ;;  %v2498_v57 = vmul.f32 %v5196_v3, %v2417_v36 }
 0x379   : > { %v5430_v21 = vsel %vm3848_vm15, %v3767_v26, %v3894_v53  ;;  %v3363_v43 = vmax.f32 %v3361_v45, %v3362_v63  ;;  %v3369_v54 = vrot.slane %v3368_v9, 2  ;;  %v2709_v61 = vrot.slane %v2591_v29, 2  ;;  %v2437_v53 = vpop.f32.mrf.mxu1 }
 0x37a   : > { %v3357_v17 = vrot.slane %v3356_v34, 1  ;;  %v3376_v48 = vrot.slane %v3375_v2, 2  ;;  %v2710_v5 = vrot.slane %v2591_v29, 4  ;;  %v2711_v50 = vrot.slane %v2591_v29, 6 }
 0x37b   : > { %v3364_v6 = vrot.slane %v3363_v43, 1  ;;  %v3370_v46 = vmax.f32 %v3368_v9, %v3369_v54  ;;  %v3576_v22 = vsel %vm2399_vm9, %v2591_v29, -inf  ;;  %v3583_v11 = vsel %vm2399_vm9, %v2709_v61, -inf  ;;  %v2419_v26 = vpop.f32.mrf.mxu0 }
 0x37c   : > { %v3358_v10 = vmax.f32 %v3356_v34, %v3357_v17  ;;  %v3377_v16 = vmax.f32 %v3375_v2, %v3376_v48  ;;  %v3577_v39 = vrot.slane %v3576_v22, 4  ;;  %v3584_v51 = vrot.slane %v3583_v11, 4 }
 0x37d   : > { %v3365_v52 = vmax.f32 %v3363_v43, %v3364_v6  ;;  %v3371_v62 = vrot.slane %v3370_v46, 1  ;;  %v3590_v30 = vsel %vm2399_vm9, %v2710_v5, -inf  ;;  %v3597_v45 = vsel %vm2399_vm9, %v2711_v50, -inf }
 0x37e   : > { %v3378_v59 = vrot.slane %v3377_v16, 1  ;;  %v3752_v24 = vmax.f32 %v5285_v56, %v3358_v10  ;;  %v3578_v40 = vmax.f32 %v3576_v22, %v3577_v39  ;;  %v3591_v23 = vrot.slane %v3590_v30, 4 }
 0x37f   : > { %v3372_v42 = vmax.f32 %v3370_v46, %v3371_v62  ;;  %v3753_v7 = vmax.f32 %v5288_v38, %v3365_v52  ;;  %v3585_v18 = vmax.f32 %v3583_v11, %v3584_v51  ;;  %v3598_v9 = vrot.slane %v3597_v45, 4 }
 0x380   : > { %v3379_v44 = vmax.f32 %v3377_v16, %v3378_v59  ;;  %v3882_v47 = vsel %vm3850_vm0, %v3752_v24, %v3881_v15  ;;  %v3579_v27 = vrot.slane %v3578_v40, 2  ;;  %v3592_v36 = vmax.f32 %v3590_v30, %v3591_v23 }
 0x381   : > { %v3754_v37 = vmax.f32 %v5290_v1, %v3372_v42  ;;  %v3883_v63 = vsel %vm3852_vm1, %v3753_v7, %v3882_v47  ;;  %v3586_v56 = vrot.slane %v3585_v18, 2  ;;  %v2534_v2 = vadd.f32 %v5201_v14, %v2498_v57  ;;  %v5458_v57 = vld [vmem:[%s5826_s2] ss:$0 sm:$0xff] }
 0x382   : > { %v3755_v38 = vmax.f32 %v5307_v19, %v3379_v44  ;;  %v3580_v34 = vmax.f32 %v3578_v40, %v3579_v27  ;;  %v3593_v15 = vrot.slane %v3592_v36, 2  ;;  %v3599_v43 = vmax.f32 %v3597_v45, %v3598_v9 }
 0x383   : > { %v3884_v29 = vsel %vm3854_vm2, %v3754_v37, %v3883_v63  ;;  %v3587_v1 = vmax.f32 %v3585_v18, %v3586_v56  ;;  %v2499_v54 = vmul.f32 %v5196_v3, %v2419_v26  ;;  %v2566_v5 = vmax.f32 %v2534_v2, 0.0  ;;  %v2439_v26 = vpop.f32.mrf.mxu1 }
 0x384   : > { %v3885_v17 = vsel %vm3856_vm3, %v3755_v38, %v3884_v29  ;;  %v3581_v48 = vrot.slane %v3580_v34, 1  ;;  %v3594_v61 = vmax.f32 %v3592_v36, %v3593_v15  ;;  %v3600_v46 = vrot.slane %v3599_v43, 2 }
 0x385   : > { %3919 = vst [vmem:[%s5446_s17 + $0x20] sm:$0xff] %v3885_v17  ;;  %v3588_v6 = vrot.slane %v3587_v1, 1  ;;  %v2535_v19 = vadd.f32 %v5201_v14, %v2499_v54  ;;  %v2506_v50 = vmul.f32 %v5458_v57, %v2437_v53  ;;  %v2634_v3 = vrot.slane %v2566_v5, 2 }
 0x386   : > { %v3582_v22 = vmax.f32 %v3580_v34, %v3581_v48  ;;  %v3595_v10 = vrot.slane %v3594_v61, 1  ;;  %v2635_v16 = vrot.slane %v2566_v5, 4  ;;  %v3601_v11 = vmax.f32 %v3599_v43, %v3600_v46 }
 0x387   : > { %v3589_v39 = vmax.f32 %v3587_v1, %v3588_v6  ;;  %v2636_v52 = vrot.slane %v2566_v5, 6  ;;  %v2876_v62 = vsel %vm2399_vm9, %v2566_v5, -inf  ;;  %v2883_v59 = vsel %vm2399_vm9, %v2634_v3, -inf }
 0x388   : > { %v3596_v51 = vmax.f32 %v3594_v61, %v3595_v10  ;;  %v3768_v30 = vmax.f32 %v5309_v35, %v3582_v22  ;;  %v2877_v14 = vrot.slane %v2876_v62, 4  ;;  %v3602_v24 = vrot.slane %v3601_v11, 1 }
 0x389   : > { %v3769_v40 = vmax.f32 %v5311_v0, %v3589_v39  ;;  %v2884_v23 = vrot.slane %v2883_v59, 4  ;;  %v2890_v42 = vsel %vm2399_vm9, %v2635_v16, -inf  ;;  %v2897_v36 = vsel %vm2399_vm9, %v2636_v52, -inf }
 0x38a   : > { %v3770_v7 = vmax.f32 %v5316_v25, %v3596_v51  ;;  %v3896_v18 = vsel %vm3850_vm0, %v3768_v30, %v5430_v21  ;;  %v2878_v45 = vmax.f32 %v2876_v62, %v2877_v14  ;;  %v2891_v44 = vrot.slane %v2890_v42, 4  ;;  %v5476_v21 = vld [vmem:[%s5827_s3] ss:$0 sm:$0xff] }
 0x38b   : > { %v3603_v47 = vmax.f32 %v3601_v11, %v3602_v24  ;;  %v3897_v27 = vsel %vm3852_vm1, %v3769_v40, %v3896_v18  ;;  %v2885_v35 = vmax.f32 %v2883_v59, %v2884_v23  ;;  %v2898_v56 = vrot.slane %v2897_v36, 4 }
 0x38c   : > { %v3898_v37 = vsel %vm3854_vm2, %v3770_v7, %v3897_v27  ;;  %v2879_v0 = vrot.slane %v2878_v45, 2  ;;  %v2892_v63 = vmax.f32 %v2890_v42, %v2891_v44  ;;  %v2567_v53 = vmax.f32 %v2535_v19, 0.0 }
 0x38d   : > { %v3771_v25 = vmax.f32 %v5318_v33, %v3603_v47  ;;  %v2886_v9 = vrot.slane %v2885_v35, 2  ;;  %v2542_v38 = vadd.f32 %v5476_v21, %v2506_v50  ;;  %v2899_v2 = vmax.f32 %v2897_v36, %v2898_v56 }
 0x38e   : > { %v2880_v34 = vmax.f32 %v2878_v45, %v2879_v0  ;;  %v2893_v15 = vrot.slane %v2892_v63, 2  ;;  %v5480_v29 = vmul.f32 %v5458_v57, %v2439_v26  ;;  %v2637_v54 = vrot.slane %v2567_v53, 2 }
 0x38f   : > { %v3899_v1 = vsel %vm3856_vm3, %v3771_v25, %v3898_v37  ;;  %v2887_v43 = vmax.f32 %v2885_v35, %v2886_v9  ;;  %v2638_v33 = vrot.slane %v2567_v53, 4  ;;  %v2900_v61 = vrot.slane %v2899_v2, 2 }
 0x390   : > { %3921 = vst [vmem:[%s5446_s17 + $0x30] sm:$0xff] %v3899_v1  ;;  %v2881_v17 = vrot.slane %v2880_v34, 1  ;;  %v2894_v48 = vmax.f32 %v2892_v63, %v2893_v15  ;;  %v2639_v5 = vrot.slane %v2567_v53, 6  ;;  %v2904_v46 = vsel %vm2399_vm9, %v2567_v53, -inf }
 0x391   : > { %v2888_v6 = vrot.slane %v2887_v43, 1  ;;  %v2911_v19 = vsel %vm2399_vm9, %v2637_v54, -inf  ;;  %v2918_v50 = vsel %vm2399_vm9, %v2638_v33, -inf  ;;  %v2901_v3 = vmax.f32 %v2899_v2, %v2900_v61 }
 0x392   : > { %v2882_v22 = vmax.f32 %v2880_v34, %v2881_v17  ;;  %v2895_v10 = vrot.slane %v2894_v48, 1  ;;  %v2905_v16 = vrot.slane %v2904_v46, 4  ;;  %v2912_v11 = vrot.slane %v2911_v19, 4 }
 0x393   : > { %v2889_v39 = vmax.f32 %v2887_v43, %v2888_v6  ;;  %v2919_v52 = vrot.slane %v2918_v50, 4  ;;  %v2925_v62 = vsel %vm2399_vm9, %v2639_v5, -inf  ;;  %v2902_v30 = vrot.slane %v2901_v3, 1 }
 0x394   : > { %v2896_v51 = vmax.f32 %v2894_v48, %v2895_v10  ;;  %v3716_v14 = vmax.f32 %v5323_v8, %v2882_v22  ;;  %v2906_v59 = vmax.f32 %v2904_v46, %v2905_v16  ;;  %v2913_v40 = vmax.f32 %v2911_v19, %v2912_v11 }
 0x395   : > { %v3717_v24 = vmax.f32 %v5347_v49, %v2889_v39  ;;  %v2920_v23 = vmax.f32 %v2918_v50, %v2919_v52  ;;  %v2926_v42 = vrot.slane %v2925_v62, 4  ;;  %v2903_v7 = vmax.f32 %v2901_v3, %v2902_v30  ;;  %v2462_v39 = vpop.f32.mrf.mxu2 }
 0x396   : > { %v3718_v18 = vmax.f32 %v5353_v60, %v2896_v51  ;;  %v2907_v45 = vrot.slane %v2906_v59, 2  ;;  %v2574_v44 = vmax.f32 %v2542_v38, 0.0  ;;  %v2914_v27 = vrot.slane %v2913_v40, 2 }
 0x397   : > { %v3845_v47 = vsel %vm3844_vm13, %v3717_v24, %v3716_v14  ;;  %v2921_v35 = vrot.slane %v2920_v23, 2  ;;  %v2927_v36 = vmax.f32 %v2925_v62, %v2926_v42  ;;  %v3719_v26 = vmax.f32 %v5356_v4, %v2903_v7 }
 0x398   : > { %v3847_v8 = vsel %vm3846_vm14, %v3718_v18, %v3845_v47  ;;  %v2908_v37 = vmax.f32 %v2906_v59, %v2907_v45  ;;  %v2658_v0 = vrot.slane %v2574_v44, 2  ;;  %v2915_v49 = vmax.f32 %v2913_v40, %v2914_v27 }
 0x399   : > { %v2922_v63 = vmax.f32 %v2920_v23, %v2921_v35  ;;  %v2928_v56 = vrot.slane %v2927_v36, 2  ;;  %v2659_v25 = vrot.slane %v2574_v44, 4  ;;  %v3849_v9 = vsel %vm3848_vm15, %v3719_v26, %v3847_v8 }
 0x39a   : > { %v2909_v60 = vrot.slane %v2908_v37, 1  ;;  %v2660_v53 = vrot.slane %v2574_v44, 6  ;;  %v3100_v38 = vsel %vm2399_vm9, %v2574_v44, -inf  ;;  %v2916_v34 = vrot.slane %v2915_v49, 1 }
 0x39b   : > { %v2923_v15 = vrot.slane %v2922_v63, 1  ;;  %v2929_v2 = vmax.f32 %v2927_v36, %v2928_v56  ;;  %v3101_v1 = vrot.slane %v3100_v38, 4  ;;  %v3107_v4 = vsel %vm2399_vm9, %v2658_v0, -inf }
 0x39c   : > { %v2910_v43 = vmax.f32 %v2908_v37, %v2909_v60  ;;  %v3114_v54 = vsel %vm2399_vm9, %v2659_v25, -inf  ;;  %v3121_v33 = vsel %vm2399_vm9, %v2660_v53, -inf  ;;  %v2917_v17 = vmax.f32 %v2915_v49, %v2916_v34 }
 0x39d   : > { %v2924_v48 = vmax.f32 %v2922_v63, %v2923_v15  ;;  %v2930_v61 = vrot.slane %v2929_v2, 1  ;;  %v3102_v5 = vmax.f32 %v3100_v38, %v3101_v1  ;;  %v3108_v46 = vrot.slane %v3107_v4, 4 }
 0x39e   : > { %v3720_v6 = vmax.f32 %v5374_v41, %v2910_v43  ;;  %v3115_v19 = vrot.slane %v3114_v54, 4  ;;  %v3122_v50 = vrot.slane %v3121_v33, 4  ;;  %v3721_v10 = vmax.f32 %v5376_v55, %v2917_v17 }
 0x39f   : > { %v2931_v22 = vmax.f32 %v2929_v2, %v2930_v61  ;;  %v3722_v3 = vmax.f32 %v5383_v12, %v2924_v48  ;;  %v3103_v16 = vrot.slane %v3102_v5, 2  ;;  %v3109_v52 = vmax.f32 %v3107_v4, %v3108_v46  ;;  %v2464_v4 = vpop.f32.mrf.mxu2 }
 0x3a0   : > { %v3851_v11 = vsel %vm3850_vm0, %v3720_v6, %v3849_v9  ;;  %v3116_v62 = vmax.f32 %v3114_v54, %v3115_v19  ;;  %v3123_v51 = vmax.f32 %v3121_v33, %v3122_v50  ;;  %v2543_v59 = vadd.f32 %v5476_v21, %v5480_v29  ;;  %v5835_v19 = vld [vmem:[#allocation4_spill] sm:$0xff] }
 0x3a1   : > { %v3723_v30 = vmax.f32 %v5385_v28, %v2931_v22  ;;  %v3853_v41 = vsel %vm3852_vm1, %v3721_v10, %v3851_v11  ;;  %v3104_v14 = vmax.f32 %v3102_v5, %v3103_v16  ;;  %v3110_v24 = vrot.slane %v3109_v52, 2 }
 0x3a2   : > { %v3855_v55 = vsel %vm3854_vm2, %v3722_v3, %v3853_v41  ;;  %v3117_v12 = vrot.slane %v3116_v62, 2  ;;  %v3124_v40 = vrot.slane %v3123_v51, 2  ;;  %v5832_v23 = vrot.slane %v5359_v58, 2 }
 0x3a3   : > { %v3857_v7 = vsel %vm3856_vm3, %v3723_v30, %v3855_v55  ;;  %v3105_v18 = vrot.slane %v3104_v14, 1  ;;  %v2575_v45 = vmax.f32 %v2543_v59, 0.0  ;;  %v5833_v28 = vrot.slane %v5378_v32, 1 }
 0x3a4   : > { %v3097_v42 = vmax.f32 %v5359_v58, %v5832_v23  ;;  %3915 = vst [vmem:[%s5446_s17] sm:$0xff] %v3857_v7  ;;  %v3111_v29 = vmax.f32 %v3109_v52, %v3110_v24  ;;  %v3118_v47 = vmax.f32 %v3116_v62, %v3117_v12  ;;  %v2516_v27 = vmul.f32 %v5458_v57, %v2462_v39 }
 0x3a5   : > { %v5515_v44 = vmax.f32 %v5378_v32, %v5833_v28  ;;  %v3125_v35 = vmax.f32 %v3123_v51, %v3124_v40  ;;  %v2661_v36 = vrot.slane %v2575_v45, 2  ;;  %v2662_v26 = vrot.slane %v2575_v45, 4 }
 0x3a6   : > { %v2663_v8 = vrot.slane %v2575_v45, 6  ;;  %v3106_v37 = vmax.f32 %v3104_v14, %v3105_v18  ;;  %v3112_v58 = vrot.slane %v3111_v29, 1  ;;  %v3119_v0 = vrot.slane %v3118_v47, 1  ;;  %v5836_v18 = vld [vmem:[#allocation5_spill] sm:$0xff] }
 0x3a7   : > { %v3128_v49 = vsel %vm2399_vm9, %v2575_v45, -inf  ;;  %v5834_v63 = vrot.slane %v5387_v20, 1  ;;  %v3135_v25 = vsel %vm2399_vm9, %v2661_v36, -inf  ;;  %v3142_v9 = vsel %vm2399_vm9, %v2662_v26, -inf  ;;  %v5837_v26 = vld [vmem:[#allocation6_spill] sm:$0xff] }
 0x3a8   : > { %v3129_v32 = vrot.slane %v3128_v49, 4  ;;  %v3098_v60 = vrot.slane %v3097_v42, 1  ;;  %v3113_v53 = vmax.f32 %v3111_v29, %v3112_v58  ;;  %v3120_v38 = vmax.f32 %v3118_v47, %v3119_v0 }
 0x3a9   : > { %v5523_v56 = vmax.f32 %v5387_v20, %v5834_v63  ;;  %v3136_v34 = vrot.slane %v3135_v25, 4  ;;  %v3143_v2 = vrot.slane %v3142_v9, 4  ;;  %v3149_v1 = vsel %vm2399_vm9, %v2663_v8, -inf }
 0x3aa   : > { %v3130_v15 = vmax.f32 %v3128_v49, %v3129_v32  ;;  %v2552_v43 = vadd.f32 %v5476_v21, %v2516_v27  ;;  %v3126_v54 = vrot.slane %v3125_v35, 1  ;;  %v3732_v20 = vmax.f32 %v5362_v13, %v3106_v37  ;;  %v2482_v27 = vpop.f32.mrf.mxu3 }
 0x3ab   : > { %v3733_v33 = vmax.f32 %v5365_v31, %v3113_v53  ;;  %v3137_v17 = vmax.f32 %v3135_v25, %v3136_v34  ;;  %v3144_v61 = vmax.f32 %v3142_v9, %v3143_v2  ;;  %v3150_v5 = vrot.slane %v3149_v1, 4 }
 0x3ac   : > { %v3131_v48 = vrot.slane %v3130_v15, 2  ;;  %v2584_v6 = vmax.f32 %v2552_v43, 0.0  ;;  %v3099_v46 = vmax.f32 %v3097_v42, %v3098_v60  ;;  %v3734_v50 = vmax.f32 %v5835_v19, %v3120_v38 }
 0x3ad   : > { %v3138_v22 = vrot.slane %v3137_v17, 2  ;;  %v2517_v10 = vmul.f32 %v5458_v57, %v2464_v4  ;;  %v3865_v3 = vsel %vm3844_vm13, %v3733_v33, %v3732_v20  ;;  %v3145_v39 = vrot.slane %v3144_v61, 2 }
 0x3ae   : > { %v3132_v16 = vmax.f32 %v3130_v15, %v3131_v48  ;;  %v3151_v11 = vmax.f32 %v3149_v1, %v3150_v5  ;;  %v3127_v52 = vmax.f32 %v3125_v35, %v3126_v54  ;;  %v2688_v62 = vrot.slane %v2584_v6, 2 }
 0x3af   : > { %v3139_v13 = vmax.f32 %v3137_v17, %v3138_v22  ;;  %v2689_v31 = vrot.slane %v2584_v6, 4  ;;  %v3146_v30 = vmax.f32 %v3144_v61, %v3145_v39  ;;  %v2690_v14 = vrot.slane %v2584_v6, 6 }
 0x3b0   : > { %v3133_v51 = vrot.slane %v3132_v16, 1  ;;  %v3152_v41 = vrot.slane %v3151_v11, 2  ;;  %v3866_v59 = vsel %vm3846_vm14, %v3734_v50, %v3865_v3  ;;  %v3380_v24 = vsel %vm2399_vm9, %v2584_v6, -inf }
 0x3b1   : > { %v3140_v55 = vrot.slane %v3139_v13, 1  ;;  %v3387_v12 = vsel %vm2399_vm9, %v2688_v62, -inf  ;;  %v3147_v23 = vrot.slane %v3146_v30, 1  ;;  %v3394_v7 = vsel %vm2399_vm9, %v2689_v31, -inf }
 0x3b2   : > { %v3134_v40 = vmax.f32 %v3132_v16, %v3133_v51  ;;  %v3153_v42 = vmax.f32 %v3151_v11, %v3152_v41  ;;  %v3735_v45 = vmax.f32 %v5836_v18, %v3127_v52  ;;  %v3381_v29 = vrot.slane %v3380_v24, 4 }
 0x3b3   : > { %v3141_v28 = vmax.f32 %v3139_v13, %v3140_v55  ;;  %v2553_v47 = vadd.f32 %v5476_v21, %v2517_v10  ;;  %v3148_v35 = vmax.f32 %v3146_v30, %v3147_v23  ;;  %v3401_v37 = vsel %vm2399_vm9, %v2690_v14, -inf }
 0x3b4   : > { %v3154_v36 = vrot.slane %v3153_v42, 1  ;;  %v3736_v8 = vmax.f32 %v5837_v26, %v3134_v40  ;;  %v3867_v58 = vsel %vm3848_vm15, %v3735_v45, %v3866_v59  ;;  %v3388_v49 = vrot.slane %v3387_v12, 4  ;;  %v2484_v40 = vpop.f32.mrf.mxu3 }
 0x3b5   : > { %v3737_v0 = vmax.f32 %v5515_v44, %v3141_v28  ;;  %v3395_v63 = vrot.slane %v3394_v7, 4  ;;  %v3738_v25 = vmax.f32 %v5523_v56, %v3148_v35  ;;  %v2524_v60 = vmul.f32 %v5458_v57, %v2482_v27 }
 0x3b6   : > { %v3155_v32 = vmax.f32 %v3153_v42, %v3154_v36  ;;  %v3868_v9 = vsel %vm3850_vm0, %v3736_v8, %v3867_v58  ;;  %v3382_v38 = vmax.f32 %v3380_v24, %v3381_v29  ;;  %v3402_v34 = vrot.slane %v3401_v37, 4 }
 0x3b7   : > { %v3869_v53 = vsel %vm3852_vm1, %v3737_v0, %v3868_v9  ;;  %v2585_v1 = vmax.f32 %v2553_v47, 0.0  ;;  %v3389_v43 = vmax.f32 %v3387_v12, %v3388_v49  ;;  %v3396_v44 = vmax.f32 %v3394_v7, %v3395_v63 }
 0x3b8   : > { %v3739_v15 = vmax.f32 %v3099_v46, %v3155_v32  ;;  %v3870_v2 = vsel %vm3854_vm2, %v3738_v25, %v3869_v53  ;;  %v2560_v56 = vadd.f32 %v5476_v21, %v2524_v60  ;;  %v3383_v33 = vrot.slane %v3382_v38, 2  ;;  %v2422_v32 = vpop.f32.mrf.mxu0 }
 0x3b9   : > { %v2691_v54 = vrot.slane %v2585_v1, 2  ;;  %v2692_v20 = vrot.slane %v2585_v1, 4  ;;  %v3403_v17 = vmax.f32 %v3401_v37, %v3402_v34  ;;  %v2693_v48 = vrot.slane %v2585_v1, 6 }
 0x3ba   : > { %v3871_v4 = vsel %vm3856_vm3, %v3739_v15, %v3870_v2  ;;  %v3408_v61 = vsel %vm2399_vm9, %v2585_v1, -inf  ;;  %v3390_v46 = vrot.slane %v3389_v43, 2  ;;  %v3397_v19 = vrot.slane %v3396_v44, 2 }
 0x3bb   : > { %3917 = vst [vmem:[%s5446_s17 + $0x10] sm:$0xff] %v3871_v4  ;;  %v3415_v5 = vsel %vm2399_vm9, %v2691_v54, -inf  ;;  %v3422_v6 = vsel %vm2399_vm9, %v2692_v20, -inf  ;;  %v3409_v50 = vrot.slane %v3408_v61, 4  ;;  %v3429_v3 = vsel %vm2399_vm9, %v2693_v48, -inf }
 0x3bc   : > { %v3416_v22 = vrot.slane %v3415_v5, 4  ;;  %v3423_v10 = vrot.slane %v3422_v6, 4  ;;  %v2592_v16 = vmax.f32 %v2560_v56, 0.0  ;;  %v3384_v39 = vmax.f32 %v3382_v38, %v3383_v33 }
 0x3bd   : > { %v3404_v11 = vrot.slane %v3403_v17, 2  ;;  %v3410_v52 = vmax.f32 %v3408_v61, %v3409_v50  ;;  %v3430_v13 = vrot.slane %v3429_v3, 4  ;;  %v3391_v59 = vmax.f32 %v3389_v43, %v3390_v46 }
 0x3be   : > { %v3417_v62 = vmax.f32 %v3415_v5, %v3416_v22  ;;  %v3424_v31 = vmax.f32 %v3422_v6, %v3423_v10  ;;  %v2712_v51 = vrot.slane %v2592_v16, 2  ;;  %v2713_v30 = vrot.slane %v2592_v16, 4 }
 0x3bf   : > { %v2714_v41 = vrot.slane %v2592_v16, 6  ;;  %v3604_v14 = vsel %vm2399_vm9, %v2592_v16, -inf  ;;  %v3398_v55 = vmax.f32 %v3396_v44, %v3397_v19  ;;  %v3405_v23 = vmax.f32 %v3403_v17, %v3404_v11 }
 0x3c0   : > { %v3605_v24 = vrot.slane %v3604_v14, 4  ;;  %v3611_v12 = vsel %vm2399_vm9, %v2712_v51, -inf  ;;  %v3411_v42 = vrot.slane %v3410_v52, 2  ;;  %v3618_v18 = vsel %vm2399_vm9, %v2713_v30, -inf }
 0x3c1   : > { %v3612_v7 = vrot.slane %v3611_v12, 4  ;;  %v3385_v45 = vrot.slane %v3384_v39, 1  ;;  %v3418_v28 = vrot.slane %v3417_v62, 2  ;;  %v3425_v29 = vrot.slane %v3424_v31, 2 }
 0x3c2   : > { %v3431_v47 = vmax.f32 %v3429_v3, %v3430_v13  ;;  %v3606_v27 = vmax.f32 %v3604_v14, %v3605_v24  ;;  %v3619_v35 = vrot.slane %v3618_v18, 4  ;;  %v3625_v36 = vsel %vm2399_vm9, %v2714_v41, -inf  ;;  %v2442_v13 = vpop.f32.mrf.mxu1 }
 0x3c3   : > { %v2525_v26 = vmul.f32 %v5458_v57, %v2484_v40  ;;  %v3392_v8 = vrot.slane %v3391_v59, 1  ;;  %v3399_v37 = vrot.slane %v3398_v55, 1  ;;  %v3613_v58 = vmax.f32 %v3611_v12, %v3612_v7 }
 0x3c4   : > { %v3406_v0 = vrot.slane %v3405_v23, 1  ;;  %v3412_v49 = vmax.f32 %v3410_v52, %v3411_v42  ;;  %v3626_v63 = vrot.slane %v3625_v36, 4  ;;  %v3419_v25 = vmax.f32 %v3417_v62, %v3418_v28 }
 0x3c5   : > { %v5561_v9 = vmax.f32 %v3424_v31, %v3425_v29  ;;  %v3432_v60 = vrot.slane %v3431_v47, 2  ;;  %v5563_v53 = vmax.f32 %v3384_v39, %v3385_v45  ;;  %v3607_v38 = vrot.slane %v3606_v27, 2 }
 0x3c6   : > { %v3620_v34 = vmax.f32 %v3618_v18, %v3619_v35  ;;  %v2561_v15 = vadd.f32 %v5476_v21, %v2525_v26  ;;  %v5566_v2 = vmax.f32 %v3391_v59, %v3392_v8  ;;  %v5568_v1 = vmax.f32 %v3398_v55, %v3399_v37 }
 0x3c7   : > { %v3614_v43 = vrot.slane %v3613_v58, 2  ;;  %v2500_v44 = vmul.f32 %v5458_v57, %v2422_v32  ;;  %v5571_v4 = vmax.f32 %v3405_v23, %v3406_v0  ;;  %v3413_v54 = vrot.slane %v3412_v49, 1  ;;  %v2424_v32 = vpop.f32.mrf.mxu0 }
 0x3c8   : > { %v3627_v20 = vmax.f32 %v3625_v36, %v3626_v63  ;;  %v2593_v56 = vmax.f32 %v2561_v15, 0.0  ;;  %v3420_v33 = vrot.slane %v3419_v25, 1  ;;  %v3427_v17 = vrot.slane %v5561_v9, 1 }
 0x3c9   : > { %v3433_v48 = vmax.f32 %v3431_v47, %v3432_v60  ;;  %v2536_v61 = vadd.f32 %v5476_v21, %v2500_v44  ;;  %v3608_v5 = vmax.f32 %v3606_v27, %v3607_v38  ;;  %v3621_v6 = vrot.slane %v3620_v34, 2 }
 0x3ca   : > { %v2715_v46 = vrot.slane %v2593_v56, 2  ;;  %v2716_v19 = vrot.slane %v2593_v56, 4  ;;  %v3615_v50 = vmax.f32 %v3613_v58, %v3614_v43  ;;  %v2717_v22 = vrot.slane %v2593_v56, 6 }
 0x3cb   : > { %v3632_v10 = vsel %vm2399_vm9, %v2593_v56, -inf  ;;  %v2568_v3 = vmax.f32 %v2536_v61, 0.0  ;;  %v3628_v16 = vrot.slane %v3627_v20, 2  ;;  %v3622_v41 = vmax.f32 %v3620_v34, %v3621_v6 }
 0x3cc   : > { %v3633_v39 = vrot.slane %v3632_v10, 4  ;;  %v3639_v11 = vsel %vm2399_vm9, %v2715_v46, -inf  ;;  %v3646_v52 = vsel %vm2399_vm9, %v2716_v19, -inf  ;;  %v3653_v51 = vsel %vm2399_vm9, %v2717_v22, -inf }
 0x3cd   : > { %v3640_v62 = vrot.slane %v3639_v11, 4  ;;  %v3647_v31 = vrot.slane %v3646_v52, 4  ;;  %v2640_v30 = vrot.slane %v2568_v3, 2  ;;  %v3654_v59 = vrot.slane %v3653_v51, 4 }
 0x3ce   : > { %v3634_v14 = vmax.f32 %v3632_v10, %v3633_v39  ;;  %v2641_v55 = vrot.slane %v2568_v3, 4  ;;  %v2932_v40 = vsel %vm2399_vm9, %v2568_v3, -inf  ;;  %v2508_v23 = vmul.f32 %v5458_v57, %v2442_v13 }
 0x3cf   : > { %v3641_v24 = vmax.f32 %v3639_v11, %v3640_v62  ;;  %v3648_v12 = vmax.f32 %v3646_v52, %v3647_v31  ;;  %v3629_v42 = vmax.f32 %v3627_v20, %v3628_v16  ;;  %v3655_v18 = vmax.f32 %v3653_v51, %v3654_v59 }
 0x3d0   : > { %v3635_v7 = vrot.slane %v3634_v14, 2  ;;  %v2939_v45 = vsel %vm2399_vm9, %v2640_v30, -inf  ;;  %v5582_v28 = vmax.f32 %v3412_v49, %v3413_v54  ;;  %v3434_v29 = vrot.slane %v3433_v48, 1 }
 0x3d1   : > { %v3642_v47 = vrot.slane %v3641_v24, 2  ;;  %v2933_v27 = vrot.slane %v2932_v40, 4  ;;  %v5584_v35 = vmax.f32 %v3419_v25, %v3420_v33  ;;  %v3649_v36 = vrot.slane %v3648_v12, 2 }
 0x3d2   : > { %v2642_v26 = vrot.slane %v2568_v3, 6  ;;  %v2946_v8 = vsel %vm2399_vm9, %v2641_v55, -inf  ;;  %v3609_v37 = vrot.slane %v3608_v5, 1  ;;  %v3616_v58 = vrot.slane %v3615_v50, 1 }
 0x3d3   : > { %v3636_v0 = vmax.f32 %v3634_v14, %v3635_v7  ;;  %v2940_v63 = vrot.slane %v2939_v45, 4  ;;  %v3623_v60 = vrot.slane %v3622_v41, 1  ;;  %v3630_v38 = vrot.slane %v3629_v42, 1 }
 0x3d4   : > { %v3656_v34 = vrot.slane %v3655_v18, 2  ;;  %v2544_v49 = vadd.f32 %v5476_v21, %v2508_v23  ;;  %v5589_v15 = vmax.f32 %v5561_v9, %v3427_v17  ;;  %v3643_v43 = vmax.f32 %v3641_v24, %v3642_v47  ;;  %v2444_v23 = vpop.f32.mrf.mxu1 }
 0x3d5   : > { %v2934_v25 = vmax.f32 %v2932_v40, %v2933_v27  ;;  %v2947_v44 = vrot.slane %v2946_v8, 4  ;;  %v5591_v54 = vmax.f32 %v3433_v48, %v3434_v29  ;;  %v3650_v20 = vmax.f32 %v3648_v12, %v3649_v36 }
 0x3d6   : > { %v2953_v56 = vsel %vm2399_vm9, %v2642_v26, -inf  ;;  %v2501_v33 = vmul.f32 %v5458_v57, %v2424_v32  ;;  %v5595_v61 = vmax.f32 %v3608_v5, %v3609_v37  ;;  %v5597_v6 = vmax.f32 %v3615_v50, %v3616_v58 }
 0x3d7   : > { %v3637_v46 = vrot.slane %v3636_v0, 1  ;;  %v2941_v19 = vmax.f32 %v2939_v45, %v2940_v63  ;;  %v5599_v22 = vmax.f32 %v3622_v41, %v3623_v60  ;;  %v5601_v9 = vmax.f32 %v3629_v42, %v3630_v38 }
 0x3d8   : > { %v5603_v17 = vmax.f32 %v3655_v18, %v3656_v34  ;;  %v2576_v10 = vmax.f32 %v2544_v49, 0.0  ;;  %v3644_v48 = vrot.slane %v3643_v43, 1  ;;  %v2935_v3 = vrot.slane %v2934_v25, 2 }
 0x3d9   : > { %v2948_v16 = vmax.f32 %v2946_v8, %v2947_v44  ;;  %v2954_v39 = vrot.slane %v2953_v56, 4  ;;  %v3651_v11 = vrot.slane %v3650_v20, 1  ;;  %v2537_v5 = vadd.f32 %v5476_v21, %v2501_v33 }
 0x3da   : > { %v2664_v52 = vrot.slane %v2576_v10, 2  ;;  %v2665_v13 = vrot.slane %v2576_v10, 4  ;;  %v5606_v50 = vmax.f32 %v3636_v0, %v3637_v46  ;;  %v2942_v62 = vrot.slane %v2941_v19, 2 }
 0x3db   : > { %v2666_v31 = vrot.slane %v2576_v10, 6  ;;  %v3156_v51 = vsel %vm2399_vm9, %v2576_v10, -inf  ;;  %v3658_v30 = vrot.slane %v5603_v17, 1  ;;  %v2955_v55 = vmax.f32 %v2953_v56, %v2954_v39 }
 0x3dc   : > { %v3157_v41 = vrot.slane %v3156_v51, 4  ;;  %v3163_v14 = vsel %vm2399_vm9, %v2664_v52, -inf  ;;  %v3170_v59 = vsel %vm2399_vm9, %v2665_v13, -inf  ;;  %v2936_v42 = vmax.f32 %v2934_v25, %v2935_v3 }
 0x3dd   : > { %v3164_v24 = vrot.slane %v3163_v14, 4  ;;  %v3171_v12 = vrot.slane %v3170_v59, 4  ;;  %v3177_v40 = vsel %vm2399_vm9, %v2666_v31, -inf  ;;  %v2569_v45 = vmax.f32 %v2537_v5, 0.0 }
 0x3de   : > { %v3158_v7 = vmax.f32 %v3156_v51, %v3157_v41  ;;  %v3178_v18 = vrot.slane %v3177_v40, 4  ;;  %v5613_v29 = vmax.f32 %v3643_v43, %v3644_v48  ;;  %v5615_v47 = vmax.f32 %v3650_v20, %v3651_v11 }
 0x3df   : > { %v2949_v27 = vrot.slane %v2948_v16, 2  ;;  %v3165_v36 = vmax.f32 %v3163_v14, %v3164_v24  ;;  %v3172_v26 = vmax.f32 %v3170_v59, %v3171_v12  ;;  %v2643_v8 = vrot.slane %v2569_v45, 2 }
 0x3e0   : > { %v2644_v37 = vrot.slane %v2569_v45, 4  ;;  %v2509_v58 = vmul.f32 %v5458_v57, %v2444_v23  ;;  %v2943_v0 = vmax.f32 %v2941_v19, %v2942_v62  ;;  %v2956_v63 = vrot.slane %v2955_v55, 2  ;;  %v2467_v19 = vpop.f32.mrf.mxu2 }
 0x3e1   : > { %v2645_v32 = vrot.slane %v2569_v45, 6  ;;  %v2960_v60 = vsel %vm2399_vm9, %v2569_v45, -inf  ;;  %v3159_v38 = vrot.slane %v3158_v7, 2  ;;  %v3179_v34 = vmax.f32 %v3177_v40, %v3178_v18 }
 0x3e2   : > { %v2961_v49 = vrot.slane %v2960_v60, 4  ;;  %v2967_v43 = vsel %vm2399_vm9, %v2643_v8, -inf  ;;  %v2937_v25 = vrot.slane %v2936_v42, 1  ;;  %v3166_v44 = vrot.slane %v3165_v36, 2 }
 0x3e3   : > { %v2968_v20 = vrot.slane %v2967_v43, 4  ;;  %v2974_v56 = vsel %vm2399_vm9, %v2644_v37, -inf  ;;  %v3173_v33 = vrot.slane %v3172_v26, 2  ;;  %v2545_v48 = vadd.f32 %v5476_v21, %v2509_v58 }
 0x3e4   : > { %v2962_v46 = vmax.f32 %v2960_v60, %v2961_v49  ;;  %v2975_v10 = vrot.slane %v2974_v56, 4  ;;  %v2950_v3 = vmax.f32 %v2948_v16, %v2949_v27  ;;  %v2957_v39 = vmax.f32 %v2955_v55, %v2956_v63 }
 0x3e5   : > { %v2969_v11 = vmax.f32 %v2967_v43, %v2968_v20  ;;  %v2981_v52 = vsel %vm2399_vm9, %v2645_v32, -inf  ;;  %v3160_v13 = vmax.f32 %v3158_v7, %v3159_v38  ;;  %v3180_v5 = vrot.slane %v3179_v34, 2 }
 0x3e6   : > { %v2963_v62 = vrot.slane %v2962_v46, 2  ;;  %v2976_v31 = vmax.f32 %v2974_v56, %v2975_v10  ;;  %v3167_v51 = vmax.f32 %v3165_v36, %v3166_v44  ;;  %v2982_v14 = vrot.slane %v2981_v52, 4 }
 0x3e7   : > { %v2970_v41 = vrot.slane %v2969_v11, 2  ;;  %v2518_v59 = vmul.f32 %v5458_v57, %v2467_v19  ;;  %v5625_v24 = vmax.f32 %v5603_v17, %v3658_v30  ;;  %v2944_v12 = vrot.slane %v2943_v0, 1 }
 0x3e8   : > { %v3174_v40 = vmax.f32 %v3172_v26, %v3173_v33  ;;  %v2577_v23 = vmax.f32 %v2545_v48, 0.0  ;;  %v2951_v16 = vrot.slane %v2950_v3, 1  ;;  %v2964_v55 = vmax.f32 %v2962_v46, %v2963_v62 }
 0x3e9   : > { %v2977_v18 = vrot.slane %v2976_v31, 2  ;;  %v2983_v45 = vmax.f32 %v2981_v52, %v2982_v14  ;;  %v2958_v27 = vrot.slane %v2957_v39, 1  ;;  %v3161_v7 = vrot.slane %v3160_v13, 1  ;;  %v2469_v14 = vpop.f32.mrf.mxu2 }
 0x3ea   : > { %v5627_v8 = vmax.f32 %v3179_v34, %v3180_v5  ;;  %v2971_v37 = vmax.f32 %v2969_v11, %v2970_v41  ;;  %v5629_v36 = vmax.f32 %v2936_v42, %v2937_v25  ;;  %v3168_v58 = vrot.slane %v3167_v51, 1  ;;  %v2487_v34 = vpop.f32.mrf.mxu3 }
 0x3eb   : > { %v2667_v63 = vrot.slane %v2577_v23, 2  ;;  %v2554_v32 = vadd.f32 %v5476_v21, %v2518_v59  ;;  %v5632_v17 = vmax.f32 %v2943_v0, %v2944_v12  ;;  %v3175_v30 = vrot.slane %v3174_v40, 1 }
 0x3ec   : > { %v2668_v26 = vrot.slane %v2577_v23, 4  ;;  %v3184_v60 = vsel %vm2399_vm9, %v2577_v23, -inf  ;;  %v5635_v38 = vmax.f32 %v2950_v3, %v2951_v16  ;;  %v2965_v49 = vrot.slane %v2964_v55, 1 }
 0x3ed   : > { %v2978_v43 = vmax.f32 %v2976_v31, %v2977_v18  ;;  %v2984_v44 = vrot.slane %v2983_v45, 2  ;;  %v5637_v20 = vmax.f32 %v2957_v39, %v2958_v27  ;;  %v5639_v42 = vmax.f32 %v3160_v13, %v3161_v7 }
 0x3ee   : > { %v2972_v56 = vrot.slane %v2971_v37, 1  ;;  %v5642_v33 = vmax.f32 %v3167_v51, %v3168_v58  ;;  %v3185_v0 = vrot.slane %v3184_v60, 4  ;;  %v3191_v46 = vsel %vm2399_vm9, %v2667_v63, -inf }
 0x3ef   : > { %v2586_v10 = vmax.f32 %v2554_v32, 0.0  ;;  %v5645_v48 = vmax.f32 %v3174_v40, %v3175_v30  ;;  %v2669_v19 = vrot.slane %v2577_v23, 6  ;;  %v3198_v3 = vsel %vm2399_vm9, %v2668_v26, -inf }
 0x3f0   : > { %v2526_v11 = vmul.f32 %v5458_v57, %v2487_v34  ;;  %v5649_v39 = vmax.f32 %v2964_v55, %v2965_v49  ;;  %v2979_v52 = vrot.slane %v2978_v43, 1  ;;  %v2985_v13 = vmax.f32 %v2983_v45, %v2984_v44 }
 0x3f1   : > { %v2694_v5 = vrot.slane %v2586_v10, 2  ;;  %v5651_v62 = vmax.f32 %v2971_v37, %v2972_v56  ;;  %v3192_v31 = vrot.slane %v3191_v46, 4  ;;  %v2695_v51 = vrot.slane %v2586_v10, 4 }
 0x3f2   : > { %v2696_v41 = vrot.slane %v2586_v10, 6  ;;  %v5653_v59 = vmax.f32 %v3184_v60, %v3185_v0  ;;  %v3199_v12 = vrot.slane %v3198_v3, 4  ;;  %v3436_v40 = vsel %vm2399_vm9, %v2586_v10, -inf }
 0x3f3   : > { %v3443_v23 = vsel %vm2399_vm9, %v2694_v5, -inf  ;;  %v5658_v16 = vsel %vm2399_vm9, %v2669_v19, -inf  ;;  %v3437_v55 = vrot.slane %v3436_v40, 4  ;;  %v2562_v45 = vadd.f32 %v5476_v21, %v2526_v11 }
 0x3f4   : > { %v3444_v18 = vrot.slane %v3443_v23, 4  ;;  %v2986_v27 = vrot.slane %v2985_v13, 1  ;;  %v3450_v7 = vsel %vm2399_vm9, %v2695_v51, -inf  ;;  %v3457_v37 = vsel %vm2399_vm9, %v2696_v41, -inf }
 0x3f5   : > { %v2519_v58 = vmul.f32 %v5458_v57, %v2469_v14  ;;  %v5664_v63 = vmax.f32 %v2978_v43, %v2979_v52  ;;  %v5666_v32 = vmax.f32 %v3191_v46, %v3192_v31  ;;  %v3438_v30 = vmax.f32 %v3436_v40, %v3437_v55 }
 0x3f6   : > { %v3445_v26 = vmax.f32 %v3443_v23, %v3444_v18  ;;  %v3187_v60 = vrot.slane %v5653_v59, 2  ;;  %v3206_v49 = vrot.slane %v5658_v16, 4  ;;  %v3451_v44 = vrot.slane %v3450_v7, 4 }
 0x3f7   : > { %v3458_v34 = vrot.slane %v3457_v37, 4  ;;  %v5670_v56 = vmax.f32 %v3198_v3, %v3199_v12  ;;  %v3439_v0 = vrot.slane %v3438_v30, 2  ;;  %v2594_v19 = vmax.f32 %v2562_v45, 0.0 }
 0x3f8   : > { %v3446_v10 = vrot.slane %v3445_v26, 2  ;;  %v5672_v11 = vmax.f32 %v2985_v13, %v2986_v27  ;;  %v3452_v57 = vmax.f32 %v3450_v7, %v3451_v44  ;;  %v2555_v46 = vadd.f32 %v5476_v21, %v2519_v58 }
 0x3f9   : > { %v3459_v43 = vmax.f32 %v3457_v37, %v3458_v34  ;;  %v3440_v52 = vmax.f32 %v3438_v30, %v3439_v0  ;;  %v2718_v31 = vrot.slane %v2594_v19, 2  ;;  %v2719_v51 = vrot.slane %v2594_v19, 4 }
 0x3fa   : > { %v3447_v5 = vmax.f32 %v3445_v26, %v3446_v10  ;;  %v3453_v41 = vrot.slane %v3452_v57, 2  ;;  %v2720_v40 = vrot.slane %v2594_v19, 6  ;;  %v3660_v23 = vsel %vm2399_vm9, %v2594_v19, -inf }
 0x3fb   : > { %v3460_v14 = vrot.slane %v3459_v43, 2  ;;  %v3441_v3 = vrot.slane %v3440_v52, 1  ;;  %v3661_v55 = vrot.slane %v3660_v23, 4  ;;  %v3667_v18 = vsel %vm2399_vm9, %v2718_v31, -inf }
 0x3fc   : > { %v3448_v12 = vrot.slane %v3447_v5, 1  ;;  %v3454_v13 = vmax.f32 %v3452_v57, %v3453_v41  ;;  %v3668_v27 = vrot.slane %v3667_v18, 4  ;;  %v3674_v7 = vsel %vm2399_vm9, %v2719_v51, -inf }
 0x3fd   : > { %v3461_v45 = vmax.f32 %v3459_v43, %v3460_v14  ;;  %v3442_v21 = vmax.f32 %v3440_v52, %v3441_v3  ;;  %v3662_v58 = vmax.f32 %v3660_v23, %v3661_v55  ;;  %v3675_v30 = vrot.slane %v3674_v7, 4 }
 0x3fe   : > { %v3449_v37 = vmax.f32 %v3447_v5, %v3448_v12  ;;  %v3455_v26 = vrot.slane %v3454_v13, 1  ;;  %v3669_v34 = vmax.f32 %v3667_v18, %v3668_v27  ;;  %v3681_v0 = vsel %vm2399_vm9, %v2720_v40, -inf }
 0x3ff   : > { %v3462_v44 = vrot.slane %v3461_v45, 1  ;;  %v3756_v10 = vmax.f32 %v5563_v53, %v3442_v21  ;;  %v3663_v25 = vrot.slane %v3662_v58, 2  ;;  %v3676_v31 = vmax.f32 %v3674_v7, %v3675_v30 }
 0x400   : > { %v3757_v19 = vmax.f32 %v5566_v2, %v3449_v37  ;;  %v3456_v57 = vmax.f32 %v3454_v13, %v3455_v26  ;;  %v3670_v41 = vrot.slane %v3669_v34, 2  ;;  %v3682_v14 = vrot.slane %v3681_v0, 4 }
 0x401   : > { %v3463_v43 = vmax.f32 %v3461_v45, %v3462_v44  ;;  %v3664_v5 = vmax.f32 %v3662_v58, %v3663_v25  ;;  %v3677_v51 = vrot.slane %v3676_v31, 2  ;;  %v2587_v23 = vmax.f32 %v2555_v46, 0.0  ;;  %v2489_v44 = vpop.f32.mrf.mxu3 }
 0x402   : > { %v3886_v52 = vsel %vm3844_vm13, %v3757_v19, %v3756_v10  ;;  %v3758_v3 = vmax.f32 %v5568_v1, %v3456_v57  ;;  %v3671_v40 = vmax.f32 %v3669_v34, %v3670_v41  ;;  %v3683_v55 = vmax.f32 %v3681_v0, %v3682_v14 }
 0x403   : > { %v3759_v12 = vmax.f32 %v5571_v4, %v3463_v43  ;;  %v3665_v53 = vrot.slane %v3664_v5, 1  ;;  %v3678_v18 = vmax.f32 %v3676_v31, %v3677_v51  ;;  %v2697_v2 = vrot.slane %v2587_v23, 2  ;;  %v5698_v51 = vld [vmem:[%s5826_s2] ss:$0 sm:$0xff] }
 0x404   : > { %v2698_v27 = vrot.slane %v2587_v23, 4  ;;  %v3887_v13 = vsel %vm3846_vm14, %v3758_v3, %v3886_v52  ;;  %v3672_v45 = vrot.slane %v3671_v40, 1  ;;  %v3684_v7 = vrot.slane %v3683_v55, 2 }
 0x405   : > { %v2699_v21 = vrot.slane %v2587_v23, 6  ;;  %v5686_v37 = vsel %vm3848_vm15, %v3759_v12, %v3887_v13  ;;  %v3666_v25 = vmax.f32 %v3664_v5, %v3665_v53  ;;  %v3679_v46 = vrot.slane %v3678_v18, 1 }
 0x406   : > { %v3464_v1 = vsel %vm2399_vm9, %v2587_v23, -inf  ;;  %v3673_v58 = vmax.f32 %v3671_v40, %v3672_v45  ;;  %v3685_v4 = vmax.f32 %v3683_v55, %v3684_v7  ;;  %v3471_v26 = vsel %vm2399_vm9, %v2697_v2, -inf  ;;  %v2427_v23 = vpop.f32.mrf.mxu0  ;;  %v2447_v55 = vpop.f32.mrf.mxu1  ;;  %v5706_v2 = vld [vmem:[%s5827_s3] ss:$0 sm:$0xff] }
 0x407   : > { %v3465_v30 = vrot.slane %v3464_v1, 4  ;;  %v3680_v34 = vmax.f32 %v3678_v18, %v3679_v46  ;;  %v3772_v0 = vmax.f32 %v5595_v61, %v3666_v25  ;;  %v3472_v10 = vrot.slane %v3471_v26, 4 }
 0x408   : > { %v3478_v19 = vsel %vm2399_vm9, %v2698_v27, -inf  ;;  %v3686_v31 = vrot.slane %v3685_v4, 1  ;;  %v3773_v57 = vmax.f32 %v5597_v6, %v3673_v58  ;;  %v3485_v5 = vsel %vm2399_vm9, %v2699_v21, -inf }
 0x409   : > { %v3466_v43 = vmax.f32 %v3464_v1, %v3465_v30  ;;  %v3479_v41 = vrot.slane %v3478_v19, 4  ;;  %v3774_v14 = vmax.f32 %v5599_v22, %v3680_v34  ;;  %v3473_v52 = vmax.f32 %v3471_v26, %v3472_v10 }
 0x40a   : > { %v2527_v61 = vmul.f32 %v5698_v51, %v2489_v44  ;;  %v3687_v3 = vmax.f32 %v3685_v4, %v3686_v31  ;;  %v3900_v12 = vsel %vm3844_vm13, %v3773_v57, %v3772_v0  ;;  %v3486_v18 = vrot.slane %v3485_v5, 4 }
 0x40b   : > { %v3467_v40 = vrot.slane %v3466_v43, 2  ;;  %v3480_v6 = vmax.f32 %v3478_v19, %v3479_v41  ;;  %v3901_v53 = vsel %vm3846_vm14, %v3774_v14, %v3900_v12  ;;  %v3474_v22 = vrot.slane %v3473_v52, 2 }
 0x40c   : > { %v2563_v27 = vadd.f32 %v5706_v2, %v2527_v61  ;;  %v3775_v13 = vmax.f32 %v5601_v9, %v3687_v3  ;;  %v2502_v21 = vmul.f32 %v5698_v51, %v2427_v23  ;;  %v3487_v46 = vmax.f32 %v3485_v5, %v3486_v18 }
 0x40d   : > { %v3468_v45 = vmax.f32 %v3466_v43, %v3467_v40  ;;  %v3481_v7 = vrot.slane %v3480_v6, 2  ;;  %v3475_v25 = vmax.f32 %v3473_v52, %v3474_v22  ;;  %v2510_v58 = vmul.f32 %v5698_v51, %v2447_v55 }
 0x40e   : > { %v2595_v1 = vmax.f32 %v2563_v27, 0.0  ;;  %v5713_v4 = vsel %vm3848_vm15, %v3775_v13, %v3901_v53  ;;  %v2538_v44 = vadd.f32 %v5706_v2, %v2502_v21  ;;  %v3488_v0 = vrot.slane %v3487_v46, 2 }
 0x40f   : > { %v3469_v30 = vrot.slane %v3468_v45, 1  ;;  %v3482_v26 = vmax.f32 %v3480_v6, %v3481_v7  ;;  %v3476_v34 = vrot.slane %v3475_v25, 1 }
 0x410   : > { %v2721_v10 = vrot.slane %v2595_v1, 2  ;;  %v2722_v9 = vrot.slane %v2595_v1, 4  ;;  %v2723_v57 = vrot.slane %v2595_v1, 6  ;;  %v3688_v43 = vsel %vm2399_vm9, %v2595_v1, -inf }
 0x411   : > { %v3470_v19 = vmax.f32 %v3468_v45, %v3469_v30  ;;  %v3483_v31 = vrot.slane %v3482_v26, 1  ;;  %v3477_v41 = vmax.f32 %v3475_v25, %v3476_v34  ;;  %v3489_v14 = vmax.f32 %v3487_v46, %v3488_v0 }
 0x412   : > { %v3689_v52 = vrot.slane %v3688_v43, 4  ;;  %v3695_v5 = vsel %vm2399_vm9, %v2721_v10, -inf  ;;  %v3702_v12 = vsel %vm2399_vm9, %v2722_v9, -inf  ;;  %v3709_v13 = vsel %vm2399_vm9, %v2723_v57, -inf }
 0x413   : > { %v3484_v61 = vmax.f32 %v3482_v26, %v3483_v31  ;;  %v3760_v23 = vmax.f32 %v5582_v28, %v3470_v19  ;;  %v3696_v3 = vrot.slane %v3695_v5, 4  ;;  %v3490_v40 = vrot.slane %v3489_v14, 1 }
 0x414   : > { %v3761_v6 = vmax.f32 %v5584_v35, %v3477_v41  ;;  %v3690_v55 = vmax.f32 %v3688_v43, %v3689_v52  ;;  %v3703_v53 = vrot.slane %v3702_v12, 4  ;;  %v3710_v35 = vrot.slane %v3709_v13, 4 }
 0x415   : > { %v3762_v22 = vmax.f32 %v5589_v15, %v3484_v61  ;;  %v3889_v18 = vsel %vm3850_vm0, %v3760_v23, %v5686_v37  ;;  %v3697_v27 = vmax.f32 %v3695_v5, %v3696_v3  ;;  %v3491_v45 = vmax.f32 %v3489_v14, %v3490_v40 }
 0x416   : > { %v3890_v7 = vsel %vm3852_vm1, %v3761_v6, %v3889_v18  ;;  %v3691_v28 = vrot.slane %v3690_v55, 2  ;;  %v3704_v21 = vmax.f32 %v3702_v12, %v3703_v53  ;;  %v2570_v1 = vmax.f32 %v2538_v44, 0.0 }
 0x417   : > { %v3891_v25 = vsel %vm3854_vm2, %v3762_v22, %v3890_v7  ;;  %v3698_v46 = vrot.slane %v3697_v27, 2  ;;  %v3763_v30 = vmax.f32 %v5591_v54, %v3491_v45  ;;  %v2546_v37 = vadd.f32 %v5706_v2, %v2510_v58 }
 0x418   : > { %v3692_v15 = vmax.f32 %v3690_v55, %v3691_v28  ;;  %v3705_v26 = vrot.slane %v3704_v21, 2  ;;  %v3711_v0 = vmax.f32 %v3709_v13, %v3710_v35  ;;  %v2646_v10 = vrot.slane %v2570_v1, 2 }
 0x419   : > { %v3699_v34 = vmax.f32 %v3697_v27, %v3698_v46  ;;  %v2647_v9 = vrot.slane %v2570_v1, 4  ;;  %v3892_v19 = vsel %vm3856_vm3, %v3763_v30, %v3891_v25  ;;  %v2648_v43 = vrot.slane %v2570_v1, 6 }
 0x41a   : > { %v3693_v31 = vrot.slane %v3692_v15, 1  ;;  %v3706_v57 = vmax.f32 %v3704_v21, %v3705_v26  ;;  %3920 = vst [vmem:[%s5446_s17 + $0x28] sm:$0xff] %v3892_v19  ;;  %v3712_v14 = vrot.slane %v3711_v0, 2  ;;  %v2988_v44 = vsel %vm2399_vm9, %v2570_v1, -inf }
 0x41b   : > { %v3700_v41 = vrot.slane %v3699_v34, 1  ;;  %v2995_v54 = vsel %vm2399_vm9, %v2646_v10, -inf  ;;  %v2989_v61 = vrot.slane %v2988_v44, 4  ;;  %v3002_v12 = vsel %vm2399_vm9, %v2647_v9, -inf }
 0x41c   : > { %v3694_v52 = vmax.f32 %v3692_v15, %v3693_v31  ;;  %v3707_v5 = vrot.slane %v3706_v57, 1  ;;  %v2996_v58 = vrot.slane %v2995_v54, 4  ;;  %v3713_v3 = vmax.f32 %v3711_v0, %v3712_v14 }
 0x41d   : > { %v3701_v23 = vmax.f32 %v3699_v34, %v3700_v41  ;;  %v3009_v40 = vsel %vm2399_vm9, %v2648_v43, -inf  ;;  %v2990_v53 = vmax.f32 %v2988_v44, %v2989_v61  ;;  %v3003_v13 = vrot.slane %v3002_v12, 4 }
 0x41e   : > { %v3708_v6 = vmax.f32 %v3706_v57, %v3707_v5  ;;  %v3776_v55 = vmax.f32 %v5606_v50, %v3694_v52  ;;  %v2997_v22 = vmax.f32 %v2995_v54, %v2996_v58  ;;  %v3714_v18 = vrot.slane %v3713_v3, 1 }
 0x41f   : > { %v3777_v27 = vmax.f32 %v5613_v29, %v3701_v23  ;;  %v3010_v45 = vrot.slane %v3009_v40, 4  ;;  %v2991_v21 = vrot.slane %v2990_v53, 2  ;;  %v3004_v1 = vmax.f32 %v3002_v12, %v3003_v13 }
 0x420   : > { %v3778_v7 = vmax.f32 %v5615_v47, %v3708_v6  ;;  %v3903_v28 = vsel %vm3850_vm0, %v3776_v55, %v5713_v4  ;;  %v2998_v25 = vrot.slane %v2997_v22, 2  ;;  %v3715_v46 = vmax.f32 %v3713_v3, %v3714_v18  ;;  %v2429_v4 = vpop.f32.mrf.mxu0 }
 0x421   : > { %v3904_v35 = vsel %vm3852_vm1, %v3777_v27, %v3903_v28  ;;  %v3011_v30 = vmax.f32 %v3009_v40, %v3010_v45  ;;  %v2992_v15 = vmax.f32 %v2990_v53, %v2991_v21  ;;  %v2578_v29 = vmax.f32 %v2546_v37, 0.0 }
 0x422   : > { %v3905_v50 = vsel %vm3854_vm2, %v3778_v7, %v3904_v35  ;;  %v2999_v26 = vmax.f32 %v2997_v22, %v2998_v25  ;;  %v3194_v34 = vrot.slane %v5666_v32, 2  ;;  %v3779_v47 = vmax.f32 %v5625_v24, %v3715_v46 }
 0x423   : > { %v3005_v0 = vrot.slane %v3004_v1, 2  ;;  %v3012_v10 = vrot.slane %v3011_v30, 2  ;;  %v2993_v9 = vrot.slane %v2992_v15, 1  ;;  %v2670_v31 = vrot.slane %v2578_v29, 2 }
 0x424   : > { %v3000_v19 = vrot.slane %v2999_v26, 1  ;;  %v2671_v57 = vrot.slane %v2578_v29, 4  ;;  %v3906_v43 = vsel %vm3856_vm3, %v3779_v47, %v3905_v50  ;;  %v2672_v44 = vrot.slane %v2578_v29, 6 }
 0x425   : > { %v3006_v41 = vmax.f32 %v3004_v1, %v3005_v0  ;;  %v3013_v14 = vmax.f32 %v3011_v30, %v3012_v10  ;;  %3922 = vst [vmem:[%s5446_s17 + $0x38] sm:$0xff] %v3906_v43  ;;  %v3212_v37 = vsel %vm2399_vm9, %v2578_v29, -inf  ;;  %v3219_v52 = vsel %vm2399_vm9, %v2670_v31, -inf  ;;  %v2449_v29 = vpop.f32.mrf.mxu1 }
 0x426   : > { %v3001_v54 = vmax.f32 %v2999_v26, %v3000_v19  ;;  %v2503_v24 = vmul.f32 %v5698_v51, %v2429_v4  ;;  %v3207_v5 = vmax.f32 %v5658_v16, %v3206_v49  ;;  %v3213_v58 = vrot.slane %v3212_v37, 4 }
 0x427   : > { %v3007_v61 = vrot.slane %v3006_v41, 1  ;;  %v3220_v23 = vrot.slane %v3219_v52, 4  ;;  %v5755_v3 = vmax.f32 %v5653_v59, %v3187_v60  ;;  %v2994_v12 = vmax.f32 %v2992_v15, %v2993_v9 }
 0x428   : > { %v3226_v40 = vsel %vm2399_vm9, %v2671_v57, -inf  ;;  %v3233_v6 = vsel %vm2399_vm9, %v2672_v44, -inf  ;;  %v3201_v55 = vrot.slane %v5670_v56, 2  ;;  %v3014_v53 = vrot.slane %v3013_v14, 1 }
 0x429   : > { %v3214_v22 = vmax.f32 %v3212_v37, %v3213_v58  ;;  %v3221_v18 = vmax.f32 %v3219_v52, %v3220_v23  ;;  %v3725_v16 = vmax.f32 %v5632_v17, %v3001_v54  ;;  %v3227_v49 = vrot.slane %v3226_v40, 4 }
 0x42a   : > { %v3234_v27 = vrot.slane %v3233_v6, 4  ;;  %v2539_v13 = vadd.f32 %v5706_v2, %v2503_v24  ;;  %v5763_v45 = vmax.f32 %v5666_v32, %v3194_v34  ;;  %v3008_v59 = vmax.f32 %v3006_v41, %v3007_v61 }
 0x42b   : > { %v3215_v60 = vrot.slane %v3214_v22, 2  ;;  %v3222_v7 = vrot.slane %v3221_v18, 2  ;;  %v3724_v28 = vmax.f32 %v5629_v36, %v2994_v12  ;;  %v3228_v21 = vmax.f32 %v3226_v40, %v3227_v49 }
 0x42c   : > { %v3235_v25 = vmax.f32 %v3233_v6, %v3234_v27  ;;  %v2571_v46 = vmax.f32 %v2539_v13, 0.0  ;;  %v3189_v35 = vrot.slane %v5755_v3, 1  ;;  %v5768_v1 = vmax.f32 %v5670_v56, %v3201_v55 }
 0x42d   : > { %v3208_v17 = vrot.slane %v3207_v5, 2  ;;  %v3223_v30 = vmax.f32 %v3221_v18, %v3222_v7  ;;  %v3015_v50 = vmax.f32 %v3013_v14, %v3014_v53  ;;  %v3858_v15 = vsel %vm3844_vm13, %v3725_v16, %v3724_v28 }
 0x42e   : > { %v3229_v32 = vrot.slane %v3228_v21, 2  ;;  %v2649_v26 = vrot.slane %v2571_v46, 2  ;;  %v3726_v34 = vmax.f32 %v5635_v38, %v3008_v59  ;;  %v3216_v47 = vmax.f32 %v3214_v22, %v3215_v60 }
 0x42f   : > { %v2650_v36 = vrot.slane %v2571_v46, 4  ;;  %v2651_v0 = vrot.slane %v2571_v46, 6  ;;  %v3224_v10 = vrot.slane %v3223_v30, 1  ;;  %v3236_v4 = vrot.slane %v3235_v25, 2 }
 0x430   : > { %v3016_v9 = vsel %vm2399_vm9, %v2571_v46, -inf  ;;  %v3023_v56 = vsel %vm2399_vm9, %v2649_v26, -inf  ;;  %v3230_v19 = vmax.f32 %v3228_v21, %v3229_v32  ;;  %v2511_v43 = vmul.f32 %v5698_v51, %v2449_v29 }
 0x431   : > { %v3017_v31 = vrot.slane %v3016_v9, 4  ;;  %v3024_v57 = vrot.slane %v3023_v56, 4  ;;  %v3196_v41 = vrot.slane %v5763_v45, 1  ;;  %v3727_v14 = vmax.f32 %v5637_v20, %v3015_v50 }
 0x432   : > { %v3030_v38 = vsel %vm2399_vm9, %v2650_v36, -inf  ;;  %v3037_v44 = vsel %vm2399_vm9, %v2651_v0, -inf  ;;  %v3859_v54 = vsel %vm3846_vm14, %v3726_v34, %v3858_v15  ;;  %v3217_v37 = vrot.slane %v3216_v47, 1 }
 0x433   : > { %v3018_v52 = vmax.f32 %v3016_v9, %v3017_v31  ;;  %v3025_v24 = vmax.f32 %v3023_v56, %v3024_v57  ;;  %v3225_v61 = vmax.f32 %v3223_v30, %v3224_v10  ;;  %v3237_v58 = vmax.f32 %v3235_v25, %v3236_v4 }
 0x434   : > { %v3031_v23 = vrot.slane %v3030_v38, 4  ;;  %v3038_v12 = vrot.slane %v3037_v44, 4  ;;  %v3231_v40 = vrot.slane %v3230_v19, 1  ;;  %v2547_v55 = vadd.f32 %v5706_v2, %v2511_v43 }
 0x435   : > { %v3019_v6 = vrot.slane %v3018_v52, 2  ;;  %v3026_v51 = vrot.slane %v3025_v24, 2  ;;  %v5781_v53 = vmax.f32 %v3207_v5, %v3208_v17  ;;  %v3860_v20 = vsel %vm3848_vm15, %v3727_v14, %v3859_v54 }
 0x436   : > { %v3032_v22 = vmax.f32 %v3030_v38, %v3031_v23  ;;  %v3039_v18 = vmax.f32 %v3037_v44, %v3038_v12  ;;  %v3218_v16 = vmax.f32 %v3216_v47, %v3217_v37  ;;  %v2579_v13 = vmax.f32 %v2547_v55, 0.0 }
 0x437   : > { %v3020_v49 = vmax.f32 %v3018_v52, %v3019_v6  ;;  %v3027_v27 = vmax.f32 %v3025_v24, %v3026_v51  ;;  %v3238_v59 = vrot.slane %v3237_v58, 1  ;;  %v3741_v60 = vmax.f32 %v5642_v33, %v3225_v61 }
 0x438   : > { %v3033_v7 = vrot.slane %v3032_v22, 2  ;;  %v3040_v28 = vrot.slane %v3039_v18, 2  ;;  %v3232_v21 = vmax.f32 %v3230_v19, %v3231_v40  ;;  %v2673_v30 = vrot.slane %v2579_v13, 2 }
 0x439   : > { %v3021_v25 = vrot.slane %v3020_v49, 1  ;;  %v3028_v46 = vrot.slane %v3027_v27, 1  ;;  %v2674_v17 = vrot.slane %v2579_v13, 4  ;;  %v2675_v50 = vrot.slane %v2579_v13, 6 }
 0x43a   : > { %v3034_v2 = vmax.f32 %v3032_v22, %v3033_v7  ;;  %v3041_v5 = vmax.f32 %v3039_v18, %v3040_v28  ;;  %v3240_v26 = vsel %vm2399_vm9, %v2579_v13, -inf  ;;  %v3247_v29 = vsel %vm2399_vm9, %v2673_v30, -inf }
 0x43b   : > { %v3022_v15 = vmax.f32 %v3020_v49, %v3021_v25  ;;  %v3029_v32 = vmax.f32 %v3027_v27, %v3028_v46  ;;  %v3241_v36 = vrot.slane %v3240_v26, 4  ;;  %v3248_v33 = vrot.slane %v3247_v29, 4 }
 0x43c   : > { %v3035_v34 = vrot.slane %v3034_v2, 1  ;;  %v3042_v47 = vrot.slane %v3041_v5, 1  ;;  %v3254_v4 = vsel %vm2399_vm9, %v2674_v17, -inf  ;;  %v3261_v9 = vsel %vm2399_vm9, %v2675_v50, -inf }
 0x43d   : > { %v3728_v0 = vmax.f32 %v5649_v39, %v3022_v15  ;;  %v3729_v10 = vmax.f32 %v5651_v62, %v3029_v32  ;;  %v3242_v31 = vmax.f32 %v3240_v26, %v3241_v36  ;;  %v3249_v57 = vmax.f32 %v3247_v29, %v3248_v33 }
 0x43e   : > { %v3036_v56 = vmax.f32 %v3034_v2, %v3035_v34  ;;  %v3043_v19 = vmax.f32 %v3041_v5, %v3042_v47  ;;  %v3740_v43 = vmax.f32 %v5639_v42, %v3218_v16  ;;  %v3255_v38 = vrot.slane %v3254_v4, 4 }
 0x43f   : > { %v3861_v14 = vsel %vm3850_vm0, %v3728_v0, %v3860_v20  ;;  %v3262_v44 = vrot.slane %v3261_v9, 4  ;;  %v3239_v54 = vmax.f32 %v3237_v58, %v3238_v59  ;;  %v3243_v62 = vrot.slane %v3242_v31, 2 }
 0x440   : > { %v3730_v37 = vmax.f32 %v5664_v63, %v3036_v56  ;;  %v3862_v39 = vsel %vm3852_vm1, %v3729_v10, %v3861_v14  ;;  %v3731_v52 = vmax.f32 %v5672_v11, %v3043_v19  ;;  %v3250_v24 = vrot.slane %v3249_v57, 2 }
 0x441   : > { %v3256_v61 = vmax.f32 %v3254_v4, %v3255_v38  ;;  %v3263_v23 = vmax.f32 %v3261_v9, %v3262_v44  ;;  %v3742_v12 = vmax.f32 %v5645_v48, %v3232_v21  ;;  %v3872_v42 = vsel %vm3844_vm13, %v3741_v60, %v3740_v43 }
 0x442   : > { %v3863_v40 = vsel %vm3854_vm2, %v3730_v37, %v3862_v39  ;;  %v3244_v6 = vmax.f32 %v3242_v31, %v3243_v62  ;;  %v3251_v51 = vmax.f32 %v3249_v57, %v3250_v24  ;;  %v5838_v20 = vrot.slane %v5627_v8, 1 }
 0x443   : > { %v3864_v58 = vsel %vm3856_vm3, %v3731_v52, %v3863_v40  ;;  %v3257_v63 = vrot.slane %v3256_v61, 2  ;;  %v3264_v55 = vrot.slane %v3263_v23, 2  ;;  %v3203_v11 = vrot.slane %v5768_v1, 1 }
 0x444   : > { %v3183_v22 = vmax.f32 %v5627_v8, %v5838_v20  ;;  %3916 = vst [vmem:[%s5446_s17 + $0x8] sm:$0xff] %v3864_v58  ;;  %v3245_v18 = vrot.slane %v3244_v6, 1  ;;  %v3190_v48 = vmax.f32 %v5755_v3, %v3189_v35  ;;  %v3252_v16 = vrot.slane %v3251_v51, 1 }
 0x445   : > { %v3258_v49 = vmax.f32 %v3256_v61, %v3257_v63  ;;  %v3265_v27 = vmax.f32 %v3263_v23, %v3264_v55  ;;  %v3197_v13 = vmax.f32 %v5763_v45, %v3196_v41  ;;  %v3210_v59 = vrot.slane %v5781_v53, 1 }
 0x446   : > { %v3873_v60 = vsel %vm3846_vm14, %v3742_v12, %v3872_v42  ;;  %v3246_v8 = vmax.f32 %v3244_v6, %v3245_v18  ;;  %v3743_v7 = vmax.f32 %v3183_v22, %v3239_v54  ;;  %v3253_v28 = vmax.f32 %v3251_v51, %v3252_v16 }
 0x447   : > { %v3259_v21 = vrot.slane %v3258_v49, 1  ;;  %v3266_v25 = vrot.slane %v3265_v27, 1  ;;  %v3204_v46 = vmax.f32 %v5768_v1, %v3203_v11  ;;  %v3211_v45 = vmax.f32 %v5781_v53, %v3210_v59 }
 0x448   : > { %v3744_v3 = vmax.f32 %v3190_v48, %v3246_v8  ;;  %v3874_v35 = vsel %vm3848_vm15, %v3743_v7, %v3873_v60  ;;  %v3745_v5 = vmax.f32 %v3197_v13, %v3253_v28 }
 0x449   : > { %v3260_v30 = vmax.f32 %v3258_v49, %v3259_v21  ;;  %v3267_v2 = vmax.f32 %v3265_v27, %v3266_v25 }
 0x44a   : > { %v3875_v41 = vsel %vm3850_vm0, %v3744_v3, %v3874_v35 }
 0x44b   : > { %v3746_v17 = vmax.f32 %v3204_v46, %v3260_v30  ;;  %v3876_v50 = vsel %vm3852_vm1, %v3745_v5, %v3875_v41  ;;  %v3747_v15 = vmax.f32 %v3211_v45, %v3267_v2 }
 0x44d   : > { %v3877_v32 = vsel %vm3854_vm2, %v3746_v17, %v3876_v50 }
 0x44e   : > { %v3878_v26 = vsel %vm3856_vm3, %v3747_v15, %v3877_v32 }
 0x44f   : > { %3918 = vst [vmem:[%s5446_s17 + $0x18] sm:$0xff] %v3878_v26 }
 0x450 PF: > { %s14_s15 = sadd.s32 1, %s4135_s15  }
 0x451   : > { %p11_p4 = scmp.ge.s32.totalorder %s14_s15, 4  }
 0x453   :  { %13 = sbr.rel (!%p11_p4) target bundleno = 1 (0x1), region = 68 }

</bundles_post_ra>
